<compile_context>
chip_gen: v7x
topology: tpu7x:2x2x1
jax: 0.10.0
libtpu: 0.0.40
codegen_flags: <defaults>
</compile_context>

<pallas_src>
import functools

import jax
import jax.numpy as jnp
from jax.experimental import pallas as pl
from jax.experimental.pallas import tpu as pltpu


# ----------------------------------------------------------------------------
# Pallas kernels
# ----------------------------------------------------------------------------
def _linear_kernel(x_ref, w_ref, b_ref, o_ref, acc_ref, *, nk, relu):
    """o = [relu](x @ w + b); f32 accumulation in a VMEM scratch block."""
    k = pl.program_id(1)

    @pl.when(k == 0)
    def _():
        acc_ref[...] = jnp.zeros_like(acc_ref)

    acc_ref[...] += jnp.dot(x_ref[...], w_ref[...],
                            preferred_element_type=jnp.float32)

    @pl.when(k == nk - 1)
    def _():
        out = acc_ref[...] + b_ref[...]
        if relu:
            out = jnp.maximum(out, 0.0)
        o_ref[...] = out.astype(o_ref.dtype)


def linear_pallas(x, w, b, *, relu, out_dtype=jnp.float32, tm=None, tk=None):
    """x: (M, K), w: (K, N), b: (N,) -> (M, N) out_dtype.

    Grid = (M tiles [parallel], K tiles [arbitrary]); bf16 MXU operands,
    f32 accumulation in VMEM scratch, bias+ReLU fused in the epilogue.
    """
    M, K = x.shape
    K2, N = w.shape
    assert K == K2, (K, K2)
    if tm is None or tm >= M:
        tm = M
    if tk is None or tk >= K:
        tk = K
    assert K % tk == 0, (K, tk)
    nm = pl.cdiv(M, tm)
    nk = K // tk

    x = x.astype(jnp.bfloat16)
    w = w.astype(jnp.bfloat16)
    b2 = b.astype(jnp.float32).reshape(1, N)

    kernel = functools.partial(_linear_kernel, nk=nk, relu=relu)
    return pl.pallas_call(
        kernel,
        out_shape=jax.ShapeDtypeStruct((M, N), out_dtype),
        grid_spec=pltpu.PrefetchScalarGridSpec(
            num_scalar_prefetch=0,
            grid=(nm, nk),
            in_specs=[
                pl.BlockSpec((tm, tk), lambda m, k: (m, k)),
                pl.BlockSpec((tk, N), lambda m, k: (k, 0)),
                pl.BlockSpec((1, N), lambda m, k: (0, 0)),
            ],
            out_specs=pl.BlockSpec((tm, N), lambda m, k: (m, 0)),
            scratch_shapes=[pltpu.VMEM((tm, N), jnp.float32)],
        ),
        compiler_params=pltpu.CompilerParams(
            dimension_semantics=("parallel", "arbitrary")),
    )(x, w, b2)


def _pool_kernel(x_ref, o_ref, *, c):
    """x: (M, 2, Wo, 2*C) -> o: (M, Wo, C) via max over the 2x2 window taps."""
    x = x_ref[...]
    hm = jnp.maximum(x[:, 0], x[:, 1])                     # reduce the H pair
    o_ref[...] = jnp.maximum(hm[:, :, :c], hm[:, :, c:])   # reduce the W pair


def maxpool2x2_pallas(x):
    """2x2 / stride-2 max pool (floor mode), x: (N, H, W, C) NHWC."""
    n, h, w, c = x.shape
    ho, wo = h // 2, w // 2
    xe = x[:, : 2 * ho, : 2 * wo, :]
    # Contiguous regrouping (free reshape): (N, 2Ho, 2Wo, C) -> (N*Ho, 2, Wo, 2C).
    xr = xe.reshape(n * ho, 2, wo, 2 * c)
    out = pl.pallas_call(
        functools.partial(_pool_kernel, c=c),
        out_shape=jax.ShapeDtypeStruct((n * ho, wo, c), x.dtype),
    )(xr)
    return out.reshape(n, ho, wo, c)


# ----------------------------------------------------------------------------
# Layer wrappers (im2col glue + Pallas matmul)
# ----------------------------------------------------------------------------
def conv3x3_relu(x_nhwc, wmat, b, *, tm, tk):
    """3x3 valid conv (cross-correlation, PyTorch-style) + bias + ReLU, bf16 out.

    x_nhwc: (N, H, W, Cin);  wmat: (9*Cin, Cout) matmul-ready bf16 weights.
    """
    n, h, w, cin = x_nhwc.shape
    cout = wmat.shape[1]
    ho, wo = h - 2, w - 2
    xb = x_nhwc.astype(jnp.bfloat16)
    patches = [xb[:, kh:kh + ho, kw:kw + wo, :]
               for kh in range(3) for kw in range(3)]
    pat = jnp.concatenate(patches, axis=-1).reshape(n * ho * wo, 9 * cin)
    out = linear_pallas(pat, wmat, b, relu=True, out_dtype=jnp.bfloat16,
                        tm=tm, tk=tk)
    return out.reshape(n, ho, wo, cout)


@jax.jit
def net_forward(x_nchw, prep):
    n = x_nchw.shape[0]
    x = jnp.transpose(x_nchw, (0, 2, 3, 1))                          # -> NHWC
    x = conv3x3_relu(x, prep["w1"], prep["b1"], tm=360, tk=27)       # (N,30,30,512)
    x = maxpool2x2_pallas(x)                                         # (N,15,15,512)
    x = conv3x3_relu(x, prep["w2"], prep["b2"], tm=176, tk=512)      # (N,13,13,512)
    x = maxpool2x2_pallas(x)                                         # (N, 6, 6,512)
    # fc1 weights were column-permuted at init so they consume the NHWC
    # flatten directly (matches PyTorch's NCHW x.view(-1, 6*6*512)).
    x = x.reshape(n, 6 * 6 * 512)
    x = linear_pallas(x, prep["fc1_w"], prep["fc1_b"], relu=True, tk=2048)
    x = linear_pallas(x, prep["fc2_w"], prep["fc2_b"], relu=True)
    x = linear_pallas(x, prep["fc3_w"], prep["fc3_b"], relu=False)
    return x[:, :10]


# ----------------------------------------------------------------------------
# Parameters: PyTorch-style init, then one-time matmul-ready re-layout.
# ----------------------------------------------------------------------------
def init_params(key):
    def uniform(k, shape, fan_in):
        bound = 1.0 / jnp.sqrt(float(fan_in))
        return jax.random.uniform(k, shape, jnp.float32, -bound, bound)

    ks = jax.random.split(key, 10)
    return {
        "w1": uniform(ks[0], (512, 3, 3, 3), 3 * 9),
        "b1": uniform(ks[1], (512,), 3 * 9),
        "w2": uniform(ks[2], (512, 512, 3, 3), 512 * 9),
        "b2": uniform(ks[3], (512,), 512 * 9),
        "fc1_w": uniform(ks[4], (120, 6 * 6 * 512), 6 * 6 * 512),
        "fc1_b": uniform(ks[5], (120,), 6 * 6 * 512),
        "fc2_w": uniform(ks[6], (84, 120), 120),
        "fc2_b": uniform(ks[7], (84,), 120),
        "fc3_w": uniform(ks[8], (10, 84), 84),
        "fc3_b": uniform(ks[9], (10,), 84),
    }


def prepare_params(p):
    bf16, f32 = jnp.bfloat16, jnp.float32
    # Conv weights: (Cout, Cin, 3, 3) -> (KH, KW, Cin, Cout) -> (9*Cin, Cout),
    # matching the im2col tap order [(kh,kw) row-major, each of length Cin].
    w1 = jnp.transpose(p["w1"], (2, 3, 1, 0)).reshape(9 * 3, 512).astype(bf16)
    w2 = jnp.transpose(p["w2"], (2, 3, 1, 0)).reshape(9 * 512, 512).astype(bf16)
    # fc1: permute columns from NCHW-flatten order (c*36+h*6+w) to NHWC-flatten
    # order (h*3072+w*512+c), transpose to (K, N), pad N 120 -> 128 lanes.
    fc1 = p["fc1_w"].reshape(120, 512, 6, 6)                 # (Nout, C, H, W)
    fc1 = jnp.transpose(fc1, (2, 3, 1, 0)).reshape(6 * 6 * 512, 120)
    fc1 = jnp.pad(fc1, ((0, 0), (0, 8))).astype(bf16)        # (18432, 128)
    fc1_b = jnp.pad(p["fc1_b"], (0, 8)).astype(f32)          # (128,)
    # fc2: (84,120) -> (120,84) -> pad to (128,128).
    fc2 = jnp.pad(p["fc2_w"].T, ((0, 8), (0, 44))).astype(bf16)
    fc2_b = jnp.pad(p["fc2_b"], (0, 44)).astype(f32)
    # fc3: (10,84) -> (84,10) -> pad to (128,128); logits sliced back to 10.
    fc3 = jnp.pad(p["fc3_w"].T, ((0, 44), (0, 118))).astype(bf16)
    fc3_b = jnp.pad(p["fc3_b"], (0, 118)).astype(f32)
    return {
        "w1": w1, "b1": p["b1"].astype(f32),
        "w2": w2, "b2": p["b2"].astype(f32),
        "fc1_w": fc1, "fc1_b": fc1_b,
        "fc2_w": fc2, "fc2_b": fc2_b,
        "fc3_w": fc3, "fc3_b": fc3_b,
    }


if __name__ == "__main__":
    root = jax.random.PRNGKey(0)
    k_params, k_x = jax.random.split(root)
    prep = prepare_params(init_params(k_params))
    # fc1 (6*6*512 features) forces a 32x32 spatial input with 3 channels.
    x = jax.random.normal(k_x, (2, 3, 32, 32), jnp.float32)   # NCHW like PyTorch

    out = net_forward(x, prep)
    out = jax.block_until_ready(out)
    assert out.shape == (2, 10), out.shape
    assert bool(jnp.all(jnp.isfinite(out)))
    print("KERNEL_OK")
</pallas_src>

<mosaic_0001>
module attributes {stable_mosaic.version = 11 : i64} {
  func.func @_linear_kernel(%arg0: i32, %arg1: i32, %arg2: memref<360x27xbf16, #tpu.memory_space<vmem>>, %arg3: memref<27x512xbf16, #tpu.memory_space<vmem>>, %arg4: memref<1x512xf32, #tpu.memory_space<vmem>>, %arg5: memref<360x512xbf16, #tpu.memory_space<vmem>>, %arg6: memref<360x512xf32, #tpu.memory_space<vmem>>) attributes {dimension_semantics = [#tpu.dimension_semantics<parallel>, #tpu.dimension_semantics<arbitrary>], iteration_bounds = array<i64: 5, 1>, scalar_prefetch = 0 : i64, scratch_operands = 1 : i64, tpu.core_type = #tpu.core_type<tc>, window_params = [{transform_indices = @transform_0, window_bounds = array<i64: 360, 27>}, {transform_indices = @transform_1, window_bounds = array<i64: 27, 512>}, {pipeline_mode = #tpu.pipeline_mode<synchronous>, transform_indices = @transform_2, window_bounds = array<i64: 1, 512>}, {transform_indices = @transform_3, window_bounds = array<i64: 360, 512>}]} {
    %c0_i32 = arith.constant 0 : i32
    %0 = arith.cmpi eq, %arg1, %c0_i32 : i32
    %1 = arith.extui %0 : i1 to i32
    %c0_i32_0 = arith.constant 0 : i32
    %2 = arith.cmpi ne, %1, %c0_i32_0 : i32
    scf.if %2 {
      %cst_10 = arith.constant 0.000000e+00 : f32
      %12 = vector.broadcast %cst_10 : f32 to vector<360x512xf32>
      %c0_11 = arith.constant 0 : index
      %c0_12 = arith.constant 0 : index
      %13 = vector.load %arg6[%c0_11, %c0_12] : memref<360x512xf32, #tpu.memory_space<vmem>>, vector<360x512xf32>
      tpu.vector_store %arg6[%c0_11, %c0_12], %12 {strides = array<i32>} : memref<360x512xf32, #tpu.memory_space<vmem>>, vector<360x512xf32>,
    } else {
    }
    %c0 = arith.constant 0 : index
    %c0_1 = arith.constant 0 : index
    %3 = vector.load %arg6[%c0, %c0_1] : memref<360x512xf32, #tpu.memory_space<vmem>>, vector<360x512xf32>
    %c0_2 = arith.constant 0 : index
    %c0_3 = arith.constant 0 : index
    %4 = vector.load %arg2[%c0_2, %c0_3] : memref<360x27xbf16, #tpu.memory_space<vmem>>, vector<360x27xbf16>
    %c0_4 = arith.constant 0 : index
    %c0_5 = arith.constant 0 : index
    %5 = vector.load %arg3[%c0_4, %c0_5] : memref<27x512xbf16, #tpu.memory_space<vmem>>, vector<27x512xbf16>
    %cst = arith.constant dense<0.000000e+00> : vector<360x512xf32>
    %6 = tpu.matmul %4, %5, %cst {dimension_numbers = #tpu.dot_dimension_numbers<[1], [0], [0], [1], [0, 0, 1, 1], [], []>} : vector<360x27xbf16>, vector<27x512xbf16>, vector<360x512xf32> -> vector<360x512xf32>
    %7 = arith.addf %3, %6 : vector<360x512xf32>
    %c0_6 = arith.constant 0 : index
    %c0_7 = arith.constant 0 : index
    %8 = vector.load %arg6[%c0_6, %c0_7] : memref<360x512xf32, #tpu.memory_space<vmem>>, vector<360x512xf32>
    tpu.vector_store %arg6[%c0_6, %c0_7], %7 {strides = array<i32>} : memref<360x512xf32, #tpu.memory_space<vmem>>, vector<360x512xf32>,
    %c0_i32_8 = arith.constant 0 : i32
    %9 = arith.cmpi eq, %arg1, %c0_i32_8 : i32
    %10 = arith.extui %9 : i1 to i32
    %c0_i32_9 = arith.constant 0 : i32
    %11 = arith.cmpi ne, %10, %c0_i32_9 : i32
    scf.if %11 {
      %c0_10 = arith.constant 0 : index
      %c0_11 = arith.constant 0 : index
      %12 = vector.load %arg6[%c0_10, %c0_11] : memref<360x512xf32, #tpu.memory_space<vmem>>, vector<360x512xf32>
      %c0_12 = arith.constant 0 : index
      %c0_13 = arith.constant 0 : index
      %13 = vector.load %arg4[%c0_12, %c0_13] : memref<1x512xf32, #tpu.memory_space<vmem>>, vector<1x512xf32>
      %14 = vector.broadcast %13 : vector<1x512xf32> to vector<360x512xf32>
      %15 = arith.addf %12, %14 : vector<360x512xf32>
      %cst_14 = arith.constant 0.000000e+00 : f32
      %16 = vector.broadcast %cst_14 : f32 to vector<360x512xf32>
      %17 = arith.maximumf %15, %16 : vector<360x512xf32>
      %18 = arith.truncf %17 : vector<360x512xf32> to vector<360x512xbf16>
      %c0_15 = arith.constant 0 : index
      %c0_16 = arith.constant 0 : index
      %19 = vector.load %arg5[%c0_15, %c0_16] : memref<360x512xbf16, #tpu.memory_space<vmem>>, vector<360x512xbf16>
      tpu.vector_store %arg5[%c0_15, %c0_16], %18 {strides = array<i32>} : memref<360x512xbf16, #tpu.memory_space<vmem>>, vector<360x512xbf16>,
    } else {
    }
    return
  }
  func.func @transform_0(%arg0: i32, %arg1: i32) -> (i32, i32) {
    %c0_i32 = arith.constant 0 : i32
    return %arg0, %arg1 : i32, i32
  }
  func.func @transform_1(%arg0: i32, %arg1: i32) -> (i32, i32) {
    %c0_i32 = arith.constant 0 : i32
    %c0_i32_0 = arith.constant 0 : i32
    return %arg1, %c0_i32 : i32, i32
  }
  func.func @transform_2(%arg0: i32, %arg1: i32) -> (i32, i32) {
    %c0_i32 = arith.constant 0 : i32
    %c0_i32_0 = arith.constant 0 : i32
    %c0_i32_1 = arith.constant 0 : i32
    return %c0_i32, %c0_i32_0 : i32, i32
  }
  func.func @transform_3(%arg0: i32, %arg1: i32) -> (i32, i32) {
    %c0_i32 = arith.constant 0 : i32
    %c0_i32_0 = arith.constant 0 : i32
    return %arg0, %c0_i32 : i32, i32
  }
}

module attributes {stable_mosaic.version = 11 : i64} {
  func.func @_pool_kernel(%arg0: memref<30x2x15x1024xbf16, #tpu.memory_space<vmem>>, %arg1: memref<30x15x512xbf16, #tpu.memory_space<vmem>>) attributes {dimension_semantics = [], scalar_prefetch = 0 : i64, scratch_operands = 0 : i64, tpu.core_type = #tpu.core_type<tc>} {
    %c0 = arith.constant 0 : index
    %c0_0 = arith.constant 0 : index
    %c0_1 = arith.constant 0 : index
    %c0_2 = arith.constant 0 : index
    %0 = vector.load %arg0[%c0, %c0_0, %c0_1, %c0_2] : memref<30x2x15x1024xbf16, #tpu.memory_space<vmem>>, vector<30x2x15x1024xbf16>
    %1 = vector.extract_strided_slice %0 {offsets = [0, 0, 0, 0], sizes = [30, 1, 15, 1024], strides = [1, 1, 1, 1]} : vector<30x2x15x1024xbf16> to vector<30x1x15x1024xbf16>
    %2 = vector.shape_cast %1 : vector<30x1x15x1024xbf16> to vector<30x15x1024xbf16>
    %3 = vector.extract_strided_slice %0 {offsets = [0, 1, 0, 0], sizes = [30, 1, 15, 1024], strides = [1, 1, 1, 1]} : vector<30x2x15x1024xbf16> to vector<30x1x15x1024xbf16>
    %4 = vector.shape_cast %3 : vector<30x1x15x1024xbf16> to vector<30x15x1024xbf16>
    %5 = arith.maximumf %2, %4 : vector<30x15x1024xbf16>
    %6 = vector.extract_strided_slice %5 {offsets = [0, 0, 0], sizes = [30, 15, 512], strides = [1, 1, 1]} : vector<30x15x1024xbf16> to vector<30x15x512xbf16>
    %7 = vector.extract_strided_slice %5 {offsets = [0, 0, 512], sizes = [30, 15, 512], strides = [1, 1, 1]} : vector<30x15x1024xbf16> to vector<30x15x512xbf16>
    %8 = arith.maximumf %6, %7 : vector<30x15x512xbf16>
    %c0_3 = arith.constant 0 : index
    %c0_4 = arith.constant 0 : index
    %c0_5 = arith.constant 0 : index
    %9 = vector.load %arg1[%c0_3, %c0_4, %c0_5] : memref<30x15x512xbf16, #tpu.memory_space<vmem>>, vector<30x15x512xbf16>
    tpu.vector_store %arg1[%c0_3, %c0_4, %c0_5], %8 {strides = array<i32>} : memref<30x15x512xbf16, #tpu.memory_space<vmem>>, vector<30x15x512xbf16>,
    return
  }
}

module attributes {stable_mosaic.version = 11 : i64} {
  func.func @_linear_kernel(%arg0: i32, %arg1: i32, %arg2: memref<176x512xbf16, #tpu.memory_space<vmem>>, %arg3: memref<512x512xbf16, #tpu.memory_space<vmem>>, %arg4: memref<1x512xf32, #tpu.memory_space<vmem>>, %arg5: memref<176x512xbf16, #tpu.memory_space<vmem>>, %arg6: memref<176x512xf32, #tpu.memory_space<vmem>>) attributes {dimension_semantics = [#tpu.dimension_semantics<parallel>, #tpu.dimension_semantics<arbitrary>], iteration_bounds = array<i64: 2, 9>, scalar_prefetch = 0 : i64, scratch_operands = 1 : i64, tpu.core_type = #tpu.core_type<tc>, window_params = [{transform_indices = @transform_0, window_bounds = array<i64: 176, 512>}, {transform_indices = @transform_1, window_bounds = array<i64: 512, 512>}, {pipeline_mode = #tpu.pipeline_mode<synchronous>, transform_indices = @transform_2, window_bounds = array<i64: 1, 512>}, {transform_indices = @transform_3, window_bounds = array<i64: 176, 512>}]} {
    %c0_i32 = arith.constant 0 : i32
    %0 = arith.cmpi eq, %arg1, %c0_i32 : i32
    %1 = arith.extui %0 : i1 to i32
    %c0_i32_0 = arith.constant 0 : i32
    %2 = arith.cmpi ne, %1, %c0_i32_0 : i32
    scf.if %2 {
      %cst_9 = arith.constant 0.000000e+00 : f32
      %12 = vector.broadcast %cst_9 : f32 to vector<176x512xf32>
      %c0_10 = arith.constant 0 : index
      %c0_11 = arith.constant 0 : index
      %13 = vector.load %arg6[%c0_10, %c0_11] : memref<176x512xf32, #tpu.memory_space<vmem>>, vector<176x512xf32>
      tpu.vector_store %arg6[%c0_10, %c0_11], %12 {strides = array<i32>} : memref<176x512xf32, #tpu.memory_space<vmem>>, vector<176x512xf32>,
    } else {
    }
    %c0 = arith.constant 0 : index
    %c0_1 = arith.constant 0 : index
    %3 = vector.load %arg6[%c0, %c0_1] : memref<176x512xf32, #tpu.memory_space<vmem>>, vector<176x512xf32>
    %c0_2 = arith.constant 0 : index
    %c0_3 = arith.constant 0 : index
    %4 = vector.load %arg2[%c0_2, %c0_3] : memref<176x512xbf16, #tpu.memory_space<vmem>>, vector<176x512xbf16>
    %c0_4 = arith.constant 0 : index
    %c0_5 = arith.constant 0 : index
    %5 = vector.load %arg3[%c0_4, %c0_5] : memref<512x512xbf16, #tpu.memory_space<vmem>>, vector<512x512xbf16>
    %cst = arith.constant dense<0.000000e+00> : vector<176x512xf32>
    %6 = tpu.matmul %4, %5, %cst {dimension_numbers = #tpu.dot_dimension_numbers<[1], [0], [0], [1], [0, 0, 1, 1], [], []>} : vector<176x512xbf16>, vector<512x512xbf16>, vector<176x512xf32> -> vector<176x512xf32>
    %7 = arith.addf %3, %6 : vector<176x512xf32>
    %c0_6 = arith.constant 0 : index
    %c0_7 = arith.constant 0 : index
    %8 = vector.load %arg6[%c0_6, %c0_7] : memref<176x512xf32, #tpu.memory_space<vmem>>, vector<176x512xf32>
    tpu.vector_store %arg6[%c0_6, %c0_7], %7 {strides = array<i32>} : memref<176x512xf32, #tpu.memory_space<vmem>>, vector<176x512xf32>,
    %c8_i32 = arith.constant 8 : i32
    %9 = arith.cmpi eq, %arg1, %c8_i32 : i32
    %10 = arith.extui %9 : i1 to i32
    %c0_i32_8 = arith.constant 0 : i32
    %11 = arith.cmpi ne, %10, %c0_i32_8 : i32
    scf.if %11 {
      %c0_9 = arith.constant 0 : index
      %c0_10 = arith.constant 0 : index
      %12 = vector.load %arg6[%c0_9, %c0_10] : memref<176x512xf32, #tpu.memory_space<vmem>>, vector<176x512xf32>
      %c0_11 = arith.constant 0 : index
      %c0_12 = arith.constant 0 : index
      %13 = vector.load %arg4[%c0_11, %c0_12] : memref<1x512xf32, #tpu.memory_space<vmem>>, vector<1x512xf32>
      %14 = vector.broadcast %13 : vector<1x512xf32> to vector<176x512xf32>
      %15 = arith.addf %12, %14 : vector<176x512xf32>
      %cst_13 = arith.constant 0.000000e+00 : f32
      %16 = vector.broadcast %cst_13 : f32 to vector<176x512xf32>
      %17 = arith.maximumf %15, %16 : vector<176x512xf32>
      %18 = arith.truncf %17 : vector<176x512xf32> to vector<176x512xbf16>
      %c0_14 = arith.constant 0 : index
      %c0_15 = arith.constant 0 : index
      %19 = vector.load %arg5[%c0_14, %c0_15] : memref<176x512xbf16, #tpu.memory_space<vmem>>, vector<176x512xbf16>
      tpu.vector_store %arg5[%c0_14, %c0_15], %18 {strides = array<i32>} : memref<176x512xbf16, #tpu.memory_space<vmem>>, vector<176x512xbf16>,
    } else {
    }
    return
  }
  func.func @transform_0(%arg0: i32, %arg1: i32) -> (i32, i32) {
    %c0_i32 = arith.constant 0 : i32
    return %arg0, %arg1 : i32, i32
  }
  func.func @transform_1(%arg0: i32, %arg1: i32) -> (i32, i32) {
    %c0_i32 = arith.constant 0 : i32
    %c0_i32_0 = arith.constant 0 : i32
    return %arg1, %c0_i32 : i32, i32
  }
  func.func @transform_2(%arg0: i32, %arg1: i32) -> (i32, i32) {
    %c0_i32 = arith.constant 0 : i32
    %c0_i32_0 = arith.constant 0 : i32
    %c0_i32_1 = arith.constant 0 : i32
    return %c0_i32, %c0_i32_0 : i32, i32
  }
  func.func @transform_3(%arg0: i32, %arg1: i32) -> (i32, i32) {
    %c0_i32 = arith.constant 0 : i32
    %c0_i32_0 = arith.constant 0 : i32
    return %arg0, %c0_i32 : i32, i32
  }
}

module attributes {stable_mosaic.version = 11 : i64} {
  func.func @_pool_kernel(%arg0: memref<12x2x6x1024xbf16, #tpu.memory_space<vmem>>, %arg1: memref<12x6x512xbf16, #tpu.memory_space<vmem>>) attributes {dimension_semantics = [], scalar_prefetch = 0 : i64, scratch_operands = 0 : i64, tpu.core_type = #tpu.core_type<tc>} {
    %c0 = arith.constant 0 : index
    %c0_0 = arith.constant 0 : index
    %c0_1 = arith.constant 0 : index
    %c0_2 = arith.constant 0 : index
    %0 = vector.load %arg0[%c0, %c0_0, %c0_1, %c0_2] : memref<12x2x6x1024xbf16, #tpu.memory_space<vmem>>, vector<12x2x6x1024xbf16>
    %1 = vector.extract_strided_slice %0 {offsets = [0, 0, 0, 0], sizes = [12, 1, 6, 1024], strides = [1, 1, 1, 1]} : vector<12x2x6x1024xbf16> to vector<12x1x6x1024xbf16>
    %2 = vector.shape_cast %1 : vector<12x1x6x1024xbf16> to vector<12x6x1024xbf16>
    %3 = vector.extract_strided_slice %0 {offsets = [0, 1, 0, 0], sizes = [12, 1, 6, 1024], strides = [1, 1, 1, 1]} : vector<12x2x6x1024xbf16> to vector<12x1x6x1024xbf16>
    %4 = vector.shape_cast %3 : vector<12x1x6x1024xbf16> to vector<12x6x1024xbf16>
    %5 = arith.maximumf %2, %4 : vector<12x6x1024xbf16>
    %6 = vector.extract_strided_slice %5 {offsets = [0, 0, 0], sizes = [12, 6, 512], strides = [1, 1, 1]} : vector<12x6x1024xbf16> to vector<12x6x512xbf16>
    %7 = vector.extract_strided_slice %5 {offsets = [0, 0, 512], sizes = [12, 6, 512], strides = [1, 1, 1]} : vector<12x6x1024xbf16> to vector<12x6x512xbf16>
    %8 = arith.maximumf %6, %7 : vector<12x6x512xbf16>
    %c0_3 = arith.constant 0 : index
    %c0_4 = arith.constant 0 : index
    %c0_5 = arith.constant 0 : index
    %9 = vector.load %arg1[%c0_3, %c0_4, %c0_5] : memref<12x6x512xbf16, #tpu.memory_space<vmem>>, vector<12x6x512xbf16>
    tpu.vector_store %arg1[%c0_3, %c0_4, %c0_5], %8 {strides = array<i32>} : memref<12x6x512xbf16, #tpu.memory_space<vmem>>, vector<12x6x512xbf16>,
    return
  }
}

module attributes {stable_mosaic.version = 11 : i64} {
  func.func @_linear_kernel(%arg0: i32, %arg1: i32, %arg2: memref<2x2048xbf16, #tpu.memory_space<vmem>>, %arg3: memref<2048x128xbf16, #tpu.memory_space<vmem>>, %arg4: memref<1x128xf32, #tpu.memory_space<vmem>>, %arg5: memref<2x128xf32, #tpu.memory_space<vmem>>, %arg6: memref<2x128xf32, #tpu.memory_space<vmem>>) attributes {dimension_semantics = [#tpu.dimension_semantics<parallel>, #tpu.dimension_semantics<arbitrary>], iteration_bounds = array<i64: 1, 9>, scalar_prefetch = 0 : i64, scratch_operands = 1 : i64, tpu.core_type = #tpu.core_type<tc>, window_params = [{transform_indices = @transform_0, window_bounds = array<i64: 2, 2048>}, {transform_indices = @transform_1, window_bounds = array<i64: 2048, 128>}, {pipeline_mode = #tpu.pipeline_mode<synchronous>, transform_indices = @transform_2, window_bounds = array<i64: 1, 128>}, {transform_indices = @transform_3, window_bounds = array<i64: 2, 128>}]} {
    %c0_i32 = arith.constant 0 : i32
    %0 = arith.cmpi eq, %arg1, %c0_i32 : i32
    %1 = arith.extui %0 : i1 to i32
    %c0_i32_0 = arith.constant 0 : i32
    %2 = arith.cmpi ne, %1, %c0_i32_0 : i32
    scf.if %2 {
      %cst_9 = arith.constant 0.000000e+00 : f32
      %12 = vector.broadcast %cst_9 : f32 to vector<2x128xf32>
      %c0_10 = arith.constant 0 : index
      %c0_11 = arith.constant 0 : index
      %13 = vector.load %arg6[%c0_10, %c0_11] : memref<2x128xf32, #tpu.memory_space<vmem>>, vector<2x128xf32>
      tpu.vector_store %arg6[%c0_10, %c0_11], %12 {strides = array<i32>} : memref<2x128xf32, #tpu.memory_space<vmem>>, vector<2x128xf32>,
    } else {
    }
    %c0 = arith.constant 0 : index
    %c0_1 = arith.constant 0 : index
    %3 = vector.load %arg6[%c0, %c0_1] : memref<2x128xf32, #tpu.memory_space<vmem>>, vector<2x128xf32>
    %c0_2 = arith.constant 0 : index
    %c0_3 = arith.constant 0 : index
    %4 = vector.load %arg2[%c0_2, %c0_3] : memref<2x2048xbf16, #tpu.memory_space<vmem>>, vector<2x2048xbf16>
    %c0_4 = arith.constant 0 : index
    %c0_5 = arith.constant 0 : index
    %5 = vector.load %arg3[%c0_4, %c0_5] : memref<2048x128xbf16, #tpu.memory_space<vmem>>, vector<2048x128xbf16>
    %cst = arith.constant dense<0.000000e+00> : vector<2x128xf32>
    %6 = tpu.matmul %4, %5, %cst {dimension_numbers = #tpu.dot_dimension_numbers<[1], [0], [0], [1], [0, 0, 1, 1], [], []>} : vector<2x2048xbf16>, vector<2048x128xbf16>, vector<2x128xf32> -> vector<2x128xf32>
    %7 = arith.addf %3, %6 : vector<2x128xf32>
    %c0_6 = arith.constant 0 : index
    %c0_7 = arith.constant 0 : index
    %8 = vector.load %arg6[%c0_6, %c0_7] : memref<2x128xf32, #tpu.memory_space<vmem>>, vector<2x128xf32>
    tpu.vector_store %arg6[%c0_6, %c0_7], %7 {strides = array<i32>} : memref<2x128xf32, #tpu.memory_space<vmem>>, vector<2x128xf32>,
    %c8_i32 = arith.constant 8 : i32
    %9 = arith.cmpi eq, %arg1, %c8_i32 : i32
    %10 = arith.extui %9 : i1 to i32
    %c0_i32_8 = arith.constant 0 : i32
    %11 = arith.cmpi ne, %10, %c0_i32_8 : i32
    scf.if %11 {
      %c0_9 = arith.constant 0 : index
      %c0_10 = arith.constant 0 : index
      %12 = vector.load %arg6[%c0_9, %c0_10] : memref<2x128xf32, #tpu.memory_space<vmem>>, vector<2x128xf32>
      %c0_11 = arith.constant 0 : index
      %c0_12 = arith.constant 0 : index
      %13 = vector.load %arg4[%c0_11, %c0_12] : memref<1x128xf32, #tpu.memory_space<vmem>>, vector<1x128xf32>
      %14 = vector.broadcast %13 : vector<1x128xf32> to vector<2x128xf32>
      %15 = arith.addf %12, %14 : vector<2x128xf32>
      %cst_13 = arith.constant 0.000000e+00 : f32
      %16 = vector.broadcast %cst_13 : f32 to vector<2x128xf32>
      %17 = arith.maximumf %15, %16 : vector<2x128xf32>
      %c0_14 = arith.constant 0 : index
      %c0_15 = arith.constant 0 : index
      %18 = vector.load %arg5[%c0_14, %c0_15] : memref<2x128xf32, #tpu.memory_space<vmem>>, vector<2x128xf32>
      tpu.vector_store %arg5[%c0_14, %c0_15], %17 {strides = array<i32>} : memref<2x128xf32, #tpu.memory_space<vmem>>, vector<2x128xf32>,
    } else {
    }
    return
  }
  func.func @transform_0(%arg0: i32, %arg1: i32) -> (i32, i32) {
    %c0_i32 = arith.constant 0 : i32
    return %arg0, %arg1 : i32, i32
  }
  func.func @transform_1(%arg0: i32, %arg1: i32) -> (i32, i32) {
    %c0_i32 = arith.constant 0 : i32
    %c0_i32_0 = arith.constant 0 : i32
    return %arg1, %c0_i32 : i32, i32
  }
  func.func @transform_2(%arg0: i32, %arg1: i32) -> (i32, i32) {
    %c0_i32 = arith.constant 0 : i32
    %c0_i32_0 = arith.constant 0 : i32
    %c0_i32_1 = arith.constant 0 : i32
    return %c0_i32, %c0_i32_0 : i32, i32
  }
  func.func @transform_3(%arg0: i32, %arg1: i32) -> (i32, i32) {
    %c0_i32 = arith.constant 0 : i32
    %c0_i32_0 = arith.constant 0 : i32
    return %arg0, %c0_i32 : i32, i32
  }
}

module attributes {stable_mosaic.version = 11 : i64} {
  func.func @_linear_kernel(%arg0: i32, %arg1: i32, %arg2: memref<2x128xbf16, #tpu.memory_space<vmem>>, %arg3: memref<128x128xbf16, #tpu.memory_space<vmem>>, %arg4: memref<1x128xf32, #tpu.memory_space<vmem>>, %arg5: memref<2x128xf32, #tpu.memory_space<vmem>>, %arg6: memref<2x128xf32, #tpu.memory_space<vmem>>) attributes {dimension_semantics = [#tpu.dimension_semantics<parallel>, #tpu.dimension_semantics<arbitrary>], iteration_bounds = array<i64: 1, 1>, scalar_prefetch = 0 : i64, scratch_operands = 1 : i64, tpu.core_type = #tpu.core_type<tc>, window_params = [{transform_indices = @transform_0, window_bounds = array<i64: 2, 128>}, {transform_indices = @transform_1, window_bounds = array<i64: 128, 128>}, {pipeline_mode = #tpu.pipeline_mode<synchronous>, transform_indices = @transform_2, window_bounds = array<i64: 1, 128>}, {transform_indices = @transform_3, window_bounds = array<i64: 2, 128>}]} {
    %c0_i32 = arith.constant 0 : i32
    %0 = arith.cmpi eq, %arg1, %c0_i32 : i32
    %1 = arith.extui %0 : i1 to i32
    %c0_i32_0 = arith.constant 0 : i32
    %2 = arith.cmpi ne, %1, %c0_i32_0 : i32
    scf.if %2 {
      %cst_10 = arith.constant 0.000000e+00 : f32
      %12 = vector.broadcast %cst_10 : f32 to vector<2x128xf32>
      %c0_11 = arith.constant 0 : index
      %c0_12 = arith.constant 0 : index
      %13 = vector.load %arg6[%c0_11, %c0_12] : memref<2x128xf32, #tpu.memory_space<vmem>>, vector<2x128xf32>
      tpu.vector_store %arg6[%c0_11, %c0_12], %12 {strides = array<i32>} : memref<2x128xf32, #tpu.memory_space<vmem>>, vector<2x128xf32>,
    } else {
    }
    %c0 = arith.constant 0 : index
    %c0_1 = arith.constant 0 : index
    %3 = vector.load %arg6[%c0, %c0_1] : memref<2x128xf32, #tpu.memory_space<vmem>>, vector<2x128xf32>
    %c0_2 = arith.constant 0 : index
    %c0_3 = arith.constant 0 : index
    %4 = vector.load %arg2[%c0_2, %c0_3] : memref<2x128xbf16, #tpu.memory_space<vmem>>, vector<2x128xbf16>
    %c0_4 = arith.constant 0 : index
    %c0_5 = arith.constant 0 : index
    %5 = vector.load %arg3[%c0_4, %c0_5] : memref<128x128xbf16, #tpu.memory_space<vmem>>, vector<128x128xbf16>
    %cst = arith.constant dense<0.000000e+00> : vector<2x128xf32>
    %6 = tpu.matmul %4, %5, %cst {dimension_numbers = #tpu.dot_dimension_numbers<[1], [0], [0], [1], [0, 0, 1, 1], [], []>} : vector<2x128xbf16>, vector<128x128xbf16>, vector<2x128xf32> -> vector<2x128xf32>
    %7 = arith.addf %3, %6 : vector<2x128xf32>
    %c0_6 = arith.constant 0 : index
    %c0_7 = arith.constant 0 : index
    %8 = vector.load %arg6[%c0_6, %c0_7] : memref<2x128xf32, #tpu.memory_space<vmem>>, vector<2x128xf32>
    tpu.vector_store %arg6[%c0_6, %c0_7], %7 {strides = array<i32>} : memref<2x128xf32, #tpu.memory_space<vmem>>, vector<2x128xf32>,
    %c0_i32_8 = arith.constant 0 : i32
    %9 = arith.cmpi eq, %arg1, %c0_i32_8 : i32
    %10 = arith.extui %9 : i1 to i32
    %c0_i32_9 = arith.constant 0 : i32
    %11 = arith.cmpi ne, %10, %c0_i32_9 : i32
    scf.if %11 {
      %c0_10 = arith.constant 0 : index
      %c0_11 = arith.constant 0 : index
      %12 = vector.load %arg6[%c0_10, %c0_11] : memref<2x128xf32, #tpu.memory_space<vmem>>, vector<2x128xf32>
      %c0_12 = arith.constant 0 : index
      %c0_13 = arith.constant 0 : index
      %13 = vector.load %arg4[%c0_12, %c0_13] : memref<1x128xf32, #tpu.memory_space<vmem>>, vector<1x128xf32>
      %14 = vector.broadcast %13 : vector<1x128xf32> to vector<2x128xf32>
      %15 = arith.addf %12, %14 : vector<2x128xf32>
      %cst_14 = arith.constant 0.000000e+00 : f32
      %16 = vector.broadcast %cst_14 : f32 to vector<2x128xf32>
      %17 = arith.maximumf %15, %16 : vector<2x128xf32>
      %c0_15 = arith.constant 0 : index
      %c0_16 = arith.constant 0 : index
      %18 = vector.load %arg5[%c0_15, %c0_16] : memref<2x128xf32, #tpu.memory_space<vmem>>, vector<2x128xf32>
      tpu.vector_store %arg5[%c0_15, %c0_16], %17 {strides = array<i32>} : memref<2x128xf32, #tpu.memory_space<vmem>>, vector<2x128xf32>,
    } else {
    }
    return
  }
  func.func @transform_0(%arg0: i32, %arg1: i32) -> (i32, i32) {
    %c0_i32 = arith.constant 0 : i32
    return %arg0, %arg1 : i32, i32
  }
  func.func @transform_1(%arg0: i32, %arg1: i32) -> (i32, i32) {
    %c0_i32 = arith.constant 0 : i32
    %c0_i32_0 = arith.constant 0 : i32
    return %arg1, %c0_i32 : i32, i32
  }
  func.func @transform_2(%arg0: i32, %arg1: i32) -> (i32, i32) {
    %c0_i32 = arith.constant 0 : i32
    %c0_i32_0 = arith.constant 0 : i32
    %c0_i32_1 = arith.constant 0 : i32
    return %c0_i32, %c0_i32_0 : i32, i32
  }
  func.func @transform_3(%arg0: i32, %arg1: i32) -> (i32, i32) {
    %c0_i32 = arith.constant 0 : i32
    %c0_i32_0 = arith.constant 0 : i32
    return %arg0, %c0_i32 : i32, i32
  }
}

module attributes {stable_mosaic.version = 11 : i64} {
  func.func @_linear_kernel(%arg0: i32, %arg1: i32, %arg2: memref<2x128xbf16, #tpu.memory_space<vmem>>, %arg3: memref<128x128xbf16, #tpu.memory_space<vmem>>, %arg4: memref<1x128xf32, #tpu.memory_space<vmem>>, %arg5: memref<2x128xf32, #tpu.memory_space<vmem>>, %arg6: memref<2x128xf32, #tpu.memory_space<vmem>>) attributes {dimension_semantics = [#tpu.dimension_semantics<parallel>, #tpu.dimension_semantics<arbitrary>], iteration_bounds = array<i64: 1, 1>, scalar_prefetch = 0 : i64, scratch_operands = 1 : i64, tpu.core_type = #tpu.core_type<tc>, window_params = [{transform_indices = @transform_0, window_bounds = array<i64: 2, 128>}, {transform_indices = @transform_1, window_bounds = array<i64: 128, 128>}, {pipeline_mode = #tpu.pipeline_mode<synchronous>, transform_indices = @transform_2, window_bounds = array<i64: 1, 128>}, {transform_indices = @transform_3, window_bounds = array<i64: 2, 128>}]} {
    %c0_i32 = arith.constant 0 : i32
    %0 = arith.cmpi eq, %arg1, %c0_i32 : i32
    %1 = arith.extui %0 : i1 to i32
    %c0_i32_0 = arith.constant 0 : i32
    %2 = arith.cmpi ne, %1, %c0_i32_0 : i32
    scf.if %2 {
      %cst_10 = arith.constant 0.000000e+00 : f32
      %12 = vector.broadcast %cst_10 : f32 to vector<2x128xf32>
      %c0_11 = arith.constant 0 : index
      %c0_12 = arith.constant 0 : index
      %13 = vector.load %arg6[%c0_11, %c0_12] : memref<2x128xf32, #tpu.memory_space<vmem>>, vector<2x128xf32>
      tpu.vector_store %arg6[%c0_11, %c0_12], %12 {strides = array<i32>} : memref<2x128xf32, #tpu.memory_space<vmem>>, vector<2x128xf32>,
    } else {
    }
    %c0 = arith.constant 0 : index
    %c0_1 = arith.constant 0 : index
    %3 = vector.load %arg6[%c0, %c0_1] : memref<2x128xf32, #tpu.memory_space<vmem>>, vector<2x128xf32>
    %c0_2 = arith.constant 0 : index
    %c0_3 = arith.constant 0 : index
    %4 = vector.load %arg2[%c0_2, %c0_3] : memref<2x128xbf16, #tpu.memory_space<vmem>>, vector<2x128xbf16>
    %c0_4 = arith.constant 0 : index
    %c0_5 = arith.constant 0 : index
    %5 = vector.load %arg3[%c0_4, %c0_5] : memref<128x128xbf16, #tpu.memory_space<vmem>>, vector<128x128xbf16>
    %cst = arith.constant dense<0.000000e+00> : vector<2x128xf32>
    %6 = tpu.matmul %4, %5, %cst {dimension_numbers = #tpu.dot_dimension_numbers<[1], [0], [0], [1], [0, 0, 1, 1], [], []>} : vector<2x128xbf16>, vector<128x128xbf16>, vector<2x128xf32> -> vector<2x128xf32>
    %7 = arith.addf %3, %6 : vector<2x128xf32>
    %c0_6 = arith.constant 0 : index
    %c0_7 = arith.constant 0 : index
    %8 = vector.load %arg6[%c0_6, %c0_7] : memref<2x128xf32, #tpu.memory_space<vmem>>, vector<2x128xf32>
    tpu.vector_store %arg6[%c0_6, %c0_7], %7 {strides = array<i32>} : memref<2x128xf32, #tpu.memory_space<vmem>>, vector<2x128xf32>,
    %c0_i32_8 = arith.constant 0 : i32
    %9 = arith.cmpi eq, %arg1, %c0_i32_8 : i32
    %10 = arith.extui %9 : i1 to i32
    %c0_i32_9 = arith.constant 0 : i32
    %11 = arith.cmpi ne, %10, %c0_i32_9 : i32
    scf.if %11 {
      %c0_10 = arith.constant 0 : index
      %c0_11 = arith.constant 0 : index
      %12 = vector.load %arg6[%c0_10, %c0_11] : memref<2x128xf32, #tpu.memory_space<vmem>>, vector<2x128xf32>
      %c0_12 = arith.constant 0 : index
      %c0_13 = arith.constant 0 : index
      %13 = vector.load %arg4[%c0_12, %c0_13] : memref<1x128xf32, #tpu.memory_space<vmem>>, vector<1x128xf32>
      %14 = vector.broadcast %13 : vector<1x128xf32> to vector<2x128xf32>
      %15 = arith.addf %12, %14 : vector<2x128xf32>
      %c0_14 = arith.constant 0 : index
      %c0_15 = arith.constant 0 : index
      %16 = vector.load %arg5[%c0_14, %c0_15] : memref<2x128xf32, #tpu.memory_space<vmem>>, vector<2x128xf32>
      tpu.vector_store %arg5[%c0_14, %c0_15], %15 {strides = array<i32>} : memref<2x128xf32, #tpu.memory_space<vmem>>, vector<2x128xf32>,
    } else {
    }
    return
  }
  func.func @transform_0(%arg0: i32, %arg1: i32) -> (i32, i32) {
    %c0_i32 = arith.constant 0 : i32
    return %arg0, %arg1 : i32, i32
  }
  func.func @transform_1(%arg0: i32, %arg1: i32) -> (i32, i32) {
    %c0_i32 = arith.constant 0 : i32
    %c0_i32_0 = arith.constant 0 : i32
    return %arg1, %c0_i32 : i32, i32
  }
  func.func @transform_2(%arg0: i32, %arg1: i32) -> (i32, i32) {
    %c0_i32 = arith.constant 0 : i32
    %c0_i32_0 = arith.constant 0 : i32
    %c0_i32_1 = arith.constant 0 : i32
    return %c0_i32, %c0_i32_0 : i32, i32
  }
  func.func @transform_3(%arg0: i32, %arg1: i32) -> (i32, i32) {
    %c0_i32 = arith.constant 0 : i32
    %c0_i32_0 = arith.constant 0 : i32
    return %arg0, %c0_i32 : i32, i32
  }
}

</mosaic_0001>

<bundles_post_ra>
// kernel: net_forward.7
= control target key start
LH: loop header
LB: loop body
LE: loop exit
PB: predicated region body
PF: predicated region fallthrough
CT: control target
= control target key end

     0   :  { %8 = vsyncpa [#allocation4], 0  ;;  %s4048_s0 = inlined_call_operand.vmem [shape: bf16[1800,27], index: 0, kind: input, shape index: {}]   ;;  %s4049_s1 = inlined_call_operand.hbm [shape: bf16[27,512], index: 1, kind: input, shape index: {}]   ;;  %s4050_s2 = inlined_call_operand.hbm [shape: f32[1,512], index: 2, kind: input, shape index: {}]   ;;  %s4051_s3 = inlined_call_operand.vmem [shape: bf16[1800,512], index: 3, kind: output, shape index: {}]  }
   0x1   :  { %9 = vsyncpa [#allocation6], 0  ;;  %s3535_s12 = smov 0   ;;  %s3537_s13 = smov 0  }
   0x2   :  { %s3539_s14 = smov 0  }
   0x3 LB: > { %s3065_s15 = sadd.s32 4294967295, %s3507_s14   ;;  %s27_s16 = sadd.s32 1, %s3503_s13  ;;  %s3507_s14 = sphi %s3539_s14, %s15_s14   ;;  %s3503_s13 = sphi %s3537_s13, %s4061_s13   ;;  %s3499_s12 = sphi %s3535_s12, %s4060_s12  }
   0x4   : > { %p29_p0 = scmp.ge.s32.totalorder %s27_s16, 5  ;;  %p3067_p1 = scmp.ge.s32.totalorder %s3507_s14, 1 }
   0x5   : > { %p133_p2 = scmp.lt.s32.totalorder %s3507_s14, 6  ;;  %p3560_p4 = scmp.eq.s32.totalorder %s3065_s15, 0 }
   0x6   : > { %s4063_s16 = smov (%p29_p0, %s27_s16), 0  ;;  %s3509_s19 = smov [#allocation3]  }
   0x7   : > { %p3556_p3 = pnand %p3067_p1, %p133_p2  ;;  %s149_s20 = sshll.u32 %s3509_s19, 4  ;;  %s150_s20 = int_to_ptr.vmem [resolvable:$true] %s149_s20 }
   0x8   : > { %s4056_s18 = scalar_select %p3560_p4, 1, 0 }
   0x9   : > { %s4055_s17 = scalar_select %p3556_p3, 1, 0 }
   0xa   : > { %p3345_p5 = pneg %p3556_p3  ;;  %s3510_s22 = smov [#allocation5]  }
   0xb   : > { %s163_s23 = sshll.u32 %s3510_s22, 4  ;;  %s3421_s26 = scalar_lea.hbm %s4049_s1, 1024  ;;  %s3572_s23 = int_to_ptr.vmem [resolvable:$true] %s163_s23 }
   0xc   : > { %p3568_p6 = pnand %p3560_p4, %p3345_p5  ;;  %p3422_p7 = scmp.ne.s32.totalorder %s4049_s1, %s3421_s26 }
   0xd   : > { %p3428_p11 = scmp.lt.u32.totalorder %s3421_s26, %s4049_s1 }
   0xe   : > { %p3423_p8 = pneg %p3568_p6 }
  0x10   : > { %p3424_p9 = pnand %p3423_p8, %p3422_p7 }
  0x12   : > { %p3425_p10 = pneg %p3424_p9 }
  0x14   : > { %p3430_p12 = pnand %p3428_p11, %p3425_p10 }
  0x16   : > { %3433 = shalt.err (!%p3430_p12)
}
  0x17   : > { %s3434_s4 = scalar_lea.vmem %s150_s20, 1024  ;;  %p3442_p2 = scmp.lt.s32.totalorder %s150_s20, %s150_s20 }
  0x18   : > { %p3435_p13 = scmp.ne.s32.totalorder %s150_s20, %s3434_s4  ;;  %p3443_p5 = scmp.lt.s32.totalorder %s3434_s4, %s3434_s4 }
  0x1a   : > { %p3437_p0 = pnand %p3435_p13, %p3423_p8  ;;  %p3444_p4 = por %p3443_p5, %p3442_p2 }
  0x1c   : > { %p3438_p1 = pneg %p3437_p0 }
  0x1e   : > { %p3445_p3 = pnand %p3444_p4, %p3438_p1 }
  0x20   : > { %3448 = shalt.err (!%p3445_p3)
}
  0x21   : > { %s3511_s5 = smov 256   ;;  %s3512_s6 = smov 16  }
  0x22   : > { %3348 = dma.hbm_to_vmem [thread:$0]  (!%p3568_p6), %s4049_s1, 1024, %s150_s20, [#allocation4], %s3511_s5, %s3511_s5, %s3512_s6  }
  0x23   : > { %s3449_s11 = scalar_lea.hbm %s4050_s2, 64 }
  0x24   : > { %p3450_p7 = scmp.ne.s32.totalorder %s4050_s2, %s3449_s11  ;;  %p3456_p9 = scmp.lt.u32.totalorder %s3449_s11, %s4050_s2 }
  0x26   : > { %p3452_p3 = pnand %p3450_p7, %p3423_p8 }
  0x28   : > { %p3453_p4 = pneg %p3452_p3 }
  0x2a   : > { %p3458_p10 = pnand %p3456_p9, %p3453_p4 }
  0x2c   : > { %3461 = shalt.err (!%p3458_p10)
}
  0x2d   : > { %s3462_s20 = scalar_lea.vmem %s3572_s23, 64  ;;  %p3470_p0 = scmp.lt.s32.totalorder %s3572_s23, %s3572_s23 }
  0x2e   : > { %p3463_p11 = scmp.ne.s32.totalorder %s3572_s23, %s3462_s20  ;;  %p3471_p1 = scmp.lt.s32.totalorder %s3462_s20, %s3462_s20 }
  0x30   : > { %p3465_p12 = pnand %p3463_p11, %p3423_p8  ;;  %p3472_p2 = por %p3471_p1, %p3470_p0 }
  0x32   : > { %p3466_p13 = pneg %p3465_p12 }
  0x34   : > { %p3473_p5 = pnand %p3472_p2, %p3466_p13 }
  0x36   : > { %3476 = shalt.err (!%p3473_p5)
}
  0x37   : > { %3351 = dma.hbm_to_vmem [thread:$0]  (!%p3568_p6), %s4050_s2, 64, %s3572_s23, [#allocation6]  }
  0x38   : > { %p4058_p7 = scmp.ne.s32.totalorder %s4055_s17, 0 }
  0x39   : > { %p4059_p3 = scmp.ne.s32.totalorder (!%p4058_p7), %s4056_s18, 0 }
  0x3a   : > { %188 = sbr.rel (%p4058_p7) target bundleno = 476 (0x1dc), region = 32 }
  0x41   : > { %3490 = dma.done.wait (%p4059_p3), [#allocation4], 1024  }
  0x42   : > { %3492 = vsyncadd (%p4059_p3), [#allocation4], 4294966272 }
  0x43   : > { %3494 = dma.done.wait (%p4059_p3), [#allocation6], 64  }
  0x44   : > { %3496 = vsyncadd (%p4059_p3), [#allocation6], 4294967232  ;;  %v3513_v0 = vmov 0   ;;  %s220_s17 = smul.u32 45, %s3499_s12  ;;  %vm874_vm0 = vcmask 1044480   ;;  %vm875_vm1 = vcmask 1045504   ;;  %v1957_v39 = vlaneseq }
  0x45   : > { %922 = vmatprep.mubr.bf16.mxu0 %v3513_v0  ;;  %1183 = vmatprep.mubr.bf16.mxu1 %v3513_v0  ;;  %v3514_v1 = vmov 65535   ;;  %v3386_v3 = vld [vmem:[#allocation3 + $0x4] ss:$16 sps:$4 sm:$0xff]   ;;  %v3388_v4 = vld [vmem:[#allocation3 + $0xc] ss:$16 sps:$4 sm:$0xff]   ;;  %vm804_vm2 = vcmask 220160  }
  0x46   : > { %p221_p6 = scmp.lt.s32.totalorder %s220_s17, 224  ;;  %v876_v2 = vsel %vm874_vm0, 4294967295, %v3514_v1  ;;  %890 = vmatprep.subr.bf16.mxu0 %v3386_v3  ;;  %v3390_v6 = vld [vmem:[#allocation3] ss:$16 sps:$4 sm:$0xff]   ;;  %v3391_v7 = vld [vmem:[#allocation3 + $0x8] ss:$16 sps:$4 sm:$0xff]   ;;  %1151 = vmatprep.subr.bf16.mxu1 %v3388_v4 }
  0x47   : > { %v877_v5 = vsel %vm875_vm1, %v876_v2, 0  ;;  %v3392_v8 = vld [vmem:[#allocation3 + $0x24] ss:$16 sps:$4 sm:$0x3f]   ;;  %891 = vmatpush1.bf16.msra.mxu0 %v3390_v6  ;;  %1152 = vmatpush1.bf16.msra.mxu1 %v3391_v7  ;;  %v1958_v40 = vshrl.u32 %v1957_v39, 7 }
  0x48   : > { %s4065_s17 = smov (!%p221_p6, %s220_s17), 224  ;;  %v3394_v9 = vld [vmem:[#allocation3 + $0x2c] ss:$16 sps:$4 sm:$0x3f]   ;;  %v882_v10 = vand.u32 %v3392_v8, %v877_v5  ;;  %v1955_v43 = vld [vmem:[#allocation5] sm:$0xf] }
  0x49   : > { %s3074_s18 = sshll.u32 %s4065_s17, 2  ;;  %v3396_v11 = vld [vmem:[#allocation3 + $0x20] ss:$16 sps:$4 sm:$0x3f]   ;;  %v888_v13 = vand.u32 %v3394_v9, %v877_v5  ;;  %v1959_v41 = vsub.s32 0, %v1958_v40  ;;  %v1967_v42 = vsub.s32 2, %v1958_v40 }
  0x4a   : > { %v3397_v12 = vld [vmem:[#allocation3 + $0x28] ss:$16 sps:$4 sm:$0x3f]   ;;  %s3640_s23 = scalar_lea.vmem %s4048_s0, %s3074_s18  ;;  %892 = vmatprep.subr.bf16.mxu0 %v882_v10  ;;  %v879_v14 = vand.u32 %v3396_v11, %v877_v5  ;;  %v1963_v44 = vsub.s32 1, %v1958_v40  ;;  %v1971_v45 = vsub.s32 3, %v1958_v40  ;;  %s3246_s27 = sshll.u32 %s4065_s17, 4 }
  0x4b   : > { %v885_v15 = vand.u32 %v3397_v12, %v877_v5  ;;  %1153 = vmatprep.subr.bf16.mxu1 %v888_v13  ;;  %v3398_v16 = vld [vmem:[%s3640_s23] sm:$0xff]   ;;  %v3399_v17 = vld [vmem:[%s3640_s23 + $0x8] sm:$0xff]   ;;  %v3400_v18 = vld [vmem:[%s3640_s23 + $0x10] sm:$0xff]   ;;  %v3755_v46 = vrot.slane %v1955_v43, %v1959_v41  ;;  %v3757_v47 = vrot.slane %v1955_v43, %v1967_v42  ;;  %s3775_s30 = scalar_lea.vmem %s4051_s3, %s3246_s27 }
  0x4c   : > { %893 = vmatpush1.bf16.msra.mxu0 %v879_v14  ;;  %v3401_v19 = vld [vmem:[%s3640_s23 + $0x18] sm:$0xff]   ;;  %v3402_v20 = vld [vmem:[%s3640_s23 + $0x20] sm:$0xff]   ;;  %v3403_v21 = vld [vmem:[%s3640_s23 + $0x28] sm:$0xff]   ;;  %v3759_v48 = vrot.slane %v1955_v43, %v1963_v44  ;;  %v3761_v49 = vrot.slane %v1955_v43, %v1971_v45 }
  0x4d   : > { %1154 = vmatpush1.bf16.msra.mxu1 %v885_v15  ;;  %v3404_v22 = vld [vmem:[%s3640_s23 + $0x30] sm:$0xff]   ;;  %v3405_v23 = vld [vmem:[%s3640_s23 + $0x38] sm:$0xff]   ;;  %v3406_v24 = vld [vmem:[%s3640_s23 + $0x40] sm:$0xff]  }
  0x4e   : > { %v3407_v25 = vld [vmem:[%s3640_s23 + $0x48] sm:$0xff]   ;;  %v3408_v26 = vld [vmem:[%s3640_s23 + $0x50] sm:$0xff]   ;;  %v3409_v27 = vld [vmem:[%s3640_s23 + $0x58] sm:$0xff]  }
  0x4f   : > { %3108 = vmatmul.mubr.msk.bf16.vlgmr.msra.gmra.mrb[0].mxu0 %vm804_vm2, %v3398_v16  ;;  %v3410_v28 = vld [vmem:[%s3640_s23 + $0x60] sm:$0xff]   ;;  %v3411_v29 = vld [vmem:[%s3640_s23 + $0x68] sm:$0xff]   ;;  %v3412_v30 = vld [vmem:[%s3640_s23 + $0x70] sm:$0xff]  }
  0x50   : > { %3131 = vmatmul.mubr.msk.bf16.vlgmr.msra.gmra.mrb[0].mxu1 %vm804_vm2, %v3398_v16  ;;  %932 = vmatprep.mubr.bf16.mxu0 %v3513_v0  ;;  %v3413_v31 = vld [vmem:[%s3640_s23 + $0x78] sm:$0xff]   ;;  %v3414_v32 = vld [vmem:[%s3640_s23 + $0x80] sm:$0xff]   ;;  %v3415_v33 = vld [vmem:[%s3640_s23 + $0x88] sm:$0xff]  }
  0x51   : > { %1193 = vmatprep.mubr.bf16.mxu1 %v3513_v0  ;;  %v3416_v34 = vld [vmem:[%s3640_s23 + $0x90] sm:$0xff]   ;;  %v3417_v35 = vld [vmem:[%s3640_s23 + $0x98] sm:$0xff]   ;;  %v3418_v36 = vld [vmem:[%s3640_s23 + $0xa0] sm:$0xff]  }
  0x52   : > { %v3419_v37 = vld [vmem:[%s3640_s23 + $0xa8] sm:$0xff]   ;;  %v3420_v38 = vld [vmem:[%s3640_s23 + $0xb0] ss:$0 sps:$4 sm:$0xff]  }
  0x57   : > { %3109 = vmatmul.mubr.msk.bf16.gmra.mrb[4].mxu0 %vm804_vm2, %v3399_v17 }
  0x58   : > { %3132 = vmatmul.mubr.msk.bf16.gmra.mrb[4].mxu1 %vm804_vm2, %v3399_v17  ;;  %942 = vmatprep.mubr.bf16.mxu0 %v3513_v0 }
  0x59   : > { %1203 = vmatprep.mubr.bf16.mxu1 %v3513_v0 }
  0x5f   : > { %3110 = vmatmul.mubr.msk.bf16.gmra.mrb[8].mxu0 %vm804_vm2, %v3400_v18 }
  0x60   : > { %3133 = vmatmul.mubr.msk.bf16.gmra.mrb[8].mxu1 %vm804_vm2, %v3400_v18  ;;  %952 = vmatprep.mubr.bf16.mxu0 %v3513_v0 }
  0x61   : > { %1213 = vmatprep.mubr.bf16.mxu1 %v3513_v0 }
  0x67   : > { %3111 = vmatmul.mubr.msk.bf16.gmra.mrb[12].mxu0 %vm804_vm2, %v3401_v19 }
  0x68   : > { %3134 = vmatmul.mubr.msk.bf16.gmra.mrb[12].mxu1 %vm804_vm2, %v3401_v19  ;;  %962 = vmatprep.mubr.bf16.mxu0 %v3513_v0 }
  0x69   : > { %1223 = vmatprep.mubr.bf16.mxu1 %v3513_v0 }
  0x6f   : > { %3112 = vmatmul.mubr.msk.bf16.gmra.mrb[16].mxu0 %vm804_vm2, %v3402_v20 }
  0x70   : > { %3135 = vmatmul.mubr.msk.bf16.gmra.mrb[16].mxu1 %vm804_vm2, %v3402_v20  ;;  %972 = vmatprep.mubr.bf16.mxu0 %v3513_v0 }
  0x71   : > { %1233 = vmatprep.mubr.bf16.mxu1 %v3513_v0 }
  0x77   : > { %3113 = vmatmul.mubr.msk.bf16.gmra.mrb[20].mxu0 %vm804_vm2, %v3403_v21 }
  0x78   : > { %3136 = vmatmul.mubr.msk.bf16.gmra.mrb[20].mxu1 %vm804_vm2, %v3403_v21  ;;  %982 = vmatprep.mubr.bf16.mxu0 %v3513_v0 }
  0x79   : > { %1243 = vmatprep.mubr.bf16.mxu1 %v3513_v0 }
  0x7f   : > { %3114 = vmatmul.mubr.msk.bf16.gmra.mrb[24].mxu0 %vm804_vm2, %v3404_v22 }
  0x80   : > { %3137 = vmatmul.mubr.msk.bf16.gmra.mrb[24].mxu1 %vm804_vm2, %v3404_v22  ;;  %992 = vmatprep.mubr.bf16.mxu0 %v3513_v0 }
  0x81   : > { %1253 = vmatprep.mubr.bf16.mxu1 %v3513_v0 }
  0x87   : > { %3115 = vmatmul.mubr.msk.bf16.gmra.mrb[28].mxu0 %vm804_vm2, %v3405_v23 }
  0x88   : > { %3138 = vmatmul.mubr.msk.bf16.gmra.mrb[28].mxu1 %vm804_vm2, %v3405_v23  ;;  %1002 = vmatprep.mubr.bf16.mxu0 %v3513_v0 }
  0x89   : > { %1263 = vmatprep.mubr.bf16.mxu1 %v3513_v0 }
  0x8f   : > { %3116 = vmatmul.mubr.msk.bf16.gmra.mrb[32].mxu0 %vm804_vm2, %v3406_v24 }
  0x90   : > { %3139 = vmatmul.mubr.msk.bf16.gmra.mrb[32].mxu1 %vm804_vm2, %v3406_v24  ;;  %1012 = vmatprep.mubr.bf16.mxu0 %v3513_v0 }
  0x91   : > { %1273 = vmatprep.mubr.bf16.mxu1 %v3513_v0 }
  0x97   : > { %3117 = vmatmul.mubr.msk.bf16.gmra.mrb[36].mxu0 %vm804_vm2, %v3407_v25 }
  0x98   : > { %3140 = vmatmul.mubr.msk.bf16.gmra.mrb[36].mxu1 %vm804_vm2, %v3407_v25  ;;  %1022 = vmatprep.mubr.bf16.mxu0 %v3513_v0 }
  0x99   : > { %1283 = vmatprep.mubr.bf16.mxu1 %v3513_v0 }
  0x9f   : > { %3118 = vmatmul.mubr.msk.bf16.gmra.mrb[40].mxu0 %vm804_vm2, %v3408_v26 }
  0xa0   : > { %3141 = vmatmul.mubr.msk.bf16.gmra.mrb[40].mxu1 %vm804_vm2, %v3408_v26  ;;  %1032 = vmatprep.mubr.bf16.mxu0 %v3513_v0 }
  0xa1   : > { %1293 = vmatprep.mubr.bf16.mxu1 %v3513_v0 }
  0xa7   : > { %3119 = vmatmul.mubr.msk.bf16.gmra.mrb[44].mxu0 %vm804_vm2, %v3409_v27 }
  0xa8   : > { %3142 = vmatmul.mubr.msk.bf16.gmra.mrb[44].mxu1 %vm804_vm2, %v3409_v27  ;;  %1042 = vmatprep.mubr.bf16.mxu0 %v3513_v0 }
  0xa9   : > { %1303 = vmatprep.mubr.bf16.mxu1 %v3513_v0 }
  0xaf   : > { %3120 = vmatmul.mubr.msk.bf16.gmra.mrb[48].mxu0 %vm804_vm2, %v3410_v28 }
  0xb0   : > { %3143 = vmatmul.mubr.msk.bf16.gmra.mrb[48].mxu1 %vm804_vm2, %v3410_v28  ;;  %1052 = vmatprep.mubr.bf16.mxu0 %v3513_v0 }
  0xb1   : > { %1313 = vmatprep.mubr.bf16.mxu1 %v3513_v0 }
  0xb7   : > { %3121 = vmatmul.mubr.msk.bf16.gmra.mrb[52].mxu0 %vm804_vm2, %v3411_v29 }
  0xb8   : > { %3144 = vmatmul.mubr.msk.bf16.gmra.mrb[52].mxu1 %vm804_vm2, %v3411_v29  ;;  %1062 = vmatprep.mubr.bf16.mxu0 %v3513_v0 }
  0xb9   : > { %1323 = vmatprep.mubr.bf16.mxu1 %v3513_v0 }
  0xbf   : > { %3122 = vmatmul.mubr.msk.bf16.gmra.mrb[56].mxu0 %vm804_vm2, %v3412_v30 }
  0xc0   : > { %3145 = vmatmul.mubr.msk.bf16.gmra.mrb[56].mxu1 %vm804_vm2, %v3412_v30  ;;  %1072 = vmatprep.mubr.bf16.mxu0 %v3513_v0 }
  0xc1   : > { %1333 = vmatprep.mubr.bf16.mxu1 %v3513_v0 }
  0xc7   : > { %3123 = vmatmul.mubr.msk.bf16.gmra.mrb[60].mxu0 %vm804_vm2, %v3413_v31 }
  0xc8   : > { %3146 = vmatmul.mubr.msk.bf16.gmra.mrb[60].mxu1 %vm804_vm2, %v3413_v31  ;;  %1082 = vmatprep.mubr.bf16.mxu0 %v3513_v0 }
  0xc9   : > { %1343 = vmatprep.mubr.bf16.mxu1 %v3513_v0 }
  0xcf   : > { %3124 = vmatmul.mubr.msk.bf16.gmra.mrb[64].mxu0 %vm804_vm2, %v3414_v32 }
  0xd0   : > { %3147 = vmatmul.mubr.msk.bf16.gmra.mrb[64].mxu1 %vm804_vm2, %v3414_v32  ;;  %1092 = vmatprep.mubr.bf16.mxu0 %v3513_v0 }
  0xd1   : > { %1353 = vmatprep.mubr.bf16.mxu1 %v3513_v0 }
  0xd7   : > { %3125 = vmatmul.mubr.msk.bf16.gmra.mrb[68].mxu0 %vm804_vm2, %v3415_v33 }
  0xd8   : > { %3148 = vmatmul.mubr.msk.bf16.gmra.mrb[68].mxu1 %vm804_vm2, %v3415_v33  ;;  %1102 = vmatprep.mubr.bf16.mxu0 %v3513_v0 }
  0xd9   : > { %1363 = vmatprep.mubr.bf16.mxu1 %v3513_v0 }
  0xdf   : > { %3126 = vmatmul.mubr.msk.bf16.gmra.mrb[72].mxu0 %vm804_vm2, %v3416_v34 }
  0xe0   : > { %3149 = vmatmul.mubr.msk.bf16.gmra.mrb[72].mxu1 %vm804_vm2, %v3416_v34  ;;  %1112 = vmatprep.mubr.bf16.mxu0 %v3513_v0 }
  0xe1   : > { %1373 = vmatprep.mubr.bf16.mxu1 %v3513_v0 }
  0xe7   : > { %3127 = vmatmul.mubr.msk.bf16.gmra.mrb[76].mxu0 %vm804_vm2, %v3417_v35 }
  0xe8   : > { %3150 = vmatmul.mubr.msk.bf16.gmra.mrb[76].mxu1 %vm804_vm2, %v3417_v35  ;;  %1122 = vmatprep.mubr.bf16.mxu0 %v3513_v0 }
  0xe9   : > { %1383 = vmatprep.mubr.bf16.mxu1 %v3513_v0 }
  0xef   : > { %3128 = vmatmul.mubr.msk.bf16.gmra.mrb[80].mxu0 %vm804_vm2, %v3418_v36 }
  0xf0   : > { %3151 = vmatmul.mubr.msk.bf16.gmra.mrb[80].mxu1 %vm804_vm2, %v3418_v36  ;;  %1132 = vmatprep.mubr.bf16.mxu0 %v3513_v0 }
  0xf1   : > { %1393 = vmatprep.mubr.bf16.mxu1 %v3513_v0 }
  0xf7   : > { %3129 = vmatmul.mubr.msk.bf16.gmra.mrb[84].mxu0 %vm804_vm2, %v3419_v37 }
  0xf8   : > { %3152 = vmatmul.mubr.msk.bf16.gmra.mrb[84].mxu1 %vm804_vm2, %v3419_v37  ;;  %1142 = vmatprep.mubr.bf16.mxu0 %v3513_v0 }
  0xf9   : > { %1403 = vmatprep.mubr.bf16.mxu1 %v3513_v0 }
  0xff   : > { %3130 = vmatmul.mubr.msk.bf16.gmra.mrb[88].mxu0 %vm804_vm2, %v3420_v38 }
 0x100   : > { %3153 = vmatmul.mubr.msk.bf16.gmra.mrb[88].mxu1 %vm804_vm2, %v3420_v38 }
 0x122   : > { %v924_v50 = vpop.f32.mrb[0].mxu0 }
 0x123   : > { %v1185_v51 = vpop.f32.mrb[0].mxu1  ;;  %v1977_v52 = vadd.f32 %v3755_v46, %v924_v50  ;;  %v926_v54 = vpop.f32.mrb[1].mxu0 }
 0x124   : > { %v1979_v53 = vadd.f32 %v3757_v47, %v1185_v51  ;;  %v1187_v55 = vpop.f32.mrb[1].mxu1  ;;  %v1978_v56 = vadd.f32 %v3759_v48, %v926_v54  ;;  %v928_v58 = vpop.f32.mrb[2].mxu0 }
 0x125   : > { %v1980_v57 = vadd.f32 %v3761_v49, %v1187_v55  ;;  %v1189_v59 = vpop.f32.mrb[2].mxu1  ;;  %v2157_v60 = vmax.f32 %v1977_v52, 0.0  ;;  %v1981_v62 = vadd.f32 %v3755_v46, %v928_v58  ;;  %v930_v0 = vpop.f32.mrb[3].mxu0 }
 0x126   : > { %v2159_v61 = vmax.f32 %v1979_v53, 0.0  ;;  %v1983_v63 = vadd.f32 %v3757_v47, %v1189_v59  ;;  %v1191_v1 = vpop.f32.mrb[3].mxu1  ;;  %v2158_v2 = vmax.f32 %v1978_v56, 0.0  ;;  %v1982_v4 = vadd.f32 %v3759_v48, %v930_v0 }
 0x127   : > { %v2160_v3 = vmax.f32 %v1980_v57, 0.0  ;;  %v1984_v5 = vadd.f32 %v3761_v49, %v1191_v1  ;;  %v2161_v6 = vmax.f32 %v1981_v62, 0.0 }
 0x128   : > { %v2163_v7 = vmax.f32 %v1983_v63, 0.0  ;;  %v3247_v8 = vpack.c.bf16 %v2158_v2, %v2157_v60  ;;  %v2162_v10 = vmax.f32 %v1982_v4, 0.0 }
 0x129   : > { %v3248_v9 = vpack.c.bf16 %v2160_v3, %v2159_v61  ;;  %v2164_v11 = vmax.f32 %v1984_v5, 0.0 }
 0x12a   : > { %2881 = vst [vmem:[%s3775_s30] sm:$0xff] %v3247_v8  ;;  %v3249_v12 = vpack.c.bf16 %v2162_v10, %v2161_v6  ;;  %v934_v14 = vpop.f32.mrb[4].mxu0 }
 0x12b   : > { %2882 = vst [vmem:[%s3775_s30 + $0x8] sm:$0xff] %v3248_v9  ;;  %v3250_v13 = vpack.c.bf16 %v2164_v11, %v2163_v7  ;;  %v1195_v15 = vpop.f32.mrb[4].mxu1  ;;  %v1985_v16 = vadd.f32 %v3755_v46, %v934_v14  ;;  %v936_v18 = vpop.f32.mrb[5].mxu0 }
 0x12c   : > { %v1987_v17 = vadd.f32 %v3757_v47, %v1195_v15  ;;  %v1197_v19 = vpop.f32.mrb[5].mxu1  ;;  %2883 = vst [vmem:[%s3775_s30 + $0x10] sm:$0xff] %v3249_v12  ;;  %v1986_v20 = vadd.f32 %v3759_v48, %v936_v18  ;;  %v938_v22 = vpop.f32.mrb[6].mxu0 }
 0x12d   : > { %2884 = vst [vmem:[%s3775_s30 + $0x18] sm:$0xff] %v3250_v13  ;;  %v1988_v21 = vadd.f32 %v3761_v49, %v1197_v19  ;;  %v1199_v23 = vpop.f32.mrb[6].mxu1  ;;  %v2165_v24 = vmax.f32 %v1985_v16, 0.0  ;;  %v1989_v26 = vadd.f32 %v3755_v46, %v938_v22  ;;  %v940_v28 = vpop.f32.mrb[7].mxu0 }
 0x12e   : > { %v2167_v25 = vmax.f32 %v1987_v17, 0.0  ;;  %v1991_v27 = vadd.f32 %v3757_v47, %v1199_v23  ;;  %v1201_v29 = vpop.f32.mrb[7].mxu1  ;;  %v2166_v30 = vmax.f32 %v1986_v20, 0.0  ;;  %v1990_v32 = vadd.f32 %v3759_v48, %v940_v28 }
 0x12f   : > { %v2168_v31 = vmax.f32 %v1988_v21, 0.0  ;;  %v1992_v33 = vadd.f32 %v3761_v49, %v1201_v29  ;;  %v2169_v34 = vmax.f32 %v1989_v26, 0.0 }
 0x130   : > { %v2171_v35 = vmax.f32 %v1991_v27, 0.0  ;;  %v3251_v36 = vpack.c.bf16 %v2166_v30, %v2165_v24  ;;  %v2170_v38 = vmax.f32 %v1990_v32, 0.0 }
 0x131   : > { %v3252_v37 = vpack.c.bf16 %v2168_v31, %v2167_v25  ;;  %v2172_v39 = vmax.f32 %v1992_v33, 0.0 }
 0x132   : > { %2885 = vst [vmem:[%s3775_s30 + $0x20] sm:$0xff] %v3251_v36  ;;  %v3253_v40 = vpack.c.bf16 %v2170_v38, %v2169_v34  ;;  %v944_v42 = vpop.f32.mrb[8].mxu0 }
 0x133   : > { %2886 = vst [vmem:[%s3775_s30 + $0x28] sm:$0xff] %v3252_v37  ;;  %v3254_v41 = vpack.c.bf16 %v2172_v39, %v2171_v35  ;;  %v1205_v43 = vpop.f32.mrb[8].mxu1  ;;  %v1993_v44 = vadd.f32 %v3755_v46, %v944_v42  ;;  %v946_v50 = vpop.f32.mrb[9].mxu0 }
 0x134   : > { %v1995_v45 = vadd.f32 %v3757_v47, %v1205_v43  ;;  %v1207_v51 = vpop.f32.mrb[9].mxu1  ;;  %2887 = vst [vmem:[%s3775_s30 + $0x30] sm:$0xff] %v3253_v40  ;;  %v1994_v52 = vadd.f32 %v3759_v48, %v946_v50  ;;  %v948_v54 = vpop.f32.mrb[10].mxu0 }
 0x135   : > { %2888 = vst [vmem:[%s3775_s30 + $0x38] sm:$0xff] %v3254_v41  ;;  %v1996_v53 = vadd.f32 %v3761_v49, %v1207_v51  ;;  %v1209_v55 = vpop.f32.mrb[10].mxu1  ;;  %v2173_v56 = vmax.f32 %v1993_v44, 0.0  ;;  %v1997_v58 = vadd.f32 %v3755_v46, %v948_v54  ;;  %v950_v60 = vpop.f32.mrb[11].mxu0 }
 0x136   : > { %v2175_v57 = vmax.f32 %v1995_v45, 0.0  ;;  %v1999_v59 = vadd.f32 %v3757_v47, %v1209_v55  ;;  %v1211_v61 = vpop.f32.mrb[11].mxu1  ;;  %v2174_v62 = vmax.f32 %v1994_v52, 0.0  ;;  %v1998_v0 = vadd.f32 %v3759_v48, %v950_v60 }
 0x137   : > { %v2176_v63 = vmax.f32 %v1996_v53, 0.0  ;;  %v2000_v1 = vadd.f32 %v3761_v49, %v1211_v61  ;;  %v2177_v2 = vmax.f32 %v1997_v58, 0.0 }
 0x138   : > { %v2179_v3 = vmax.f32 %v1999_v59, 0.0  ;;  %v3255_v4 = vpack.c.bf16 %v2174_v62, %v2173_v56  ;;  %v2178_v6 = vmax.f32 %v1998_v0, 0.0 }
 0x139   : > { %v3256_v5 = vpack.c.bf16 %v2176_v63, %v2175_v57  ;;  %v2180_v7 = vmax.f32 %v2000_v1, 0.0 }
 0x13a   : > { %2889 = vst [vmem:[%s3775_s30 + $0x40] sm:$0xff] %v3255_v4  ;;  %v3257_v8 = vpack.c.bf16 %v2178_v6, %v2177_v2  ;;  %v954_v10 = vpop.f32.mrb[12].mxu0 }
 0x13b   : > { %2890 = vst [vmem:[%s3775_s30 + $0x48] sm:$0xff] %v3256_v5  ;;  %v3258_v9 = vpack.c.bf16 %v2180_v7, %v2179_v3  ;;  %v1215_v11 = vpop.f32.mrb[12].mxu1  ;;  %v2001_v12 = vadd.f32 %v3755_v46, %v954_v10  ;;  %v956_v14 = vpop.f32.mrb[13].mxu0 }
 0x13c   : > { %v2003_v13 = vadd.f32 %v3757_v47, %v1215_v11  ;;  %v1217_v15 = vpop.f32.mrb[13].mxu1  ;;  %2891 = vst [vmem:[%s3775_s30 + $0x50] sm:$0xff] %v3257_v8  ;;  %v2002_v16 = vadd.f32 %v3759_v48, %v956_v14  ;;  %v958_v18 = vpop.f32.mrb[14].mxu0 }
 0x13d   : > { %2892 = vst [vmem:[%s3775_s30 + $0x58] sm:$0xff] %v3258_v9  ;;  %v2004_v17 = vadd.f32 %v3761_v49, %v1217_v15  ;;  %v1219_v19 = vpop.f32.mrb[14].mxu1  ;;  %v2181_v20 = vmax.f32 %v2001_v12, 0.0  ;;  %v2005_v22 = vadd.f32 %v3755_v46, %v958_v18  ;;  %v960_v24 = vpop.f32.mrb[15].mxu0 }
 0x13e   : > { %v2183_v21 = vmax.f32 %v2003_v13, 0.0  ;;  %v2007_v23 = vadd.f32 %v3757_v47, %v1219_v19  ;;  %v1221_v25 = vpop.f32.mrb[15].mxu1  ;;  %v2182_v26 = vmax.f32 %v2002_v16, 0.0  ;;  %v2006_v28 = vadd.f32 %v3759_v48, %v960_v24 }
 0x13f   : > { %v2184_v27 = vmax.f32 %v2004_v17, 0.0  ;;  %v2008_v29 = vadd.f32 %v3761_v49, %v1221_v25  ;;  %v2185_v30 = vmax.f32 %v2005_v22, 0.0 }
 0x140   : > { %v2187_v31 = vmax.f32 %v2007_v23, 0.0  ;;  %v3259_v32 = vpack.c.bf16 %v2182_v26, %v2181_v20  ;;  %v2186_v34 = vmax.f32 %v2006_v28, 0.0 }
 0x141   : > { %v3260_v33 = vpack.c.bf16 %v2184_v27, %v2183_v21  ;;  %v2188_v35 = vmax.f32 %v2008_v29, 0.0 }
 0x142   : > { %2893 = vst [vmem:[%s3775_s30 + $0x60] sm:$0xff] %v3259_v32  ;;  %v3261_v36 = vpack.c.bf16 %v2186_v34, %v2185_v30  ;;  %v964_v38 = vpop.f32.mrb[16].mxu0 }
 0x143   : > { %2894 = vst [vmem:[%s3775_s30 + $0x68] sm:$0xff] %v3260_v33  ;;  %v3262_v37 = vpack.c.bf16 %v2188_v35, %v2187_v31  ;;  %v1225_v39 = vpop.f32.mrb[16].mxu1  ;;  %v2009_v40 = vadd.f32 %v3755_v46, %v964_v38  ;;  %v966_v42 = vpop.f32.mrb[17].mxu0 }
 0x144   : > { %v2011_v41 = vadd.f32 %v3757_v47, %v1225_v39  ;;  %v1227_v43 = vpop.f32.mrb[17].mxu1  ;;  %2895 = vst [vmem:[%s3775_s30 + $0x70] sm:$0xff] %v3261_v36  ;;  %v2010_v44 = vadd.f32 %v3759_v48, %v966_v42  ;;  %v968_v50 = vpop.f32.mrb[18].mxu0 }
 0x145   : > { %2896 = vst [vmem:[%s3775_s30 + $0x78] sm:$0xff] %v3262_v37  ;;  %v2012_v45 = vadd.f32 %v3761_v49, %v1227_v43  ;;  %v1229_v51 = vpop.f32.mrb[18].mxu1  ;;  %v2189_v52 = vmax.f32 %v2009_v40, 0.0  ;;  %v2013_v54 = vadd.f32 %v3755_v46, %v968_v50  ;;  %v970_v56 = vpop.f32.mrb[19].mxu0 }
 0x146   : > { %v2191_v53 = vmax.f32 %v2011_v41, 0.0  ;;  %v2015_v55 = vadd.f32 %v3757_v47, %v1229_v51  ;;  %v1231_v57 = vpop.f32.mrb[19].mxu1  ;;  %v2190_v58 = vmax.f32 %v2010_v44, 0.0  ;;  %v2014_v60 = vadd.f32 %v3759_v48, %v970_v56 }
 0x147   : > { %v2192_v59 = vmax.f32 %v2012_v45, 0.0  ;;  %v2016_v61 = vadd.f32 %v3761_v49, %v1231_v57  ;;  %v2193_v62 = vmax.f32 %v2013_v54, 0.0 }
 0x148   : > { %v2195_v63 = vmax.f32 %v2015_v55, 0.0  ;;  %v3263_v0 = vpack.c.bf16 %v2190_v58, %v2189_v52  ;;  %v2194_v2 = vmax.f32 %v2014_v60, 0.0 }
 0x149   : > { %v3264_v1 = vpack.c.bf16 %v2192_v59, %v2191_v53  ;;  %v2196_v3 = vmax.f32 %v2016_v61, 0.0 }
 0x14a   : > { %2897 = vst [vmem:[%s3775_s30 + $0x80] sm:$0xff] %v3263_v0  ;;  %v3265_v4 = vpack.c.bf16 %v2194_v2, %v2193_v62  ;;  %v974_v6 = vpop.f32.mrb[20].mxu0 }
 0x14b   : > { %2898 = vst [vmem:[%s3775_s30 + $0x88] sm:$0xff] %v3264_v1  ;;  %v3266_v5 = vpack.c.bf16 %v2196_v3, %v2195_v63  ;;  %v1235_v7 = vpop.f32.mrb[20].mxu1  ;;  %v2017_v8 = vadd.f32 %v3755_v46, %v974_v6  ;;  %v976_v10 = vpop.f32.mrb[21].mxu0 }
 0x14c   : > { %v2019_v9 = vadd.f32 %v3757_v47, %v1235_v7  ;;  %v1237_v11 = vpop.f32.mrb[21].mxu1  ;;  %2899 = vst [vmem:[%s3775_s30 + $0x90] sm:$0xff] %v3265_v4  ;;  %v2018_v12 = vadd.f32 %v3759_v48, %v976_v10  ;;  %v978_v14 = vpop.f32.mrb[22].mxu0 }
 0x14d   : > { %2900 = vst [vmem:[%s3775_s30 + $0x98] sm:$0xff] %v3266_v5  ;;  %v2020_v13 = vadd.f32 %v3761_v49, %v1237_v11  ;;  %v1239_v15 = vpop.f32.mrb[22].mxu1  ;;  %v2197_v16 = vmax.f32 %v2017_v8, 0.0  ;;  %v2021_v18 = vadd.f32 %v3755_v46, %v978_v14  ;;  %v980_v20 = vpop.f32.mrb[23].mxu0 }
 0x14e   : > { %v2199_v17 = vmax.f32 %v2019_v9, 0.0  ;;  %v2023_v19 = vadd.f32 %v3757_v47, %v1239_v15  ;;  %v1241_v21 = vpop.f32.mrb[23].mxu1  ;;  %v2198_v22 = vmax.f32 %v2018_v12, 0.0  ;;  %v2022_v24 = vadd.f32 %v3759_v48, %v980_v20 }
 0x14f   : > { %v2200_v23 = vmax.f32 %v2020_v13, 0.0  ;;  %v2024_v25 = vadd.f32 %v3761_v49, %v1241_v21  ;;  %v2201_v26 = vmax.f32 %v2021_v18, 0.0 }
 0x150   : > { %v2203_v27 = vmax.f32 %v2023_v19, 0.0  ;;  %v3267_v28 = vpack.c.bf16 %v2198_v22, %v2197_v16  ;;  %v2202_v30 = vmax.f32 %v2022_v24, 0.0 }
 0x151   : > { %v3268_v29 = vpack.c.bf16 %v2200_v23, %v2199_v17  ;;  %v2204_v31 = vmax.f32 %v2024_v25, 0.0 }
 0x152   : > { %2901 = vst [vmem:[%s3775_s30 + $0xa0] sm:$0xff] %v3267_v28  ;;  %v3269_v32 = vpack.c.bf16 %v2202_v30, %v2201_v26  ;;  %v984_v34 = vpop.f32.mrb[24].mxu0 }
 0x153   : > { %2902 = vst [vmem:[%s3775_s30 + $0xa8] sm:$0xff] %v3268_v29  ;;  %v3270_v33 = vpack.c.bf16 %v2204_v31, %v2203_v27  ;;  %v1245_v35 = vpop.f32.mrb[24].mxu1  ;;  %v2025_v36 = vadd.f32 %v3755_v46, %v984_v34  ;;  %v986_v38 = vpop.f32.mrb[25].mxu0 }
 0x154   : > { %v2027_v37 = vadd.f32 %v3757_v47, %v1245_v35  ;;  %v1247_v39 = vpop.f32.mrb[25].mxu1  ;;  %2903 = vst [vmem:[%s3775_s30 + $0xb0] sm:$0xff] %v3269_v32  ;;  %v2026_v40 = vadd.f32 %v3759_v48, %v986_v38  ;;  %v988_v42 = vpop.f32.mrb[26].mxu0 }
 0x155   : > { %2904 = vst [vmem:[%s3775_s30 + $0xb8] sm:$0xff] %v3270_v33  ;;  %v2028_v41 = vadd.f32 %v3761_v49, %v1247_v39  ;;  %v1249_v43 = vpop.f32.mrb[26].mxu1  ;;  %v2205_v44 = vmax.f32 %v2025_v36, 0.0  ;;  %v2029_v50 = vadd.f32 %v3755_v46, %v988_v42  ;;  %v990_v52 = vpop.f32.mrb[27].mxu0 }
 0x156   : > { %v2207_v45 = vmax.f32 %v2027_v37, 0.0  ;;  %v2031_v51 = vadd.f32 %v3757_v47, %v1249_v43  ;;  %v1251_v53 = vpop.f32.mrb[27].mxu1  ;;  %v2206_v54 = vmax.f32 %v2026_v40, 0.0  ;;  %v2030_v56 = vadd.f32 %v3759_v48, %v990_v52 }
 0x157   : > { %v2208_v55 = vmax.f32 %v2028_v41, 0.0  ;;  %v2032_v57 = vadd.f32 %v3761_v49, %v1251_v53  ;;  %v2209_v58 = vmax.f32 %v2029_v50, 0.0 }
 0x158   : > { %v2211_v59 = vmax.f32 %v2031_v51, 0.0  ;;  %v3271_v60 = vpack.c.bf16 %v2206_v54, %v2205_v44  ;;  %v2210_v62 = vmax.f32 %v2030_v56, 0.0 }
 0x159   : > { %v3272_v61 = vpack.c.bf16 %v2208_v55, %v2207_v45  ;;  %v2212_v63 = vmax.f32 %v2032_v57, 0.0 }
 0x15a   : > { %2905 = vst [vmem:[%s3775_s30 + $0xc0] sm:$0xff] %v3271_v60  ;;  %v3273_v0 = vpack.c.bf16 %v2210_v62, %v2209_v58  ;;  %v994_v2 = vpop.f32.mrb[28].mxu0 }
 0x15b   : > { %2906 = vst [vmem:[%s3775_s30 + $0xc8] sm:$0xff] %v3272_v61  ;;  %v3274_v1 = vpack.c.bf16 %v2212_v63, %v2211_v59  ;;  %v1255_v3 = vpop.f32.mrb[28].mxu1  ;;  %v2033_v4 = vadd.f32 %v3755_v46, %v994_v2  ;;  %v996_v6 = vpop.f32.mrb[29].mxu0 }
 0x15c   : > { %v2035_v5 = vadd.f32 %v3757_v47, %v1255_v3  ;;  %v1257_v7 = vpop.f32.mrb[29].mxu1  ;;  %2907 = vst [vmem:[%s3775_s30 + $0xd0] sm:$0xff] %v3273_v0  ;;  %v2034_v8 = vadd.f32 %v3759_v48, %v996_v6  ;;  %v998_v10 = vpop.f32.mrb[30].mxu0 }
 0x15d   : > { %2908 = vst [vmem:[%s3775_s30 + $0xd8] sm:$0xff] %v3274_v1  ;;  %v2036_v9 = vadd.f32 %v3761_v49, %v1257_v7  ;;  %v1259_v11 = vpop.f32.mrb[30].mxu1  ;;  %v2213_v12 = vmax.f32 %v2033_v4, 0.0  ;;  %v2037_v14 = vadd.f32 %v3755_v46, %v998_v10  ;;  %v1000_v16 = vpop.f32.mrb[31].mxu0 }
 0x15e   : > { %v2215_v13 = vmax.f32 %v2035_v5, 0.0  ;;  %v2039_v15 = vadd.f32 %v3757_v47, %v1259_v11  ;;  %v1261_v17 = vpop.f32.mrb[31].mxu1  ;;  %v2214_v18 = vmax.f32 %v2034_v8, 0.0  ;;  %v2038_v20 = vadd.f32 %v3759_v48, %v1000_v16 }
 0x15f   : > { %v2216_v19 = vmax.f32 %v2036_v9, 0.0  ;;  %v2040_v21 = vadd.f32 %v3761_v49, %v1261_v17  ;;  %v2217_v22 = vmax.f32 %v2037_v14, 0.0 }
 0x160   : > { %v2219_v23 = vmax.f32 %v2039_v15, 0.0  ;;  %v3275_v24 = vpack.c.bf16 %v2214_v18, %v2213_v12  ;;  %v2218_v26 = vmax.f32 %v2038_v20, 0.0 }
 0x161   : > { %v3276_v25 = vpack.c.bf16 %v2216_v19, %v2215_v13  ;;  %v2220_v27 = vmax.f32 %v2040_v21, 0.0 }
 0x162   : > { %2909 = vst [vmem:[%s3775_s30 + $0xe0] sm:$0xff] %v3275_v24  ;;  %v3277_v28 = vpack.c.bf16 %v2218_v26, %v2217_v22  ;;  %v1004_v30 = vpop.f32.mrb[32].mxu0 }
 0x163   : > { %2910 = vst [vmem:[%s3775_s30 + $0xe8] sm:$0xff] %v3276_v25  ;;  %v3278_v29 = vpack.c.bf16 %v2220_v27, %v2219_v23  ;;  %v1265_v31 = vpop.f32.mrb[32].mxu1  ;;  %v2041_v32 = vadd.f32 %v3755_v46, %v1004_v30  ;;  %v1006_v34 = vpop.f32.mrb[33].mxu0 }
 0x164   : > { %v2043_v33 = vadd.f32 %v3757_v47, %v1265_v31  ;;  %v1267_v35 = vpop.f32.mrb[33].mxu1  ;;  %2911 = vst [vmem:[%s3775_s30 + $0xf0] sm:$0xff] %v3277_v28  ;;  %v2042_v36 = vadd.f32 %v3759_v48, %v1006_v34  ;;  %v1008_v38 = vpop.f32.mrb[34].mxu0 }
 0x165   : > { %2912 = vst [vmem:[%s3775_s30 + $0xf8] sm:$0xff] %v3278_v29  ;;  %v2044_v37 = vadd.f32 %v3761_v49, %v1267_v35  ;;  %v1269_v39 = vpop.f32.mrb[34].mxu1  ;;  %v2221_v40 = vmax.f32 %v2041_v32, 0.0  ;;  %v2045_v42 = vadd.f32 %v3755_v46, %v1008_v38  ;;  %v1010_v44 = vpop.f32.mrb[35].mxu0 }
 0x166   : > { %v2223_v41 = vmax.f32 %v2043_v33, 0.0  ;;  %v2047_v43 = vadd.f32 %v3757_v47, %v1269_v39  ;;  %v1271_v45 = vpop.f32.mrb[35].mxu1  ;;  %v2222_v50 = vmax.f32 %v2042_v36, 0.0  ;;  %v2046_v52 = vadd.f32 %v3759_v48, %v1010_v44 }
 0x167   : > { %v2224_v51 = vmax.f32 %v2044_v37, 0.0  ;;  %v2048_v53 = vadd.f32 %v3761_v49, %v1271_v45  ;;  %v2225_v54 = vmax.f32 %v2045_v42, 0.0 }
 0x168   : > { %v2227_v55 = vmax.f32 %v2047_v43, 0.0  ;;  %v3279_v56 = vpack.c.bf16 %v2222_v50, %v2221_v40  ;;  %v2226_v58 = vmax.f32 %v2046_v52, 0.0 }
 0x169   : > { %v3280_v57 = vpack.c.bf16 %v2224_v51, %v2223_v41  ;;  %v2228_v59 = vmax.f32 %v2048_v53, 0.0 }
 0x16a   : > { %2913 = vst [vmem:[%s3775_s30 + $0x100] sm:$0xff] %v3279_v56  ;;  %v3281_v60 = vpack.c.bf16 %v2226_v58, %v2225_v54  ;;  %v1014_v62 = vpop.f32.mrb[36].mxu0 }
 0x16b   : > { %2914 = vst [vmem:[%s3775_s30 + $0x108] sm:$0xff] %v3280_v57  ;;  %v3282_v61 = vpack.c.bf16 %v2228_v59, %v2227_v55  ;;  %v1275_v63 = vpop.f32.mrb[36].mxu1  ;;  %v2049_v0 = vadd.f32 %v3755_v46, %v1014_v62  ;;  %v1016_v2 = vpop.f32.mrb[37].mxu0 }
 0x16c   : > { %v2051_v1 = vadd.f32 %v3757_v47, %v1275_v63  ;;  %v1277_v3 = vpop.f32.mrb[37].mxu1  ;;  %2915 = vst [vmem:[%s3775_s30 + $0x110] sm:$0xff] %v3281_v60  ;;  %v2050_v4 = vadd.f32 %v3759_v48, %v1016_v2  ;;  %v1018_v6 = vpop.f32.mrb[38].mxu0 }
 0x16d   : > { %2916 = vst [vmem:[%s3775_s30 + $0x118] sm:$0xff] %v3282_v61  ;;  %v2052_v5 = vadd.f32 %v3761_v49, %v1277_v3  ;;  %v1279_v7 = vpop.f32.mrb[38].mxu1  ;;  %v2229_v8 = vmax.f32 %v2049_v0, 0.0  ;;  %v2053_v10 = vadd.f32 %v3755_v46, %v1018_v6  ;;  %v1020_v12 = vpop.f32.mrb[39].mxu0 }
 0x16e   : > { %v2231_v9 = vmax.f32 %v2051_v1, 0.0  ;;  %v2055_v11 = vadd.f32 %v3757_v47, %v1279_v7  ;;  %v1281_v13 = vpop.f32.mrb[39].mxu1  ;;  %v2230_v14 = vmax.f32 %v2050_v4, 0.0  ;;  %v2054_v16 = vadd.f32 %v3759_v48, %v1020_v12 }
 0x16f   : > { %v2232_v15 = vmax.f32 %v2052_v5, 0.0  ;;  %v2056_v17 = vadd.f32 %v3761_v49, %v1281_v13  ;;  %v2233_v18 = vmax.f32 %v2053_v10, 0.0 }
 0x170   : > { %v2235_v19 = vmax.f32 %v2055_v11, 0.0  ;;  %v3283_v20 = vpack.c.bf16 %v2230_v14, %v2229_v8  ;;  %v2234_v22 = vmax.f32 %v2054_v16, 0.0 }
 0x171   : > { %v3284_v21 = vpack.c.bf16 %v2232_v15, %v2231_v9  ;;  %v2236_v23 = vmax.f32 %v2056_v17, 0.0 }
 0x172   : > { %2917 = vst [vmem:[%s3775_s30 + $0x120] sm:$0xff] %v3283_v20  ;;  %v3285_v24 = vpack.c.bf16 %v2234_v22, %v2233_v18  ;;  %v1024_v26 = vpop.f32.mrb[40].mxu0 }
 0x173   : > { %2918 = vst [vmem:[%s3775_s30 + $0x128] sm:$0xff] %v3284_v21  ;;  %v3286_v25 = vpack.c.bf16 %v2236_v23, %v2235_v19  ;;  %v1285_v27 = vpop.f32.mrb[40].mxu1  ;;  %v2057_v28 = vadd.f32 %v3755_v46, %v1024_v26  ;;  %v1026_v30 = vpop.f32.mrb[41].mxu0 }
 0x174   : > { %v2059_v29 = vadd.f32 %v3757_v47, %v1285_v27  ;;  %v1287_v31 = vpop.f32.mrb[41].mxu1  ;;  %2919 = vst [vmem:[%s3775_s30 + $0x130] sm:$0xff] %v3285_v24  ;;  %v2058_v32 = vadd.f32 %v3759_v48, %v1026_v30  ;;  %v1028_v34 = vpop.f32.mrb[42].mxu0 }
 0x175   : > { %2920 = vst [vmem:[%s3775_s30 + $0x138] sm:$0xff] %v3286_v25  ;;  %v2060_v33 = vadd.f32 %v3761_v49, %v1287_v31  ;;  %v1289_v35 = vpop.f32.mrb[42].mxu1  ;;  %v2237_v36 = vmax.f32 %v2057_v28, 0.0  ;;  %v2061_v38 = vadd.f32 %v3755_v46, %v1028_v34  ;;  %v1030_v40 = vpop.f32.mrb[43].mxu0 }
 0x176   : > { %v2239_v37 = vmax.f32 %v2059_v29, 0.0  ;;  %v2063_v39 = vadd.f32 %v3757_v47, %v1289_v35  ;;  %v1291_v41 = vpop.f32.mrb[43].mxu1  ;;  %v2238_v42 = vmax.f32 %v2058_v32, 0.0  ;;  %v2062_v44 = vadd.f32 %v3759_v48, %v1030_v40 }
 0x177   : > { %v2240_v43 = vmax.f32 %v2060_v33, 0.0  ;;  %v2064_v45 = vadd.f32 %v3761_v49, %v1291_v41  ;;  %v2241_v50 = vmax.f32 %v2061_v38, 0.0 }
 0x178   : > { %v2243_v51 = vmax.f32 %v2063_v39, 0.0  ;;  %v3287_v52 = vpack.c.bf16 %v2238_v42, %v2237_v36  ;;  %v2242_v54 = vmax.f32 %v2062_v44, 0.0 }
 0x179   : > { %v3288_v53 = vpack.c.bf16 %v2240_v43, %v2239_v37  ;;  %v2244_v55 = vmax.f32 %v2064_v45, 0.0 }
 0x17a   : > { %2921 = vst [vmem:[%s3775_s30 + $0x140] sm:$0xff] %v3287_v52  ;;  %v3289_v56 = vpack.c.bf16 %v2242_v54, %v2241_v50  ;;  %v1034_v58 = vpop.f32.mrb[44].mxu0 }
 0x17b   : > { %2922 = vst [vmem:[%s3775_s30 + $0x148] sm:$0xff] %v3288_v53  ;;  %v3290_v57 = vpack.c.bf16 %v2244_v55, %v2243_v51  ;;  %v1295_v59 = vpop.f32.mrb[44].mxu1  ;;  %v2065_v60 = vadd.f32 %v3755_v46, %v1034_v58  ;;  %v1036_v62 = vpop.f32.mrb[45].mxu0 }
 0x17c   : > { %v2067_v61 = vadd.f32 %v3757_v47, %v1295_v59  ;;  %v1297_v63 = vpop.f32.mrb[45].mxu1  ;;  %2923 = vst [vmem:[%s3775_s30 + $0x150] sm:$0xff] %v3289_v56  ;;  %v2066_v0 = vadd.f32 %v3759_v48, %v1036_v62  ;;  %v1038_v2 = vpop.f32.mrb[46].mxu0 }
 0x17d   : > { %2924 = vst [vmem:[%s3775_s30 + $0x158] sm:$0xff] %v3290_v57  ;;  %v2068_v1 = vadd.f32 %v3761_v49, %v1297_v63  ;;  %v1299_v3 = vpop.f32.mrb[46].mxu1  ;;  %v2245_v4 = vmax.f32 %v2065_v60, 0.0  ;;  %v2069_v6 = vadd.f32 %v3755_v46, %v1038_v2  ;;  %v1040_v8 = vpop.f32.mrb[47].mxu0 }
 0x17e   : > { %v2247_v5 = vmax.f32 %v2067_v61, 0.0  ;;  %v2071_v7 = vadd.f32 %v3757_v47, %v1299_v3  ;;  %v1301_v9 = vpop.f32.mrb[47].mxu1  ;;  %v2246_v10 = vmax.f32 %v2066_v0, 0.0  ;;  %v2070_v12 = vadd.f32 %v3759_v48, %v1040_v8 }
 0x17f   : > { %v2248_v11 = vmax.f32 %v2068_v1, 0.0  ;;  %v2072_v13 = vadd.f32 %v3761_v49, %v1301_v9  ;;  %v2249_v14 = vmax.f32 %v2069_v6, 0.0 }
 0x180   : > { %v2251_v15 = vmax.f32 %v2071_v7, 0.0  ;;  %v3291_v16 = vpack.c.bf16 %v2246_v10, %v2245_v4  ;;  %v2250_v18 = vmax.f32 %v2070_v12, 0.0 }
 0x181   : > { %v3292_v17 = vpack.c.bf16 %v2248_v11, %v2247_v5  ;;  %v2252_v19 = vmax.f32 %v2072_v13, 0.0 }
 0x182   : > { %2925 = vst [vmem:[%s3775_s30 + $0x160] sm:$0xff] %v3291_v16  ;;  %v3293_v20 = vpack.c.bf16 %v2250_v18, %v2249_v14  ;;  %v1044_v22 = vpop.f32.mrb[48].mxu0 }
 0x183   : > { %2926 = vst [vmem:[%s3775_s30 + $0x168] sm:$0xff] %v3292_v17  ;;  %v3294_v21 = vpack.c.bf16 %v2252_v19, %v2251_v15  ;;  %v1305_v23 = vpop.f32.mrb[48].mxu1  ;;  %v2073_v24 = vadd.f32 %v3755_v46, %v1044_v22  ;;  %v1046_v26 = vpop.f32.mrb[49].mxu0 }
 0x184   : > { %v2075_v25 = vadd.f32 %v3757_v47, %v1305_v23  ;;  %v1307_v27 = vpop.f32.mrb[49].mxu1  ;;  %2927 = vst [vmem:[%s3775_s30 + $0x170] sm:$0xff] %v3293_v20  ;;  %v2074_v28 = vadd.f32 %v3759_v48, %v1046_v26  ;;  %v1048_v30 = vpop.f32.mrb[50].mxu0 }
 0x185   : > { %2928 = vst [vmem:[%s3775_s30 + $0x178] sm:$0xff] %v3294_v21  ;;  %v2076_v29 = vadd.f32 %v3761_v49, %v1307_v27  ;;  %v1309_v31 = vpop.f32.mrb[50].mxu1  ;;  %v2253_v32 = vmax.f32 %v2073_v24, 0.0  ;;  %v2077_v34 = vadd.f32 %v3755_v46, %v1048_v30  ;;  %v1050_v36 = vpop.f32.mrb[51].mxu0 }
 0x186   : > { %v2255_v33 = vmax.f32 %v2075_v25, 0.0  ;;  %v2079_v35 = vadd.f32 %v3757_v47, %v1309_v31  ;;  %v1311_v37 = vpop.f32.mrb[51].mxu1  ;;  %v2254_v38 = vmax.f32 %v2074_v28, 0.0  ;;  %v2078_v40 = vadd.f32 %v3759_v48, %v1050_v36 }
 0x187   : > { %v2256_v39 = vmax.f32 %v2076_v29, 0.0  ;;  %v2080_v41 = vadd.f32 %v3761_v49, %v1311_v37  ;;  %v2257_v42 = vmax.f32 %v2077_v34, 0.0 }
 0x188   : > { %v2259_v43 = vmax.f32 %v2079_v35, 0.0  ;;  %v3295_v44 = vpack.c.bf16 %v2254_v38, %v2253_v32  ;;  %v2258_v50 = vmax.f32 %v2078_v40, 0.0 }
 0x189   : > { %v3296_v45 = vpack.c.bf16 %v2256_v39, %v2255_v33  ;;  %v2260_v51 = vmax.f32 %v2080_v41, 0.0 }
 0x18a   : > { %2929 = vst [vmem:[%s3775_s30 + $0x180] sm:$0xff] %v3295_v44  ;;  %v3297_v52 = vpack.c.bf16 %v2258_v50, %v2257_v42  ;;  %v1054_v54 = vpop.f32.mrb[52].mxu0 }
 0x18b   : > { %2930 = vst [vmem:[%s3775_s30 + $0x188] sm:$0xff] %v3296_v45  ;;  %v3298_v53 = vpack.c.bf16 %v2260_v51, %v2259_v43  ;;  %v1315_v55 = vpop.f32.mrb[52].mxu1  ;;  %v2081_v56 = vadd.f32 %v3755_v46, %v1054_v54  ;;  %v1056_v58 = vpop.f32.mrb[53].mxu0 }
 0x18c   : > { %v2083_v57 = vadd.f32 %v3757_v47, %v1315_v55  ;;  %v1317_v59 = vpop.f32.mrb[53].mxu1  ;;  %2931 = vst [vmem:[%s3775_s30 + $0x190] sm:$0xff] %v3297_v52  ;;  %v2082_v60 = vadd.f32 %v3759_v48, %v1056_v58  ;;  %v1058_v62 = vpop.f32.mrb[54].mxu0 }
 0x18d   : > { %2932 = vst [vmem:[%s3775_s30 + $0x198] sm:$0xff] %v3298_v53  ;;  %v2084_v61 = vadd.f32 %v3761_v49, %v1317_v59  ;;  %v1319_v63 = vpop.f32.mrb[54].mxu1  ;;  %v2261_v0 = vmax.f32 %v2081_v56, 0.0  ;;  %v2085_v2 = vadd.f32 %v3755_v46, %v1058_v62  ;;  %v1060_v4 = vpop.f32.mrb[55].mxu0 }
 0x18e   : > { %v2263_v1 = vmax.f32 %v2083_v57, 0.0  ;;  %v2087_v3 = vadd.f32 %v3757_v47, %v1319_v63  ;;  %v1321_v5 = vpop.f32.mrb[55].mxu1  ;;  %v2262_v6 = vmax.f32 %v2082_v60, 0.0  ;;  %v2086_v8 = vadd.f32 %v3759_v48, %v1060_v4 }
 0x18f   : > { %v2264_v7 = vmax.f32 %v2084_v61, 0.0  ;;  %v2088_v9 = vadd.f32 %v3761_v49, %v1321_v5  ;;  %v2265_v10 = vmax.f32 %v2085_v2, 0.0 }
 0x190   : > { %v2267_v11 = vmax.f32 %v2087_v3, 0.0  ;;  %v3299_v12 = vpack.c.bf16 %v2262_v6, %v2261_v0  ;;  %v2266_v14 = vmax.f32 %v2086_v8, 0.0 }
 0x191   : > { %v3300_v13 = vpack.c.bf16 %v2264_v7, %v2263_v1  ;;  %v2268_v15 = vmax.f32 %v2088_v9, 0.0 }
 0x192   : > { %2933 = vst [vmem:[%s3775_s30 + $0x1a0] sm:$0xff] %v3299_v12  ;;  %v3301_v16 = vpack.c.bf16 %v2266_v14, %v2265_v10  ;;  %v1064_v18 = vpop.f32.mrb[56].mxu0 }
 0x193   : > { %2934 = vst [vmem:[%s3775_s30 + $0x1a8] sm:$0xff] %v3300_v13  ;;  %v3302_v17 = vpack.c.bf16 %v2268_v15, %v2267_v11  ;;  %v1325_v19 = vpop.f32.mrb[56].mxu1  ;;  %v2089_v20 = vadd.f32 %v3755_v46, %v1064_v18  ;;  %v1066_v22 = vpop.f32.mrb[57].mxu0 }
 0x194   : > { %v2091_v21 = vadd.f32 %v3757_v47, %v1325_v19  ;;  %v1327_v23 = vpop.f32.mrb[57].mxu1  ;;  %2935 = vst [vmem:[%s3775_s30 + $0x1b0] sm:$0xff] %v3301_v16  ;;  %v2090_v24 = vadd.f32 %v3759_v48, %v1066_v22  ;;  %v1068_v26 = vpop.f32.mrb[58].mxu0 }
 0x195   : > { %2936 = vst [vmem:[%s3775_s30 + $0x1b8] sm:$0xff] %v3302_v17  ;;  %v2092_v25 = vadd.f32 %v3761_v49, %v1327_v23  ;;  %v1329_v27 = vpop.f32.mrb[58].mxu1  ;;  %v2269_v28 = vmax.f32 %v2089_v20, 0.0  ;;  %v2093_v30 = vadd.f32 %v3755_v46, %v1068_v26  ;;  %v1070_v32 = vpop.f32.mrb[59].mxu0 }
 0x196   : > { %v2271_v29 = vmax.f32 %v2091_v21, 0.0  ;;  %v2095_v31 = vadd.f32 %v3757_v47, %v1329_v27  ;;  %v1331_v33 = vpop.f32.mrb[59].mxu1  ;;  %v2270_v34 = vmax.f32 %v2090_v24, 0.0  ;;  %v2094_v36 = vadd.f32 %v3759_v48, %v1070_v32 }
 0x197   : > { %v2272_v35 = vmax.f32 %v2092_v25, 0.0  ;;  %v2096_v37 = vadd.f32 %v3761_v49, %v1331_v33  ;;  %v2273_v38 = vmax.f32 %v2093_v30, 0.0 }
 0x198   : > { %v2275_v39 = vmax.f32 %v2095_v31, 0.0  ;;  %v3303_v40 = vpack.c.bf16 %v2270_v34, %v2269_v28  ;;  %v2274_v42 = vmax.f32 %v2094_v36, 0.0 }
 0x199   : > { %v3304_v41 = vpack.c.bf16 %v2272_v35, %v2271_v29  ;;  %v2276_v43 = vmax.f32 %v2096_v37, 0.0 }
 0x19a   : > { %2937 = vst [vmem:[%s3775_s30 + $0x1c0] sm:$0xff] %v3303_v40  ;;  %v3305_v44 = vpack.c.bf16 %v2274_v42, %v2273_v38  ;;  %v1074_v50 = vpop.f32.mrb[60].mxu0 }
 0x19b   : > { %2938 = vst [vmem:[%s3775_s30 + $0x1c8] sm:$0xff] %v3304_v41  ;;  %v3306_v45 = vpack.c.bf16 %v2276_v43, %v2275_v39  ;;  %v1335_v51 = vpop.f32.mrb[60].mxu1  ;;  %v2097_v52 = vadd.f32 %v3755_v46, %v1074_v50  ;;  %v1076_v54 = vpop.f32.mrb[61].mxu0 }
 0x19c   : > { %v2099_v53 = vadd.f32 %v3757_v47, %v1335_v51  ;;  %v1337_v55 = vpop.f32.mrb[61].mxu1  ;;  %2939 = vst [vmem:[%s3775_s30 + $0x1d0] sm:$0xff] %v3305_v44  ;;  %v2098_v56 = vadd.f32 %v3759_v48, %v1076_v54  ;;  %v1078_v58 = vpop.f32.mrb[62].mxu0 }
 0x19d   : > { %2940 = vst [vmem:[%s3775_s30 + $0x1d8] sm:$0xff] %v3306_v45  ;;  %v2100_v57 = vadd.f32 %v3761_v49, %v1337_v55  ;;  %v1339_v59 = vpop.f32.mrb[62].mxu1  ;;  %v2277_v60 = vmax.f32 %v2097_v52, 0.0  ;;  %v2101_v62 = vadd.f32 %v3755_v46, %v1078_v58  ;;  %v1080_v0 = vpop.f32.mrb[63].mxu0 }
 0x19e   : > { %v2279_v61 = vmax.f32 %v2099_v53, 0.0  ;;  %v2103_v63 = vadd.f32 %v3757_v47, %v1339_v59  ;;  %v1341_v1 = vpop.f32.mrb[63].mxu1  ;;  %v2278_v2 = vmax.f32 %v2098_v56, 0.0  ;;  %v2102_v4 = vadd.f32 %v3759_v48, %v1080_v0 }
 0x19f   : > { %v2280_v3 = vmax.f32 %v2100_v57, 0.0  ;;  %v2104_v5 = vadd.f32 %v3761_v49, %v1341_v1  ;;  %v2281_v6 = vmax.f32 %v2101_v62, 0.0 }
 0x1a0   : > { %v2283_v7 = vmax.f32 %v2103_v63, 0.0  ;;  %v3307_v8 = vpack.c.bf16 %v2278_v2, %v2277_v60  ;;  %v2282_v10 = vmax.f32 %v2102_v4, 0.0 }
 0x1a1   : > { %v3308_v9 = vpack.c.bf16 %v2280_v3, %v2279_v61  ;;  %v2284_v11 = vmax.f32 %v2104_v5, 0.0 }
 0x1a2   : > { %2941 = vst [vmem:[%s3775_s30 + $0x1e0] sm:$0xff] %v3307_v8  ;;  %v3309_v12 = vpack.c.bf16 %v2282_v10, %v2281_v6  ;;  %v1084_v14 = vpop.f32.mrb[64].mxu0 }
 0x1a3   : > { %2942 = vst [vmem:[%s3775_s30 + $0x1e8] sm:$0xff] %v3308_v9  ;;  %v3310_v13 = vpack.c.bf16 %v2284_v11, %v2283_v7  ;;  %v1345_v15 = vpop.f32.mrb[64].mxu1  ;;  %v2105_v16 = vadd.f32 %v3755_v46, %v1084_v14  ;;  %v1086_v18 = vpop.f32.mrb[65].mxu0 }
 0x1a4   : > { %v2107_v17 = vadd.f32 %v3757_v47, %v1345_v15  ;;  %v1347_v19 = vpop.f32.mrb[65].mxu1  ;;  %2943 = vst [vmem:[%s3775_s30 + $0x1f0] sm:$0xff] %v3309_v12  ;;  %v2106_v20 = vadd.f32 %v3759_v48, %v1086_v18  ;;  %v1088_v22 = vpop.f32.mrb[66].mxu0 }
 0x1a5   : > { %2944 = vst [vmem:[%s3775_s30 + $0x1f8] sm:$0xff] %v3310_v13  ;;  %v2108_v21 = vadd.f32 %v3761_v49, %v1347_v19  ;;  %v1349_v23 = vpop.f32.mrb[66].mxu1  ;;  %v2285_v24 = vmax.f32 %v2105_v16, 0.0  ;;  %v2109_v26 = vadd.f32 %v3755_v46, %v1088_v22  ;;  %v1090_v28 = vpop.f32.mrb[67].mxu0 }
 0x1a6   : > { %v2287_v25 = vmax.f32 %v2107_v17, 0.0  ;;  %v2111_v27 = vadd.f32 %v3757_v47, %v1349_v23  ;;  %v1351_v29 = vpop.f32.mrb[67].mxu1  ;;  %v2286_v30 = vmax.f32 %v2106_v20, 0.0  ;;  %v2110_v32 = vadd.f32 %v3759_v48, %v1090_v28 }
 0x1a7   : > { %v2288_v31 = vmax.f32 %v2108_v21, 0.0  ;;  %v2112_v33 = vadd.f32 %v3761_v49, %v1351_v29  ;;  %v2289_v34 = vmax.f32 %v2109_v26, 0.0 }
 0x1a8   : > { %v2291_v35 = vmax.f32 %v2111_v27, 0.0  ;;  %v3311_v36 = vpack.c.bf16 %v2286_v30, %v2285_v24  ;;  %v2290_v38 = vmax.f32 %v2110_v32, 0.0 }
 0x1a9   : > { %v3312_v37 = vpack.c.bf16 %v2288_v31, %v2287_v25  ;;  %v2292_v39 = vmax.f32 %v2112_v33, 0.0 }
 0x1aa   : > { %2945 = vst [vmem:[%s3775_s30 + $0x200] sm:$0xff] %v3311_v36  ;;  %v3313_v40 = vpack.c.bf16 %v2290_v38, %v2289_v34  ;;  %v1094_v42 = vpop.f32.mrb[68].mxu0 }
 0x1ab   : > { %2946 = vst [vmem:[%s3775_s30 + $0x208] sm:$0xff] %v3312_v37  ;;  %v3314_v41 = vpack.c.bf16 %v2292_v39, %v2291_v35  ;;  %v1355_v43 = vpop.f32.mrb[68].mxu1  ;;  %v2113_v44 = vadd.f32 %v3755_v46, %v1094_v42  ;;  %v1096_v50 = vpop.f32.mrb[69].mxu0 }
 0x1ac   : > { %v2115_v45 = vadd.f32 %v3757_v47, %v1355_v43  ;;  %v1357_v51 = vpop.f32.mrb[69].mxu1  ;;  %2947 = vst [vmem:[%s3775_s30 + $0x210] sm:$0xff] %v3313_v40  ;;  %v2114_v52 = vadd.f32 %v3759_v48, %v1096_v50  ;;  %v1098_v54 = vpop.f32.mrb[70].mxu0 }
 0x1ad   : > { %2948 = vst [vmem:[%s3775_s30 + $0x218] sm:$0xff] %v3314_v41  ;;  %v2116_v53 = vadd.f32 %v3761_v49, %v1357_v51  ;;  %v1359_v55 = vpop.f32.mrb[70].mxu1  ;;  %v2293_v56 = vmax.f32 %v2113_v44, 0.0  ;;  %v2117_v58 = vadd.f32 %v3755_v46, %v1098_v54  ;;  %v1100_v60 = vpop.f32.mrb[71].mxu0 }
 0x1ae   : > { %v2295_v57 = vmax.f32 %v2115_v45, 0.0  ;;  %v2119_v59 = vadd.f32 %v3757_v47, %v1359_v55  ;;  %v1361_v61 = vpop.f32.mrb[71].mxu1  ;;  %v2294_v62 = vmax.f32 %v2114_v52, 0.0  ;;  %v2118_v0 = vadd.f32 %v3759_v48, %v1100_v60 }
 0x1af   : > { %v2296_v63 = vmax.f32 %v2116_v53, 0.0  ;;  %v2120_v1 = vadd.f32 %v3761_v49, %v1361_v61  ;;  %v2297_v2 = vmax.f32 %v2117_v58, 0.0 }
 0x1b0   : > { %v2299_v3 = vmax.f32 %v2119_v59, 0.0  ;;  %v3315_v4 = vpack.c.bf16 %v2294_v62, %v2293_v56  ;;  %v2298_v6 = vmax.f32 %v2118_v0, 0.0 }
 0x1b1   : > { %v3316_v5 = vpack.c.bf16 %v2296_v63, %v2295_v57  ;;  %v2300_v7 = vmax.f32 %v2120_v1, 0.0 }
 0x1b2   : > { %2949 = vst [vmem:[%s3775_s30 + $0x220] sm:$0xff] %v3315_v4  ;;  %v3317_v8 = vpack.c.bf16 %v2298_v6, %v2297_v2  ;;  %v1104_v10 = vpop.f32.mrb[72].mxu0 }
 0x1b3   : > { %2950 = vst [vmem:[%s3775_s30 + $0x228] sm:$0xff] %v3316_v5  ;;  %v3318_v9 = vpack.c.bf16 %v2300_v7, %v2299_v3  ;;  %v1365_v11 = vpop.f32.mrb[72].mxu1  ;;  %v2121_v12 = vadd.f32 %v3755_v46, %v1104_v10  ;;  %v1106_v14 = vpop.f32.mrb[73].mxu0 }
 0x1b4   : > { %v2123_v13 = vadd.f32 %v3757_v47, %v1365_v11  ;;  %v1367_v15 = vpop.f32.mrb[73].mxu1  ;;  %2951 = vst [vmem:[%s3775_s30 + $0x230] sm:$0xff] %v3317_v8  ;;  %v2122_v16 = vadd.f32 %v3759_v48, %v1106_v14  ;;  %v1108_v18 = vpop.f32.mrb[74].mxu0 }
 0x1b5   : > { %2952 = vst [vmem:[%s3775_s30 + $0x238] sm:$0xff] %v3318_v9  ;;  %v2124_v17 = vadd.f32 %v3761_v49, %v1367_v15  ;;  %v1369_v19 = vpop.f32.mrb[74].mxu1  ;;  %v2301_v20 = vmax.f32 %v2121_v12, 0.0  ;;  %v2125_v22 = vadd.f32 %v3755_v46, %v1108_v18  ;;  %v1110_v24 = vpop.f32.mrb[75].mxu0 }
 0x1b6   : > { %v2303_v21 = vmax.f32 %v2123_v13, 0.0  ;;  %v2127_v23 = vadd.f32 %v3757_v47, %v1369_v19  ;;  %v1371_v25 = vpop.f32.mrb[75].mxu1  ;;  %v2302_v26 = vmax.f32 %v2122_v16, 0.0  ;;  %v2126_v28 = vadd.f32 %v3759_v48, %v1110_v24 }
 0x1b7   : > { %v2304_v27 = vmax.f32 %v2124_v17, 0.0  ;;  %v2128_v29 = vadd.f32 %v3761_v49, %v1371_v25  ;;  %v2305_v30 = vmax.f32 %v2125_v22, 0.0 }
 0x1b8   : > { %v2307_v31 = vmax.f32 %v2127_v23, 0.0  ;;  %v3319_v32 = vpack.c.bf16 %v2302_v26, %v2301_v20  ;;  %v2306_v34 = vmax.f32 %v2126_v28, 0.0 }
 0x1b9   : > { %v3320_v33 = vpack.c.bf16 %v2304_v27, %v2303_v21  ;;  %v2308_v35 = vmax.f32 %v2128_v29, 0.0 }
 0x1ba   : > { %2953 = vst [vmem:[%s3775_s30 + $0x240] sm:$0xff] %v3319_v32  ;;  %v3321_v36 = vpack.c.bf16 %v2306_v34, %v2305_v30  ;;  %v1114_v38 = vpop.f32.mrb[76].mxu0 }
 0x1bb   : > { %2954 = vst [vmem:[%s3775_s30 + $0x248] sm:$0xff] %v3320_v33  ;;  %v3322_v37 = vpack.c.bf16 %v2308_v35, %v2307_v31  ;;  %v1375_v39 = vpop.f32.mrb[76].mxu1  ;;  %v2129_v40 = vadd.f32 %v3755_v46, %v1114_v38  ;;  %v1116_v42 = vpop.f32.mrb[77].mxu0 }
 0x1bc   : > { %v2131_v41 = vadd.f32 %v3757_v47, %v1375_v39  ;;  %v1377_v43 = vpop.f32.mrb[77].mxu1  ;;  %2955 = vst [vmem:[%s3775_s30 + $0x250] sm:$0xff] %v3321_v36  ;;  %v2130_v44 = vadd.f32 %v3759_v48, %v1116_v42  ;;  %v1118_v50 = vpop.f32.mrb[78].mxu0 }
 0x1bd   : > { %2956 = vst [vmem:[%s3775_s30 + $0x258] sm:$0xff] %v3322_v37  ;;  %v2132_v45 = vadd.f32 %v3761_v49, %v1377_v43  ;;  %v1379_v51 = vpop.f32.mrb[78].mxu1  ;;  %v2309_v52 = vmax.f32 %v2129_v40, 0.0  ;;  %v2133_v54 = vadd.f32 %v3755_v46, %v1118_v50  ;;  %v1120_v56 = vpop.f32.mrb[79].mxu0 }
 0x1be   : > { %v2311_v53 = vmax.f32 %v2131_v41, 0.0  ;;  %v2135_v55 = vadd.f32 %v3757_v47, %v1379_v51  ;;  %v1381_v57 = vpop.f32.mrb[79].mxu1  ;;  %v2310_v58 = vmax.f32 %v2130_v44, 0.0  ;;  %v2134_v60 = vadd.f32 %v3759_v48, %v1120_v56 }
 0x1bf   : > { %v2312_v59 = vmax.f32 %v2132_v45, 0.0  ;;  %v2136_v61 = vadd.f32 %v3761_v49, %v1381_v57  ;;  %v2313_v62 = vmax.f32 %v2133_v54, 0.0 }
 0x1c0   : > { %v2315_v63 = vmax.f32 %v2135_v55, 0.0  ;;  %v3323_v0 = vpack.c.bf16 %v2310_v58, %v2309_v52  ;;  %v2314_v2 = vmax.f32 %v2134_v60, 0.0 }
 0x1c1   : > { %v3324_v1 = vpack.c.bf16 %v2312_v59, %v2311_v53  ;;  %v2316_v3 = vmax.f32 %v2136_v61, 0.0 }
 0x1c2   : > { %2957 = vst [vmem:[%s3775_s30 + $0x260] sm:$0xff] %v3323_v0  ;;  %v3325_v4 = vpack.c.bf16 %v2314_v2, %v2313_v62  ;;  %v1124_v6 = vpop.f32.mrb[80].mxu0 }
 0x1c3   : > { %2958 = vst [vmem:[%s3775_s30 + $0x268] sm:$0xff] %v3324_v1  ;;  %v3326_v5 = vpack.c.bf16 %v2316_v3, %v2315_v63  ;;  %v1385_v7 = vpop.f32.mrb[80].mxu1  ;;  %v2137_v8 = vadd.f32 %v3755_v46, %v1124_v6  ;;  %v1126_v10 = vpop.f32.mrb[81].mxu0 }
 0x1c4   : > { %v2139_v9 = vadd.f32 %v3757_v47, %v1385_v7  ;;  %v1387_v11 = vpop.f32.mrb[81].mxu1  ;;  %2959 = vst [vmem:[%s3775_s30 + $0x270] sm:$0xff] %v3325_v4  ;;  %v2138_v12 = vadd.f32 %v3759_v48, %v1126_v10  ;;  %v1128_v14 = vpop.f32.mrb[82].mxu0 }
 0x1c5   : > { %2960 = vst [vmem:[%s3775_s30 + $0x278] sm:$0xff] %v3326_v5  ;;  %v2140_v13 = vadd.f32 %v3761_v49, %v1387_v11  ;;  %v1389_v15 = vpop.f32.mrb[82].mxu1  ;;  %v2317_v16 = vmax.f32 %v2137_v8, 0.0  ;;  %v2141_v18 = vadd.f32 %v3755_v46, %v1128_v14  ;;  %v1130_v20 = vpop.f32.mrb[83].mxu0 }
 0x1c6   : > { %v2319_v17 = vmax.f32 %v2139_v9, 0.0  ;;  %v2143_v19 = vadd.f32 %v3757_v47, %v1389_v15  ;;  %v1391_v21 = vpop.f32.mrb[83].mxu1  ;;  %v2318_v22 = vmax.f32 %v2138_v12, 0.0  ;;  %v2142_v24 = vadd.f32 %v3759_v48, %v1130_v20 }
 0x1c7   : > { %v2320_v23 = vmax.f32 %v2140_v13, 0.0  ;;  %v2144_v25 = vadd.f32 %v3761_v49, %v1391_v21  ;;  %v2321_v26 = vmax.f32 %v2141_v18, 0.0 }
 0x1c8   : > { %v2323_v27 = vmax.f32 %v2143_v19, 0.0  ;;  %v3327_v28 = vpack.c.bf16 %v2318_v22, %v2317_v16  ;;  %v2322_v30 = vmax.f32 %v2142_v24, 0.0 }
 0x1c9   : > { %v3328_v29 = vpack.c.bf16 %v2320_v23, %v2319_v17  ;;  %v2324_v31 = vmax.f32 %v2144_v25, 0.0 }
 0x1ca   : > { %2961 = vst [vmem:[%s3775_s30 + $0x280] sm:$0xff] %v3327_v28  ;;  %v3329_v32 = vpack.c.bf16 %v2322_v30, %v2321_v26  ;;  %v1134_v34 = vpop.f32.mrb[84].mxu0 }
 0x1cb   : > { %2962 = vst [vmem:[%s3775_s30 + $0x288] sm:$0xff] %v3328_v29  ;;  %v3330_v33 = vpack.c.bf16 %v2324_v31, %v2323_v27  ;;  %v1395_v35 = vpop.f32.mrb[84].mxu1  ;;  %v2145_v36 = vadd.f32 %v3755_v46, %v1134_v34  ;;  %v1136_v38 = vpop.f32.mrb[85].mxu0 }
 0x1cc   : > { %v2147_v37 = vadd.f32 %v3757_v47, %v1395_v35  ;;  %v1397_v39 = vpop.f32.mrb[85].mxu1  ;;  %2963 = vst [vmem:[%s3775_s30 + $0x290] sm:$0xff] %v3329_v32  ;;  %v2146_v40 = vadd.f32 %v3759_v48, %v1136_v38  ;;  %v1138_v42 = vpop.f32.mrb[86].mxu0 }
 0x1cd   : > { %2964 = vst [vmem:[%s3775_s30 + $0x298] sm:$0xff] %v3330_v33  ;;  %v2148_v41 = vadd.f32 %v3761_v49, %v1397_v39  ;;  %v1399_v43 = vpop.f32.mrb[86].mxu1  ;;  %v2325_v44 = vmax.f32 %v2145_v36, 0.0  ;;  %v2149_v50 = vadd.f32 %v3755_v46, %v1138_v42  ;;  %v1140_v52 = vpop.f32.mrb[87].mxu0 }
 0x1ce   : > { %v2327_v45 = vmax.f32 %v2147_v37, 0.0  ;;  %v2151_v51 = vadd.f32 %v3757_v47, %v1399_v43  ;;  %v1401_v53 = vpop.f32.mrb[87].mxu1  ;;  %v2326_v54 = vmax.f32 %v2146_v40, 0.0  ;;  %v2150_v56 = vadd.f32 %v3759_v48, %v1140_v52 }
 0x1cf   : > { %v2328_v55 = vmax.f32 %v2148_v41, 0.0  ;;  %v2152_v57 = vadd.f32 %v3761_v49, %v1401_v53  ;;  %v2329_v58 = vmax.f32 %v2149_v50, 0.0 }
 0x1d0   : > { %v2331_v59 = vmax.f32 %v2151_v51, 0.0  ;;  %v3331_v60 = vpack.c.bf16 %v2326_v54, %v2325_v44  ;;  %v2330_v62 = vmax.f32 %v2150_v56, 0.0 }
 0x1d1   : > { %v3332_v61 = vpack.c.bf16 %v2328_v55, %v2327_v45  ;;  %v2332_v63 = vmax.f32 %v2152_v57, 0.0 }
 0x1d2   : > { %2965 = vst [vmem:[%s3775_s30 + $0x2a0] sm:$0xff] %v3331_v60  ;;  %v3333_v0 = vpack.c.bf16 %v2330_v62, %v2329_v58  ;;  %v1144_v2 = vpop.f32.mrb[88].mxu0 }
 0x1d3   : > { %2966 = vst [vmem:[%s3775_s30 + $0x2a8] sm:$0xff] %v3332_v61  ;;  %v3334_v1 = vpack.c.bf16 %v2332_v63, %v2331_v59  ;;  %v1405_v3 = vpop.f32.mrb[88].mxu1  ;;  %v2153_v4 = vadd.f32 %v3755_v46, %v1144_v2  ;;  %v1146_v6 = vpop.f32.mrb[89].mxu0 }
 0x1d4   : > { %v2155_v5 = vadd.f32 %v3757_v47, %v1405_v3  ;;  %v1407_v7 = vpop.f32.mrb[89].mxu1  ;;  %2967 = vst [vmem:[%s3775_s30 + $0x2b0] sm:$0xff] %v3333_v0  ;;  %v2154_v8 = vadd.f32 %v3759_v48, %v1146_v6  ;;  %v1148_v10 = vpop.f32.mrb[90].mxu0 }
 0x1d5   : > { %2968 = vst [vmem:[%s3775_s30 + $0x2b8] sm:$0xff] %v3334_v1  ;;  %v2156_v9 = vadd.f32 %v3761_v49, %v1407_v7  ;;  %v1409_v11 = vpop.f32.mrb[90].mxu1  ;;  %v2333_v12 = vmax.f32 %v2153_v4, 0.0  ;;  %v1149_v14 = vpop.f32.mrb[91].mxu0 }
 0x1d6   : > { %v2335_v13 = vmax.f32 %v2155_v5, 0.0  ;;  %v1410_v15 = vpop.f32.mrb[91].mxu1  ;;  %v2334_v16 = vmax.f32 %v2154_v8, 0.0 }
 0x1d7   : > { %v2336_v46 = vmax.f32 %v2156_v9, 0.0 }
 0x1d8   : > { %v3335_v17 = vpack.c.bf16 %v2334_v16, %v2333_v12 }
 0x1d9   : > { %v3336_v47 = vpack.c.bf16 %v2336_v46, %v2335_v13 }
 0x1da   : > { %2969 = vst [vmem:[%s3775_s30 + $0x2c0] sm:$0xff] %v3335_v17 }
 0x1db   : > { %2970 = vst [vmem:[%s3775_s30 + $0x2c8] sm:$0xff] %v3336_v47 }
 0x1dc PF: > { %s15_s14 = sadd.s32 1, %s3507_s14   ;;  %s4060_s12 = smov %s3503_s13 }
 0x1dd   : > { %p12_p8 = scmp.ge.s32.totalorder %s15_s14, 7   ;;  %s4061_s13 = smov %s4063_s16 }
 0x1df   :  { %14 = sbr.rel (!%p12_p8) target bundleno = 3 (0x3), region = 80 }
 0x1e6   :  { %2995 = vsyncpa [#allocation4], 1 }
 0x1e7   :  { %2997 = vsyncpa [#allocation4 + $0x1], 1 }
 0x1e8   :  { %2998 = vsyncpa [#allocation6], 1 }

// kernel: net_forward.8
= control target key start
LH: loop header
LB: loop body
LE: loop exit
PB: predicated region body
PF: predicated region fallthrough
CT: control target
= control target key end

     0   :  { %vm850_vm0 = vcmask 1043456   ;;  %vm851_vm1 = vsmask.f32 3328  ;;  %vm853_vm2 = vcmask 1047556   ;;  %vm854_vm3 = vsmask.f32 7424  ;;  %s3215_s0 = inlined_call_operand.vmem [shape: bf16[30,2,15,1024], index: 0, kind: input, shape index: {}]   ;;  %s3216_s1 = inlined_call_operand.vmem [shape: bf16[30,15,512], index: 1, kind: output, shape index: {}]  }
   0x1   :  { %v8_v0 = vld [vmem:[%s3215_s0] sm:$0xff]  ;;  %v10_v1 = vld [vmem:[%s3215_s0 + $0x10] sm:$0xff]  ;;  %v9_v5 = vld [vmem:[%s3215_s0 + $0x8] sm:$0xff] }
   0x2   :  { %v16_v2 = vld [vmem:[%s3215_s0 + $0x40] sm:$0xff]  ;;  %v18_v3 = vld [vmem:[%s3215_s0 + $0x50] sm:$0xff]  ;;  %v11_v6 = vld [vmem:[%s3215_s0 + $0x18] sm:$0xff] }
   0x3   :  { %v488_v4 = vmax.bf16 %v16_v2, %v8_v0  ;;  %v490_v7 = vmax.bf16 %v18_v3, %v10_v1  ;;  %v17_v8 = vld [vmem:[%s3215_s0 + $0x48] sm:$0xff]  ;;  %v19_v9 = vld [vmem:[%s3215_s0 + $0x58] sm:$0xff]  ;;  %v12_v10 = vld [vmem:[%s3215_s0 + $0x20] sm:$0xff] }
   0x4   :  { %v489_v11 = vmax.bf16 %v17_v8, %v9_v5  ;;  %v491_v12 = vmax.bf16 %v19_v9, %v11_v6  ;;  %v14_v13 = vld [vmem:[%s3215_s0 + $0x30] sm:$0xff]  ;;  %v20_v14 = vld [vmem:[%s3215_s0 + $0x60] sm:$0xff]  ;;  %vm852_vm4 = vmand %vm850_vm0, %vm851_vm1 }
   0x5   :  { %v22_v15 = vld [vmem:[%s3215_s0 + $0x70] sm:$0xff]  ;;  %v728_v16 = vmax.bf16 %v490_v7, %v488_v4  ;;  %v492_v17 = vmax.bf16 %v20_v14, %v12_v10  ;;  %v13_v20 = vld [vmem:[%s3215_s0 + $0x28] sm:$0xff]  ;;  %vm855_vm5 = vmand %vm853_vm2, %vm854_vm3 }
   0x6   :  { %v494_v18 = vmax.bf16 %v22_v15, %v14_v13  ;;  %v857_v19 = vld [vmem:[%s3216_s1 + $0x10] sm:$0xff]  ;;  %v729_v21 = vmax.bf16 %v491_v12, %v489_v11  ;;  %v15_v22 = vld [vmem:[%s3215_s0 + $0x38] sm:$0xff]  ;;  %v21_v23 = vld [vmem:[%s3215_s0 + $0x68] sm:$0xff] }
   0x7   :  { %848 = vst [vmem:[%s3216_s1] sm:$0xff] %v728_v16  ;;  %vm1162_vm6 = vmor %vm855_vm5, %vm852_vm4  ;;  %v23_v26 = vld [vmem:[%s3215_s0 + $0x78] sm:$0xff]  ;;  %v493_v27 = vmax.bf16 %v21_v23, %v13_v20  ;;  %v24_v30 = vld [vmem:[%s3215_s0 + $0x80] sm:$0xff] }
   0x8   :  { %v730_v24 = vmax.bf16 %v494_v18, %v492_v17  ;;  %v860_v28 = vld [vmem:[%s3216_s1 + $0x18] sm:$0xff]  ;;  %849 = vst [vmem:[%s3216_s1 + $0x8] sm:$0xff] %v729_v21  ;;  %v495_v29 = vmax.bf16 %v23_v26, %v15_v22  ;;  %v26_v31 = vld [vmem:[%s3215_s0 + $0x90] sm:$0xff]  ;;  %v32_v32 = vld [vmem:[%s3215_s0 + $0xc0] sm:$0xff] }
   0x9   :  { %v34_v34 = vld [vmem:[%s3215_s0 + $0xd0] sm:$0xff]  ;;  %v496_v35 = vmax.bf16 %v32_v32, %v24_v30  ;;  %v25_v36 = vld [vmem:[%s3215_s0 + $0x88] sm:$0xff]  ;;  %v27_v37 = vld [vmem:[%s3215_s0 + $0x98] sm:$0xff] }
   0xa   :  { %v858_v33 = vsel %vm1162_vm6, %v730_v24, %v857_v19  ;;  %v731_v38 = vmax.bf16 %v495_v29, %v493_v27  ;;  %v498_v39 = vmax.bf16 %v34_v34, %v26_v31  ;;  %v33_v40 = vld [vmem:[%s3215_s0 + $0xc8] sm:$0xff]  ;;  %v35_v41 = vld [vmem:[%s3215_s0 + $0xd8] sm:$0xff]  ;;  %v28_v42 = vld [vmem:[%s3215_s0 + $0xa0] sm:$0xff] }
   0xb   :  { %859 = vst [vmem:[%s3216_s1 + $0x10] sm:$0xff] %v858_v33  ;;  %v497_v43 = vmax.bf16 %v33_v40, %v25_v36  ;;  %v499_v44 = vmax.bf16 %v35_v41, %v27_v37  ;;  %v30_v45 = vld [vmem:[%s3215_s0 + $0xb0] sm:$0xff]  ;;  %v36_v46 = vld [vmem:[%s3215_s0 + $0xe0] sm:$0xff]  ;;  %v29_v53 = vld [vmem:[%s3215_s0 + $0xa8] sm:$0xff] }
   0xc   :  { %v38_v47 = vld [vmem:[%s3215_s0 + $0xf0] sm:$0xff]  ;;  %v861_v48 = vsel %vm1162_vm6, %v731_v38, %v860_v28  ;;  %v732_v49 = vmax.bf16 %v498_v39, %v496_v35  ;;  %v500_v50 = vmax.bf16 %v36_v46, %v28_v42  ;;  %v31_v54 = vld [vmem:[%s3215_s0 + $0xb8] sm:$0xff]  ;;  %v37_v56 = vld [vmem:[%s3215_s0 + $0xe8] sm:$0xff] }
   0xd   :  { %v502_v51 = vmax.bf16 %v38_v47, %v30_v45  ;;  %v865_v52 = vld [vmem:[%s3216_s1 + $0x30] sm:$0xff]  ;;  %862 = vst [vmem:[%s3216_s1 + $0x18] sm:$0xff] %v861_v48  ;;  %v733_v55 = vmax.bf16 %v499_v44, %v497_v43  ;;  %v39_v57 = vld [vmem:[%s3215_s0 + $0xf8] sm:$0xff]  ;;  %v501_v60 = vmax.bf16 %v37_v56, %v29_v53  ;;  %v40_v62 = vld [vmem:[%s3215_s0 + $0x100] sm:$0xff] }
   0xe   :  { %v868_v58 = vld [vmem:[%s3216_s1 + $0x38] sm:$0xff]  ;;  %863 = vst [vmem:[%s3216_s1 + $0x20] sm:$0xff] %v732_v49  ;;  %v503_v61 = vmax.bf16 %v39_v57, %v31_v54  ;;  %v42_v63 = vld [vmem:[%s3215_s0 + $0x110] sm:$0xff]  ;;  %v48_v0 = vld [vmem:[%s3215_s0 + $0x140] sm:$0xff] }
   0xf   :  { %v734_v59 = vmax.bf16 %v502_v51, %v500_v50  ;;  %864 = vst [vmem:[%s3216_s1 + $0x28] sm:$0xff] %v733_v55  ;;  %v50_v1 = vld [vmem:[%s3215_s0 + $0x150] sm:$0xff]  ;;  %v504_v2 = vmax.bf16 %v48_v0, %v40_v62  ;;  %v41_v3 = vld [vmem:[%s3215_s0 + $0x108] sm:$0xff]  ;;  %v43_v4 = vld [vmem:[%s3215_s0 + $0x118] sm:$0xff] }
  0x10   :  { %v735_v6 = vmax.bf16 %v503_v61, %v501_v60  ;;  %v506_v7 = vmax.bf16 %v50_v1, %v42_v63  ;;  %v49_v8 = vld [vmem:[%s3215_s0 + $0x148] sm:$0xff]  ;;  %v51_v9 = vld [vmem:[%s3215_s0 + $0x158] sm:$0xff]  ;;  %v44_v10 = vld [vmem:[%s3215_s0 + $0x120] sm:$0xff] }
  0x11   :  { %v866_v5 = vsel %vm1162_vm6, %v734_v59, %v865_v52  ;;  %v505_v11 = vmax.bf16 %v49_v8, %v41_v3  ;;  %v507_v12 = vmax.bf16 %v51_v9, %v43_v4  ;;  %v46_v13 = vld [vmem:[%s3215_s0 + $0x130] sm:$0xff]  ;;  %v52_v14 = vld [vmem:[%s3215_s0 + $0x160] sm:$0xff]  ;;  %v45_v21 = vld [vmem:[%s3215_s0 + $0x128] sm:$0xff] }
  0x12   :  { %867 = vst [vmem:[%s3216_s1 + $0x30] sm:$0xff] %v866_v5  ;;  %v54_v15 = vld [vmem:[%s3215_s0 + $0x170] sm:$0xff]  ;;  %v869_v16 = vsel %vm1162_vm6, %v735_v6, %v868_v58  ;;  %v736_v17 = vmax.bf16 %v506_v7, %v504_v2  ;;  %v508_v18 = vmax.bf16 %v52_v14, %v44_v10  ;;  %v47_v22 = vld [vmem:[%s3215_s0 + $0x138] sm:$0xff]  ;;  %v53_v24 = vld [vmem:[%s3215_s0 + $0x168] sm:$0xff] }
  0x13   :  { %v510_v19 = vmax.bf16 %v54_v15, %v46_v13  ;;  %v873_v20 = vld [vmem:[%s3216_s1 + $0x50] sm:$0xff]  ;;  %870 = vst [vmem:[%s3216_s1 + $0x38] sm:$0xff] %v869_v16  ;;  %v737_v23 = vmax.bf16 %v507_v12, %v505_v11  ;;  %v55_v26 = vld [vmem:[%s3215_s0 + $0x178] sm:$0xff]  ;;  %v509_v29 = vmax.bf16 %v53_v24, %v45_v21  ;;  %v56_v31 = vld [vmem:[%s3215_s0 + $0x180] sm:$0xff] }
  0x14   :  { %v876_v27 = vld [vmem:[%s3216_s1 + $0x58] sm:$0xff]  ;;  %871 = vst [vmem:[%s3216_s1 + $0x40] sm:$0xff] %v736_v17  ;;  %v511_v30 = vmax.bf16 %v55_v26, %v47_v22  ;;  %v58_v32 = vld [vmem:[%s3215_s0 + $0x190] sm:$0xff]  ;;  %v64_v33 = vld [vmem:[%s3215_s0 + $0x1c0] sm:$0xff] }
  0x15   :  { %v738_v28 = vmax.bf16 %v510_v19, %v508_v18  ;;  %872 = vst [vmem:[%s3216_s1 + $0x48] sm:$0xff] %v737_v23  ;;  %v66_v34 = vld [vmem:[%s3215_s0 + $0x1d0] sm:$0xff]  ;;  %v512_v35 = vmax.bf16 %v64_v33, %v56_v31  ;;  %v57_v36 = vld [vmem:[%s3215_s0 + $0x188] sm:$0xff]  ;;  %v59_v37 = vld [vmem:[%s3215_s0 + $0x198] sm:$0xff] }
  0x16   :  { %v739_v39 = vmax.bf16 %v511_v30, %v509_v29  ;;  %v514_v40 = vmax.bf16 %v66_v34, %v58_v32  ;;  %v65_v41 = vld [vmem:[%s3215_s0 + $0x1c8] sm:$0xff]  ;;  %v67_v42 = vld [vmem:[%s3215_s0 + $0x1d8] sm:$0xff]  ;;  %v60_v43 = vld [vmem:[%s3215_s0 + $0x1a0] sm:$0xff] }
  0x17   :  { %v874_v38 = vsel %vm1162_vm6, %v738_v28, %v873_v20  ;;  %v513_v44 = vmax.bf16 %v65_v41, %v57_v36  ;;  %v515_v45 = vmax.bf16 %v67_v42, %v59_v37  ;;  %v62_v46 = vld [vmem:[%s3215_s0 + $0x1b0] sm:$0xff]  ;;  %v68_v47 = vld [vmem:[%s3215_s0 + $0x1e0] sm:$0xff]  ;;  %v61_v54 = vld [vmem:[%s3215_s0 + $0x1a8] sm:$0xff] }
  0x18   :  { %875 = vst [vmem:[%s3216_s1 + $0x50] sm:$0xff] %v874_v38  ;;  %v70_v48 = vld [vmem:[%s3215_s0 + $0x1f0] sm:$0xff]  ;;  %v877_v49 = vsel %vm1162_vm6, %v739_v39, %v876_v27  ;;  %v740_v50 = vmax.bf16 %v514_v40, %v512_v35  ;;  %v516_v51 = vmax.bf16 %v68_v47, %v60_v43  ;;  %v63_v55 = vld [vmem:[%s3215_s0 + $0x1b8] sm:$0xff]  ;;  %v69_v57 = vld [vmem:[%s3215_s0 + $0x1e8] sm:$0xff] }
  0x19   :  { %v518_v52 = vmax.bf16 %v70_v48, %v62_v46  ;;  %v881_v53 = vld [vmem:[%s3216_s1 + $0x70] sm:$0xff]  ;;  %878 = vst [vmem:[%s3216_s1 + $0x58] sm:$0xff] %v877_v49  ;;  %v741_v56 = vmax.bf16 %v515_v45, %v513_v44  ;;  %v71_v58 = vld [vmem:[%s3215_s0 + $0x1f8] sm:$0xff]  ;;  %v517_v61 = vmax.bf16 %v69_v57, %v61_v54  ;;  %v72_v63 = vld [vmem:[%s3215_s0 + $0x200] sm:$0xff] }
  0x1a   :  { %v884_v59 = vld [vmem:[%s3216_s1 + $0x78] sm:$0xff]  ;;  %879 = vst [vmem:[%s3216_s1 + $0x60] sm:$0xff] %v740_v50  ;;  %v519_v62 = vmax.bf16 %v71_v58, %v63_v55  ;;  %v74_v0 = vld [vmem:[%s3215_s0 + $0x210] sm:$0xff]  ;;  %v80_v1 = vld [vmem:[%s3215_s0 + $0x240] sm:$0xff] }
  0x1b   :  { %v742_v60 = vmax.bf16 %v518_v52, %v516_v51  ;;  %880 = vst [vmem:[%s3216_s1 + $0x68] sm:$0xff] %v741_v56  ;;  %v82_v2 = vld [vmem:[%s3215_s0 + $0x250] sm:$0xff]  ;;  %v520_v3 = vmax.bf16 %v80_v1, %v72_v63  ;;  %v73_v4 = vld [vmem:[%s3215_s0 + $0x208] sm:$0xff]  ;;  %v75_v5 = vld [vmem:[%s3215_s0 + $0x218] sm:$0xff] }
  0x1c   :  { %v743_v7 = vmax.bf16 %v519_v62, %v517_v61  ;;  %v522_v8 = vmax.bf16 %v82_v2, %v74_v0  ;;  %v81_v9 = vld [vmem:[%s3215_s0 + $0x248] sm:$0xff]  ;;  %v83_v10 = vld [vmem:[%s3215_s0 + $0x258] sm:$0xff]  ;;  %v76_v11 = vld [vmem:[%s3215_s0 + $0x220] sm:$0xff] }
  0x1d   :  { %v882_v6 = vsel %vm1162_vm6, %v742_v60, %v881_v53  ;;  %v521_v12 = vmax.bf16 %v81_v9, %v73_v4  ;;  %v523_v13 = vmax.bf16 %v83_v10, %v75_v5  ;;  %v78_v14 = vld [vmem:[%s3215_s0 + $0x230] sm:$0xff]  ;;  %v84_v15 = vld [vmem:[%s3215_s0 + $0x260] sm:$0xff]  ;;  %v77_v22 = vld [vmem:[%s3215_s0 + $0x228] sm:$0xff] }
  0x1e   :  { %883 = vst [vmem:[%s3216_s1 + $0x70] sm:$0xff] %v882_v6  ;;  %v86_v16 = vld [vmem:[%s3215_s0 + $0x270] sm:$0xff]  ;;  %v885_v17 = vsel %vm1162_vm6, %v743_v7, %v884_v59  ;;  %v744_v18 = vmax.bf16 %v522_v8, %v520_v3  ;;  %v524_v19 = vmax.bf16 %v84_v15, %v76_v11  ;;  %v79_v23 = vld [vmem:[%s3215_s0 + $0x238] sm:$0xff]  ;;  %v85_v26 = vld [vmem:[%s3215_s0 + $0x268] sm:$0xff] }
  0x1f   :  { %v526_v20 = vmax.bf16 %v86_v16, %v78_v14  ;;  %v889_v21 = vld [vmem:[%s3216_s1 + $0x90] sm:$0xff]  ;;  %886 = vst [vmem:[%s3216_s1 + $0x78] sm:$0xff] %v885_v17  ;;  %v745_v24 = vmax.bf16 %v523_v13, %v521_v12  ;;  %v87_v27 = vld [vmem:[%s3215_s0 + $0x278] sm:$0xff]  ;;  %v525_v30 = vmax.bf16 %v85_v26, %v77_v22  ;;  %v88_v32 = vld [vmem:[%s3215_s0 + $0x280] sm:$0xff] }
  0x20   :  { %v892_v28 = vld [vmem:[%s3216_s1 + $0x98] sm:$0xff]  ;;  %887 = vst [vmem:[%s3216_s1 + $0x80] sm:$0xff] %v744_v18  ;;  %v527_v31 = vmax.bf16 %v87_v27, %v79_v23  ;;  %v90_v33 = vld [vmem:[%s3215_s0 + $0x290] sm:$0xff]  ;;  %v96_v34 = vld [vmem:[%s3215_s0 + $0x2c0] sm:$0xff] }
  0x21   :  { %v746_v29 = vmax.bf16 %v526_v20, %v524_v19  ;;  %888 = vst [vmem:[%s3216_s1 + $0x88] sm:$0xff] %v745_v24  ;;  %v98_v35 = vld [vmem:[%s3215_s0 + $0x2d0] sm:$0xff]  ;;  %v528_v36 = vmax.bf16 %v96_v34, %v88_v32  ;;  %v89_v37 = vld [vmem:[%s3215_s0 + $0x288] sm:$0xff]  ;;  %v91_v38 = vld [vmem:[%s3215_s0 + $0x298] sm:$0xff] }
  0x22   :  { %v747_v40 = vmax.bf16 %v527_v31, %v525_v30  ;;  %v530_v41 = vmax.bf16 %v98_v35, %v90_v33  ;;  %v97_v42 = vld [vmem:[%s3215_s0 + $0x2c8] sm:$0xff]  ;;  %v99_v43 = vld [vmem:[%s3215_s0 + $0x2d8] sm:$0xff]  ;;  %v92_v44 = vld [vmem:[%s3215_s0 + $0x2a0] sm:$0xff] }
  0x23   :  { %v890_v39 = vsel %vm1162_vm6, %v746_v29, %v889_v21  ;;  %v529_v45 = vmax.bf16 %v97_v42, %v89_v37  ;;  %v531_v46 = vmax.bf16 %v99_v43, %v91_v38  ;;  %v94_v47 = vld [vmem:[%s3215_s0 + $0x2b0] sm:$0xff]  ;;  %v100_v48 = vld [vmem:[%s3215_s0 + $0x2e0] sm:$0xff]  ;;  %v93_v55 = vld [vmem:[%s3215_s0 + $0x2a8] sm:$0xff] }
  0x24   :  { %891 = vst [vmem:[%s3216_s1 + $0x90] sm:$0xff] %v890_v39  ;;  %v102_v49 = vld [vmem:[%s3215_s0 + $0x2f0] sm:$0xff]  ;;  %v893_v50 = vsel %vm1162_vm6, %v747_v40, %v892_v28  ;;  %v748_v51 = vmax.bf16 %v530_v41, %v528_v36  ;;  %v532_v52 = vmax.bf16 %v100_v48, %v92_v44  ;;  %v95_v56 = vld [vmem:[%s3215_s0 + $0x2b8] sm:$0xff]  ;;  %v101_v58 = vld [vmem:[%s3215_s0 + $0x2e8] sm:$0xff] }
  0x25   :  { %v534_v53 = vmax.bf16 %v102_v49, %v94_v47  ;;  %v897_v54 = vld [vmem:[%s3216_s1 + $0xb0] sm:$0xff]  ;;  %894 = vst [vmem:[%s3216_s1 + $0x98] sm:$0xff] %v893_v50  ;;  %v749_v57 = vmax.bf16 %v531_v46, %v529_v45  ;;  %v103_v59 = vld [vmem:[%s3215_s0 + $0x2f8] sm:$0xff]  ;;  %v533_v62 = vmax.bf16 %v101_v58, %v93_v55  ;;  %v104_v0 = vld [vmem:[%s3215_s0 + $0x300] sm:$0xff] }
  0x26   :  { %v900_v60 = vld [vmem:[%s3216_s1 + $0xb8] sm:$0xff]  ;;  %895 = vst [vmem:[%s3216_s1 + $0xa0] sm:$0xff] %v748_v51  ;;  %v535_v63 = vmax.bf16 %v103_v59, %v95_v56  ;;  %v106_v1 = vld [vmem:[%s3215_s0 + $0x310] sm:$0xff]  ;;  %v112_v2 = vld [vmem:[%s3215_s0 + $0x340] sm:$0xff] }
  0x27   :  { %v750_v61 = vmax.bf16 %v534_v53, %v532_v52  ;;  %896 = vst [vmem:[%s3216_s1 + $0xa8] sm:$0xff] %v749_v57  ;;  %v114_v3 = vld [vmem:[%s3215_s0 + $0x350] sm:$0xff]  ;;  %v536_v4 = vmax.bf16 %v112_v2, %v104_v0  ;;  %v105_v5 = vld [vmem:[%s3215_s0 + $0x308] sm:$0xff]  ;;  %v107_v6 = vld [vmem:[%s3215_s0 + $0x318] sm:$0xff] }
  0x28   :  { %v751_v8 = vmax.bf16 %v535_v63, %v533_v62  ;;  %v538_v9 = vmax.bf16 %v114_v3, %v106_v1  ;;  %v113_v10 = vld [vmem:[%s3215_s0 + $0x348] sm:$0xff]  ;;  %v115_v11 = vld [vmem:[%s3215_s0 + $0x358] sm:$0xff]  ;;  %v108_v12 = vld [vmem:[%s3215_s0 + $0x320] sm:$0xff] }
  0x29   :  { %v898_v7 = vsel %vm1162_vm6, %v750_v61, %v897_v54  ;;  %v537_v13 = vmax.bf16 %v113_v10, %v105_v5  ;;  %v539_v14 = vmax.bf16 %v115_v11, %v107_v6  ;;  %v110_v15 = vld [vmem:[%s3215_s0 + $0x330] sm:$0xff]  ;;  %v116_v16 = vld [vmem:[%s3215_s0 + $0x360] sm:$0xff]  ;;  %v109_v23 = vld [vmem:[%s3215_s0 + $0x328] sm:$0xff] }
  0x2a   :  { %899 = vst [vmem:[%s3216_s1 + $0xb0] sm:$0xff] %v898_v7  ;;  %v118_v17 = vld [vmem:[%s3215_s0 + $0x370] sm:$0xff]  ;;  %v901_v18 = vsel %vm1162_vm6, %v751_v8, %v900_v60  ;;  %v752_v19 = vmax.bf16 %v538_v9, %v536_v4  ;;  %v540_v20 = vmax.bf16 %v116_v16, %v108_v12  ;;  %v111_v24 = vld [vmem:[%s3215_s0 + $0x338] sm:$0xff]  ;;  %v117_v27 = vld [vmem:[%s3215_s0 + $0x368] sm:$0xff] }
  0x2b   :  { %v542_v21 = vmax.bf16 %v118_v17, %v110_v15  ;;  %v905_v22 = vld [vmem:[%s3216_s1 + $0xd0] sm:$0xff]  ;;  %902 = vst [vmem:[%s3216_s1 + $0xb8] sm:$0xff] %v901_v18  ;;  %v753_v26 = vmax.bf16 %v539_v14, %v537_v13  ;;  %v119_v28 = vld [vmem:[%s3215_s0 + $0x378] sm:$0xff]  ;;  %v541_v31 = vmax.bf16 %v117_v27, %v109_v23  ;;  %v120_v33 = vld [vmem:[%s3215_s0 + $0x380] sm:$0xff] }
  0x2c   :  { %v908_v29 = vld [vmem:[%s3216_s1 + $0xd8] sm:$0xff]  ;;  %903 = vst [vmem:[%s3216_s1 + $0xc0] sm:$0xff] %v752_v19  ;;  %v543_v32 = vmax.bf16 %v119_v28, %v111_v24  ;;  %v122_v34 = vld [vmem:[%s3215_s0 + $0x390] sm:$0xff]  ;;  %v128_v35 = vld [vmem:[%s3215_s0 + $0x3c0] sm:$0xff] }
  0x2d   :  { %v754_v30 = vmax.bf16 %v542_v21, %v540_v20  ;;  %904 = vst [vmem:[%s3216_s1 + $0xc8] sm:$0xff] %v753_v26  ;;  %v130_v36 = vld [vmem:[%s3215_s0 + $0x3d0] sm:$0xff]  ;;  %v544_v37 = vmax.bf16 %v128_v35, %v120_v33  ;;  %v121_v38 = vld [vmem:[%s3215_s0 + $0x388] sm:$0xff]  ;;  %v123_v39 = vld [vmem:[%s3215_s0 + $0x398] sm:$0xff] }
  0x2e   :  { %v755_v41 = vmax.bf16 %v543_v32, %v541_v31  ;;  %v546_v42 = vmax.bf16 %v130_v36, %v122_v34  ;;  %v129_v43 = vld [vmem:[%s3215_s0 + $0x3c8] sm:$0xff]  ;;  %v131_v44 = vld [vmem:[%s3215_s0 + $0x3d8] sm:$0xff]  ;;  %v124_v45 = vld [vmem:[%s3215_s0 + $0x3a0] sm:$0xff] }
  0x2f   :  { %v906_v40 = vsel %vm1162_vm6, %v754_v30, %v905_v22  ;;  %v545_v46 = vmax.bf16 %v129_v43, %v121_v38  ;;  %v547_v47 = vmax.bf16 %v131_v44, %v123_v39  ;;  %v126_v48 = vld [vmem:[%s3215_s0 + $0x3b0] sm:$0xff]  ;;  %v132_v49 = vld [vmem:[%s3215_s0 + $0x3e0] sm:$0xff]  ;;  %v125_v56 = vld [vmem:[%s3215_s0 + $0x3a8] sm:$0xff] }
  0x30   :  { %907 = vst [vmem:[%s3216_s1 + $0xd0] sm:$0xff] %v906_v40  ;;  %v134_v50 = vld [vmem:[%s3215_s0 + $0x3f0] sm:$0xff]  ;;  %v909_v51 = vsel %vm1162_vm6, %v755_v41, %v908_v29  ;;  %v756_v52 = vmax.bf16 %v546_v42, %v544_v37  ;;  %v548_v53 = vmax.bf16 %v132_v49, %v124_v45  ;;  %v127_v57 = vld [vmem:[%s3215_s0 + $0x3b8] sm:$0xff]  ;;  %v133_v59 = vld [vmem:[%s3215_s0 + $0x3e8] sm:$0xff] }
  0x31   :  { %v550_v54 = vmax.bf16 %v134_v50, %v126_v48  ;;  %v913_v55 = vld [vmem:[%s3216_s1 + $0xf0] sm:$0xff]  ;;  %910 = vst [vmem:[%s3216_s1 + $0xd8] sm:$0xff] %v909_v51  ;;  %v757_v58 = vmax.bf16 %v547_v47, %v545_v46  ;;  %v135_v60 = vld [vmem:[%s3215_s0 + $0x3f8] sm:$0xff]  ;;  %v549_v63 = vmax.bf16 %v133_v59, %v125_v56  ;;  %v136_v1 = vld [vmem:[%s3215_s0 + $0x400] sm:$0xff] }
  0x32   :  { %v916_v61 = vld [vmem:[%s3216_s1 + $0xf8] sm:$0xff]  ;;  %911 = vst [vmem:[%s3216_s1 + $0xe0] sm:$0xff] %v756_v52  ;;  %v551_v0 = vmax.bf16 %v135_v60, %v127_v57  ;;  %v138_v2 = vld [vmem:[%s3215_s0 + $0x410] sm:$0xff]  ;;  %v144_v3 = vld [vmem:[%s3215_s0 + $0x440] sm:$0xff] }
  0x33   :  { %v758_v62 = vmax.bf16 %v550_v54, %v548_v53  ;;  %912 = vst [vmem:[%s3216_s1 + $0xe8] sm:$0xff] %v757_v58  ;;  %v146_v4 = vld [vmem:[%s3215_s0 + $0x450] sm:$0xff]  ;;  %v552_v5 = vmax.bf16 %v144_v3, %v136_v1  ;;  %v137_v6 = vld [vmem:[%s3215_s0 + $0x408] sm:$0xff]  ;;  %v139_v7 = vld [vmem:[%s3215_s0 + $0x418] sm:$0xff] }
  0x34   :  { %v759_v9 = vmax.bf16 %v551_v0, %v549_v63  ;;  %v554_v10 = vmax.bf16 %v146_v4, %v138_v2  ;;  %v145_v11 = vld [vmem:[%s3215_s0 + $0x448] sm:$0xff]  ;;  %v147_v12 = vld [vmem:[%s3215_s0 + $0x458] sm:$0xff]  ;;  %v140_v13 = vld [vmem:[%s3215_s0 + $0x420] sm:$0xff] }
  0x35   :  { %v914_v8 = vsel %vm1162_vm6, %v758_v62, %v913_v55  ;;  %v553_v14 = vmax.bf16 %v145_v11, %v137_v6  ;;  %v555_v15 = vmax.bf16 %v147_v12, %v139_v7  ;;  %v142_v16 = vld [vmem:[%s3215_s0 + $0x430] sm:$0xff]  ;;  %v148_v17 = vld [vmem:[%s3215_s0 + $0x460] sm:$0xff]  ;;  %v141_v24 = vld [vmem:[%s3215_s0 + $0x428] sm:$0xff] }
  0x36   :  { %915 = vst [vmem:[%s3216_s1 + $0xf0] sm:$0xff] %v914_v8  ;;  %v150_v18 = vld [vmem:[%s3215_s0 + $0x470] sm:$0xff]  ;;  %v917_v19 = vsel %vm1162_vm6, %v759_v9, %v916_v61  ;;  %v760_v20 = vmax.bf16 %v554_v10, %v552_v5  ;;  %v556_v21 = vmax.bf16 %v148_v17, %v140_v13  ;;  %v143_v26 = vld [vmem:[%s3215_s0 + $0x438] sm:$0xff]  ;;  %v149_v28 = vld [vmem:[%s3215_s0 + $0x468] sm:$0xff] }
  0x37   :  { %v558_v22 = vmax.bf16 %v150_v18, %v142_v16  ;;  %v921_v23 = vld [vmem:[%s3216_s1 + $0x110] sm:$0xff]  ;;  %918 = vst [vmem:[%s3216_s1 + $0xf8] sm:$0xff] %v917_v19  ;;  %v761_v27 = vmax.bf16 %v555_v15, %v553_v14  ;;  %v151_v29 = vld [vmem:[%s3215_s0 + $0x478] sm:$0xff]  ;;  %v557_v32 = vmax.bf16 %v149_v28, %v141_v24  ;;  %v152_v34 = vld [vmem:[%s3215_s0 + $0x480] sm:$0xff] }
  0x38   :  { %v924_v30 = vld [vmem:[%s3216_s1 + $0x118] sm:$0xff]  ;;  %919 = vst [vmem:[%s3216_s1 + $0x100] sm:$0xff] %v760_v20  ;;  %v559_v33 = vmax.bf16 %v151_v29, %v143_v26  ;;  %v154_v35 = vld [vmem:[%s3215_s0 + $0x490] sm:$0xff]  ;;  %v160_v36 = vld [vmem:[%s3215_s0 + $0x4c0] sm:$0xff] }
  0x39   :  { %v762_v31 = vmax.bf16 %v558_v22, %v556_v21  ;;  %920 = vst [vmem:[%s3216_s1 + $0x108] sm:$0xff] %v761_v27  ;;  %v162_v37 = vld [vmem:[%s3215_s0 + $0x4d0] sm:$0xff]  ;;  %v560_v38 = vmax.bf16 %v160_v36, %v152_v34  ;;  %v153_v39 = vld [vmem:[%s3215_s0 + $0x488] sm:$0xff]  ;;  %v155_v40 = vld [vmem:[%s3215_s0 + $0x498] sm:$0xff] }
  0x3a   :  { %v763_v42 = vmax.bf16 %v559_v33, %v557_v32  ;;  %v562_v43 = vmax.bf16 %v162_v37, %v154_v35  ;;  %v161_v44 = vld [vmem:[%s3215_s0 + $0x4c8] sm:$0xff]  ;;  %v163_v45 = vld [vmem:[%s3215_s0 + $0x4d8] sm:$0xff]  ;;  %v156_v46 = vld [vmem:[%s3215_s0 + $0x4a0] sm:$0xff] }
  0x3b   :  { %v922_v41 = vsel %vm1162_vm6, %v762_v31, %v921_v23  ;;  %v561_v47 = vmax.bf16 %v161_v44, %v153_v39  ;;  %v563_v48 = vmax.bf16 %v163_v45, %v155_v40  ;;  %v158_v49 = vld [vmem:[%s3215_s0 + $0x4b0] sm:$0xff]  ;;  %v164_v50 = vld [vmem:[%s3215_s0 + $0x4e0] sm:$0xff]  ;;  %v157_v57 = vld [vmem:[%s3215_s0 + $0x4a8] sm:$0xff] }
  0x3c   :  { %923 = vst [vmem:[%s3216_s1 + $0x110] sm:$0xff] %v922_v41  ;;  %v166_v51 = vld [vmem:[%s3215_s0 + $0x4f0] sm:$0xff]  ;;  %v925_v52 = vsel %vm1162_vm6, %v763_v42, %v924_v30  ;;  %v764_v53 = vmax.bf16 %v562_v43, %v560_v38  ;;  %v564_v54 = vmax.bf16 %v164_v50, %v156_v46  ;;  %v159_v58 = vld [vmem:[%s3215_s0 + $0x4b8] sm:$0xff]  ;;  %v165_v60 = vld [vmem:[%s3215_s0 + $0x4e8] sm:$0xff] }
  0x3d   :  { %v566_v55 = vmax.bf16 %v166_v51, %v158_v49  ;;  %v929_v56 = vld [vmem:[%s3216_s1 + $0x130] sm:$0xff]  ;;  %926 = vst [vmem:[%s3216_s1 + $0x118] sm:$0xff] %v925_v52  ;;  %v765_v59 = vmax.bf16 %v563_v48, %v561_v47  ;;  %v167_v61 = vld [vmem:[%s3215_s0 + $0x4f8] sm:$0xff]  ;;  %v565_v0 = vmax.bf16 %v165_v60, %v157_v57  ;;  %v168_v2 = vld [vmem:[%s3215_s0 + $0x500] sm:$0xff] }
  0x3e   :  { %v932_v62 = vld [vmem:[%s3216_s1 + $0x138] sm:$0xff]  ;;  %927 = vst [vmem:[%s3216_s1 + $0x120] sm:$0xff] %v764_v53  ;;  %v567_v1 = vmax.bf16 %v167_v61, %v159_v58  ;;  %v170_v3 = vld [vmem:[%s3215_s0 + $0x510] sm:$0xff]  ;;  %v176_v4 = vld [vmem:[%s3215_s0 + $0x540] sm:$0xff] }
  0x3f   :  { %v766_v63 = vmax.bf16 %v566_v55, %v564_v54  ;;  %928 = vst [vmem:[%s3216_s1 + $0x128] sm:$0xff] %v765_v59  ;;  %v178_v5 = vld [vmem:[%s3215_s0 + $0x550] sm:$0xff]  ;;  %v568_v6 = vmax.bf16 %v176_v4, %v168_v2  ;;  %v169_v7 = vld [vmem:[%s3215_s0 + $0x508] sm:$0xff]  ;;  %v171_v8 = vld [vmem:[%s3215_s0 + $0x518] sm:$0xff] }
  0x40   :  { %v767_v10 = vmax.bf16 %v567_v1, %v565_v0  ;;  %v570_v11 = vmax.bf16 %v178_v5, %v170_v3  ;;  %v177_v12 = vld [vmem:[%s3215_s0 + $0x548] sm:$0xff]  ;;  %v179_v13 = vld [vmem:[%s3215_s0 + $0x558] sm:$0xff]  ;;  %v172_v14 = vld [vmem:[%s3215_s0 + $0x520] sm:$0xff] }
  0x41   :  { %v930_v9 = vsel %vm1162_vm6, %v766_v63, %v929_v56  ;;  %v569_v15 = vmax.bf16 %v177_v12, %v169_v7  ;;  %v571_v16 = vmax.bf16 %v179_v13, %v171_v8  ;;  %v174_v17 = vld [vmem:[%s3215_s0 + $0x530] sm:$0xff]  ;;  %v180_v18 = vld [vmem:[%s3215_s0 + $0x560] sm:$0xff]  ;;  %v173_v26 = vld [vmem:[%s3215_s0 + $0x528] sm:$0xff] }
  0x42   :  { %931 = vst [vmem:[%s3216_s1 + $0x130] sm:$0xff] %v930_v9  ;;  %v182_v19 = vld [vmem:[%s3215_s0 + $0x570] sm:$0xff]  ;;  %v933_v20 = vsel %vm1162_vm6, %v767_v10, %v932_v62  ;;  %v768_v21 = vmax.bf16 %v570_v11, %v568_v6  ;;  %v572_v22 = vmax.bf16 %v180_v18, %v172_v14  ;;  %v175_v27 = vld [vmem:[%s3215_s0 + $0x538] sm:$0xff]  ;;  %v181_v29 = vld [vmem:[%s3215_s0 + $0x568] sm:$0xff] }
  0x43   :  { %v574_v23 = vmax.bf16 %v182_v19, %v174_v17  ;;  %v937_v24 = vld [vmem:[%s3216_s1 + $0x150] sm:$0xff]  ;;  %934 = vst [vmem:[%s3216_s1 + $0x138] sm:$0xff] %v933_v20  ;;  %v769_v28 = vmax.bf16 %v571_v16, %v569_v15  ;;  %v183_v30 = vld [vmem:[%s3215_s0 + $0x578] sm:$0xff]  ;;  %v573_v33 = vmax.bf16 %v181_v29, %v173_v26  ;;  %v184_v35 = vld [vmem:[%s3215_s0 + $0x580] sm:$0xff] }
  0x44   :  { %v940_v31 = vld [vmem:[%s3216_s1 + $0x158] sm:$0xff]  ;;  %935 = vst [vmem:[%s3216_s1 + $0x140] sm:$0xff] %v768_v21  ;;  %v575_v34 = vmax.bf16 %v183_v30, %v175_v27  ;;  %v186_v36 = vld [vmem:[%s3215_s0 + $0x590] sm:$0xff]  ;;  %v192_v37 = vld [vmem:[%s3215_s0 + $0x5c0] sm:$0xff] }
  0x45   :  { %v770_v32 = vmax.bf16 %v574_v23, %v572_v22  ;;  %936 = vst [vmem:[%s3216_s1 + $0x148] sm:$0xff] %v769_v28  ;;  %v194_v38 = vld [vmem:[%s3215_s0 + $0x5d0] sm:$0xff]  ;;  %v576_v39 = vmax.bf16 %v192_v37, %v184_v35  ;;  %v185_v40 = vld [vmem:[%s3215_s0 + $0x588] sm:$0xff]  ;;  %v187_v41 = vld [vmem:[%s3215_s0 + $0x598] sm:$0xff] }
  0x46   :  { %v771_v43 = vmax.bf16 %v575_v34, %v573_v33  ;;  %v578_v44 = vmax.bf16 %v194_v38, %v186_v36  ;;  %v193_v45 = vld [vmem:[%s3215_s0 + $0x5c8] sm:$0xff]  ;;  %v195_v46 = vld [vmem:[%s3215_s0 + $0x5d8] sm:$0xff]  ;;  %v188_v47 = vld [vmem:[%s3215_s0 + $0x5a0] sm:$0xff] }
  0x47   :  { %v938_v42 = vsel %vm1162_vm6, %v770_v32, %v937_v24  ;;  %v577_v48 = vmax.bf16 %v193_v45, %v185_v40  ;;  %v579_v49 = vmax.bf16 %v195_v46, %v187_v41  ;;  %v190_v50 = vld [vmem:[%s3215_s0 + $0x5b0] sm:$0xff]  ;;  %v196_v51 = vld [vmem:[%s3215_s0 + $0x5e0] sm:$0xff]  ;;  %v189_v58 = vld [vmem:[%s3215_s0 + $0x5a8] sm:$0xff] }
  0x48   :  { %939 = vst [vmem:[%s3216_s1 + $0x150] sm:$0xff] %v938_v42  ;;  %v198_v52 = vld [vmem:[%s3215_s0 + $0x5f0] sm:$0xff]  ;;  %v941_v53 = vsel %vm1162_vm6, %v771_v43, %v940_v31  ;;  %v772_v54 = vmax.bf16 %v578_v44, %v576_v39  ;;  %v580_v55 = vmax.bf16 %v196_v51, %v188_v47  ;;  %v191_v59 = vld [vmem:[%s3215_s0 + $0x5b8] sm:$0xff]  ;;  %v197_v61 = vld [vmem:[%s3215_s0 + $0x5e8] sm:$0xff] }
  0x49   :  { %v582_v56 = vmax.bf16 %v198_v52, %v190_v50  ;;  %v945_v57 = vld [vmem:[%s3216_s1 + $0x170] sm:$0xff]  ;;  %942 = vst [vmem:[%s3216_s1 + $0x158] sm:$0xff] %v941_v53  ;;  %v773_v60 = vmax.bf16 %v579_v49, %v577_v48  ;;  %v199_v62 = vld [vmem:[%s3215_s0 + $0x5f8] sm:$0xff]  ;;  %v581_v1 = vmax.bf16 %v197_v61, %v189_v58  ;;  %v200_v3 = vld [vmem:[%s3215_s0 + $0x600] sm:$0xff] }
  0x4a   :  { %v948_v63 = vld [vmem:[%s3216_s1 + $0x178] sm:$0xff]  ;;  %943 = vst [vmem:[%s3216_s1 + $0x160] sm:$0xff] %v772_v54  ;;  %v583_v2 = vmax.bf16 %v199_v62, %v191_v59  ;;  %v202_v4 = vld [vmem:[%s3215_s0 + $0x610] sm:$0xff]  ;;  %v208_v5 = vld [vmem:[%s3215_s0 + $0x640] sm:$0xff] }
  0x4b   :  { %v774_v0 = vmax.bf16 %v582_v56, %v580_v55  ;;  %944 = vst [vmem:[%s3216_s1 + $0x168] sm:$0xff] %v773_v60  ;;  %v210_v6 = vld [vmem:[%s3215_s0 + $0x650] sm:$0xff]  ;;  %v584_v7 = vmax.bf16 %v208_v5, %v200_v3  ;;  %v201_v8 = vld [vmem:[%s3215_s0 + $0x608] sm:$0xff]  ;;  %v203_v9 = vld [vmem:[%s3215_s0 + $0x618] sm:$0xff] }
  0x4c   :  { %v775_v11 = vmax.bf16 %v583_v2, %v581_v1  ;;  %v586_v12 = vmax.bf16 %v210_v6, %v202_v4  ;;  %v209_v13 = vld [vmem:[%s3215_s0 + $0x648] sm:$0xff]  ;;  %v211_v14 = vld [vmem:[%s3215_s0 + $0x658] sm:$0xff]  ;;  %v204_v15 = vld [vmem:[%s3215_s0 + $0x620] sm:$0xff] }
  0x4d   :  { %v946_v10 = vsel %vm1162_vm6, %v774_v0, %v945_v57  ;;  %v585_v16 = vmax.bf16 %v209_v13, %v201_v8  ;;  %v587_v17 = vmax.bf16 %v211_v14, %v203_v9  ;;  %v206_v18 = vld [vmem:[%s3215_s0 + $0x630] sm:$0xff]  ;;  %v212_v19 = vld [vmem:[%s3215_s0 + $0x660] sm:$0xff]  ;;  %v205_v27 = vld [vmem:[%s3215_s0 + $0x628] sm:$0xff] }
  0x4e   :  { %947 = vst [vmem:[%s3216_s1 + $0x170] sm:$0xff] %v946_v10  ;;  %v214_v20 = vld [vmem:[%s3215_s0 + $0x670] sm:$0xff]  ;;  %v949_v21 = vsel %vm1162_vm6, %v775_v11, %v948_v63  ;;  %v776_v22 = vmax.bf16 %v586_v12, %v584_v7  ;;  %v588_v23 = vmax.bf16 %v212_v19, %v204_v15  ;;  %v207_v28 = vld [vmem:[%s3215_s0 + $0x638] sm:$0xff]  ;;  %v213_v30 = vld [vmem:[%s3215_s0 + $0x668] sm:$0xff] }
  0x4f   :  { %v590_v24 = vmax.bf16 %v214_v20, %v206_v18  ;;  %v953_v26 = vld [vmem:[%s3216_s1 + $0x190] sm:$0xff]  ;;  %950 = vst [vmem:[%s3216_s1 + $0x178] sm:$0xff] %v949_v21  ;;  %v777_v29 = vmax.bf16 %v587_v17, %v585_v16  ;;  %v215_v31 = vld [vmem:[%s3215_s0 + $0x678] sm:$0xff]  ;;  %v589_v34 = vmax.bf16 %v213_v30, %v205_v27  ;;  %v216_v36 = vld [vmem:[%s3215_s0 + $0x680] sm:$0xff] }
  0x50   :  { %v956_v32 = vld [vmem:[%s3216_s1 + $0x198] sm:$0xff]  ;;  %951 = vst [vmem:[%s3216_s1 + $0x180] sm:$0xff] %v776_v22  ;;  %v591_v35 = vmax.bf16 %v215_v31, %v207_v28  ;;  %v218_v37 = vld [vmem:[%s3215_s0 + $0x690] sm:$0xff]  ;;  %v224_v38 = vld [vmem:[%s3215_s0 + $0x6c0] sm:$0xff] }
  0x51   :  { %v778_v33 = vmax.bf16 %v590_v24, %v588_v23  ;;  %952 = vst [vmem:[%s3216_s1 + $0x188] sm:$0xff] %v777_v29  ;;  %v226_v39 = vld [vmem:[%s3215_s0 + $0x6d0] sm:$0xff]  ;;  %v592_v40 = vmax.bf16 %v224_v38, %v216_v36  ;;  %v217_v41 = vld [vmem:[%s3215_s0 + $0x688] sm:$0xff]  ;;  %v219_v42 = vld [vmem:[%s3215_s0 + $0x698] sm:$0xff] }
  0x52   :  { %v779_v44 = vmax.bf16 %v591_v35, %v589_v34  ;;  %v594_v45 = vmax.bf16 %v226_v39, %v218_v37  ;;  %v225_v46 = vld [vmem:[%s3215_s0 + $0x6c8] sm:$0xff]  ;;  %v227_v47 = vld [vmem:[%s3215_s0 + $0x6d8] sm:$0xff]  ;;  %v220_v48 = vld [vmem:[%s3215_s0 + $0x6a0] sm:$0xff] }
  0x53   :  { %v954_v43 = vsel %vm1162_vm6, %v778_v33, %v953_v26  ;;  %v593_v49 = vmax.bf16 %v225_v46, %v217_v41  ;;  %v595_v50 = vmax.bf16 %v227_v47, %v219_v42  ;;  %v222_v51 = vld [vmem:[%s3215_s0 + $0x6b0] sm:$0xff]  ;;  %v228_v52 = vld [vmem:[%s3215_s0 + $0x6e0] sm:$0xff]  ;;  %v221_v59 = vld [vmem:[%s3215_s0 + $0x6a8] sm:$0xff] }
  0x54   :  { %955 = vst [vmem:[%s3216_s1 + $0x190] sm:$0xff] %v954_v43  ;;  %v230_v53 = vld [vmem:[%s3215_s0 + $0x6f0] sm:$0xff]  ;;  %v957_v54 = vsel %vm1162_vm6, %v779_v44, %v956_v32  ;;  %v780_v55 = vmax.bf16 %v594_v45, %v592_v40  ;;  %v596_v56 = vmax.bf16 %v228_v52, %v220_v48  ;;  %v223_v60 = vld [vmem:[%s3215_s0 + $0x6b8] sm:$0xff]  ;;  %v229_v62 = vld [vmem:[%s3215_s0 + $0x6e8] sm:$0xff] }
  0x55   :  { %v598_v57 = vmax.bf16 %v230_v53, %v222_v51  ;;  %v961_v58 = vld [vmem:[%s3216_s1 + $0x1b0] sm:$0xff]  ;;  %958 = vst [vmem:[%s3216_s1 + $0x198] sm:$0xff] %v957_v54  ;;  %v781_v61 = vmax.bf16 %v595_v50, %v593_v49  ;;  %v231_v63 = vld [vmem:[%s3215_s0 + $0x6f8] sm:$0xff]  ;;  %v597_v2 = vmax.bf16 %v229_v62, %v221_v59  ;;  %v232_v4 = vld [vmem:[%s3215_s0 + $0x700] sm:$0xff] }
  0x56   :  { %v964_v0 = vld [vmem:[%s3216_s1 + $0x1b8] sm:$0xff]  ;;  %959 = vst [vmem:[%s3216_s1 + $0x1a0] sm:$0xff] %v780_v55  ;;  %v599_v3 = vmax.bf16 %v231_v63, %v223_v60  ;;  %v234_v5 = vld [vmem:[%s3215_s0 + $0x710] sm:$0xff]  ;;  %v240_v6 = vld [vmem:[%s3215_s0 + $0x740] sm:$0xff] }
  0x57   :  { %v782_v1 = vmax.bf16 %v598_v57, %v596_v56  ;;  %960 = vst [vmem:[%s3216_s1 + $0x1a8] sm:$0xff] %v781_v61  ;;  %v242_v7 = vld [vmem:[%s3215_s0 + $0x750] sm:$0xff]  ;;  %v600_v8 = vmax.bf16 %v240_v6, %v232_v4  ;;  %v233_v9 = vld [vmem:[%s3215_s0 + $0x708] sm:$0xff]  ;;  %v235_v10 = vld [vmem:[%s3215_s0 + $0x718] sm:$0xff] }
  0x58   :  { %v783_v12 = vmax.bf16 %v599_v3, %v597_v2  ;;  %v602_v13 = vmax.bf16 %v242_v7, %v234_v5  ;;  %v241_v14 = vld [vmem:[%s3215_s0 + $0x748] sm:$0xff]  ;;  %v243_v15 = vld [vmem:[%s3215_s0 + $0x758] sm:$0xff]  ;;  %v236_v16 = vld [vmem:[%s3215_s0 + $0x720] sm:$0xff] }
  0x59   :  { %v962_v11 = vsel %vm1162_vm6, %v782_v1, %v961_v58  ;;  %v601_v17 = vmax.bf16 %v241_v14, %v233_v9  ;;  %v603_v18 = vmax.bf16 %v243_v15, %v235_v10  ;;  %v238_v19 = vld [vmem:[%s3215_s0 + $0x730] sm:$0xff]  ;;  %v244_v20 = vld [vmem:[%s3215_s0 + $0x760] sm:$0xff]  ;;  %v237_v28 = vld [vmem:[%s3215_s0 + $0x728] sm:$0xff] }
  0x5a   :  { %963 = vst [vmem:[%s3216_s1 + $0x1b0] sm:$0xff] %v962_v11  ;;  %v246_v21 = vld [vmem:[%s3215_s0 + $0x770] sm:$0xff]  ;;  %v965_v22 = vsel %vm1162_vm6, %v783_v12, %v964_v0  ;;  %v784_v23 = vmax.bf16 %v602_v13, %v600_v8  ;;  %v604_v24 = vmax.bf16 %v244_v20, %v236_v16  ;;  %v239_v29 = vld [vmem:[%s3215_s0 + $0x738] sm:$0xff]  ;;  %v245_v31 = vld [vmem:[%s3215_s0 + $0x768] sm:$0xff] }
  0x5b   :  { %v606_v26 = vmax.bf16 %v246_v21, %v238_v19  ;;  %v969_v27 = vld [vmem:[%s3216_s1 + $0x1d0] sm:$0xff]  ;;  %966 = vst [vmem:[%s3216_s1 + $0x1b8] sm:$0xff] %v965_v22  ;;  %v785_v30 = vmax.bf16 %v603_v18, %v601_v17  ;;  %v247_v32 = vld [vmem:[%s3215_s0 + $0x778] sm:$0xff]  ;;  %v605_v35 = vmax.bf16 %v245_v31, %v237_v28  ;;  %v248_v37 = vld [vmem:[%s3215_s0 + $0x780] sm:$0xff] }
  0x5c   :  { %v972_v33 = vld [vmem:[%s3216_s1 + $0x1d8] sm:$0xff]  ;;  %967 = vst [vmem:[%s3216_s1 + $0x1c0] sm:$0xff] %v784_v23  ;;  %v607_v36 = vmax.bf16 %v247_v32, %v239_v29  ;;  %v250_v38 = vld [vmem:[%s3215_s0 + $0x790] sm:$0xff]  ;;  %v256_v39 = vld [vmem:[%s3215_s0 + $0x7c0] sm:$0xff] }
  0x5d   :  { %v786_v34 = vmax.bf16 %v606_v26, %v604_v24  ;;  %968 = vst [vmem:[%s3216_s1 + $0x1c8] sm:$0xff] %v785_v30  ;;  %v258_v40 = vld [vmem:[%s3215_s0 + $0x7d0] sm:$0xff]  ;;  %v608_v41 = vmax.bf16 %v256_v39, %v248_v37  ;;  %v249_v42 = vld [vmem:[%s3215_s0 + $0x788] sm:$0xff]  ;;  %v251_v43 = vld [vmem:[%s3215_s0 + $0x798] sm:$0xff] }
  0x5e   :  { %v787_v45 = vmax.bf16 %v607_v36, %v605_v35  ;;  %v610_v46 = vmax.bf16 %v258_v40, %v250_v38  ;;  %v257_v47 = vld [vmem:[%s3215_s0 + $0x7c8] sm:$0xff]  ;;  %v259_v48 = vld [vmem:[%s3215_s0 + $0x7d8] sm:$0xff]  ;;  %v252_v49 = vld [vmem:[%s3215_s0 + $0x7a0] sm:$0xff] }
  0x5f   :  { %v970_v44 = vsel %vm1162_vm6, %v786_v34, %v969_v27  ;;  %v609_v50 = vmax.bf16 %v257_v47, %v249_v42  ;;  %v611_v51 = vmax.bf16 %v259_v48, %v251_v43  ;;  %v254_v52 = vld [vmem:[%s3215_s0 + $0x7b0] sm:$0xff]  ;;  %v260_v53 = vld [vmem:[%s3215_s0 + $0x7e0] sm:$0xff]  ;;  %v253_v60 = vld [vmem:[%s3215_s0 + $0x7a8] sm:$0xff] }
  0x60   :  { %971 = vst [vmem:[%s3216_s1 + $0x1d0] sm:$0xff] %v970_v44  ;;  %v262_v54 = vld [vmem:[%s3215_s0 + $0x7f0] sm:$0xff]  ;;  %v973_v55 = vsel %vm1162_vm6, %v787_v45, %v972_v33  ;;  %v788_v56 = vmax.bf16 %v610_v46, %v608_v41  ;;  %v612_v57 = vmax.bf16 %v260_v53, %v252_v49  ;;  %v255_v61 = vld [vmem:[%s3215_s0 + $0x7b8] sm:$0xff]  ;;  %v261_v63 = vld [vmem:[%s3215_s0 + $0x7e8] sm:$0xff] }
  0x61   :  { %v614_v58 = vmax.bf16 %v262_v54, %v254_v52  ;;  %v977_v59 = vld [vmem:[%s3216_s1 + $0x1f0] sm:$0xff]  ;;  %974 = vst [vmem:[%s3216_s1 + $0x1d8] sm:$0xff] %v973_v55  ;;  %v789_v62 = vmax.bf16 %v611_v51, %v609_v50  ;;  %v263_v0 = vld [vmem:[%s3215_s0 + $0x7f8] sm:$0xff]  ;;  %v613_v3 = vmax.bf16 %v261_v63, %v253_v60  ;;  %v264_v5 = vld [vmem:[%s3215_s0 + $0x800] sm:$0xff] }
  0x62   :  { %v980_v1 = vld [vmem:[%s3216_s1 + $0x1f8] sm:$0xff]  ;;  %975 = vst [vmem:[%s3216_s1 + $0x1e0] sm:$0xff] %v788_v56  ;;  %v615_v4 = vmax.bf16 %v263_v0, %v255_v61  ;;  %v266_v6 = vld [vmem:[%s3215_s0 + $0x810] sm:$0xff]  ;;  %v272_v7 = vld [vmem:[%s3215_s0 + $0x840] sm:$0xff] }
  0x63   :  { %v790_v2 = vmax.bf16 %v614_v58, %v612_v57  ;;  %976 = vst [vmem:[%s3216_s1 + $0x1e8] sm:$0xff] %v789_v62  ;;  %v274_v8 = vld [vmem:[%s3215_s0 + $0x850] sm:$0xff]  ;;  %v616_v9 = vmax.bf16 %v272_v7, %v264_v5  ;;  %v265_v10 = vld [vmem:[%s3215_s0 + $0x808] sm:$0xff]  ;;  %v267_v11 = vld [vmem:[%s3215_s0 + $0x818] sm:$0xff] }
  0x64   :  { %v791_v13 = vmax.bf16 %v615_v4, %v613_v3  ;;  %v618_v14 = vmax.bf16 %v274_v8, %v266_v6  ;;  %v273_v15 = vld [vmem:[%s3215_s0 + $0x848] sm:$0xff]  ;;  %v275_v16 = vld [vmem:[%s3215_s0 + $0x858] sm:$0xff]  ;;  %v268_v17 = vld [vmem:[%s3215_s0 + $0x820] sm:$0xff] }
  0x65   :  { %v978_v12 = vsel %vm1162_vm6, %v790_v2, %v977_v59  ;;  %v617_v18 = vmax.bf16 %v273_v15, %v265_v10  ;;  %v619_v19 = vmax.bf16 %v275_v16, %v267_v11  ;;  %v270_v20 = vld [vmem:[%s3215_s0 + $0x830] sm:$0xff]  ;;  %v276_v21 = vld [vmem:[%s3215_s0 + $0x860] sm:$0xff]  ;;  %v269_v29 = vld [vmem:[%s3215_s0 + $0x828] sm:$0xff] }
  0x66   :  { %979 = vst [vmem:[%s3216_s1 + $0x1f0] sm:$0xff] %v978_v12  ;;  %v278_v22 = vld [vmem:[%s3215_s0 + $0x870] sm:$0xff]  ;;  %v981_v23 = vsel %vm1162_vm6, %v791_v13, %v980_v1  ;;  %v792_v24 = vmax.bf16 %v618_v14, %v616_v9  ;;  %v620_v26 = vmax.bf16 %v276_v21, %v268_v17  ;;  %v271_v30 = vld [vmem:[%s3215_s0 + $0x838] sm:$0xff]  ;;  %v277_v32 = vld [vmem:[%s3215_s0 + $0x868] sm:$0xff] }
  0x67   :  { %v622_v27 = vmax.bf16 %v278_v22, %v270_v20  ;;  %v985_v28 = vld [vmem:[%s3216_s1 + $0x210] sm:$0xff]  ;;  %982 = vst [vmem:[%s3216_s1 + $0x1f8] sm:$0xff] %v981_v23  ;;  %v793_v31 = vmax.bf16 %v619_v19, %v617_v18  ;;  %v279_v33 = vld [vmem:[%s3215_s0 + $0x878] sm:$0xff]  ;;  %v621_v36 = vmax.bf16 %v277_v32, %v269_v29  ;;  %v280_v38 = vld [vmem:[%s3215_s0 + $0x880] sm:$0xff] }
  0x68   :  { %v988_v34 = vld [vmem:[%s3216_s1 + $0x218] sm:$0xff]  ;;  %983 = vst [vmem:[%s3216_s1 + $0x200] sm:$0xff] %v792_v24  ;;  %v623_v37 = vmax.bf16 %v279_v33, %v271_v30  ;;  %v282_v39 = vld [vmem:[%s3215_s0 + $0x890] sm:$0xff]  ;;  %v288_v40 = vld [vmem:[%s3215_s0 + $0x8c0] sm:$0xff] }
  0x69   :  { %v794_v35 = vmax.bf16 %v622_v27, %v620_v26  ;;  %984 = vst [vmem:[%s3216_s1 + $0x208] sm:$0xff] %v793_v31  ;;  %v290_v41 = vld [vmem:[%s3215_s0 + $0x8d0] sm:$0xff]  ;;  %v624_v42 = vmax.bf16 %v288_v40, %v280_v38  ;;  %v281_v43 = vld [vmem:[%s3215_s0 + $0x888] sm:$0xff]  ;;  %v283_v44 = vld [vmem:[%s3215_s0 + $0x898] sm:$0xff] }
  0x6a   :  { %v795_v46 = vmax.bf16 %v623_v37, %v621_v36  ;;  %v626_v47 = vmax.bf16 %v290_v41, %v282_v39  ;;  %v289_v48 = vld [vmem:[%s3215_s0 + $0x8c8] sm:$0xff]  ;;  %v291_v49 = vld [vmem:[%s3215_s0 + $0x8d8] sm:$0xff]  ;;  %v284_v50 = vld [vmem:[%s3215_s0 + $0x8a0] sm:$0xff] }
  0x6b   :  { %v986_v45 = vsel %vm1162_vm6, %v794_v35, %v985_v28  ;;  %v625_v51 = vmax.bf16 %v289_v48, %v281_v43  ;;  %v627_v52 = vmax.bf16 %v291_v49, %v283_v44  ;;  %v286_v53 = vld [vmem:[%s3215_s0 + $0x8b0] sm:$0xff]  ;;  %v292_v54 = vld [vmem:[%s3215_s0 + $0x8e0] sm:$0xff]  ;;  %v285_v61 = vld [vmem:[%s3215_s0 + $0x8a8] sm:$0xff] }
  0x6c   :  { %987 = vst [vmem:[%s3216_s1 + $0x210] sm:$0xff] %v986_v45  ;;  %v294_v55 = vld [vmem:[%s3215_s0 + $0x8f0] sm:$0xff]  ;;  %v989_v56 = vsel %vm1162_vm6, %v795_v46, %v988_v34  ;;  %v796_v57 = vmax.bf16 %v626_v47, %v624_v42  ;;  %v628_v58 = vmax.bf16 %v292_v54, %v284_v50  ;;  %v287_v62 = vld [vmem:[%s3215_s0 + $0x8b8] sm:$0xff]  ;;  %v293_v0 = vld [vmem:[%s3215_s0 + $0x8e8] sm:$0xff] }
  0x6d   :  { %v630_v59 = vmax.bf16 %v294_v55, %v286_v53  ;;  %v993_v60 = vld [vmem:[%s3216_s1 + $0x230] sm:$0xff]  ;;  %990 = vst [vmem:[%s3216_s1 + $0x218] sm:$0xff] %v989_v56  ;;  %v797_v63 = vmax.bf16 %v627_v52, %v625_v51  ;;  %v295_v1 = vld [vmem:[%s3215_s0 + $0x8f8] sm:$0xff]  ;;  %v629_v4 = vmax.bf16 %v293_v0, %v285_v61  ;;  %v296_v6 = vld [vmem:[%s3215_s0 + $0x900] sm:$0xff] }
  0x6e   :  { %v996_v2 = vld [vmem:[%s3216_s1 + $0x238] sm:$0xff]  ;;  %991 = vst [vmem:[%s3216_s1 + $0x220] sm:$0xff] %v796_v57  ;;  %v631_v5 = vmax.bf16 %v295_v1, %v287_v62  ;;  %v298_v7 = vld [vmem:[%s3215_s0 + $0x910] sm:$0xff]  ;;  %v304_v8 = vld [vmem:[%s3215_s0 + $0x940] sm:$0xff] }
  0x6f   :  { %v798_v3 = vmax.bf16 %v630_v59, %v628_v58  ;;  %992 = vst [vmem:[%s3216_s1 + $0x228] sm:$0xff] %v797_v63  ;;  %v306_v9 = vld [vmem:[%s3215_s0 + $0x950] sm:$0xff]  ;;  %v632_v10 = vmax.bf16 %v304_v8, %v296_v6  ;;  %v297_v11 = vld [vmem:[%s3215_s0 + $0x908] sm:$0xff]  ;;  %v299_v12 = vld [vmem:[%s3215_s0 + $0x918] sm:$0xff] }
  0x70   :  { %v799_v14 = vmax.bf16 %v631_v5, %v629_v4  ;;  %v634_v15 = vmax.bf16 %v306_v9, %v298_v7  ;;  %v305_v16 = vld [vmem:[%s3215_s0 + $0x948] sm:$0xff]  ;;  %v307_v17 = vld [vmem:[%s3215_s0 + $0x958] sm:$0xff]  ;;  %v300_v18 = vld [vmem:[%s3215_s0 + $0x920] sm:$0xff] }
  0x71   :  { %v994_v13 = vsel %vm1162_vm6, %v798_v3, %v993_v60  ;;  %v633_v19 = vmax.bf16 %v305_v16, %v297_v11  ;;  %v635_v20 = vmax.bf16 %v307_v17, %v299_v12  ;;  %v302_v21 = vld [vmem:[%s3215_s0 + $0x930] sm:$0xff]  ;;  %v308_v22 = vld [vmem:[%s3215_s0 + $0x960] sm:$0xff]  ;;  %v301_v30 = vld [vmem:[%s3215_s0 + $0x928] sm:$0xff] }
  0x72   :  { %995 = vst [vmem:[%s3216_s1 + $0x230] sm:$0xff] %v994_v13  ;;  %v310_v23 = vld [vmem:[%s3215_s0 + $0x970] sm:$0xff]  ;;  %v997_v24 = vsel %vm1162_vm6, %v799_v14, %v996_v2  ;;  %v800_v26 = vmax.bf16 %v634_v15, %v632_v10  ;;  %v636_v27 = vmax.bf16 %v308_v22, %v300_v18  ;;  %v303_v31 = vld [vmem:[%s3215_s0 + $0x938] sm:$0xff]  ;;  %v309_v33 = vld [vmem:[%s3215_s0 + $0x968] sm:$0xff] }
  0x73   :  { %v638_v28 = vmax.bf16 %v310_v23, %v302_v21  ;;  %v1001_v29 = vld [vmem:[%s3216_s1 + $0x250] sm:$0xff]  ;;  %998 = vst [vmem:[%s3216_s1 + $0x238] sm:$0xff] %v997_v24  ;;  %v801_v32 = vmax.bf16 %v635_v20, %v633_v19  ;;  %v311_v34 = vld [vmem:[%s3215_s0 + $0x978] sm:$0xff]  ;;  %v637_v37 = vmax.bf16 %v309_v33, %v301_v30  ;;  %v312_v39 = vld [vmem:[%s3215_s0 + $0x980] sm:$0xff] }
  0x74   :  { %v1004_v35 = vld [vmem:[%s3216_s1 + $0x258] sm:$0xff]  ;;  %999 = vst [vmem:[%s3216_s1 + $0x240] sm:$0xff] %v800_v26  ;;  %v639_v38 = vmax.bf16 %v311_v34, %v303_v31  ;;  %v314_v40 = vld [vmem:[%s3215_s0 + $0x990] sm:$0xff]  ;;  %v320_v41 = vld [vmem:[%s3215_s0 + $0x9c0] sm:$0xff] }
  0x75   :  { %v802_v36 = vmax.bf16 %v638_v28, %v636_v27  ;;  %1000 = vst [vmem:[%s3216_s1 + $0x248] sm:$0xff] %v801_v32  ;;  %v322_v42 = vld [vmem:[%s3215_s0 + $0x9d0] sm:$0xff]  ;;  %v640_v43 = vmax.bf16 %v320_v41, %v312_v39  ;;  %v313_v44 = vld [vmem:[%s3215_s0 + $0x988] sm:$0xff]  ;;  %v315_v45 = vld [vmem:[%s3215_s0 + $0x998] sm:$0xff] }
  0x76   :  { %v803_v47 = vmax.bf16 %v639_v38, %v637_v37  ;;  %v642_v48 = vmax.bf16 %v322_v42, %v314_v40  ;;  %v321_v49 = vld [vmem:[%s3215_s0 + $0x9c8] sm:$0xff]  ;;  %v323_v50 = vld [vmem:[%s3215_s0 + $0x9d8] sm:$0xff]  ;;  %v316_v51 = vld [vmem:[%s3215_s0 + $0x9a0] sm:$0xff] }
  0x77   :  { %v1002_v46 = vsel %vm1162_vm6, %v802_v36, %v1001_v29  ;;  %v641_v52 = vmax.bf16 %v321_v49, %v313_v44  ;;  %v643_v53 = vmax.bf16 %v323_v50, %v315_v45  ;;  %v318_v54 = vld [vmem:[%s3215_s0 + $0x9b0] sm:$0xff]  ;;  %v324_v55 = vld [vmem:[%s3215_s0 + $0x9e0] sm:$0xff]  ;;  %v317_v62 = vld [vmem:[%s3215_s0 + $0x9a8] sm:$0xff] }
  0x78   :  { %1003 = vst [vmem:[%s3216_s1 + $0x250] sm:$0xff] %v1002_v46  ;;  %v326_v56 = vld [vmem:[%s3215_s0 + $0x9f0] sm:$0xff]  ;;  %v1005_v57 = vsel %vm1162_vm6, %v803_v47, %v1004_v35  ;;  %v804_v58 = vmax.bf16 %v642_v48, %v640_v43  ;;  %v644_v59 = vmax.bf16 %v324_v55, %v316_v51  ;;  %v319_v63 = vld [vmem:[%s3215_s0 + $0x9b8] sm:$0xff]  ;;  %v325_v1 = vld [vmem:[%s3215_s0 + $0x9e8] sm:$0xff] }
  0x79   :  { %v646_v60 = vmax.bf16 %v326_v56, %v318_v54  ;;  %v1009_v61 = vld [vmem:[%s3216_s1 + $0x270] sm:$0xff]  ;;  %1006 = vst [vmem:[%s3216_s1 + $0x258] sm:$0xff] %v1005_v57  ;;  %v805_v0 = vmax.bf16 %v643_v53, %v641_v52  ;;  %v327_v2 = vld [vmem:[%s3215_s0 + $0x9f8] sm:$0xff]  ;;  %v645_v5 = vmax.bf16 %v325_v1, %v317_v62  ;;  %v328_v7 = vld [vmem:[%s3215_s0 + $0xa00] sm:$0xff] }
  0x7a   :  { %v1012_v3 = vld [vmem:[%s3216_s1 + $0x278] sm:$0xff]  ;;  %1007 = vst [vmem:[%s3216_s1 + $0x260] sm:$0xff] %v804_v58  ;;  %v647_v6 = vmax.bf16 %v327_v2, %v319_v63  ;;  %v330_v8 = vld [vmem:[%s3215_s0 + $0xa10] sm:$0xff]  ;;  %v336_v9 = vld [vmem:[%s3215_s0 + $0xa40] sm:$0xff] }
  0x7b   :  { %v806_v4 = vmax.bf16 %v646_v60, %v644_v59  ;;  %1008 = vst [vmem:[%s3216_s1 + $0x268] sm:$0xff] %v805_v0  ;;  %v338_v10 = vld [vmem:[%s3215_s0 + $0xa50] sm:$0xff]  ;;  %v648_v11 = vmax.bf16 %v336_v9, %v328_v7  ;;  %v329_v12 = vld [vmem:[%s3215_s0 + $0xa08] sm:$0xff]  ;;  %v331_v13 = vld [vmem:[%s3215_s0 + $0xa18] sm:$0xff] }
  0x7c   :  { %v807_v15 = vmax.bf16 %v647_v6, %v645_v5  ;;  %v650_v16 = vmax.bf16 %v338_v10, %v330_v8  ;;  %v337_v17 = vld [vmem:[%s3215_s0 + $0xa48] sm:$0xff]  ;;  %v339_v18 = vld [vmem:[%s3215_s0 + $0xa58] sm:$0xff]  ;;  %v332_v19 = vld [vmem:[%s3215_s0 + $0xa20] sm:$0xff] }
  0x7d   :  { %v1010_v14 = vsel %vm1162_vm6, %v806_v4, %v1009_v61  ;;  %v649_v20 = vmax.bf16 %v337_v17, %v329_v12  ;;  %v651_v21 = vmax.bf16 %v339_v18, %v331_v13  ;;  %v334_v22 = vld [vmem:[%s3215_s0 + $0xa30] sm:$0xff]  ;;  %v340_v23 = vld [vmem:[%s3215_s0 + $0xa60] sm:$0xff]  ;;  %v333_v31 = vld [vmem:[%s3215_s0 + $0xa28] sm:$0xff] }
  0x7e   :  { %1011 = vst [vmem:[%s3216_s1 + $0x270] sm:$0xff] %v1010_v14  ;;  %v342_v24 = vld [vmem:[%s3215_s0 + $0xa70] sm:$0xff]  ;;  %v1013_v26 = vsel %vm1162_vm6, %v807_v15, %v1012_v3  ;;  %v808_v27 = vmax.bf16 %v650_v16, %v648_v11  ;;  %v652_v28 = vmax.bf16 %v340_v23, %v332_v19  ;;  %v335_v32 = vld [vmem:[%s3215_s0 + $0xa38] sm:$0xff]  ;;  %v341_v34 = vld [vmem:[%s3215_s0 + $0xa68] sm:$0xff] }
  0x7f   :  { %v654_v29 = vmax.bf16 %v342_v24, %v334_v22  ;;  %v1017_v30 = vld [vmem:[%s3216_s1 + $0x290] sm:$0xff]  ;;  %1014 = vst [vmem:[%s3216_s1 + $0x278] sm:$0xff] %v1013_v26  ;;  %v809_v33 = vmax.bf16 %v651_v21, %v649_v20  ;;  %v343_v35 = vld [vmem:[%s3215_s0 + $0xa78] sm:$0xff]  ;;  %v653_v38 = vmax.bf16 %v341_v34, %v333_v31  ;;  %v344_v40 = vld [vmem:[%s3215_s0 + $0xa80] sm:$0xff] }
  0x80   :  { %v1020_v36 = vld [vmem:[%s3216_s1 + $0x298] sm:$0xff]  ;;  %1015 = vst [vmem:[%s3216_s1 + $0x280] sm:$0xff] %v808_v27  ;;  %v655_v39 = vmax.bf16 %v343_v35, %v335_v32  ;;  %v346_v41 = vld [vmem:[%s3215_s0 + $0xa90] sm:$0xff]  ;;  %v352_v42 = vld [vmem:[%s3215_s0 + $0xac0] sm:$0xff] }
  0x81   :  { %v810_v37 = vmax.bf16 %v654_v29, %v652_v28  ;;  %1016 = vst [vmem:[%s3216_s1 + $0x288] sm:$0xff] %v809_v33  ;;  %v354_v43 = vld [vmem:[%s3215_s0 + $0xad0] sm:$0xff]  ;;  %v656_v44 = vmax.bf16 %v352_v42, %v344_v40  ;;  %v345_v45 = vld [vmem:[%s3215_s0 + $0xa88] sm:$0xff]  ;;  %v347_v46 = vld [vmem:[%s3215_s0 + $0xa98] sm:$0xff] }
  0x82   :  { %v811_v48 = vmax.bf16 %v655_v39, %v653_v38  ;;  %v658_v49 = vmax.bf16 %v354_v43, %v346_v41  ;;  %v353_v50 = vld [vmem:[%s3215_s0 + $0xac8] sm:$0xff]  ;;  %v355_v51 = vld [vmem:[%s3215_s0 + $0xad8] sm:$0xff]  ;;  %v348_v52 = vld [vmem:[%s3215_s0 + $0xaa0] sm:$0xff] }
  0x83   :  { %v1018_v47 = vsel %vm1162_vm6, %v810_v37, %v1017_v30  ;;  %v657_v53 = vmax.bf16 %v353_v50, %v345_v45  ;;  %v659_v54 = vmax.bf16 %v355_v51, %v347_v46  ;;  %v350_v55 = vld [vmem:[%s3215_s0 + $0xab0] sm:$0xff]  ;;  %v356_v56 = vld [vmem:[%s3215_s0 + $0xae0] sm:$0xff]  ;;  %v349_v63 = vld [vmem:[%s3215_s0 + $0xaa8] sm:$0xff] }
  0x84   :  { %1019 = vst [vmem:[%s3216_s1 + $0x290] sm:$0xff] %v1018_v47  ;;  %v358_v57 = vld [vmem:[%s3215_s0 + $0xaf0] sm:$0xff]  ;;  %v1021_v58 = vsel %vm1162_vm6, %v811_v48, %v1020_v36  ;;  %v812_v59 = vmax.bf16 %v658_v49, %v656_v44  ;;  %v660_v60 = vmax.bf16 %v356_v56, %v348_v52  ;;  %v351_v0 = vld [vmem:[%s3215_s0 + $0xab8] sm:$0xff]  ;;  %v357_v2 = vld [vmem:[%s3215_s0 + $0xae8] sm:$0xff] }
  0x85   :  { %v662_v61 = vmax.bf16 %v358_v57, %v350_v55  ;;  %v1025_v62 = vld [vmem:[%s3216_s1 + $0x2b0] sm:$0xff]  ;;  %1022 = vst [vmem:[%s3216_s1 + $0x298] sm:$0xff] %v1021_v58  ;;  %v813_v1 = vmax.bf16 %v659_v54, %v657_v53  ;;  %v359_v3 = vld [vmem:[%s3215_s0 + $0xaf8] sm:$0xff]  ;;  %v661_v6 = vmax.bf16 %v357_v2, %v349_v63  ;;  %v360_v8 = vld [vmem:[%s3215_s0 + $0xb00] sm:$0xff] }
  0x86   :  { %v1028_v4 = vld [vmem:[%s3216_s1 + $0x2b8] sm:$0xff]  ;;  %1023 = vst [vmem:[%s3216_s1 + $0x2a0] sm:$0xff] %v812_v59  ;;  %v663_v7 = vmax.bf16 %v359_v3, %v351_v0  ;;  %v362_v9 = vld [vmem:[%s3215_s0 + $0xb10] sm:$0xff]  ;;  %v368_v10 = vld [vmem:[%s3215_s0 + $0xb40] sm:$0xff] }
  0x87   :  { %v814_v5 = vmax.bf16 %v662_v61, %v660_v60  ;;  %1024 = vst [vmem:[%s3216_s1 + $0x2a8] sm:$0xff] %v813_v1  ;;  %v370_v11 = vld [vmem:[%s3215_s0 + $0xb50] sm:$0xff]  ;;  %v664_v12 = vmax.bf16 %v368_v10, %v360_v8  ;;  %v361_v13 = vld [vmem:[%s3215_s0 + $0xb08] sm:$0xff]  ;;  %v363_v14 = vld [vmem:[%s3215_s0 + $0xb18] sm:$0xff] }
  0x88   :  { %v815_v16 = vmax.bf16 %v663_v7, %v661_v6  ;;  %v666_v17 = vmax.bf16 %v370_v11, %v362_v9  ;;  %v369_v18 = vld [vmem:[%s3215_s0 + $0xb48] sm:$0xff]  ;;  %v371_v19 = vld [vmem:[%s3215_s0 + $0xb58] sm:$0xff]  ;;  %v364_v20 = vld [vmem:[%s3215_s0 + $0xb20] sm:$0xff] }
  0x89   :  { %v1026_v15 = vsel %vm1162_vm6, %v814_v5, %v1025_v62  ;;  %v665_v21 = vmax.bf16 %v369_v18, %v361_v13  ;;  %v667_v22 = vmax.bf16 %v371_v19, %v363_v14  ;;  %v366_v23 = vld [vmem:[%s3215_s0 + $0xb30] sm:$0xff]  ;;  %v372_v24 = vld [vmem:[%s3215_s0 + $0xb60] sm:$0xff]  ;;  %v365_v32 = vld [vmem:[%s3215_s0 + $0xb28] sm:$0xff] }
  0x8a   :  { %1027 = vst [vmem:[%s3216_s1 + $0x2b0] sm:$0xff] %v1026_v15  ;;  %v374_v26 = vld [vmem:[%s3215_s0 + $0xb70] sm:$0xff]  ;;  %v1029_v27 = vsel %vm1162_vm6, %v815_v16, %v1028_v4  ;;  %v816_v28 = vmax.bf16 %v666_v17, %v664_v12  ;;  %v668_v29 = vmax.bf16 %v372_v24, %v364_v20  ;;  %v367_v33 = vld [vmem:[%s3215_s0 + $0xb38] sm:$0xff]  ;;  %v373_v35 = vld [vmem:[%s3215_s0 + $0xb68] sm:$0xff] }
  0x8b   :  { %v670_v30 = vmax.bf16 %v374_v26, %v366_v23  ;;  %v1033_v31 = vld [vmem:[%s3216_s1 + $0x2d0] sm:$0xff]  ;;  %1030 = vst [vmem:[%s3216_s1 + $0x2b8] sm:$0xff] %v1029_v27  ;;  %v817_v34 = vmax.bf16 %v667_v22, %v665_v21  ;;  %v375_v36 = vld [vmem:[%s3215_s0 + $0xb78] sm:$0xff]  ;;  %v669_v39 = vmax.bf16 %v373_v35, %v365_v32  ;;  %v376_v41 = vld [vmem:[%s3215_s0 + $0xb80] sm:$0xff] }
  0x8c   :  { %v1036_v37 = vld [vmem:[%s3216_s1 + $0x2d8] sm:$0xff]  ;;  %1031 = vst [vmem:[%s3216_s1 + $0x2c0] sm:$0xff] %v816_v28  ;;  %v671_v40 = vmax.bf16 %v375_v36, %v367_v33  ;;  %v378_v42 = vld [vmem:[%s3215_s0 + $0xb90] sm:$0xff]  ;;  %v384_v43 = vld [vmem:[%s3215_s0 + $0xbc0] sm:$0xff] }
  0x8d   :  { %v818_v38 = vmax.bf16 %v670_v30, %v668_v29  ;;  %1032 = vst [vmem:[%s3216_s1 + $0x2c8] sm:$0xff] %v817_v34  ;;  %v386_v44 = vld [vmem:[%s3215_s0 + $0xbd0] sm:$0xff]  ;;  %v672_v45 = vmax.bf16 %v384_v43, %v376_v41  ;;  %v377_v46 = vld [vmem:[%s3215_s0 + $0xb88] sm:$0xff]  ;;  %v379_v47 = vld [vmem:[%s3215_s0 + $0xb98] sm:$0xff] }
  0x8e   :  { %v819_v49 = vmax.bf16 %v671_v40, %v669_v39  ;;  %v674_v50 = vmax.bf16 %v386_v44, %v378_v42  ;;  %v385_v51 = vld [vmem:[%s3215_s0 + $0xbc8] sm:$0xff]  ;;  %v387_v52 = vld [vmem:[%s3215_s0 + $0xbd8] sm:$0xff]  ;;  %v380_v53 = vld [vmem:[%s3215_s0 + $0xba0] sm:$0xff] }
  0x8f   :  { %v1034_v48 = vsel %vm1162_vm6, %v818_v38, %v1033_v31  ;;  %v673_v54 = vmax.bf16 %v385_v51, %v377_v46  ;;  %v675_v55 = vmax.bf16 %v387_v52, %v379_v47  ;;  %v382_v56 = vld [vmem:[%s3215_s0 + $0xbb0] sm:$0xff]  ;;  %v388_v57 = vld [vmem:[%s3215_s0 + $0xbe0] sm:$0xff]  ;;  %v381_v0 = vld [vmem:[%s3215_s0 + $0xba8] sm:$0xff] }
  0x90   :  { %1035 = vst [vmem:[%s3216_s1 + $0x2d0] sm:$0xff] %v1034_v48  ;;  %v390_v58 = vld [vmem:[%s3215_s0 + $0xbf0] sm:$0xff]  ;;  %v1037_v59 = vsel %vm1162_vm6, %v819_v49, %v1036_v37  ;;  %v820_v60 = vmax.bf16 %v674_v50, %v672_v45  ;;  %v676_v61 = vmax.bf16 %v388_v57, %v380_v53  ;;  %v383_v1 = vld [vmem:[%s3215_s0 + $0xbb8] sm:$0xff]  ;;  %v389_v3 = vld [vmem:[%s3215_s0 + $0xbe8] sm:$0xff] }
  0x91   :  { %v678_v62 = vmax.bf16 %v390_v58, %v382_v56  ;;  %v1041_v63 = vld [vmem:[%s3216_s1 + $0x2f0] sm:$0xff]  ;;  %1038 = vst [vmem:[%s3216_s1 + $0x2d8] sm:$0xff] %v1037_v59  ;;  %v821_v2 = vmax.bf16 %v675_v55, %v673_v54  ;;  %v391_v4 = vld [vmem:[%s3215_s0 + $0xbf8] sm:$0xff]  ;;  %v677_v7 = vmax.bf16 %v389_v3, %v381_v0  ;;  %v392_v9 = vld [vmem:[%s3215_s0 + $0xc00] sm:$0xff] }
  0x92   :  { %v1044_v5 = vld [vmem:[%s3216_s1 + $0x2f8] sm:$0xff]  ;;  %1039 = vst [vmem:[%s3216_s1 + $0x2e0] sm:$0xff] %v820_v60  ;;  %v679_v8 = vmax.bf16 %v391_v4, %v383_v1  ;;  %v394_v10 = vld [vmem:[%s3215_s0 + $0xc10] sm:$0xff]  ;;  %v400_v11 = vld [vmem:[%s3215_s0 + $0xc40] sm:$0xff] }
  0x93   :  { %v822_v6 = vmax.bf16 %v678_v62, %v676_v61  ;;  %1040 = vst [vmem:[%s3216_s1 + $0x2e8] sm:$0xff] %v821_v2  ;;  %v402_v12 = vld [vmem:[%s3215_s0 + $0xc50] sm:$0xff]  ;;  %v680_v13 = vmax.bf16 %v400_v11, %v392_v9  ;;  %v393_v14 = vld [vmem:[%s3215_s0 + $0xc08] sm:$0xff]  ;;  %v395_v15 = vld [vmem:[%s3215_s0 + $0xc18] sm:$0xff] }
  0x94   :  { %v823_v17 = vmax.bf16 %v679_v8, %v677_v7  ;;  %v682_v18 = vmax.bf16 %v402_v12, %v394_v10  ;;  %v401_v19 = vld [vmem:[%s3215_s0 + $0xc48] sm:$0xff]  ;;  %v403_v20 = vld [vmem:[%s3215_s0 + $0xc58] sm:$0xff]  ;;  %v396_v21 = vld [vmem:[%s3215_s0 + $0xc20] sm:$0xff] }
  0x95   :  { %v1042_v16 = vsel %vm1162_vm6, %v822_v6, %v1041_v63  ;;  %v681_v22 = vmax.bf16 %v401_v19, %v393_v14  ;;  %v683_v23 = vmax.bf16 %v403_v20, %v395_v15  ;;  %v398_v24 = vld [vmem:[%s3215_s0 + $0xc30] sm:$0xff]  ;;  %v404_v26 = vld [vmem:[%s3215_s0 + $0xc60] sm:$0xff]  ;;  %v397_v33 = vld [vmem:[%s3215_s0 + $0xc28] sm:$0xff] }
  0x96   :  { %1043 = vst [vmem:[%s3216_s1 + $0x2f0] sm:$0xff] %v1042_v16  ;;  %v406_v27 = vld [vmem:[%s3215_s0 + $0xc70] sm:$0xff]  ;;  %v1045_v28 = vsel %vm1162_vm6, %v823_v17, %v1044_v5  ;;  %v824_v29 = vmax.bf16 %v682_v18, %v680_v13  ;;  %v684_v30 = vmax.bf16 %v404_v26, %v396_v21  ;;  %v399_v34 = vld [vmem:[%s3215_s0 + $0xc38] sm:$0xff]  ;;  %v405_v36 = vld [vmem:[%s3215_s0 + $0xc68] sm:$0xff] }
  0x97   :  { %v686_v31 = vmax.bf16 %v406_v27, %v398_v24  ;;  %v1049_v32 = vld [vmem:[%s3216_s1 + $0x310] sm:$0xff]  ;;  %1046 = vst [vmem:[%s3216_s1 + $0x2f8] sm:$0xff] %v1045_v28  ;;  %v825_v35 = vmax.bf16 %v683_v23, %v681_v22  ;;  %v407_v37 = vld [vmem:[%s3215_s0 + $0xc78] sm:$0xff]  ;;  %v685_v40 = vmax.bf16 %v405_v36, %v397_v33  ;;  %v408_v42 = vld [vmem:[%s3215_s0 + $0xc80] sm:$0xff] }
  0x98   :  { %v1052_v38 = vld [vmem:[%s3216_s1 + $0x318] sm:$0xff]  ;;  %1047 = vst [vmem:[%s3216_s1 + $0x300] sm:$0xff] %v824_v29  ;;  %v687_v41 = vmax.bf16 %v407_v37, %v399_v34  ;;  %v410_v43 = vld [vmem:[%s3215_s0 + $0xc90] sm:$0xff]  ;;  %v416_v44 = vld [vmem:[%s3215_s0 + $0xcc0] sm:$0xff] }
  0x99   :  { %v826_v39 = vmax.bf16 %v686_v31, %v684_v30  ;;  %1048 = vst [vmem:[%s3216_s1 + $0x308] sm:$0xff] %v825_v35  ;;  %v418_v45 = vld [vmem:[%s3215_s0 + $0xcd0] sm:$0xff]  ;;  %v688_v46 = vmax.bf16 %v416_v44, %v408_v42  ;;  %v409_v47 = vld [vmem:[%s3215_s0 + $0xc88] sm:$0xff]  ;;  %v411_v48 = vld [vmem:[%s3215_s0 + $0xc98] sm:$0xff] }
  0x9a   :  { %v827_v50 = vmax.bf16 %v687_v41, %v685_v40  ;;  %v690_v51 = vmax.bf16 %v418_v45, %v410_v43  ;;  %v417_v52 = vld [vmem:[%s3215_s0 + $0xcc8] sm:$0xff]  ;;  %v419_v53 = vld [vmem:[%s3215_s0 + $0xcd8] sm:$0xff]  ;;  %v412_v54 = vld [vmem:[%s3215_s0 + $0xca0] sm:$0xff] }
  0x9b   :  { %v1050_v49 = vsel %vm1162_vm6, %v826_v39, %v1049_v32  ;;  %v689_v55 = vmax.bf16 %v417_v52, %v409_v47  ;;  %v691_v56 = vmax.bf16 %v419_v53, %v411_v48  ;;  %v414_v57 = vld [vmem:[%s3215_s0 + $0xcb0] sm:$0xff]  ;;  %v420_v58 = vld [vmem:[%s3215_s0 + $0xce0] sm:$0xff]  ;;  %v413_v1 = vld [vmem:[%s3215_s0 + $0xca8] sm:$0xff] }
  0x9c   :  { %1051 = vst [vmem:[%s3216_s1 + $0x310] sm:$0xff] %v1050_v49  ;;  %v422_v59 = vld [vmem:[%s3215_s0 + $0xcf0] sm:$0xff]  ;;  %v1053_v60 = vsel %vm1162_vm6, %v827_v50, %v1052_v38  ;;  %v828_v61 = vmax.bf16 %v690_v51, %v688_v46  ;;  %v692_v62 = vmax.bf16 %v420_v58, %v412_v54  ;;  %v415_v2 = vld [vmem:[%s3215_s0 + $0xcb8] sm:$0xff]  ;;  %v421_v4 = vld [vmem:[%s3215_s0 + $0xce8] sm:$0xff] }
  0x9d   :  { %v694_v63 = vmax.bf16 %v422_v59, %v414_v57  ;;  %v1057_v0 = vld [vmem:[%s3216_s1 + $0x330] sm:$0xff]  ;;  %1054 = vst [vmem:[%s3216_s1 + $0x318] sm:$0xff] %v1053_v60  ;;  %v829_v3 = vmax.bf16 %v691_v56, %v689_v55  ;;  %v423_v5 = vld [vmem:[%s3215_s0 + $0xcf8] sm:$0xff]  ;;  %v693_v8 = vmax.bf16 %v421_v4, %v413_v1  ;;  %v424_v10 = vld [vmem:[%s3215_s0 + $0xd00] sm:$0xff] }
  0x9e   :  { %v1060_v6 = vld [vmem:[%s3216_s1 + $0x338] sm:$0xff]  ;;  %1055 = vst [vmem:[%s3216_s1 + $0x320] sm:$0xff] %v828_v61  ;;  %v695_v9 = vmax.bf16 %v423_v5, %v415_v2  ;;  %v426_v11 = vld [vmem:[%s3215_s0 + $0xd10] sm:$0xff]  ;;  %v432_v12 = vld [vmem:[%s3215_s0 + $0xd40] sm:$0xff] }
  0x9f   :  { %v830_v7 = vmax.bf16 %v694_v63, %v692_v62  ;;  %1056 = vst [vmem:[%s3216_s1 + $0x328] sm:$0xff] %v829_v3  ;;  %v434_v13 = vld [vmem:[%s3215_s0 + $0xd50] sm:$0xff]  ;;  %v696_v14 = vmax.bf16 %v432_v12, %v424_v10  ;;  %v425_v15 = vld [vmem:[%s3215_s0 + $0xd08] sm:$0xff]  ;;  %v427_v16 = vld [vmem:[%s3215_s0 + $0xd18] sm:$0xff] }
  0xa0   :  { %v831_v18 = vmax.bf16 %v695_v9, %v693_v8  ;;  %v698_v19 = vmax.bf16 %v434_v13, %v426_v11  ;;  %v433_v20 = vld [vmem:[%s3215_s0 + $0xd48] sm:$0xff]  ;;  %v435_v21 = vld [vmem:[%s3215_s0 + $0xd58] sm:$0xff]  ;;  %v428_v22 = vld [vmem:[%s3215_s0 + $0xd20] sm:$0xff] }
  0xa1   :  { %v1058_v17 = vsel %vm1162_vm6, %v830_v7, %v1057_v0  ;;  %v697_v23 = vmax.bf16 %v433_v20, %v425_v15  ;;  %v699_v24 = vmax.bf16 %v435_v21, %v427_v16  ;;  %v430_v26 = vld [vmem:[%s3215_s0 + $0xd30] sm:$0xff]  ;;  %v436_v27 = vld [vmem:[%s3215_s0 + $0xd60] sm:$0xff]  ;;  %v429_v34 = vld [vmem:[%s3215_s0 + $0xd28] sm:$0xff] }
  0xa2   :  { %1059 = vst [vmem:[%s3216_s1 + $0x330] sm:$0xff] %v1058_v17  ;;  %v438_v28 = vld [vmem:[%s3215_s0 + $0xd70] sm:$0xff]  ;;  %v1061_v29 = vsel %vm1162_vm6, %v831_v18, %v1060_v6  ;;  %v832_v30 = vmax.bf16 %v698_v19, %v696_v14  ;;  %v700_v31 = vmax.bf16 %v436_v27, %v428_v22  ;;  %v431_v35 = vld [vmem:[%s3215_s0 + $0xd38] sm:$0xff]  ;;  %v437_v37 = vld [vmem:[%s3215_s0 + $0xd68] sm:$0xff] }
  0xa3   :  { %v702_v32 = vmax.bf16 %v438_v28, %v430_v26  ;;  %v1065_v33 = vld [vmem:[%s3216_s1 + $0x350] sm:$0xff]  ;;  %1062 = vst [vmem:[%s3216_s1 + $0x338] sm:$0xff] %v1061_v29  ;;  %v833_v36 = vmax.bf16 %v699_v24, %v697_v23  ;;  %v439_v38 = vld [vmem:[%s3215_s0 + $0xd78] sm:$0xff]  ;;  %v701_v41 = vmax.bf16 %v437_v37, %v429_v34  ;;  %v440_v43 = vld [vmem:[%s3215_s0 + $0xd80] sm:$0xff] }
  0xa4   :  { %v1068_v39 = vld [vmem:[%s3216_s1 + $0x358] sm:$0xff]  ;;  %1063 = vst [vmem:[%s3216_s1 + $0x340] sm:$0xff] %v832_v30  ;;  %v703_v42 = vmax.bf16 %v439_v38, %v431_v35  ;;  %v442_v44 = vld [vmem:[%s3215_s0 + $0xd90] sm:$0xff]  ;;  %v448_v45 = vld [vmem:[%s3215_s0 + $0xdc0] sm:$0xff] }
  0xa5   :  { %v834_v40 = vmax.bf16 %v702_v32, %v700_v31  ;;  %1064 = vst [vmem:[%s3216_s1 + $0x348] sm:$0xff] %v833_v36  ;;  %v450_v46 = vld [vmem:[%s3215_s0 + $0xdd0] sm:$0xff]  ;;  %v704_v47 = vmax.bf16 %v448_v45, %v440_v43  ;;  %v441_v48 = vld [vmem:[%s3215_s0 + $0xd88] sm:$0xff]  ;;  %v443_v49 = vld [vmem:[%s3215_s0 + $0xd98] sm:$0xff] }
  0xa6   :  { %v835_v51 = vmax.bf16 %v703_v42, %v701_v41  ;;  %v706_v52 = vmax.bf16 %v450_v46, %v442_v44  ;;  %v449_v53 = vld [vmem:[%s3215_s0 + $0xdc8] sm:$0xff]  ;;  %v451_v54 = vld [vmem:[%s3215_s0 + $0xdd8] sm:$0xff]  ;;  %v444_v55 = vld [vmem:[%s3215_s0 + $0xda0] sm:$0xff] }
  0xa7   :  { %v1066_v50 = vsel %vm1162_vm6, %v834_v40, %v1065_v33  ;;  %v705_v56 = vmax.bf16 %v449_v53, %v441_v48  ;;  %v707_v57 = vmax.bf16 %v451_v54, %v443_v49  ;;  %v446_v58 = vld [vmem:[%s3215_s0 + $0xdb0] sm:$0xff]  ;;  %v452_v59 = vld [vmem:[%s3215_s0 + $0xde0] sm:$0xff]  ;;  %v445_v2 = vld [vmem:[%s3215_s0 + $0xda8] sm:$0xff] }
  0xa8   :  { %1067 = vst [vmem:[%s3216_s1 + $0x350] sm:$0xff] %v1066_v50  ;;  %v454_v60 = vld [vmem:[%s3215_s0 + $0xdf0] sm:$0xff]  ;;  %v1069_v61 = vsel %vm1162_vm6, %v835_v51, %v1068_v39  ;;  %v836_v62 = vmax.bf16 %v706_v52, %v704_v47  ;;  %v708_v63 = vmax.bf16 %v452_v59, %v444_v55  ;;  %v447_v3 = vld [vmem:[%s3215_s0 + $0xdb8] sm:$0xff]  ;;  %v453_v5 = vld [vmem:[%s3215_s0 + $0xde8] sm:$0xff] }
  0xa9   :  { %v710_v0 = vmax.bf16 %v454_v60, %v446_v58  ;;  %v1073_v1 = vld [vmem:[%s3216_s1 + $0x370] sm:$0xff]  ;;  %1070 = vst [vmem:[%s3216_s1 + $0x358] sm:$0xff] %v1069_v61  ;;  %v837_v4 = vmax.bf16 %v707_v57, %v705_v56  ;;  %v455_v6 = vld [vmem:[%s3215_s0 + $0xdf8] sm:$0xff]  ;;  %v709_v9 = vmax.bf16 %v453_v5, %v445_v2  ;;  %v456_v11 = vld [vmem:[%s3215_s0 + $0xe00] sm:$0xff] }
  0xaa   :  { %v1076_v7 = vld [vmem:[%s3216_s1 + $0x378] sm:$0xff]  ;;  %1071 = vst [vmem:[%s3216_s1 + $0x360] sm:$0xff] %v836_v62  ;;  %v711_v10 = vmax.bf16 %v455_v6, %v447_v3  ;;  %v458_v12 = vld [vmem:[%s3215_s0 + $0xe10] sm:$0xff]  ;;  %v464_v13 = vld [vmem:[%s3215_s0 + $0xe40] sm:$0xff] }
  0xab   :  { %v838_v8 = vmax.bf16 %v710_v0, %v708_v63  ;;  %1072 = vst [vmem:[%s3216_s1 + $0x368] sm:$0xff] %v837_v4  ;;  %v466_v14 = vld [vmem:[%s3215_s0 + $0xe50] sm:$0xff]  ;;  %v712_v15 = vmax.bf16 %v464_v13, %v456_v11  ;;  %v457_v16 = vld [vmem:[%s3215_s0 + $0xe08] sm:$0xff]  ;;  %v459_v17 = vld [vmem:[%s3215_s0 + $0xe18] sm:$0xff] }
  0xac   :  { %v839_v19 = vmax.bf16 %v711_v10, %v709_v9  ;;  %v714_v20 = vmax.bf16 %v466_v14, %v458_v12  ;;  %v465_v21 = vld [vmem:[%s3215_s0 + $0xe48] sm:$0xff]  ;;  %v467_v22 = vld [vmem:[%s3215_s0 + $0xe58] sm:$0xff]  ;;  %v460_v23 = vld [vmem:[%s3215_s0 + $0xe20] sm:$0xff] }
  0xad   :  { %v1074_v18 = vsel %vm1162_vm6, %v838_v8, %v1073_v1  ;;  %v713_v24 = vmax.bf16 %v465_v21, %v457_v16  ;;  %v715_v26 = vmax.bf16 %v467_v22, %v459_v17  ;;  %v462_v27 = vld [vmem:[%s3215_s0 + $0xe30] sm:$0xff]  ;;  %v468_v28 = vld [vmem:[%s3215_s0 + $0xe60] sm:$0xff]  ;;  %v461_v35 = vld [vmem:[%s3215_s0 + $0xe28] sm:$0xff] }
  0xae   :  { %1075 = vst [vmem:[%s3216_s1 + $0x370] sm:$0xff] %v1074_v18  ;;  %v470_v29 = vld [vmem:[%s3215_s0 + $0xe70] sm:$0xff]  ;;  %v1077_v30 = vsel %vm1162_vm6, %v839_v19, %v1076_v7  ;;  %v840_v31 = vmax.bf16 %v714_v20, %v712_v15  ;;  %v716_v32 = vmax.bf16 %v468_v28, %v460_v23  ;;  %v463_v36 = vld [vmem:[%s3215_s0 + $0xe38] sm:$0xff]  ;;  %v469_v38 = vld [vmem:[%s3215_s0 + $0xe68] sm:$0xff] }
  0xaf   :  { %v718_v33 = vmax.bf16 %v470_v29, %v462_v27  ;;  %v1081_v34 = vld [vmem:[%s3216_s1 + $0x390] sm:$0xff]  ;;  %1078 = vst [vmem:[%s3216_s1 + $0x378] sm:$0xff] %v1077_v30  ;;  %v841_v37 = vmax.bf16 %v715_v26, %v713_v24  ;;  %v471_v39 = vld [vmem:[%s3215_s0 + $0xe78] sm:$0xff]  ;;  %v717_v42 = vmax.bf16 %v469_v38, %v461_v35  ;;  %v472_v44 = vld [vmem:[%s3215_s0 + $0xe80] sm:$0xff] }
  0xb0   :  { %v1084_v40 = vld [vmem:[%s3216_s1 + $0x398] sm:$0xff]  ;;  %1079 = vst [vmem:[%s3216_s1 + $0x380] sm:$0xff] %v840_v31  ;;  %v719_v43 = vmax.bf16 %v471_v39, %v463_v36  ;;  %v474_v45 = vld [vmem:[%s3215_s0 + $0xe90] sm:$0xff]  ;;  %v480_v46 = vld [vmem:[%s3215_s0 + $0xec0] sm:$0xff] }
  0xb1   :  { %v842_v41 = vmax.bf16 %v718_v33, %v716_v32  ;;  %1080 = vst [vmem:[%s3216_s1 + $0x388] sm:$0xff] %v841_v37  ;;  %v482_v47 = vld [vmem:[%s3215_s0 + $0xed0] sm:$0xff]  ;;  %v720_v48 = vmax.bf16 %v480_v46, %v472_v44  ;;  %v473_v49 = vld [vmem:[%s3215_s0 + $0xe88] sm:$0xff]  ;;  %v475_v50 = vld [vmem:[%s3215_s0 + $0xe98] sm:$0xff] }
  0xb2   :  { %v843_v52 = vmax.bf16 %v719_v43, %v717_v42  ;;  %v722_v53 = vmax.bf16 %v482_v47, %v474_v45  ;;  %v481_v54 = vld [vmem:[%s3215_s0 + $0xec8] sm:$0xff]  ;;  %v483_v55 = vld [vmem:[%s3215_s0 + $0xed8] sm:$0xff]  ;;  %v476_v56 = vld [vmem:[%s3215_s0 + $0xea0] sm:$0xff] }
  0xb3   :  { %v1082_v51 = vsel %vm1162_vm6, %v842_v41, %v1081_v34  ;;  %v721_v57 = vmax.bf16 %v481_v54, %v473_v49  ;;  %v723_v58 = vmax.bf16 %v483_v55, %v475_v50  ;;  %v478_v59 = vld [vmem:[%s3215_s0 + $0xeb0] sm:$0xff]  ;;  %v484_v60 = vld [vmem:[%s3215_s0 + $0xee0] sm:$0xff]  ;;  %v477_v2 = vld [vmem:[%s3215_s0 + $0xea8] sm:$0xff] }
  0xb4   :  { %1083 = vst [vmem:[%s3216_s1 + $0x390] sm:$0xff] %v1082_v51  ;;  %v486_v61 = vld [vmem:[%s3215_s0 + $0xef0] sm:$0xff]  ;;  %v1085_v62 = vsel %vm1162_vm6, %v843_v52, %v1084_v40  ;;  %v844_v63 = vmax.bf16 %v722_v53, %v720_v48  ;;  %v724_v0 = vmax.bf16 %v484_v60, %v476_v56  ;;  %v479_v3 = vld [vmem:[%s3215_s0 + $0xeb8] sm:$0xff]  ;;  %v485_v6 = vld [vmem:[%s3215_s0 + $0xee8] sm:$0xff] }
  0xb5   :  { %v726_v1 = vmax.bf16 %v486_v61, %v478_v59  ;;  %1086 = vst [vmem:[%s3216_s1 + $0x398] sm:$0xff] %v1085_v62  ;;  %v845_v4 = vmax.bf16 %v723_v58, %v721_v57  ;;  %v1089_v5 = vld [vmem:[%s3216_s1 + $0x3b0] sm:$0xff]  ;;  %v487_v7 = vld [vmem:[%s3215_s0 + $0xef8] sm:$0xff]  ;;  %v725_v9 = vmax.bf16 %v485_v6, %v477_v2 }
  0xb6   :  { %1087 = vst [vmem:[%s3216_s1 + $0x3a0] sm:$0xff] %v844_v63  ;;  %v727_v10 = vmax.bf16 %v487_v7, %v479_v3  ;;  %v1092_v11 = vld [vmem:[%s3216_s1 + $0x3b8] sm:$0xff] }
  0xb7   :  { %v846_v8 = vmax.bf16 %v726_v1, %v724_v0  ;;  %1088 = vst [vmem:[%s3216_s1 + $0x3a8] sm:$0xff] %v845_v4 }
  0xb8   :  { %v847_v13 = vmax.bf16 %v727_v10, %v725_v9 }
  0xb9   :  { %v1090_v12 = vsel %vm1162_vm6, %v846_v8, %v1089_v5 }
  0xba   :  { %1091 = vst [vmem:[%s3216_s1 + $0x3b0] sm:$0xff] %v1090_v12  ;;  %v1093_v14 = vsel %vm1162_vm6, %v847_v13, %v1092_v11 }
  0xbb   :  { %1094 = vst [vmem:[%s3216_s1 + $0x3b8] sm:$0xff] %v1093_v14 }

// kernel: net_forward.9
= control target key start
LH: loop header
LB: loop body
LE: loop exit
PB: predicated region body
PF: predicated region fallthrough
CT: control target
= control target key end

     0   :  { %s5179_s0 = inlined_call_operand.vmem [shape: bf16[338,4608], index: 0, kind: input, shape index: {}]   ;;  %s5180_s1 = inlined_call_operand.vmem [shape: bf16[4608,512], index: 1, kind: input, shape index: {}]   ;;  %s5181_s2 = inlined_call_operand.vmem [shape: f32[1,512], index: 2, kind: input, shape index: {}]   ;;  %s5182_s3 = inlined_call_operand.vmem [shape: bf16[338,512], index: 3, kind: output, shape index: {}]  }
   0x1   :  { %5184 = sst [smem:[#allocation6_spill]] %s5179_s0 }
   0x2   :  { %s4325_s12 = smov 0   ;;  %s4327_s13 = smov 0  }
   0x3   :  { %s4329_s14 = smov 0   ;;  %s4331_s15 = smov 0  }
   0x4   :  { %s4333_s16 = smov 0   ;;  %s4335_s17 = smov 0  }
   0x5   :  { %s4337_s18 = smov 0   ;;  %s4339_s19 = smov 0  }
   0x6   :  { %s4341_s20 = smov 0  }
   0x7 LB: > { %s22_s21 = sadd.s32 1, %s4230_s18  ;;  %s25_s22 = sadd.s32 1, %s4234_s19  ;;  %s4238_s20 = sphi %s4341_s20, %s13_s20   ;;  %s4234_s19 = sphi %s4339_s19, %s5207_s19   ;;  %s4230_s18 = sphi %s4337_s18, %s5206_s18   ;;  %s4226_s17 = sphi %s4335_s17, %s5205_s17   ;;  %s4222_s16 = sphi %s4333_s16, %s5204_s16   ;;  %s4218_s15 = sphi %s4331_s15, %s5203_s15   ;;  %s4214_s14 = sphi %s4329_s14, %s5202_s14   ;;  %s4210_s13 = sphi %s4327_s13, %s5201_s13   ;;  %s4206_s12 = sphi %s4325_s12, %s5200_s12  }
   0x8   : > { %p23_p0 = scmp.ge.s32.totalorder %s22_s21, 9  ;;  %p41_p1 = scmp.ne.s32.totalorder %s4218_s15, %s4214_s14 }
   0x9   : > { %s3241_s23 = sadd.s32 4294967295, %s4238_s20   ;;  %p42_p2 = scmp.eq.s32.totalorder %s4238_s20, 0 }
   0xa   : > { %s5209_s21 = smov (%p23_p0, %s22_s21), 0  ;;  %s5211_s22 = smov (!%p23_p0, %s25_s22), %s4234_s19 }
   0xb   : > { %p27_p3 = scmp.ge.s32.totalorder %s5211_s22, 2  ;;  %s30_s24 = ssub.s32 %s4230_s18, %s5209_s21 }
   0xc   : > { %p4381_p4 = por %p42_p2, %p41_p1  ;;  %p117_p5 = scmp.ne.s32.totalorder %s4210_s13, %s4206_s12 }
   0xd   : > { %s5213_s22 = smov (%p27_p3, %s5211_s22), 0  ;;  %s34_s26 = sadd.s32 1, %s4218_s15 }
   0xe   : > { %5186 = sst [smem:[#allocation5_spill]] %s5213_s22  ;;  %p118_p6 = scmp.eq.s32.totalorder %s3241_s23, 17 }
   0xf   : > { %s29_s27 = ssub.s32 %s4234_s19, %s5213_s22  ;;  %s107_s28 = sadd.s32 1, %s4210_s13 }
  0x10   : > { %s31_s29 = sor.u32 %s30_s24, %s29_s27  ;;  %p105_p7 = scmp.eq.s32.totalorder %s29_s27, 0 }
  0x11   : > { %p32_p8 = scmp.eq.s32.totalorder %s31_s29, 0  ;;  %p4393_p9 = por %p118_p6, %p117_p5 }
  0x12   : > { %s4398_s4 = scalar_select %p105_p7, %s4210_s13, %s107_s28  }
  0x13   : > { %s4401_s5 = scalar_select %p32_p8, %s4218_s15, %s34_s26  }
  0x14   : > { %p3244_p10 = scmp.ge.s32.totalorder %s4238_s20, 18 }
  0x16   : > { %143 = sbr.rel (%p3244_p10) target bundleno = 110 (0x6e), region = 20 }
  0x1d   : > { %146 = sbr.rel (!%p4381_p4) target bundleno = 110 (0x6e), region = 24  ;;  %s148_s6 = sand.u32 (%p4381_p4), 1, %s4218_s15  }
  0x1e   : > { %s151_s7 = smul.u32 (%p4381_p4), 22, %s4234_s19  ;;  %s3245_s9 = sshll.u32 (%p4381_p4), %s4230_s18, 2 }
  0x1f   : > { %s3630_s8 = smul.u32 (%p4381_p4), 352, %s148_s6  ;;  %s5188_s0 = sld [smem:[#allocation6_spill]] (%p4381_p4) }
  0x20   : > { %s153_s10 = ssub.s32 (%p4381_p4), 43, %s151_s7  ;;  %s3634_s11 = smul.u32 (%p4381_p4), 792, %s4234_s19 }
  0x21   : > { %p154_p11 = scmp.lt.s32.totalorder (%p4381_p4), %s153_s10, 22  ;;  %s4418_s29 = scalar_lea.vmem (%p4381_p4), [#allocation3], %s3630_s8  }
  0x22   : > { %s160_s23 = sadd.s32 (%p4381_p4), %s3634_s11, %s3245_s9 }
  0x23   : > { %s3249_s24 = sshll.u32 (%p4381_p4), %s160_s23, 2 }
  0x24   : > { %s5215_s10 = smov (!%p154_p11, %s153_s10), 22 }
  0x25   : > { %s3492_s26 = sshll.u32 %s5215_s10, 8  ;;  %s4416_s28 = scalar_lea.vmem %s5188_s0, %s3249_s24  }
  0x26   : > { %p3250_p12 = scmp.eq.s32.totalorder %s3492_s26, 0 }
  0x27   : > { %3838 = sdivrem.u32 (!%p3250_p12), %s5215_s10, 22 }
  0x28   : > { %165 = sbr.rel (%p3250_p12) target bundleno = 110 (0x6e), region = 28 }
  0x30   : > { %s4421_s6 = spop.drf %3838 }
  0x31   : > { %p3251_p13 = scmp.le.s32.totalorder %s4421_s6, 0 }
  0x32   : > { %s5189_s7 = smov (!%p3251_p13), %s4418_s29  ;;  %s5190_s9 = smov (!%p3251_p13), %s4416_s28 }
  0x33   : > { %3152 = sbr.rel (%p3251_p13) target bundleno = 81 (0x51), region = 136  ;;  %s4430_s11 = smov (!%p3251_p13), 0  }
  0x34   : > { %s4432_s23 = smov (!%p3251_p13), 0  }
  0x3a LB: >> { %v179_v0 = vld [vmem:[%s4246_s9] sm:$0xff]  ;;  %v181_v1 = vld [vmem:[%s4246_s9 + $0x90] sm:$0xff]  ;;  %s267_s8 = sadd.s32 1, %s4250_s11  ;;  %v223_v22 = vld [vmem:[%s4246_s9 + $0x8] sm:$0xff]  ;;  %s173_s23 = sadd.s32 1, %s4254_s23   ;;  %s4254_s23 = sphi %s4432_s23, %s173_s23   ;;  %s4250_s11 = sphi %s4430_s11, %s5193_s11   ;;  %s4246_s9 = sphi %s5190_s9, %s5192_s9   ;;  %s4242_s7 = sphi %s5189_s7, %s5191_s7  }
  0x3b   : >> { %v183_v2 = vld [vmem:[%s4246_s9 + $0x120] sm:$0xff]  ;;  %180 = vst [vmem:[%s4242_s7] sm:$0xff] %v179_v0  ;;  %182 = vst [vmem:[%s4242_s7 + $0x10] sm:$0xff] %v181_v1  ;;  %v185_v3 = vld [vmem:[%s4246_s9 + $0x1b0] sm:$0xff]  ;;  %p268_p0 = scmp.ge.s32.totalorder %s267_s8, %s4421_s6  ;;  %p172_p1 = scmp.ge.s32.totalorder %s173_s23, %s4421_s6 }
  0x3c   : >> { %184 = vst [vmem:[%s4242_s7 + $0x20] sm:$0xff] %v183_v2  ;;  %v187_v4 = vld [vmem:[%s4246_s9 + $0x240] sm:$0xff]  ;;  %v189_v5 = vld [vmem:[%s4246_s9 + $0x2d0] sm:$0xff]  ;;  %186 = vst [vmem:[%s4242_s7 + $0x30] sm:$0xff] %v185_v3 }
  0x3d   : >> { %188 = vst [vmem:[%s4242_s7 + $0x40] sm:$0xff] %v187_v4  ;;  %190 = vst [vmem:[%s4242_s7 + $0x50] sm:$0xff] %v189_v5  ;;  %v191_v6 = vld [vmem:[%s4246_s9 + $0x360] sm:$0xff]  ;;  %v193_v7 = vld [vmem:[%s4246_s9 + $0x3f0] sm:$0xff]  ;;  %s5217_s8 = smov (%p268_p0, %s267_s8), 0 }
  0x3e   : >> { %v195_v8 = vld [vmem:[%s4246_s9 + $0x480] sm:$0xff]  ;;  %192 = vst [vmem:[%s4242_s7 + $0x60] sm:$0xff] %v191_v6  ;;  %194 = vst [vmem:[%s4242_s7 + $0x70] sm:$0xff] %v193_v7  ;;  %v197_v9 = vld [vmem:[%s4246_s9 + $0x510] sm:$0xff]  ;;  %s270_s24 = smul.u32 3168, %s5217_s8  ;;  %s5193_s11 = smov %s5217_s8 }
  0x3f   : >> { %196 = vst [vmem:[%s4242_s7 + $0x80] sm:$0xff] %v195_v8  ;;  %v199_v10 = vld [vmem:[%s4246_s9 + $0x5a0] sm:$0xff]  ;;  %v201_v11 = vld [vmem:[%s4246_s9 + $0x630] sm:$0xff]  ;;  %198 = vst [vmem:[%s4242_s7 + $0x90] sm:$0xff] %v197_v9  ;;  %s271_s26 = smul.u32 352, %s5217_s8 }
  0x40   : >> { %200 = vst [vmem:[%s4242_s7 + $0xa0] sm:$0xff] %v199_v10  ;;  %202 = vst [vmem:[%s4242_s7 + $0xb0] sm:$0xff] %v201_v11  ;;  %v203_v12 = vld [vmem:[%s4246_s9 + $0x6c0] sm:$0xff]  ;;  %v205_v13 = vld [vmem:[%s4246_s9 + $0x750] sm:$0xff]  ;;  %s4495_s27 = scalar_lea.vmem %s4416_s28, %s270_s24  }
  0x41   : >> { %v207_v14 = vld [vmem:[%s4246_s9 + $0x7e0] sm:$0xff]  ;;  %204 = vst [vmem:[%s4242_s7 + $0xc0] sm:$0xff] %v203_v12  ;;  %206 = vst [vmem:[%s4242_s7 + $0xd0] sm:$0xff] %v205_v13  ;;  %v209_v15 = vld [vmem:[%s4246_s9 + $0x870] sm:$0xff]  ;;  %s4504_s25 = scalar_lea.vmem %s4418_s29, %s271_s26 [#allocation3]  }
  0x42   : >> { %208 = vst [vmem:[%s4242_s7 + $0xe0] sm:$0xff] %v207_v14  ;;  %v211_v16 = vld [vmem:[%s4246_s9 + $0x900] sm:$0xff]  ;;  %v213_v17 = vld [vmem:[%s4246_s9 + $0x990] sm:$0xff]  ;;  %210 = vst [vmem:[%s4242_s7 + $0xf0] sm:$0xff] %v209_v15 }
  0x43   : >> { %212 = vst [vmem:[%s4242_s7 + $0x100] sm:$0xff] %v211_v16  ;;  %214 = vst [vmem:[%s4242_s7 + $0x110] sm:$0xff] %v213_v17  ;;  %v215_v18 = vld [vmem:[%s4246_s9 + $0xa20] sm:$0xff]  ;;  %v217_v19 = vld [vmem:[%s4246_s9 + $0xab0] sm:$0xff] }
  0x44   : >> { %v219_v20 = vld [vmem:[%s4246_s9 + $0xb40] sm:$0xff]  ;;  %216 = vst [vmem:[%s4242_s7 + $0x120] sm:$0xff] %v215_v18  ;;  %218 = vst [vmem:[%s4242_s7 + $0x130] sm:$0xff] %v217_v19  ;;  %v221_v21 = vld [vmem:[%s4246_s9 + $0xbd0] sm:$0xff] }
  0x45   : >> { %220 = vst [vmem:[%s4242_s7 + $0x140] sm:$0xff] %v219_v20  ;;  %v225_v23 = vld [vmem:[%s4246_s9 + $0x98] sm:$0xff]  ;;  %222 = vst [vmem:[%s4242_s7 + $0x150] sm:$0xff] %v221_v21  ;;  %v227_v24 = vld [vmem:[%s4246_s9 + $0x128] sm:$0xff] }
  0x46   : >> { %224 = vst [vmem:[%s4242_s7 + $0x8] sm:$0xff] %v223_v22  ;;  %226 = vst [vmem:[%s4242_s7 + $0x18] sm:$0xff] %v225_v23  ;;  %v229_v25 = vld [vmem:[%s4246_s9 + $0x1b8] sm:$0xff]  ;;  %v231_v26 = vld [vmem:[%s4246_s9 + $0x248] sm:$0xff] }
  0x47   : >> { %228 = vst [vmem:[%s4242_s7 + $0x28] sm:$0xff] %v227_v24  ;;  %230 = vst [vmem:[%s4242_s7 + $0x38] sm:$0xff] %v229_v25  ;;  %v233_v27 = vld [vmem:[%s4246_s9 + $0x2d8] sm:$0xff]  ;;  %v235_v28 = vld [vmem:[%s4246_s9 + $0x368] sm:$0xff] }
  0x48   : >> { %232 = vst [vmem:[%s4242_s7 + $0x48] sm:$0xff] %v231_v26  ;;  %v237_v29 = vld [vmem:[%s4246_s9 + $0x3f8] sm:$0xff]  ;;  %234 = vst [vmem:[%s4242_s7 + $0x58] sm:$0xff] %v233_v27  ;;  %v239_v30 = vld [vmem:[%s4246_s9 + $0x488] sm:$0xff] }
  0x49   : >> { %236 = vst [vmem:[%s4242_s7 + $0x68] sm:$0xff] %v235_v28  ;;  %238 = vst [vmem:[%s4242_s7 + $0x78] sm:$0xff] %v237_v29  ;;  %v241_v31 = vld [vmem:[%s4246_s9 + $0x518] sm:$0xff]  ;;  %v243_v32 = vld [vmem:[%s4246_s9 + $0x5a8] sm:$0xff] }
  0x4a   : >> { %240 = vst [vmem:[%s4242_s7 + $0x88] sm:$0xff] %v239_v30  ;;  %242 = vst [vmem:[%s4242_s7 + $0x98] sm:$0xff] %v241_v31  ;;  %v245_v33 = vld [vmem:[%s4246_s9 + $0x638] sm:$0xff]  ;;  %v247_v34 = vld [vmem:[%s4246_s9 + $0x6c8] sm:$0xff]  ;;  %175 = sbr.rel (!%p172_p1) target bundleno = 58 (0x3a), region = 142 }
  0x4b   : >> { %244 = vst [vmem:[%s4242_s7 + $0xa8] sm:$0xff] %v243_v32  ;;  %v249_v35 = vld [vmem:[%s4246_s9 + $0x758] sm:$0xff]  ;;  %246 = vst [vmem:[%s4242_s7 + $0xb8] sm:$0xff] %v245_v33  ;;  %v251_v36 = vld [vmem:[%s4246_s9 + $0x7e8] sm:$0xff] }
  0x4c   : >> { %248 = vst [vmem:[%s4242_s7 + $0xc8] sm:$0xff] %v247_v34  ;;  %250 = vst [vmem:[%s4242_s7 + $0xd8] sm:$0xff] %v249_v35  ;;  %v253_v37 = vld [vmem:[%s4246_s9 + $0x878] sm:$0xff]  ;;  %v255_v38 = vld [vmem:[%s4246_s9 + $0x908] sm:$0xff] }
  0x4d   : >> { %252 = vst [vmem:[%s4242_s7 + $0xe8] sm:$0xff] %v251_v36  ;;  %254 = vst [vmem:[%s4242_s7 + $0xf8] sm:$0xff] %v253_v37  ;;  %v257_v39 = vld [vmem:[%s4246_s9 + $0x998] sm:$0xff]  ;;  %v259_v40 = vld [vmem:[%s4246_s9 + $0xa28] sm:$0xff] }
  0x4e   : >> { %256 = vst [vmem:[%s4242_s7 + $0x108] sm:$0xff] %v255_v38  ;;  %v261_v41 = vld [vmem:[%s4246_s9 + $0xab8] sm:$0xff]  ;;  %258 = vst [vmem:[%s4242_s7 + $0x118] sm:$0xff] %v257_v39  ;;  %v263_v42 = vld [vmem:[%s4246_s9 + $0xb48] sm:$0xff] }
  0x4f   : >> { %260 = vst [vmem:[%s4242_s7 + $0x128] sm:$0xff] %v259_v40  ;;  %262 = vst [vmem:[%s4242_s7 + $0x138] sm:$0xff] %v261_v41  ;;  %v265_v43 = vld [vmem:[%s4246_s9 + $0xbd8] sm:$0xff]  ;;  %s5192_s9 = smov %s4495_s27 }
  0x50   : >> { %264 = vst [vmem:[%s4242_s7 + $0x148] sm:$0xff] %v263_v42  ;;  %266 = vst [vmem:[%s4242_s7 + $0x158] sm:$0xff] %v265_v43  ;;  %s5191_s7 = smov %s4504_s25 }
  0x51 PF: > { %3840 = sdivrem.u32 %s5215_s10, 22 }
  0x52   : > { %s3252_s24 = smul.u32 3168, %s4421_s6 }
  0x53   : > { %s3253_s26 = smul.u32 352, %s4421_s6 }
  0x54   : > { %s4560_s0 = scalar_lea.vmem %s4416_s28, %s3252_s24  }
  0x55   : > { %s4563_s22 = scalar_lea.vmem %s4418_s29, %s3253_s26 [#allocation3]  }
  0x5a   : > { %s4565_s25 = spop.drf %3840 }
  0x5b   : > { %p3254_p2 = scmp.le.s32.totalorder %s4565_s25, 0 }
  0x5c   : > { %s4256_s7 = smov (!%p3254_p2), %s4563_s22   ;;  %s4260_s9 = smov (!%p3254_p2), %s4560_s0  }
  0x5d   : > { %3166 = sbr.rel (%p3254_p2) target bundleno = 110 (0x6e), region = 147  ;;  %s4264_s11 = smov (!%p3254_p2), 0  }
  0x5e   : > { %s4268_s23 = smov (!%p3254_p2), 0  }
  0x64 LB: >> { %v290_v44 = vld [vmem:[%s4262_s9] sm:$0xff]  ;;  %v292_v45 = vld [vmem:[%s4262_s9 + $0x8] sm:$0xff]  ;;  %s294_s10 = sadd.s32 1, %s4266_s11  ;;  %s284_s23 = sadd.s32 1, %s4270_s23   ;;  %s4270_s23 = sphi %s4268_s23, %s284_s23   ;;  %s4266_s11 = sphi %s4264_s11, %s4265_s11   ;;  %s4262_s9 = sphi %s4260_s9, %s299_s9   ;;  %s4258_s7 = sphi %s4256_s7, %s300_s7  }
  0x65   : >> { %291 = vst [vmem:[%s4258_s7] sm:$0xff] %v290_v44  ;;  %293 = vst [vmem:[%s4258_s7 + $0x8] sm:$0xff] %v292_v45  ;;  %p295_p3 = scmp.ge.s32.totalorder %s294_s10, %s4565_s25  ;;  %p283_p4 = scmp.ge.s32.totalorder %s284_s23, %s4565_s25 }
  0x67   : >> { %s5219_s10 = smov (%p295_p3, %s294_s10), 0  ;;  %286 = sbr.rel (!%p283_p4) target bundleno = 100 (0x64), region = 153 }
  0x68   : >> { %s297_s28 = smul.u32 144, %s5219_s10  ;;  %s3255_s29 = sshll.u32 %s5219_s10, 4 }
  0x69   : >> { %s300_s7 = scalar_lea.vmem %s4563_s22, %s3255_s29 [#allocation3]   ;;  %s4265_s11 = smov %s5219_s10  }
  0x6a   : >> { %s299_s9 = scalar_lea.vmem %s4560_s0, %s297_s28  }
  0x6e PF: > { %p3256_p5 = scmp.ge.s32.totalorder %s4238_s20, 1  ;;  %p315_p6 = scmp.lt.s32.totalorder %s4238_s20, 19 }
  0x70   : > { %p316_p7 = pnand %p3256_p5, %p315_p6 }
  0x71   : > { %s322_s6 = sand.u32 (!%p316_p7), 1, %s4214_s14   ;;  %s347_s8 = sand.u32 (!%p316_p7), 1, %s4206_s12  }
  0x72   : > { %319 = sbr.rel (%p316_p7) target bundleno = 750 (0x2ee), region = 58  ;;  %s3257_s24 = sshll.u32 (!%p316_p7), %s4222_s16, 6 }
  0x73   : > { %s3632_s27 = smul.u32 (!%p316_p7), 352, %s322_s6  ;;  %p358_p8 = scmp.lt.s32.totalorder (!%p316_p7), %s3257_s24, 575 }
  0x74   : > { %s3633_s26 = smul.u32 (!%p316_p7), 352, %s347_s8  ;;  %p3260_p10 = scmp.ne.s32.totalorder (!%p316_p7), %s4222_s16, 0 }
  0x75   : > { %s4584_s9 = scalar_lea.vmem (!%p316_p7), [#allocation3], %s3632_s27 }
  0x76   : > { %s4586_s11 = scalar_lea.vmem (!%p316_p7), [#allocation4], %s3633_s26  }
  0x79   : > { %s5221_s24 = smov (!%p358_p8, %s3257_s24), 575  ;;  %373 = sbr.rel (%p3260_p10) target bundleno = 167 (0xa7), region = 66 }
  0x7a   : > { %s3493_s0 = sshll.u32 %s5221_s24, 4  ;;  %v4304_v46 = vmov (!%p3260_p10), 0.0  }
  0x7b   : > { %s4582_s7 = scalar_lea.vmem %s5180_s1, %s3493_s0  ;;  %374 = vst [vmem:[#allocation2] sm:$0xff] (!%p3260_p10), %v4304_v46  ;;  %375 = vst [vmem:[#allocation2 + $0x8] sm:$0xff] (!%p3260_p10), %v4304_v46 }
  0x7c   : > { %376 = vst [vmem:[#allocation2 + $0x10] sm:$0xff] (!%p3260_p10), %v4304_v46  ;;  %377 = vst [vmem:[#allocation2 + $0x18] sm:$0xff] (!%p3260_p10), %v4304_v46 }
  0x7d   : > { %378 = vst [vmem:[#allocation2 + $0x20] sm:$0xff] (!%p3260_p10), %v4304_v46  ;;  %379 = vst [vmem:[#allocation2 + $0x28] sm:$0xff] (!%p3260_p10), %v4304_v46 }
  0x7e   : > { %380 = vst [vmem:[#allocation2 + $0x30] sm:$0xff] (!%p3260_p10), %v4304_v46  ;;  %381 = vst [vmem:[#allocation2 + $0x38] sm:$0xff] (!%p3260_p10), %v4304_v46 }
  0x7f   : > { %382 = vst [vmem:[#allocation2 + $0x40] sm:$0xff] (!%p3260_p10), %v4304_v46  ;;  %383 = vst [vmem:[#allocation2 + $0x48] sm:$0xff] (!%p3260_p10), %v4304_v46 }
  0x80   : > { %384 = vst [vmem:[#allocation2 + $0x50] sm:$0xff] %v4304_v46  ;;  %385 = vst [vmem:[#allocation2 + $0x58] sm:$0xff] %v4304_v46 }
  0x81   : > { %386 = vst [vmem:[#allocation2 + $0x60] sm:$0xff] %v4304_v46  ;;  %387 = vst [vmem:[#allocation2 + $0x68] sm:$0xff] %v4304_v46 }
  0x82   : > { %388 = vst [vmem:[#allocation2 + $0x70] sm:$0xff] %v4304_v46  ;;  %389 = vst [vmem:[#allocation2 + $0x78] sm:$0xff] %v4304_v46 }
  0x83   : > { %390 = vst [vmem:[#allocation2 + $0x80] sm:$0xff] %v4304_v46  ;;  %391 = vst [vmem:[#allocation2 + $0x88] sm:$0xff] %v4304_v46 }
  0x84   : > { %392 = vst [vmem:[#allocation2 + $0x90] sm:$0xff] %v4304_v46  ;;  %393 = vst [vmem:[#allocation2 + $0x98] sm:$0xff] %v4304_v46 }
  0x85   : > { %394 = vst [vmem:[#allocation2 + $0xa0] sm:$0xff] %v4304_v46  ;;  %395 = vst [vmem:[#allocation2 + $0xa8] sm:$0xff] %v4304_v46 }
  0x86   : > { %396 = vst [vmem:[#allocation2 + $0xb0] sm:$0xff] %v4304_v46  ;;  %397 = vst [vmem:[#allocation2 + $0xb8] sm:$0xff] %v4304_v46 }
  0x87   : > { %398 = vst [vmem:[#allocation2 + $0xc0] sm:$0xff] %v4304_v46  ;;  %399 = vst [vmem:[#allocation2 + $0xc8] sm:$0xff] %v4304_v46 }
  0x88   : > { %400 = vst [vmem:[#allocation2 + $0xd0] sm:$0xff] %v4304_v46  ;;  %401 = vst [vmem:[#allocation2 + $0xd8] sm:$0xff] %v4304_v46 }
  0x89   : > { %402 = vst [vmem:[#allocation2 + $0xe0] sm:$0xff] %v4304_v46  ;;  %403 = vst [vmem:[#allocation2 + $0xe8] sm:$0xff] %v4304_v46 }
  0x8a   : > { %404 = vst [vmem:[#allocation2 + $0xf0] sm:$0xff] %v4304_v46  ;;  %405 = vst [vmem:[#allocation2 + $0xf8] sm:$0xff] %v4304_v46 }
  0x8b   : > { %406 = vst [vmem:[#allocation2 + $0x100] sm:$0xff] %v4304_v46  ;;  %407 = vst [vmem:[#allocation2 + $0x108] sm:$0xff] %v4304_v46 }
  0x8c   : > { %408 = vst [vmem:[#allocation2 + $0x110] sm:$0xff] %v4304_v46  ;;  %409 = vst [vmem:[#allocation2 + $0x118] sm:$0xff] %v4304_v46 }
  0x8d   : > { %410 = vst [vmem:[#allocation2 + $0x120] sm:$0xff] %v4304_v46  ;;  %411 = vst [vmem:[#allocation2 + $0x128] sm:$0xff] %v4304_v46 }
  0x8e   : > { %412 = vst [vmem:[#allocation2 + $0x130] sm:$0xff] %v4304_v46  ;;  %413 = vst [vmem:[#allocation2 + $0x138] sm:$0xff] %v4304_v46 }
  0x8f   : > { %414 = vst [vmem:[#allocation2 + $0x140] sm:$0xff] %v4304_v46  ;;  %415 = vst [vmem:[#allocation2 + $0x148] sm:$0xff] %v4304_v46 }
  0x90   : > { %416 = vst [vmem:[#allocation2 + $0x150] sm:$0xff] %v4304_v46  ;;  %417 = vst [vmem:[#allocation2 + $0x158] sm:$0xff] %v4304_v46 }
  0x91   : > { %418 = vst [vmem:[#allocation2 + $0x160] sm:$0xff] %v4304_v46  ;;  %419 = vst [vmem:[#allocation2 + $0x168] sm:$0xff] %v4304_v46 }
  0x92   : > { %420 = vst [vmem:[#allocation2 + $0x170] sm:$0xff] %v4304_v46  ;;  %421 = vst [vmem:[#allocation2 + $0x178] sm:$0xff] %v4304_v46 }
  0x93   : > { %422 = vst [vmem:[#allocation2 + $0x180] sm:$0xff] %v4304_v46  ;;  %423 = vst [vmem:[#allocation2 + $0x188] sm:$0xff] %v4304_v46 }
  0x94   : > { %424 = vst [vmem:[#allocation2 + $0x190] sm:$0xff] %v4304_v46  ;;  %425 = vst [vmem:[#allocation2 + $0x198] sm:$0xff] %v4304_v46 }
  0x95   : > { %426 = vst [vmem:[#allocation2 + $0x1a0] sm:$0xff] %v4304_v46  ;;  %427 = vst [vmem:[#allocation2 + $0x1a8] sm:$0xff] %v4304_v46 }
  0x96   : > { %428 = vst [vmem:[#allocation2 + $0x1b0] sm:$0xff] %v4304_v46  ;;  %429 = vst [vmem:[#allocation2 + $0x1b8] sm:$0xff] %v4304_v46 }
  0x97   : > { %430 = vst [vmem:[#allocation2 + $0x1c0] sm:$0xff] %v4304_v46  ;;  %431 = vst [vmem:[#allocation2 + $0x1c8] sm:$0xff] %v4304_v46 }
  0x98   : > { %432 = vst [vmem:[#allocation2 + $0x1d0] sm:$0xff] %v4304_v46  ;;  %433 = vst [vmem:[#allocation2 + $0x1d8] sm:$0xff] %v4304_v46 }
  0x99   : > { %434 = vst [vmem:[#allocation2 + $0x1e0] sm:$0xff] %v4304_v46  ;;  %435 = vst [vmem:[#allocation2 + $0x1e8] sm:$0xff] %v4304_v46 }
  0x9a   : > { %436 = vst [vmem:[#allocation2 + $0x1f0] sm:$0xff] %v4304_v46  ;;  %437 = vst [vmem:[#allocation2 + $0x1f8] sm:$0xff] %v4304_v46 }
  0x9b   : > { %438 = vst [vmem:[#allocation2 + $0x200] sm:$0xff] %v4304_v46  ;;  %439 = vst [vmem:[#allocation2 + $0x208] sm:$0xff] %v4304_v46 }
  0x9c   : > { %440 = vst [vmem:[#allocation2 + $0x210] sm:$0xff] %v4304_v46  ;;  %441 = vst [vmem:[#allocation2 + $0x218] sm:$0xff] %v4304_v46 }
  0x9d   : > { %442 = vst [vmem:[#allocation2 + $0x220] sm:$0xff] %v4304_v46  ;;  %443 = vst [vmem:[#allocation2 + $0x228] sm:$0xff] %v4304_v46 }
  0x9e   : > { %444 = vst [vmem:[#allocation2 + $0x230] sm:$0xff] %v4304_v46  ;;  %445 = vst [vmem:[#allocation2 + $0x238] sm:$0xff] %v4304_v46 }
  0x9f   : > { %446 = vst [vmem:[#allocation2 + $0x240] sm:$0xff] %v4304_v46  ;;  %447 = vst [vmem:[#allocation2 + $0x248] sm:$0xff] %v4304_v46 }
  0xa0   : > { %448 = vst [vmem:[#allocation2 + $0x250] sm:$0xff] %v4304_v46  ;;  %449 = vst [vmem:[#allocation2 + $0x258] sm:$0xff] %v4304_v46 }
  0xa1   : > { %450 = vst [vmem:[#allocation2 + $0x260] sm:$0xff] %v4304_v46  ;;  %451 = vst [vmem:[#allocation2 + $0x268] sm:$0xff] %v4304_v46 }
  0xa2   : > { %452 = vst [vmem:[#allocation2 + $0x270] sm:$0xff] %v4304_v46  ;;  %453 = vst [vmem:[#allocation2 + $0x278] sm:$0xff] %v4304_v46 }
  0xa3   : > { %454 = vst [vmem:[#allocation2 + $0x280] sm:$0xff] %v4304_v46  ;;  %455 = vst [vmem:[#allocation2 + $0x288] sm:$0xff] %v4304_v46 }
  0xa4   : > { %456 = vst [vmem:[#allocation2 + $0x290] sm:$0xff] %v4304_v46  ;;  %457 = vst [vmem:[#allocation2 + $0x298] sm:$0xff] %v4304_v46 }
  0xa5   : > { %458 = vst [vmem:[#allocation2 + $0x2a0] sm:$0xff] %v4304_v46  ;;  %459 = vst [vmem:[#allocation2 + $0x2a8] sm:$0xff] %v4304_v46 }
  0xa6   : > { %460 = vst [vmem:[#allocation2 + $0x2b0] sm:$0xff] %v4304_v46  ;;  %461 = vst [vmem:[#allocation2 + $0x2b8] sm:$0xff] %v4304_v46 }
  0xa7 PF: > { %v3842_v47 = vld [vmem:[%s4582_s7 + $0x4] ss:$16 sps:$4 sm:$0xff]   ;;  %v3844_v48 = vld [vmem:[%s4582_s7 + $0xc] ss:$16 sps:$4 sm:$0xff]   ;;  %v3846_v49 = vld [vmem:[%s4582_s7] ss:$16 sps:$4 sm:$0xff]  }
  0xa8   : > { %1582 = vmatprep.subr.bf16.mxu0 %v3842_v47  ;;  %v3847_v50 = vld [vmem:[%s4582_s7 + $0x8] ss:$16 sps:$4 sm:$0xff]   ;;  %1868 = vmatprep.subr.bf16.mxu1 %v3844_v48  ;;  %v3848_v51 = vld [vmem:[%s4582_s7 + $0x24] ss:$16 sps:$4 sm:$0xff]   ;;  %v3850_v52 = vld [vmem:[%s4582_s7 + $0x2c] ss:$16 sps:$4 sm:$0xff]  }
  0xa9   : > { %1583 = vmatpush1.bf16.msra.mxu0 %v3846_v49  ;;  %1869 = vmatpush1.bf16.msra.mxu1 %v3847_v50  ;;  %v3852_v53 = vld [vmem:[%s4582_s7 + $0x20] ss:$16 sps:$4 sm:$0xff]   ;;  %v3853_v54 = vld [vmem:[%s4582_s7 + $0x28] ss:$16 sps:$4 sm:$0xff]   ;;  %v3854_v55 = vld [vmem:[%s4582_s7 + $0x44] ss:$16 sps:$4 sm:$0xff]  }
  0xaa   : > { %1584 = vmatprep.subr.bf16.mxu0 %v3848_v51  ;;  %1870 = vmatprep.subr.bf16.mxu1 %v3850_v52  ;;  %v3856_v56 = vld [vmem:[%s4582_s7 + $0x4c] ss:$16 sps:$4 sm:$0xff]   ;;  %v3858_v57 = vld [vmem:[%s4582_s7 + $0x40] ss:$16 sps:$4 sm:$0xff]   ;;  %v3859_v58 = vld [vmem:[%s4582_s7 + $0x48] ss:$16 sps:$4 sm:$0xff]  }
  0xab   : > { %v3860_v59 = vld [vmem:[%s4582_s7 + $0x64] ss:$16 sps:$4 sm:$0xff]   ;;  %v3862_v60 = vld [vmem:[%s4582_s7 + $0x6c] ss:$16 sps:$4 sm:$0xff]   ;;  %v3864_v61 = vld [vmem:[%s4582_s7 + $0x60] ss:$16 sps:$4 sm:$0xff]  }
  0xac   : > { %v3865_v62 = vld [vmem:[%s4582_s7 + $0x68] ss:$16 sps:$4 sm:$0xff]   ;;  %v3866_v63 = vld [vmem:[%s4582_s7 + $0x84] ss:$16 sps:$4 sm:$0xff]   ;;  %v3868_v0 = vld [vmem:[%s4582_s7 + $0x8c] ss:$16 sps:$4 sm:$0xff]  }
  0xad   : > { %1585 = vmatpush1.bf16.msra.mxu0 %v3852_v53  ;;  %1871 = vmatpush1.bf16.msra.mxu1 %v3853_v54  ;;  %v3870_v1 = vld [vmem:[%s4582_s7 + $0x80] ss:$16 sps:$4 sm:$0xff]   ;;  %v3871_v2 = vld [vmem:[%s4582_s7 + $0x88] ss:$16 sps:$4 sm:$0xff]   ;;  %v3872_v3 = vld [vmem:[%s4582_s7 + $0xa4] ss:$16 sps:$4 sm:$0xff]  }
  0xae   : > { %1586 = vmatprep.subr.bf16.mxu0 %v3854_v55  ;;  %1872 = vmatprep.subr.bf16.mxu1 %v3856_v56  ;;  %v3874_v4 = vld [vmem:[%s4582_s7 + $0xac] ss:$16 sps:$4 sm:$0xff]   ;;  %v3876_v5 = vld [vmem:[%s4582_s7 + $0xa0] ss:$16 sps:$4 sm:$0xff]   ;;  %v3877_v6 = vld [vmem:[%s4582_s7 + $0xa8] ss:$16 sps:$4 sm:$0xff]  }
  0xaf   : > { %v3878_v7 = vld [vmem:[%s4582_s7 + $0xc4] ss:$16 sps:$4 sm:$0xff]   ;;  %v3880_v8 = vld [vmem:[%s4582_s7 + $0xcc] ss:$16 sps:$4 sm:$0xff]   ;;  %v3882_v9 = vld [vmem:[%s4582_s7 + $0xc0] ss:$16 sps:$4 sm:$0xff]  }
  0xb0   : > { %v3883_v10 = vld [vmem:[%s4582_s7 + $0xc8] ss:$16 sps:$4 sm:$0xff]   ;;  %v3884_v11 = vld [vmem:[%s4582_s7 + $0xe4] ss:$16 sps:$4 sm:$0xff]   ;;  %v3886_v12 = vld [vmem:[%s4582_s7 + $0xec] ss:$16 sps:$4 sm:$0xff]  }
  0xb1   : > { %1587 = vmatpush1.bf16.msra.mxu0 %v3858_v57  ;;  %1873 = vmatpush1.bf16.msra.mxu1 %v3859_v58  ;;  %v3888_v13 = vld [vmem:[%s4582_s7 + $0xe0] ss:$16 sps:$4 sm:$0xff]   ;;  %v3889_v14 = vld [vmem:[%s4582_s7 + $0xe8] ss:$16 sps:$4 sm:$0xff]   ;;  %v3890_v15 = vld [vmem:[%s4582_s7 + $0x104] ss:$16 sps:$4 sm:$0xff]  }
  0xb2   : > { %1588 = vmatprep.subr.bf16.mxu0 %v3860_v59  ;;  %1874 = vmatprep.subr.bf16.mxu1 %v3862_v60  ;;  %v3892_v16 = vld [vmem:[%s4582_s7 + $0x10c] ss:$16 sps:$4 sm:$0xff]   ;;  %v3894_v17 = vld [vmem:[%s4582_s7 + $0x100] ss:$16 sps:$4 sm:$0xff]   ;;  %v3895_v18 = vld [vmem:[%s4582_s7 + $0x108] ss:$16 sps:$4 sm:$0xff]  }
  0xb3   : > { %v3896_v19 = vld [vmem:[%s4582_s7 + $0x124] ss:$16 sps:$4 sm:$0xff]   ;;  %v3898_v20 = vld [vmem:[%s4582_s7 + $0x12c] ss:$16 sps:$4 sm:$0xff]   ;;  %v3900_v21 = vld [vmem:[%s4582_s7 + $0x120] ss:$16 sps:$4 sm:$0xff]  }
  0xb4   : > { %v3901_v22 = vld [vmem:[%s4582_s7 + $0x128] ss:$16 sps:$4 sm:$0xff]   ;;  %v3902_v23 = vld [vmem:[%s4582_s7 + $0x144] ss:$16 sps:$4 sm:$0xff]   ;;  %v3904_v24 = vld [vmem:[%s4582_s7 + $0x14c] ss:$16 sps:$4 sm:$0xff]  }
  0xb5   : > { %1589 = vmatpush1.bf16.msra.mxu0 %v3864_v61  ;;  %1875 = vmatpush1.bf16.msra.mxu1 %v3865_v62  ;;  %v3906_v25 = vld [vmem:[%s4582_s7 + $0x140] ss:$16 sps:$4 sm:$0xff]   ;;  %v3907_v26 = vld [vmem:[%s4582_s7 + $0x148] ss:$16 sps:$4 sm:$0xff]   ;;  %v3908_v27 = vld [vmem:[%s4582_s7 + $0x164] ss:$16 sps:$4 sm:$0xff]  }
  0xb6   : > { %1590 = vmatprep.subr.bf16.mxu0 %v3866_v63  ;;  %1876 = vmatprep.subr.bf16.mxu1 %v3868_v0  ;;  %v3910_v28 = vld [vmem:[%s4582_s7 + $0x16c] ss:$16 sps:$4 sm:$0xff]   ;;  %v3912_v29 = vld [vmem:[%s4582_s7 + $0x160] ss:$16 sps:$4 sm:$0xff]   ;;  %v3913_v30 = vld [vmem:[%s4582_s7 + $0x168] ss:$16 sps:$4 sm:$0xff]  }
  0xb7   : > { %v3940_v31 = vld [vmem:[%s4584_s9 + $0x4] ss:$16 sps:$4 sm:$0xff]   ;;  %v3916_v33 = vld [vmem:[%s4582_s7 + $0x18c] ss:$16 sps:$4 sm:$0xff]   ;;  %v3918_v34 = vld [vmem:[%s4582_s7 + $0x180] ss:$16 sps:$4 sm:$0xff]  }
  0xb8   : > { %v3914_v32 = vld [vmem:[%s4582_s7 + $0x184] ss:$16 sps:$4 sm:$0xff]   ;;  %1614 = vmatprep.mubr.bf16.mxu0 %v3940_v31  ;;  %1900 = vmatprep.mubr.bf16.mxu1 %v3940_v31  ;;  %v3919_v35 = vld [vmem:[%s4582_s7 + $0x188] ss:$16 sps:$4 sm:$0xff]   ;;  %v3922_v37 = vld [vmem:[%s4582_s7 + $0x1ac] ss:$16 sps:$4 sm:$0xff]  }
  0xb9   : > { %1591 = vmatpush1.bf16.msra.mxu0 %v3870_v1  ;;  %1877 = vmatpush1.bf16.msra.mxu1 %v3871_v2  ;;  %v3920_v36 = vld [vmem:[%s4582_s7 + $0x1a4] ss:$16 sps:$4 sm:$0xff]   ;;  %v3924_v38 = vld [vmem:[%s4582_s7 + $0x1a0] ss:$16 sps:$4 sm:$0xff]   ;;  %v3925_v39 = vld [vmem:[%s4582_s7 + $0x1a8] ss:$16 sps:$4 sm:$0xff]  }
  0xba   : > { %1592 = vmatprep.subr.bf16.mxu0 %v3872_v3  ;;  %1878 = vmatprep.subr.bf16.mxu1 %v3874_v4  ;;  %v3926_v40 = vld [vmem:[%s4582_s7 + $0x1c4] ss:$16 sps:$4 sm:$0xff]   ;;  %v3928_v41 = vld [vmem:[%s4582_s7 + $0x1cc] ss:$16 sps:$4 sm:$0xff]   ;;  %v3930_v42 = vld [vmem:[%s4582_s7 + $0x1c0] ss:$16 sps:$4 sm:$0xff]  }
  0xbb   : > { %v3931_v43 = vld [vmem:[%s4582_s7 + $0x1c8] ss:$16 sps:$4 sm:$0xff]   ;;  %v3932_v44 = vld [vmem:[%s4582_s7 + $0x1e4] ss:$16 sps:$4 sm:$0xff]   ;;  %v3934_v45 = vld [vmem:[%s4582_s7 + $0x1ec] ss:$16 sps:$4 sm:$0xff]  }
  0xbc   : > { %v3936_v46 = vld [vmem:[%s4582_s7 + $0x1e0] ss:$16 sps:$4 sm:$0xff]   ;;  %v3937_v47 = vld [vmem:[%s4582_s7 + $0x1e8] ss:$16 sps:$4 sm:$0xff]   ;;  %v3943_v48 = vld [vmem:[%s4582_s7 + $0x204] ss:$16 sps:$4 sm:$0xff]  }
  0xbd   : > { %1593 = vmatpush1.bf16.msra.mxu0 %v3876_v5  ;;  %1879 = vmatpush1.bf16.msra.mxu1 %v3877_v6  ;;  %v3946_v49 = vld [vmem:[%s4582_s7 + $0x20c] ss:$16 sps:$4 sm:$0xff]   ;;  %v3938_v50 = vld [vmem:[%s4584_s9] ss:$16 sps:$4 sm:$0xff]   ;;  %v3944_v52 = vld [vmem:[%s4582_s7 + $0x208] ss:$16 sps:$4 sm:$0xff]  }
  0xbe   : > { %1594 = vmatprep.subr.bf16.mxu0 %v3878_v7  ;;  %1880 = vmatprep.subr.bf16.mxu1 %v3880_v8  ;;  %v3941_v51 = vld [vmem:[%s4582_s7 + $0x200] ss:$16 sps:$4 sm:$0xff]   ;;  %v3949_v53 = vld [vmem:[%s4582_s7 + $0x224] ss:$16 sps:$4 sm:$0xff]   ;;  %v3952_v54 = vld [vmem:[%s4582_s7 + $0x22c] ss:$16 sps:$4 sm:$0xff]  }
  0xbf   : > { %v3953_v55 = vld [vmem:[%s4584_s9 + $0x24] ss:$16 sps:$4 sm:$0xff]   ;;  %v3947_v56 = vld [vmem:[%s4582_s7 + $0x220] ss:$16 sps:$4 sm:$0xff]   ;;  %v3950_v57 = vld [vmem:[%s4582_s7 + $0x228] ss:$16 sps:$4 sm:$0xff]  }
  0xc0   : > { %v3958_v58 = vld [vmem:[%s4582_s7 + $0x244] ss:$16 sps:$4 sm:$0xff]   ;;  %v3961_v59 = vld [vmem:[%s4582_s7 + $0x24c] ss:$16 sps:$4 sm:$0xff]   ;;  %v3955_v60 = vld [vmem:[%s4584_s9 + $0x20] ss:$16 sps:$4 sm:$0xff]  }
  0xc1   : > { %1595 = vmatpush1.bf16.msra.mxu0 %v3882_v9  ;;  %1881 = vmatpush1.bf16.msra.mxu1 %v3883_v10  ;;  %v3956_v61 = vld [vmem:[%s4582_s7 + $0x240] ss:$16 sps:$4 sm:$0xff]   ;;  %v3959_v62 = vld [vmem:[%s4582_s7 + $0x248] ss:$16 sps:$4 sm:$0xff]   ;;  %v3962_v63 = vld [vmem:[%s4584_s9 + $0x44] ss:$16 sps:$4 sm:$0xff]  }
  0xc2   : > { %1596 = vmatprep.subr.bf16.mxu0 %v3884_v11  ;;  %1882 = vmatprep.subr.bf16.mxu1 %v3886_v12  ;;  %v3967_v0 = vld [vmem:[%s4582_s7 + $0x264] ss:$16 sps:$4 sm:$0xff]   ;;  %v3970_v1 = vld [vmem:[%s4582_s7 + $0x26c] ss:$16 sps:$4 sm:$0xff]   ;;  %v3965_v2 = vld [vmem:[%s4582_s7 + $0x260] ss:$16 sps:$4 sm:$0xff]  }
  0xc3   : > { %v3968_v3 = vld [vmem:[%s4582_s7 + $0x268] ss:$16 sps:$4 sm:$0xff]   ;;  %v3973_v4 = vld [vmem:[%s4582_s7 + $0x284] ss:$16 sps:$4 sm:$0xff]   ;;  %v3976_v5 = vld [vmem:[%s4582_s7 + $0x28c] ss:$16 sps:$4 sm:$0xff]  }
  0xc4   : > { %v3964_v6 = vld [vmem:[%s4584_s9 + $0x40] ss:$16 sps:$4 sm:$0xff]   ;;  %v3977_v8 = vld [vmem:[%s4584_s9 + $0x64] ss:$16 sps:$4 sm:$0xff]   ;;  %v3974_v9 = vld [vmem:[%s4582_s7 + $0x288] ss:$16 sps:$4 sm:$0xff]  }
  0xc5   : > { %1597 = vmatpush1.bf16.msra.mxu0 %v3888_v13  ;;  %1883 = vmatpush1.bf16.msra.mxu1 %v3889_v14  ;;  %v3971_v7 = vld [vmem:[%s4582_s7 + $0x280] ss:$16 sps:$4 sm:$0xff]   ;;  %v3982_v10 = vld [vmem:[%s4582_s7 + $0x2a4] ss:$16 sps:$4 sm:$0xff]   ;;  %v3985_v11 = vld [vmem:[%s4582_s7 + $0x2ac] ss:$16 sps:$4 sm:$0xff]  }
  0xc6   : > { %1598 = vmatprep.subr.bf16.mxu0 %v3890_v15  ;;  %1884 = vmatprep.subr.bf16.mxu1 %v3892_v16  ;;  %v3980_v12 = vld [vmem:[%s4582_s7 + $0x2a0] ss:$16 sps:$4 sm:$0xff]   ;;  %v3983_v13 = vld [vmem:[%s4582_s7 + $0x2a8] ss:$16 sps:$4 sm:$0xff]   ;;  %v3991_v14 = vld [vmem:[%s4582_s7 + $0x2c4] ss:$16 sps:$4 sm:$0xff]  }
  0xc7   : > { %v3994_v15 = vld [vmem:[%s4582_s7 + $0x2cc] ss:$16 sps:$4 sm:$0xff]   ;;  %v3979_v16 = vld [vmem:[%s4584_s9 + $0x60] ss:$16 sps:$4 sm:$0xff]   ;;  %p3433_p11 = scmp.ne.s32.totalorder %s4222_s16, 8 }
  0xc8   : > { %v4018_v31 = vld [vmem:[%s4582_s7 + $0x32c] ss:$16 sps:$4 sm:$0xff]  }
  0xc9   : > { %1599 = vmatpush1.bf16.msra.mxu0 %v3894_v17  ;;  %1885 = vmatpush1.bf16.msra.mxu1 %v3895_v18  ;;  %v3986_v17 = vld [vmem:[%s4584_s9 + $0x84] ss:$16 sps:$4 sm:$0xff]   ;;  %v3989_v18 = vld [vmem:[%s4582_s7 + $0x2c0] ss:$16 sps:$4 sm:$0xff]  }
  0xca   : > { %1600 = vmatprep.subr.bf16.mxu0 %v3896_v19  ;;  %1886 = vmatprep.subr.bf16.mxu1 %v3898_v20  ;;  %v3992_v19 = vld [vmem:[%s4582_s7 + $0x2c8] ss:$16 sps:$4 sm:$0xff]   ;;  %v3999_v20 = vld [vmem:[%s4582_s7 + $0x2e4] ss:$16 sps:$4 sm:$0xff]  }
  0xcd   : > { %1601 = vmatpush1.bf16.msra.mxu0 %v3900_v21  ;;  %1887 = vmatpush1.bf16.msra.mxu1 %v3901_v22  ;;  %v4002_v21 = vld [vmem:[%s4582_s7 + $0x2ec] ss:$16 sps:$4 sm:$0xff]   ;;  %v3997_v22 = vld [vmem:[%s4582_s7 + $0x2e0] ss:$16 sps:$4 sm:$0xff]  }
  0xce   : > { %1602 = vmatprep.subr.bf16.mxu0 %v3902_v23  ;;  %1888 = vmatprep.subr.bf16.mxu1 %v3904_v24  ;;  %v4000_v23 = vld [vmem:[%s4582_s7 + $0x2e8] ss:$16 sps:$4 sm:$0xff]   ;;  %v4006_v24 = vld [vmem:[%s4582_s7 + $0x304] ss:$16 sps:$4 sm:$0xff]  }
  0xd1   : > { %1603 = vmatpush1.bf16.msra.mxu0 %v3906_v25  ;;  %1889 = vmatpush1.bf16.msra.mxu1 %v3907_v26  ;;  %v4009_v25 = vld [vmem:[%s4582_s7 + $0x30c] ss:$16 sps:$4 sm:$0xff]   ;;  %v3988_v26 = vld [vmem:[%s4584_s9 + $0x80] ss:$16 sps:$4 sm:$0xff]  }
  0xd2   : > { %1604 = vmatprep.subr.bf16.mxu0 %v3908_v27  ;;  %1890 = vmatprep.subr.bf16.mxu1 %v3910_v28  ;;  %v3995_v27 = vld [vmem:[%s4584_s9 + $0xa4] ss:$16 sps:$4 sm:$0xff]   ;;  %v4004_v28 = vld [vmem:[%s4582_s7 + $0x300] ss:$16 sps:$4 sm:$0xff]  }
  0xd5   : > { %1605 = vmatpush1.bf16.msra.mxu0 %v3912_v29  ;;  %1891 = vmatpush1.bf16.msra.mxu1 %v3913_v30  ;;  %v4007_v29 = vld [vmem:[%s4582_s7 + $0x308] ss:$16 sps:$4 sm:$0xff]   ;;  %v4015_v30 = vld [vmem:[%s4582_s7 + $0x324] ss:$16 sps:$4 sm:$0xff]  }
  0xd6   : > { %1606 = vmatprep.subr.bf16.mxu0 %v3914_v32  ;;  %1892 = vmatprep.subr.bf16.mxu1 %v3916_v33  ;;  %v4013_v32 = vld [vmem:[%s4582_s7 + $0x320] ss:$16 sps:$4 sm:$0xff]   ;;  %v4016_v33 = vld [vmem:[%s4582_s7 + $0x328] ss:$16 sps:$4 sm:$0xff]  }
  0xd9   : > { %1607 = vmatpush1.bf16.msra.mxu0 %v3918_v34  ;;  %1893 = vmatpush1.bf16.msra.mxu1 %v3919_v35  ;;  %v4023_v34 = vld [vmem:[%s4582_s7 + $0x344] ss:$16 sps:$4 sm:$0xff]   ;;  %v4026_v35 = vld [vmem:[%s4582_s7 + $0x34c] ss:$16 sps:$4 sm:$0xff]  }
  0xda   : > { %1608 = vmatprep.subr.bf16.mxu0 %v3920_v36  ;;  %1894 = vmatprep.subr.bf16.mxu1 %v3922_v37  ;;  %v4003_v36 = vld [vmem:[%s4584_s9 + $0xa0] ss:$16 sps:$4 sm:$0xff]   ;;  %v4010_v37 = vld [vmem:[%s4584_s9 + $0xc4] ss:$16 sps:$4 sm:$0xff]  }
  0xdd   : > { %1609 = vmatpush1.bf16.msra.mxu0 %v3924_v38  ;;  %1895 = vmatpush1.bf16.msra.mxu1 %v3925_v39  ;;  %v4021_v38 = vld [vmem:[%s4582_s7 + $0x340] ss:$16 sps:$4 sm:$0xff]   ;;  %v4024_v39 = vld [vmem:[%s4582_s7 + $0x348] ss:$16 sps:$4 sm:$0xff]  }
  0xde   : > { %1610 = vmatprep.subr.bf16.mxu0 %v3926_v40  ;;  %1896 = vmatprep.subr.bf16.mxu1 %v3928_v41  ;;  %v4030_v40 = vld [vmem:[%s4582_s7 + $0x364] ss:$16 sps:$4 sm:$0xff]   ;;  %v4033_v41 = vld [vmem:[%s4582_s7 + $0x36c] ss:$16 sps:$4 sm:$0xff]  }
  0xe1   : > { %1611 = vmatpush1.bf16.msra.mxu0 %v3930_v42  ;;  %1897 = vmatpush1.bf16.msra.mxu1 %v3931_v43  ;;  %v4028_v42 = vld [vmem:[%s4582_s7 + $0x360] ss:$16 sps:$4 sm:$0xff]   ;;  %v4031_v43 = vld [vmem:[%s4582_s7 + $0x368] ss:$16 sps:$4 sm:$0xff]  }
  0xe2   : > { %1612 = vmatprep.subr.bf16.mxu0 %v3932_v44  ;;  %1898 = vmatprep.subr.bf16.mxu1 %v3934_v45  ;;  %v4039_v44 = vld [vmem:[%s4582_s7 + $0x384] ss:$16 sps:$4 sm:$0xff]   ;;  %v4042_v45 = vld [vmem:[%s4582_s7 + $0x38c] ss:$16 sps:$4 sm:$0xff]  }
  0xe5   : > { %1613 = vmatpush1.bf16.msra.mxu0 %v3936_v46  ;;  %1899 = vmatpush1.bf16.msra.mxu1 %v3937_v47  ;;  %v4012_v46 = vld [vmem:[%s4584_s9 + $0xc0] ss:$16 sps:$4 sm:$0xff]   ;;  %v4019_v47 = vld [vmem:[%s4584_s9 + $0xe4] ss:$16 sps:$4 sm:$0xff]  }
  0xe6   : > { %1725 = vmatprep.subr.bf16.mxu0 %v3943_v48  ;;  %2011 = vmatprep.subr.bf16.mxu1 %v3946_v49  ;;  %v4037_v48 = vld [vmem:[%s4582_s7 + $0x380] ss:$16 sps:$4 sm:$0xff]   ;;  %v4040_v49 = vld [vmem:[%s4582_s7 + $0x388] ss:$16 sps:$4 sm:$0xff]  }
  0xe8   : > { %1615 = vmatmul.mubr.bf16.vlgmr.msra.gmra.mrb[0].mxu0 %v3938_v50  ;;  %1901 = vmatmul.mubr.bf16.vlgmr.msra.gmra.mrb[0].mxu1 %v3938_v50  ;;  %v4048_v50 = vld [vmem:[%s4582_s7 + $0x3a4] ss:$16 sps:$4 sm:$0xff]  }
  0xe9   : > { %1726 = vmatpush1.bf16.msra.mxu0 %v3941_v51  ;;  %2012 = vmatpush1.bf16.msra.mxu1 %v3944_v52  ;;  %v4051_v51 = vld [vmem:[%s4582_s7 + $0x3ac] ss:$16 sps:$4 sm:$0xff]   ;;  %v4046_v52 = vld [vmem:[%s4582_s7 + $0x3a0] ss:$16 sps:$4 sm:$0xff]  }
  0xea   : > { %1727 = vmatprep.subr.bf16.mxu0 %v3949_v53  ;;  %2013 = vmatprep.subr.bf16.mxu1 %v3952_v54  ;;  %v4049_v53 = vld [vmem:[%s4582_s7 + $0x3a8] ss:$16 sps:$4 sm:$0xff]   ;;  %v4054_v54 = vld [vmem:[%s4582_s7 + $0x3c4] ss:$16 sps:$4 sm:$0xff]  }
  0xeb   : > { %1624 = vmatprep.mubr.bf16.mxu0 %v3953_v55  ;;  %1910 = vmatprep.mubr.bf16.mxu1 %v3953_v55  ;;  %v4057_v55 = vld [vmem:[%s4582_s7 + $0x3cc] ss:$16 sps:$4 sm:$0xff]  }
  0xed   : > { %1728 = vmatpush1.bf16.msra.mxu0 %v3947_v56  ;;  %2014 = vmatpush1.bf16.msra.mxu1 %v3950_v57  ;;  %v4027_v56 = vld [vmem:[%s4584_s9 + $0xe0] ss:$16 sps:$4 sm:$0xff]   ;;  %v4034_v57 = vld [vmem:[%s4584_s9 + $0x104] ss:$16 sps:$4 sm:$0xff]  }
  0xee   : > { %1729 = vmatprep.subr.bf16.mxu0 %v3958_v58  ;;  %2015 = vmatprep.subr.bf16.mxu1 %v3961_v59  ;;  %v4052_v58 = vld [vmem:[%s4582_s7 + $0x3c0] ss:$16 sps:$4 sm:$0xff]   ;;  %v4055_v59 = vld [vmem:[%s4582_s7 + $0x3c8] ss:$16 sps:$4 sm:$0xff]  }
  0xf0   : > { %1625 = vmatmul.mubr.bf16.gmra.mrb[4].mxu0 %v3955_v60  ;;  %1911 = vmatmul.mubr.bf16.gmra.mrb[4].mxu1 %v3955_v60  ;;  %v4063_v60 = vld [vmem:[%s4582_s7 + $0x3e4] ss:$16 sps:$4 sm:$0xff]  }
  0xf1   : > { %1730 = vmatpush1.bf16.msra.mxu0 %v3956_v61  ;;  %2016 = vmatpush1.bf16.msra.mxu1 %v3959_v62  ;;  %v4066_v61 = vld [vmem:[%s4582_s7 + $0x3ec] ss:$16 sps:$4 sm:$0xff]   ;;  %v4061_v62 = vld [vmem:[%s4582_s7 + $0x3e0] ss:$16 sps:$4 sm:$0xff]  }
  0xf2   : > { %1634 = vmatprep.mubr.bf16.mxu0 %v3962_v63  ;;  %1920 = vmatprep.mubr.bf16.mxu1 %v3962_v63  ;;  %v4064_v63 = vld [vmem:[%s4582_s7 + $0x3e8] ss:$16 sps:$4 sm:$0xff]  }
  0xf3   : > { %1731 = vmatprep.subr.bf16.mxu0 %v3967_v0  ;;  %2017 = vmatprep.subr.bf16.mxu1 %v3970_v1  ;;  %v4036_v0 = vld [vmem:[%s4584_s9 + $0x100] ss:$16 sps:$4 sm:$0xff]   ;;  %v4043_v1 = vld [vmem:[%s4584_s9 + $0x124] ss:$16 sps:$4 sm:$0xff]  }
  0xf5   : > { %1732 = vmatpush1.bf16.msra.mxu0 %v3965_v2  ;;  %2018 = vmatpush1.bf16.msra.mxu1 %v3968_v3  ;;  %v4045_v2 = vld [vmem:[%s4584_s9 + $0x120] ss:$16 sps:$4 sm:$0xff]   ;;  %v4058_v3 = vld [vmem:[%s4584_s9 + $0x144] ss:$16 sps:$4 sm:$0xff]  }
  0xf6   : > { %1733 = vmatprep.subr.bf16.mxu0 %v3973_v4  ;;  %2019 = vmatprep.subr.bf16.mxu1 %v3976_v5  ;;  %v4060_v4 = vld [vmem:[%s4584_s9 + $0x140] ss:$16 sps:$4 sm:$0xff]   ;;  %v4069_v5 = vld [vmem:[%s4584_s9 + $0xc] ss:$16 sps:$4 sm:$0xff]  }
  0xf8   : > { %1635 = vmatmul.mubr.bf16.gmra.mrb[8].mxu0 %v3964_v6  ;;  %1921 = vmatmul.mubr.bf16.gmra.mrb[8].mxu1 %v3964_v6  ;;  %v4067_v6 = vld [vmem:[%s4584_s9 + $0x8] ss:$16 sps:$4 sm:$0xff]  }
  0xf9   : > { %1644 = vmatprep.mubr.bf16.mxu0 %v3977_v8  ;;  %1734 = vmatpush1.bf16.msra.mxu0 %v3971_v7  ;;  %v4070_v7 = vld [vmem:[%s4584_s9 + $0x2c] ss:$16 sps:$4 sm:$0xff]  }
  0xfa   : > { %1930 = vmatprep.mubr.bf16.mxu1 %v3977_v8  ;;  %2020 = vmatpush1.bf16.msra.mxu1 %v3974_v9  ;;  %v4072_v8 = vld [vmem:[%s4584_s9 + $0x28] ss:$16 sps:$4 sm:$0xff]   ;;  %v4073_v9 = vld [vmem:[%s4584_s9 + $0x4c] ss:$16 sps:$4 sm:$0xff]  }
  0xfb   : > { %1735 = vmatprep.subr.bf16.mxu0 %v3982_v10  ;;  %2021 = vmatprep.subr.bf16.mxu1 %v3985_v11  ;;  %v4075_v10 = vld [vmem:[%s4584_s9 + $0x48] ss:$16 sps:$4 sm:$0xff]   ;;  %v4076_v11 = vld [vmem:[%s4584_s9 + $0x6c] ss:$16 sps:$4 sm:$0xff]  }
  0xfd   : > { %1736 = vmatpush1.bf16.msra.mxu0 %v3980_v12  ;;  %v4078_v12 = vld [vmem:[%s4584_s9 + $0x68] ss:$16 sps:$4 sm:$0xff]  }
  0xfe   : > { %2022 = vmatpush1.bf16.msra.mxu1 %v3983_v13  ;;  %1737 = vmatprep.subr.bf16.mxu0 %v3991_v14  ;;  %v4079_v13 = vld [vmem:[%s4584_s9 + $0x8c] ss:$16 sps:$4 sm:$0xff]   ;;  %v4081_v14 = vld [vmem:[%s4584_s9 + $0x88] ss:$16 sps:$4 sm:$0xff]  }
  0xff   : > { %2023 = vmatprep.subr.bf16.mxu1 %v3994_v15  ;;  %v4082_v15 = vld [vmem:[%s4584_s9 + $0xac] ss:$16 sps:$4 sm:$0xff]  }
 0x100   : > { %1645 = vmatmul.mubr.bf16.gmra.mrb[12].mxu0 %v3979_v16  ;;  %1931 = vmatmul.mubr.bf16.gmra.mrb[12].mxu1 %v3979_v16  ;;  %v4084_v16 = vld [vmem:[%s4584_s9 + $0xa8] ss:$16 sps:$4 sm:$0xff]  }
 0x101   : > { %1654 = vmatprep.mubr.bf16.mxu0 %v3986_v17  ;;  %1940 = vmatprep.mubr.bf16.mxu1 %v3986_v17  ;;  %v4085_v17 = vld [vmem:[%s4584_s9 + $0xcc] ss:$16 sps:$4 sm:$0xff]  }
 0x102   : > { %1738 = vmatpush1.bf16.msra.mxu0 %v3989_v18  ;;  %2024 = vmatpush1.bf16.msra.mxu1 %v3992_v19  ;;  %v4087_v18 = vld [vmem:[%s4584_s9 + $0xc8] ss:$16 sps:$4 sm:$0xff]   ;;  %v4088_v19 = vld [vmem:[%s4584_s9 + $0xec] ss:$16 sps:$4 sm:$0xff]  }
 0x103   : > { %1739 = vmatprep.subr.bf16.mxu0 %v3999_v20  ;;  %2025 = vmatprep.subr.bf16.mxu1 %v4002_v21  ;;  %v4090_v20 = vld [vmem:[%s4584_s9 + $0xe8] ss:$16 sps:$4 sm:$0xff]   ;;  %v4091_v21 = vld [vmem:[%s4584_s9 + $0x10c] ss:$16 sps:$4 sm:$0xff]  }
 0x106   : > { %1740 = vmatpush1.bf16.msra.mxu0 %v3997_v22  ;;  %2026 = vmatpush1.bf16.msra.mxu1 %v4000_v23  ;;  %v4093_v22 = vld [vmem:[%s4584_s9 + $0x108] ss:$16 sps:$4 sm:$0xff]   ;;  %v4094_v23 = vld [vmem:[%s4584_s9 + $0x12c] ss:$16 sps:$4 sm:$0xff]  }
 0x107   : > { %1741 = vmatprep.subr.bf16.mxu0 %v4006_v24  ;;  %2027 = vmatprep.subr.bf16.mxu1 %v4009_v25  ;;  %v4096_v24 = vld [vmem:[%s4584_s9 + $0x128] ss:$16 sps:$4 sm:$0xff]   ;;  %v4097_v25 = vld [vmem:[%s4584_s9 + $0x14c] ss:$16 sps:$4 sm:$0xff]  }
 0x108   : > { %1655 = vmatmul.mubr.bf16.gmra.mrb[16].mxu0 %v3988_v26  ;;  %1941 = vmatmul.mubr.bf16.gmra.mrb[16].mxu1 %v3988_v26  ;;  %v4099_v26 = vld [vmem:[%s4584_s9 + $0x148] ss:$16 sps:$4 sm:$0xff]  }
 0x109   : > { %1664 = vmatprep.mubr.bf16.mxu0 %v3995_v27  ;;  %1950 = vmatprep.mubr.bf16.mxu1 %v3995_v27  ;;  %v462_v27 = vld [vmem:[#allocation2] sm:$0xff] }
 0x10a   : > { %1742 = vmatpush1.bf16.msra.mxu0 %v4004_v28  ;;  %2028 = vmatpush1.bf16.msra.mxu1 %v4007_v29  ;;  %v464_v28 = vld [vmem:[#allocation2 + $0x10] sm:$0xff]  ;;  %v463_v29 = vld [vmem:[#allocation2 + $0x8] sm:$0xff] }
 0x10b   : > { %1743 = vmatprep.subr.bf16.mxu0 %v4015_v30  ;;  %2029 = vmatprep.subr.bf16.mxu1 %v4018_v31  ;;  %v465_v30 = vld [vmem:[#allocation2 + $0x18] sm:$0xff] }
 0x10e   : > { %1744 = vmatpush1.bf16.msra.mxu0 %v4013_v32  ;;  %2030 = vmatpush1.bf16.msra.mxu1 %v4016_v33  ;;  %v466_v33 = vld [vmem:[#allocation2 + $0x20] sm:$0xff] }
 0x10f   : > { %1745 = vmatprep.subr.bf16.mxu0 %v4023_v34  ;;  %2031 = vmatprep.subr.bf16.mxu1 %v4026_v35  ;;  %v468_v34 = vld [vmem:[#allocation2 + $0x30] sm:$0xff] }
 0x110   : > { %1665 = vmatmul.mubr.bf16.gmra.mrb[20].mxu0 %v4003_v36  ;;  %1951 = vmatmul.mubr.bf16.gmra.mrb[20].mxu1 %v4003_v36 }
 0x111   : > { %1674 = vmatprep.mubr.bf16.mxu0 %v4010_v37  ;;  %1960 = vmatprep.mubr.bf16.mxu1 %v4010_v37 }
 0x112   : > { %1746 = vmatpush1.bf16.msra.mxu0 %v4021_v38  ;;  %2032 = vmatpush1.bf16.msra.mxu1 %v4024_v39  ;;  %v467_v39 = vld [vmem:[#allocation2 + $0x28] sm:$0xff] }
 0x113   : > { %1747 = vmatprep.subr.bf16.mxu0 %v4030_v40  ;;  %2033 = vmatprep.subr.bf16.mxu1 %v4033_v41  ;;  %v469_v40 = vld [vmem:[#allocation2 + $0x38] sm:$0xff] }
 0x116   : > { %1748 = vmatpush1.bf16.msra.mxu0 %v4028_v42  ;;  %2034 = vmatpush1.bf16.msra.mxu1 %v4031_v43 }
 0x117   : > { %1749 = vmatprep.subr.bf16.mxu0 %v4039_v44  ;;  %2035 = vmatprep.subr.bf16.mxu1 %v4042_v45 }
 0x118   : > { %1675 = vmatmul.mubr.bf16.gmra.mrb[24].mxu0 %v4012_v46  ;;  %1961 = vmatmul.mubr.bf16.gmra.mrb[24].mxu1 %v4012_v46 }
 0x119   : > { %1684 = vmatprep.mubr.bf16.mxu0 %v4019_v47  ;;  %1970 = vmatprep.mubr.bf16.mxu1 %v4019_v47 }
 0x11a   : > { %1750 = vmatpush1.bf16.msra.mxu0 %v4037_v48  ;;  %2036 = vmatpush1.bf16.msra.mxu1 %v4040_v49 }
 0x11b   : > { %1751 = vmatprep.subr.bf16.mxu0 %v4048_v50  ;;  %2037 = vmatprep.subr.bf16.mxu1 %v4051_v51  ;;  %v470_v51 = vld [vmem:[#allocation2 + $0x40] sm:$0xff] }
 0x11e   : > { %1752 = vmatpush1.bf16.msra.mxu0 %v4046_v52  ;;  %2038 = vmatpush1.bf16.msra.mxu1 %v4049_v53  ;;  %v472_v52 = vld [vmem:[#allocation2 + $0x50] sm:$0xff]  ;;  %v471_v53 = vld [vmem:[#allocation2 + $0x48] sm:$0xff] }
 0x11f   : > { %1753 = vmatprep.subr.bf16.mxu0 %v4054_v54  ;;  %2039 = vmatprep.subr.bf16.mxu1 %v4057_v55  ;;  %v473_v54 = vld [vmem:[#allocation2 + $0x58] sm:$0xff] }
 0x120   : > { %1685 = vmatmul.mubr.bf16.gmra.mrb[28].mxu0 %v4027_v56  ;;  %1971 = vmatmul.mubr.bf16.gmra.mrb[28].mxu1 %v4027_v56 }
 0x121   : > { %1694 = vmatprep.mubr.bf16.mxu0 %v4034_v57  ;;  %1980 = vmatprep.mubr.bf16.mxu1 %v4034_v57  ;;  %v474_v57 = vld [vmem:[#allocation2 + $0x60] sm:$0xff] }
 0x122   : > { %1754 = vmatpush1.bf16.msra.mxu0 %v4052_v58  ;;  %2040 = vmatpush1.bf16.msra.mxu1 %v4055_v59  ;;  %v476_v58 = vld [vmem:[#allocation2 + $0x70] sm:$0xff] }
 0x123   : > { %1755 = vmatprep.subr.bf16.mxu0 %v4063_v60  ;;  %2041 = vmatprep.subr.bf16.mxu1 %v4066_v61 }
 0x126   : > { %1756 = vmatpush1.bf16.msra.mxu0 %v4061_v62  ;;  %2042 = vmatpush1.bf16.msra.mxu1 %v4064_v63  ;;  %v475_v63 = vld [vmem:[#allocation2 + $0x68] sm:$0xff] }
 0x128   : > { %1695 = vmatmul.mubr.bf16.gmra.mrb[32].mxu0 %v4036_v0  ;;  %1981 = vmatmul.mubr.bf16.gmra.mrb[32].mxu1 %v4036_v0  ;;  %v477_v0 = vld [vmem:[#allocation2 + $0x78] sm:$0xff] }
 0x129   : > { %1704 = vmatprep.mubr.bf16.mxu0 %v4043_v1  ;;  %1990 = vmatprep.mubr.bf16.mxu1 %v4043_v1 }
 0x130   : > { %1705 = vmatmul.mubr.bf16.gmra.mrb[36].mxu0 %v4045_v2  ;;  %1991 = vmatmul.mubr.bf16.gmra.mrb[36].mxu1 %v4045_v2 }
 0x131   : > { %1714 = vmatprep.mubr.bf16.mxu0 %v4058_v3  ;;  %2000 = vmatprep.mubr.bf16.mxu1 %v4058_v3 }
 0x138   : > { %1715 = vmatmul.mubr.bf16.gmra.mrb[40].mxu0 %v4060_v4  ;;  %2001 = vmatmul.mubr.bf16.gmra.mrb[40].mxu1 %v4060_v4 }
 0x139   : > { %1757 = vmatprep.mubr.bf16.mxu0 %v4069_v5  ;;  %2043 = vmatprep.mubr.bf16.mxu1 %v4069_v5 }
 0x140   : > { %1758 = vmatmul.mubr.bf16.vlgmr.msra.gmra.mrb[0].mxu0 %v4067_v6  ;;  %2044 = vmatmul.mubr.bf16.vlgmr.msra.gmra.mrb[0].mxu1 %v4067_v6 }
 0x141   : > { %1767 = vmatprep.mubr.bf16.mxu0 %v4070_v7  ;;  %2053 = vmatprep.mubr.bf16.mxu1 %v4070_v7 }
 0x148   : > { %1768 = vmatmul.mubr.bf16.gmra.mrb[4].mxu0 %v4072_v8  ;;  %2054 = vmatmul.mubr.bf16.gmra.mrb[4].mxu1 %v4072_v8 }
 0x149   : > { %1777 = vmatprep.mubr.bf16.mxu0 %v4073_v9  ;;  %2063 = vmatprep.mubr.bf16.mxu1 %v4073_v9 }
 0x150   : > { %1778 = vmatmul.mubr.bf16.gmra.mrb[8].mxu0 %v4075_v10  ;;  %2064 = vmatmul.mubr.bf16.gmra.mrb[8].mxu1 %v4075_v10 }
 0x151   : > { %1787 = vmatprep.mubr.bf16.mxu0 %v4076_v11  ;;  %2073 = vmatprep.mubr.bf16.mxu1 %v4076_v11  ;;  %v478_v11 = vld [vmem:[#allocation2 + $0x80] sm:$0xff] }
 0x158   : > { %1788 = vmatmul.mubr.bf16.gmra.mrb[12].mxu0 %v4078_v12  ;;  %2074 = vmatmul.mubr.bf16.gmra.mrb[12].mxu1 %v4078_v12  ;;  %v480_v12 = vld [vmem:[#allocation2 + $0x90] sm:$0xff] }
 0x159   : > { %1797 = vmatprep.mubr.bf16.mxu0 %v4079_v13  ;;  %2083 = vmatprep.mubr.bf16.mxu1 %v4079_v13  ;;  %v479_v13 = vld [vmem:[#allocation2 + $0x88] sm:$0xff] }
 0x160   : > { %1798 = vmatmul.mubr.bf16.gmra.mrb[16].mxu0 %v4081_v14  ;;  %2084 = vmatmul.mubr.bf16.gmra.mrb[16].mxu1 %v4081_v14  ;;  %v481_v14 = vld [vmem:[#allocation2 + $0x98] sm:$0xff] }
 0x161   : > { %1807 = vmatprep.mubr.bf16.mxu0 %v4082_v15  ;;  %2093 = vmatprep.mubr.bf16.mxu1 %v4082_v15 }
 0x168   : > { %1808 = vmatmul.mubr.bf16.gmra.mrb[20].mxu0 %v4084_v16  ;;  %2094 = vmatmul.mubr.bf16.gmra.mrb[20].mxu1 %v4084_v16 }
 0x169   : > { %1817 = vmatprep.mubr.bf16.mxu0 %v4085_v17  ;;  %2103 = vmatprep.mubr.bf16.mxu1 %v4085_v17  ;;  %v482_v17 = vld [vmem:[#allocation2 + $0xa0] sm:$0xff] }
 0x170   : > { %1818 = vmatmul.mubr.bf16.gmra.mrb[24].mxu0 %v4087_v18  ;;  %2104 = vmatmul.mubr.bf16.gmra.mrb[24].mxu1 %v4087_v18  ;;  %v484_v18 = vld [vmem:[#allocation2 + $0xb0] sm:$0xff] }
 0x171   : > { %1827 = vmatprep.mubr.bf16.mxu0 %v4088_v19  ;;  %2113 = vmatprep.mubr.bf16.mxu1 %v4088_v19 }
 0x178   : > { %1828 = vmatmul.mubr.bf16.gmra.mrb[28].mxu0 %v4090_v20  ;;  %2114 = vmatmul.mubr.bf16.gmra.mrb[28].mxu1 %v4090_v20 }
 0x179   : > { %1837 = vmatprep.mubr.bf16.mxu0 %v4091_v21  ;;  %2123 = vmatprep.mubr.bf16.mxu1 %v4091_v21 }
 0x180   : > { %1838 = vmatmul.mubr.bf16.gmra.mrb[32].mxu0 %v4093_v22  ;;  %2124 = vmatmul.mubr.bf16.gmra.mrb[32].mxu1 %v4093_v22 }
 0x181   : > { %1847 = vmatprep.mubr.bf16.mxu0 %v4094_v23  ;;  %2133 = vmatprep.mubr.bf16.mxu1 %v4094_v23  ;;  %v483_v23 = vld [vmem:[#allocation2 + $0xa8] sm:$0xff] }
 0x188   : > { %1848 = vmatmul.mubr.bf16.gmra.mrb[36].mxu0 %v4096_v24  ;;  %2134 = vmatmul.mubr.bf16.gmra.mrb[36].mxu1 %v4096_v24  ;;  %v485_v24 = vld [vmem:[#allocation2 + $0xb8] sm:$0xff] }
 0x189   : > { %1857 = vmatprep.mubr.bf16.mxu0 %v4097_v25  ;;  %2143 = vmatprep.mubr.bf16.mxu1 %v4097_v25 }
 0x190   : > { %1858 = vmatmul.mubr.bf16.gmra.mrb[40].mxu0 %v4099_v26  ;;  %2144 = vmatmul.mubr.bf16.gmra.mrb[40].mxu1 %v4099_v26 }
 0x213   : > { %v1759_v31 = vpop.f32.mrb[0].mxu0  ;;  %v2045_v32 = vpop.f32.mrb[0].mxu1 }
 0x214   : > { %v2154_v35 = vadd.f32 %v1759_v31, %v462_v27  ;;  %v2156_v36 = vadd.f32 %v2045_v32, %v464_v28  ;;  %v1761_v37 = vpop.f32.mrb[1].mxu0  ;;  %v2047_v38 = vpop.f32.mrb[1].mxu1 }
 0x215   : > { %v2155_v41 = vadd.f32 %v1761_v37, %v463_v29  ;;  %v2157_v42 = vadd.f32 %v2047_v38, %v465_v30  ;;  %v1763_v43 = vpop.f32.mrb[2].mxu0  ;;  %v2049_v44 = vpop.f32.mrb[2].mxu1  ;;  %v487_v37 = vld [vmem:[#allocation2 + $0xc8] sm:$0xff]  ;;  %v489_v38 = vld [vmem:[#allocation2 + $0xd8] sm:$0xff] }
 0x216   : > { %2242 = vst [vmem:[#allocation2] sm:$0xff] %v2154_v35  ;;  %2244 = vst [vmem:[#allocation2 + $0x10] sm:$0xff] %v2156_v36  ;;  %v2158_v45 = vadd.f32 %v1763_v43, %v466_v33  ;;  %v2160_v46 = vadd.f32 %v2049_v44, %v468_v34  ;;  %v1765_v47 = vpop.f32.mrb[3].mxu0  ;;  %v2051_v48 = vpop.f32.mrb[3].mxu1  ;;  %v486_v35 = vld [vmem:[#allocation2 + $0xc0] sm:$0xff]  ;;  %v488_v36 = vld [vmem:[#allocation2 + $0xd0] sm:$0xff] }
 0x217   : > { %2243 = vst [vmem:[#allocation2 + $0x8] sm:$0xff] %v2155_v41  ;;  %2245 = vst [vmem:[#allocation2 + $0x18] sm:$0xff] %v2157_v42  ;;  %v2159_v49 = vadd.f32 %v1765_v47, %v467_v39  ;;  %v2161_v50 = vadd.f32 %v2051_v48, %v469_v40  ;;  %v490_v41 = vld [vmem:[#allocation2 + $0xe0] sm:$0xff]  ;;  %v492_v42 = vld [vmem:[#allocation2 + $0xf0] sm:$0xff] }
 0x218   : > { %2246 = vst [vmem:[#allocation2 + $0x20] sm:$0xff] %v2158_v45  ;;  %2248 = vst [vmem:[#allocation2 + $0x30] sm:$0xff] %v2160_v46  ;;  %v491_v47 = vld [vmem:[#allocation2 + $0xe8] sm:$0xff]  ;;  %v493_v48 = vld [vmem:[#allocation2 + $0xf8] sm:$0xff] }
 0x219   : > { %2247 = vst [vmem:[#allocation2 + $0x28] sm:$0xff] %v2159_v49  ;;  %2249 = vst [vmem:[#allocation2 + $0x38] sm:$0xff] %v2161_v50 }
 0x21b   : > { %v1769_v55 = vpop.f32.mrb[4].mxu0  ;;  %v2055_v56 = vpop.f32.mrb[4].mxu1 }
 0x21c   : > { %v2162_v59 = vadd.f32 %v1769_v55, %v470_v51  ;;  %v2164_v60 = vadd.f32 %v2055_v56, %v472_v52  ;;  %v1771_v61 = vpop.f32.mrb[5].mxu0  ;;  %v2057_v62 = vpop.f32.mrb[5].mxu1 }
 0x21d   : > { %v2163_v1 = vadd.f32 %v1771_v61, %v471_v53  ;;  %v2165_v2 = vadd.f32 %v2057_v62, %v473_v54  ;;  %v1773_v3 = vpop.f32.mrb[6].mxu0  ;;  %v2059_v4 = vpop.f32.mrb[6].mxu1  ;;  %v495_v61 = vld [vmem:[#allocation2 + $0x108] sm:$0xff]  ;;  %v497_v62 = vld [vmem:[#allocation2 + $0x118] sm:$0xff] }
 0x21e   : > { %2250 = vst [vmem:[#allocation2 + $0x40] sm:$0xff] %v2162_v59  ;;  %2252 = vst [vmem:[#allocation2 + $0x50] sm:$0xff] %v2164_v60  ;;  %v2166_v5 = vadd.f32 %v1773_v3, %v474_v57  ;;  %v2168_v6 = vadd.f32 %v2059_v4, %v476_v58  ;;  %v1775_v7 = vpop.f32.mrb[7].mxu0  ;;  %v2061_v8 = vpop.f32.mrb[7].mxu1  ;;  %v494_v59 = vld [vmem:[#allocation2 + $0x100] sm:$0xff]  ;;  %v496_v60 = vld [vmem:[#allocation2 + $0x110] sm:$0xff] }
 0x21f   : > { %2251 = vst [vmem:[#allocation2 + $0x48] sm:$0xff] %v2163_v1  ;;  %2253 = vst [vmem:[#allocation2 + $0x58] sm:$0xff] %v2165_v2  ;;  %v2167_v9 = vadd.f32 %v1775_v7, %v475_v63  ;;  %v2169_v10 = vadd.f32 %v2061_v8, %v477_v0  ;;  %v498_v1 = vld [vmem:[#allocation2 + $0x120] sm:$0xff]  ;;  %v500_v2 = vld [vmem:[#allocation2 + $0x130] sm:$0xff] }
 0x220   : > { %2254 = vst [vmem:[#allocation2 + $0x60] sm:$0xff] %v2166_v5  ;;  %2256 = vst [vmem:[#allocation2 + $0x70] sm:$0xff] %v2168_v6  ;;  %v499_v7 = vld [vmem:[#allocation2 + $0x128] sm:$0xff]  ;;  %v501_v8 = vld [vmem:[#allocation2 + $0x138] sm:$0xff] }
 0x221   : > { %2255 = vst [vmem:[#allocation2 + $0x68] sm:$0xff] %v2167_v9  ;;  %2257 = vst [vmem:[#allocation2 + $0x78] sm:$0xff] %v2169_v10 }
 0x223   : > { %v1779_v15 = vpop.f32.mrb[8].mxu0  ;;  %v2065_v16 = vpop.f32.mrb[8].mxu1 }
 0x224   : > { %v2170_v19 = vadd.f32 %v1779_v15, %v478_v11  ;;  %v2172_v20 = vadd.f32 %v2065_v16, %v480_v12  ;;  %v1781_v21 = vpop.f32.mrb[9].mxu0  ;;  %v2067_v22 = vpop.f32.mrb[9].mxu1 }
 0x225   : > { %v2171_v25 = vadd.f32 %v1781_v21, %v479_v13  ;;  %v2173_v26 = vadd.f32 %v2067_v22, %v481_v14  ;;  %v1783_v27 = vpop.f32.mrb[10].mxu0  ;;  %v2069_v28 = vpop.f32.mrb[10].mxu1  ;;  %v503_v21 = vld [vmem:[#allocation2 + $0x148] sm:$0xff]  ;;  %v505_v22 = vld [vmem:[#allocation2 + $0x158] sm:$0xff] }
 0x226   : > { %2258 = vst [vmem:[#allocation2 + $0x80] sm:$0xff] %v2170_v19  ;;  %2260 = vst [vmem:[#allocation2 + $0x90] sm:$0xff] %v2172_v20  ;;  %v2174_v29 = vadd.f32 %v1783_v27, %v482_v17  ;;  %v2176_v30 = vadd.f32 %v2069_v28, %v484_v18  ;;  %v1785_v31 = vpop.f32.mrb[11].mxu0  ;;  %v2071_v32 = vpop.f32.mrb[11].mxu1  ;;  %v502_v19 = vld [vmem:[#allocation2 + $0x140] sm:$0xff]  ;;  %v504_v20 = vld [vmem:[#allocation2 + $0x150] sm:$0xff] }
 0x227   : > { %2259 = vst [vmem:[#allocation2 + $0x88] sm:$0xff] %v2171_v25  ;;  %2261 = vst [vmem:[#allocation2 + $0x98] sm:$0xff] %v2173_v26  ;;  %v2175_v33 = vadd.f32 %v1785_v31, %v483_v23  ;;  %v2177_v34 = vadd.f32 %v2071_v32, %v485_v24  ;;  %v506_v25 = vld [vmem:[#allocation2 + $0x160] sm:$0xff]  ;;  %v508_v26 = vld [vmem:[#allocation2 + $0x170] sm:$0xff] }
 0x228   : > { %2262 = vst [vmem:[#allocation2 + $0xa0] sm:$0xff] %v2174_v29  ;;  %2264 = vst [vmem:[#allocation2 + $0xb0] sm:$0xff] %v2176_v30  ;;  %v507_v31 = vld [vmem:[#allocation2 + $0x168] sm:$0xff]  ;;  %v509_v32 = vld [vmem:[#allocation2 + $0x178] sm:$0xff] }
 0x229   : > { %2263 = vst [vmem:[#allocation2 + $0xa8] sm:$0xff] %v2175_v33  ;;  %2265 = vst [vmem:[#allocation2 + $0xb8] sm:$0xff] %v2177_v34 }
 0x22b   : > { %v1789_v39 = vpop.f32.mrb[12].mxu0  ;;  %v2075_v40 = vpop.f32.mrb[12].mxu1 }
 0x22c   : > { %v2178_v43 = vadd.f32 %v1789_v39, %v486_v35  ;;  %v2180_v44 = vadd.f32 %v2075_v40, %v488_v36  ;;  %v1791_v45 = vpop.f32.mrb[13].mxu0  ;;  %v2077_v46 = vpop.f32.mrb[13].mxu1 }
 0x22d   : > { %v2179_v49 = vadd.f32 %v1791_v45, %v487_v37  ;;  %v2181_v50 = vadd.f32 %v2077_v46, %v489_v38  ;;  %v1793_v51 = vpop.f32.mrb[14].mxu0  ;;  %v2079_v52 = vpop.f32.mrb[14].mxu1  ;;  %v511_v45 = vld [vmem:[#allocation2 + $0x188] sm:$0xff]  ;;  %v513_v46 = vld [vmem:[#allocation2 + $0x198] sm:$0xff] }
 0x22e   : > { %2266 = vst [vmem:[#allocation2 + $0xc0] sm:$0xff] %v2178_v43  ;;  %2268 = vst [vmem:[#allocation2 + $0xd0] sm:$0xff] %v2180_v44  ;;  %v2182_v53 = vadd.f32 %v1793_v51, %v490_v41  ;;  %v2184_v54 = vadd.f32 %v2079_v52, %v492_v42  ;;  %v1795_v55 = vpop.f32.mrb[15].mxu0  ;;  %v2081_v56 = vpop.f32.mrb[15].mxu1  ;;  %v510_v43 = vld [vmem:[#allocation2 + $0x180] sm:$0xff]  ;;  %v512_v44 = vld [vmem:[#allocation2 + $0x190] sm:$0xff] }
 0x22f   : > { %2267 = vst [vmem:[#allocation2 + $0xc8] sm:$0xff] %v2179_v49  ;;  %2269 = vst [vmem:[#allocation2 + $0xd8] sm:$0xff] %v2181_v50  ;;  %v2183_v57 = vadd.f32 %v1795_v55, %v491_v47  ;;  %v2185_v58 = vadd.f32 %v2081_v56, %v493_v48  ;;  %v514_v49 = vld [vmem:[#allocation2 + $0x1a0] sm:$0xff]  ;;  %v516_v50 = vld [vmem:[#allocation2 + $0x1b0] sm:$0xff] }
 0x230   : > { %2270 = vst [vmem:[#allocation2 + $0xe0] sm:$0xff] %v2182_v53  ;;  %2272 = vst [vmem:[#allocation2 + $0xf0] sm:$0xff] %v2184_v54  ;;  %v515_v55 = vld [vmem:[#allocation2 + $0x1a8] sm:$0xff]  ;;  %v517_v56 = vld [vmem:[#allocation2 + $0x1b8] sm:$0xff] }
 0x231   : > { %2271 = vst [vmem:[#allocation2 + $0xe8] sm:$0xff] %v2183_v57  ;;  %2273 = vst [vmem:[#allocation2 + $0xf8] sm:$0xff] %v2185_v58 }
 0x233   : > { %v1799_v63 = vpop.f32.mrb[16].mxu0  ;;  %v2085_v0 = vpop.f32.mrb[16].mxu1 }
 0x234   : > { %v2186_v3 = vadd.f32 %v1799_v63, %v494_v59  ;;  %v2188_v4 = vadd.f32 %v2085_v0, %v496_v60  ;;  %v1801_v5 = vpop.f32.mrb[17].mxu0  ;;  %v2087_v6 = vpop.f32.mrb[17].mxu1 }
 0x235   : > { %v2187_v9 = vadd.f32 %v1801_v5, %v495_v61  ;;  %v2189_v10 = vadd.f32 %v2087_v6, %v497_v62  ;;  %v1803_v11 = vpop.f32.mrb[18].mxu0  ;;  %v2089_v12 = vpop.f32.mrb[18].mxu1  ;;  %v519_v5 = vld [vmem:[#allocation2 + $0x1c8] sm:$0xff]  ;;  %v521_v6 = vld [vmem:[#allocation2 + $0x1d8] sm:$0xff] }
 0x236   : > { %2274 = vst [vmem:[#allocation2 + $0x100] sm:$0xff] %v2186_v3  ;;  %2276 = vst [vmem:[#allocation2 + $0x110] sm:$0xff] %v2188_v4  ;;  %v2190_v13 = vadd.f32 %v1803_v11, %v498_v1  ;;  %v2192_v14 = vadd.f32 %v2089_v12, %v500_v2  ;;  %v1805_v15 = vpop.f32.mrb[19].mxu0  ;;  %v2091_v16 = vpop.f32.mrb[19].mxu1  ;;  %v518_v3 = vld [vmem:[#allocation2 + $0x1c0] sm:$0xff]  ;;  %v520_v4 = vld [vmem:[#allocation2 + $0x1d0] sm:$0xff] }
 0x237   : > { %2275 = vst [vmem:[#allocation2 + $0x108] sm:$0xff] %v2187_v9  ;;  %2277 = vst [vmem:[#allocation2 + $0x118] sm:$0xff] %v2189_v10  ;;  %v2191_v17 = vadd.f32 %v1805_v15, %v499_v7  ;;  %v2193_v18 = vadd.f32 %v2091_v16, %v501_v8  ;;  %v522_v9 = vld [vmem:[#allocation2 + $0x1e0] sm:$0xff]  ;;  %v524_v10 = vld [vmem:[#allocation2 + $0x1f0] sm:$0xff] }
 0x238   : > { %2278 = vst [vmem:[#allocation2 + $0x120] sm:$0xff] %v2190_v13  ;;  %2280 = vst [vmem:[#allocation2 + $0x130] sm:$0xff] %v2192_v14  ;;  %v523_v15 = vld [vmem:[#allocation2 + $0x1e8] sm:$0xff]  ;;  %v525_v16 = vld [vmem:[#allocation2 + $0x1f8] sm:$0xff] }
 0x239   : > { %2279 = vst [vmem:[#allocation2 + $0x128] sm:$0xff] %v2191_v17  ;;  %2281 = vst [vmem:[#allocation2 + $0x138] sm:$0xff] %v2193_v18 }
 0x23b   : > { %v1809_v23 = vpop.f32.mrb[20].mxu0  ;;  %v2095_v24 = vpop.f32.mrb[20].mxu1 }
 0x23c   : > { %v2194_v27 = vadd.f32 %v1809_v23, %v502_v19  ;;  %v2196_v28 = vadd.f32 %v2095_v24, %v504_v20  ;;  %v1811_v29 = vpop.f32.mrb[21].mxu0  ;;  %v2097_v30 = vpop.f32.mrb[21].mxu1 }
 0x23d   : > { %v2195_v33 = vadd.f32 %v1811_v29, %v503_v21  ;;  %v2197_v34 = vadd.f32 %v2097_v30, %v505_v22  ;;  %v1813_v35 = vpop.f32.mrb[22].mxu0  ;;  %v2099_v36 = vpop.f32.mrb[22].mxu1  ;;  %v527_v29 = vld [vmem:[#allocation2 + $0x208] sm:$0xff]  ;;  %v529_v30 = vld [vmem:[#allocation2 + $0x218] sm:$0xff] }
 0x23e   : > { %2282 = vst [vmem:[#allocation2 + $0x140] sm:$0xff] %v2194_v27  ;;  %2284 = vst [vmem:[#allocation2 + $0x150] sm:$0xff] %v2196_v28  ;;  %v2198_v37 = vadd.f32 %v1813_v35, %v506_v25  ;;  %v2200_v38 = vadd.f32 %v2099_v36, %v508_v26  ;;  %v1815_v39 = vpop.f32.mrb[23].mxu0  ;;  %v2101_v40 = vpop.f32.mrb[23].mxu1  ;;  %v526_v27 = vld [vmem:[#allocation2 + $0x200] sm:$0xff]  ;;  %v528_v28 = vld [vmem:[#allocation2 + $0x210] sm:$0xff] }
 0x23f   : > { %2283 = vst [vmem:[#allocation2 + $0x148] sm:$0xff] %v2195_v33  ;;  %2285 = vst [vmem:[#allocation2 + $0x158] sm:$0xff] %v2197_v34  ;;  %v2199_v41 = vadd.f32 %v1815_v39, %v507_v31  ;;  %v2201_v42 = vadd.f32 %v2101_v40, %v509_v32  ;;  %v530_v33 = vld [vmem:[#allocation2 + $0x220] sm:$0xff]  ;;  %v532_v34 = vld [vmem:[#allocation2 + $0x230] sm:$0xff] }
 0x240   : > { %2286 = vst [vmem:[#allocation2 + $0x160] sm:$0xff] %v2198_v37  ;;  %2288 = vst [vmem:[#allocation2 + $0x170] sm:$0xff] %v2200_v38  ;;  %v531_v39 = vld [vmem:[#allocation2 + $0x228] sm:$0xff]  ;;  %v533_v40 = vld [vmem:[#allocation2 + $0x238] sm:$0xff] }
 0x241   : > { %2287 = vst [vmem:[#allocation2 + $0x168] sm:$0xff] %v2199_v41  ;;  %2289 = vst [vmem:[#allocation2 + $0x178] sm:$0xff] %v2201_v42 }
 0x243   : > { %v1819_v47 = vpop.f32.mrb[24].mxu0  ;;  %v2105_v48 = vpop.f32.mrb[24].mxu1 }
 0x244   : > { %v2202_v51 = vadd.f32 %v1819_v47, %v510_v43  ;;  %v2204_v52 = vadd.f32 %v2105_v48, %v512_v44  ;;  %v1821_v53 = vpop.f32.mrb[25].mxu0  ;;  %v2107_v54 = vpop.f32.mrb[25].mxu1 }
 0x245   : > { %v2203_v57 = vadd.f32 %v1821_v53, %v511_v45  ;;  %v2205_v58 = vadd.f32 %v2107_v54, %v513_v46  ;;  %v1823_v59 = vpop.f32.mrb[26].mxu0  ;;  %v2109_v60 = vpop.f32.mrb[26].mxu1  ;;  %v535_v53 = vld [vmem:[#allocation2 + $0x248] sm:$0xff]  ;;  %v537_v54 = vld [vmem:[#allocation2 + $0x258] sm:$0xff] }
 0x246   : > { %2290 = vst [vmem:[#allocation2 + $0x180] sm:$0xff] %v2202_v51  ;;  %2292 = vst [vmem:[#allocation2 + $0x190] sm:$0xff] %v2204_v52  ;;  %v2206_v61 = vadd.f32 %v1823_v59, %v514_v49  ;;  %v2208_v62 = vadd.f32 %v2109_v60, %v516_v50  ;;  %v1825_v63 = vpop.f32.mrb[27].mxu0  ;;  %v2111_v0 = vpop.f32.mrb[27].mxu1  ;;  %v534_v51 = vld [vmem:[#allocation2 + $0x240] sm:$0xff]  ;;  %v536_v52 = vld [vmem:[#allocation2 + $0x250] sm:$0xff] }
 0x247   : > { %2291 = vst [vmem:[#allocation2 + $0x188] sm:$0xff] %v2203_v57  ;;  %2293 = vst [vmem:[#allocation2 + $0x198] sm:$0xff] %v2205_v58  ;;  %v2207_v1 = vadd.f32 %v1825_v63, %v515_v55  ;;  %v2209_v2 = vadd.f32 %v2111_v0, %v517_v56  ;;  %v538_v57 = vld [vmem:[#allocation2 + $0x260] sm:$0xff]  ;;  %v540_v58 = vld [vmem:[#allocation2 + $0x270] sm:$0xff] }
 0x248   : > { %2294 = vst [vmem:[#allocation2 + $0x1a0] sm:$0xff] %v2206_v61  ;;  %2296 = vst [vmem:[#allocation2 + $0x1b0] sm:$0xff] %v2208_v62  ;;  %v539_v63 = vld [vmem:[#allocation2 + $0x268] sm:$0xff]  ;;  %v541_v0 = vld [vmem:[#allocation2 + $0x278] sm:$0xff] }
 0x249   : > { %2295 = vst [vmem:[#allocation2 + $0x1a8] sm:$0xff] %v2207_v1  ;;  %2297 = vst [vmem:[#allocation2 + $0x1b8] sm:$0xff] %v2209_v2 }
 0x24b   : > { %v1829_v7 = vpop.f32.mrb[28].mxu0  ;;  %v2115_v8 = vpop.f32.mrb[28].mxu1 }
 0x24c   : > { %v2210_v11 = vadd.f32 %v1829_v7, %v518_v3  ;;  %v2212_v12 = vadd.f32 %v2115_v8, %v520_v4  ;;  %v1831_v13 = vpop.f32.mrb[29].mxu0  ;;  %v2117_v14 = vpop.f32.mrb[29].mxu1 }
 0x24d   : > { %v2211_v17 = vadd.f32 %v1831_v13, %v519_v5  ;;  %v2213_v18 = vadd.f32 %v2117_v14, %v521_v6  ;;  %v1833_v19 = vpop.f32.mrb[30].mxu0  ;;  %v2119_v20 = vpop.f32.mrb[30].mxu1  ;;  %v543_v13 = vld [vmem:[#allocation2 + $0x288] sm:$0xff]  ;;  %v545_v14 = vld [vmem:[#allocation2 + $0x298] sm:$0xff] }
 0x24e   : > { %2298 = vst [vmem:[#allocation2 + $0x1c0] sm:$0xff] %v2210_v11  ;;  %2300 = vst [vmem:[#allocation2 + $0x1d0] sm:$0xff] %v2212_v12  ;;  %v2214_v21 = vadd.f32 %v1833_v19, %v522_v9  ;;  %v2216_v22 = vadd.f32 %v2119_v20, %v524_v10  ;;  %v1835_v23 = vpop.f32.mrb[31].mxu0  ;;  %v2121_v24 = vpop.f32.mrb[31].mxu1  ;;  %v542_v11 = vld [vmem:[#allocation2 + $0x280] sm:$0xff]  ;;  %v544_v12 = vld [vmem:[#allocation2 + $0x290] sm:$0xff] }
 0x24f   : > { %2299 = vst [vmem:[#allocation2 + $0x1c8] sm:$0xff] %v2211_v17  ;;  %2301 = vst [vmem:[#allocation2 + $0x1d8] sm:$0xff] %v2213_v18  ;;  %v2215_v25 = vadd.f32 %v1835_v23, %v523_v15  ;;  %v2217_v26 = vadd.f32 %v2121_v24, %v525_v16  ;;  %v546_v17 = vld [vmem:[#allocation2 + $0x2a0] sm:$0xff]  ;;  %v548_v18 = vld [vmem:[#allocation2 + $0x2b0] sm:$0xff] }
 0x250   : > { %2302 = vst [vmem:[#allocation2 + $0x1e0] sm:$0xff] %v2214_v21  ;;  %2304 = vst [vmem:[#allocation2 + $0x1f0] sm:$0xff] %v2216_v22  ;;  %v547_v23 = vld [vmem:[#allocation2 + $0x2a8] sm:$0xff]  ;;  %v549_v24 = vld [vmem:[#allocation2 + $0x2b8] sm:$0xff] }
 0x251   : > { %2303 = vst [vmem:[#allocation2 + $0x1e8] sm:$0xff] %v2215_v25  ;;  %2305 = vst [vmem:[#allocation2 + $0x1f8] sm:$0xff] %v2217_v26 }
 0x253   : > { %v1839_v31 = vpop.f32.mrb[32].mxu0  ;;  %v2125_v32 = vpop.f32.mrb[32].mxu1 }
 0x254   : > { %v2218_v35 = vadd.f32 %v1839_v31, %v526_v27  ;;  %v2220_v36 = vadd.f32 %v2125_v32, %v528_v28  ;;  %v1841_v37 = vpop.f32.mrb[33].mxu0  ;;  %v2127_v38 = vpop.f32.mrb[33].mxu1 }
 0x255   : > { %v2219_v41 = vadd.f32 %v1841_v37, %v527_v29  ;;  %v2221_v42 = vadd.f32 %v2127_v38, %v529_v30  ;;  %v1843_v43 = vpop.f32.mrb[34].mxu0  ;;  %v2129_v44 = vpop.f32.mrb[34].mxu1  ;;  %v2422_v37 = vld [vmem:[%s5181_s2] sm:$0xf] (!%p3433_p11) }
 0x256   : > { %2306 = vst [vmem:[#allocation2 + $0x200] sm:$0xff] %v2218_v35  ;;  %2308 = vst [vmem:[#allocation2 + $0x210] sm:$0xff] %v2220_v36  ;;  %v2222_v45 = vadd.f32 %v1843_v43, %v530_v33  ;;  %v2224_v46 = vadd.f32 %v2129_v44, %v532_v34  ;;  %v1845_v47 = vpop.f32.mrb[35].mxu0  ;;  %v2131_v48 = vpop.f32.mrb[35].mxu1  ;;  %v2424_v35 = vlaneseq (!%p3433_p11)  ;;  %v2334_v38 = vld [vmem:[#allocation2] sm:$0xff] (!%p3433_p11)  ;;  %v2336_v44 = vld [vmem:[#allocation2 + $0x10] sm:$0xff] (!%p3433_p11) }
 0x257   : > { %2307 = vst [vmem:[#allocation2 + $0x208] sm:$0xff] %v2219_v41  ;;  %2309 = vst [vmem:[#allocation2 + $0x218] sm:$0xff] %v2221_v42  ;;  %v2223_v49 = vadd.f32 %v1845_v47, %v531_v39  ;;  %v2225_v50 = vadd.f32 %v2131_v48, %v533_v40  ;;  %v2335_v39 = vld [vmem:[#allocation2 + $0x8] sm:$0xff] (!%p3433_p11) }
 0x258   : > { %2310 = vst [vmem:[#allocation2 + $0x220] sm:$0xff] %v2222_v45  ;;  %2312 = vst [vmem:[#allocation2 + $0x230] sm:$0xff] %v2224_v46  ;;  %v2425_v36 = vshrl.u32 (!%p3433_p11), %v2424_v35, 7  ;;  %v2337_v45 = vld [vmem:[#allocation2 + $0x18] sm:$0xff] (!%p3433_p11)  ;;  %v2338_v46 = vld [vmem:[#allocation2 + $0x20] sm:$0xff] (!%p3433_p11) }
 0x259   : > { %2311 = vst [vmem:[#allocation2 + $0x228] sm:$0xff] %v2223_v49  ;;  %2313 = vst [vmem:[#allocation2 + $0x238] sm:$0xff] %v2225_v50 }
 0x25a   : > { %v2426_v40 = vsub.s32 (!%p3433_p11), 0, %v2425_v36  ;;  %v2430_v41 = vsub.s32 (!%p3433_p11), 1, %v2425_v36  ;;  %v2434_v42 = vsub.s32 (!%p3433_p11), 2, %v2425_v36  ;;  %v2438_v43 = vsub.s32 (!%p3433_p11), 3, %v2425_v36 }
 0x25b   : > { %v1849_v55 = vpop.f32.mrb[36].mxu0  ;;  %v2135_v56 = vpop.f32.mrb[36].mxu1 }
 0x25c   : > { %v2226_v59 = vadd.f32 %v1849_v55, %v534_v51  ;;  %v2228_v60 = vadd.f32 %v2135_v56, %v536_v52  ;;  %v1851_v61 = vpop.f32.mrb[37].mxu0  ;;  %v2137_v62 = vpop.f32.mrb[37].mxu1  ;;  %v4853_v47 = vrot.slane (!%p3433_p11), %v2422_v37, %v2426_v40  ;;  %v4855_v48 = vrot.slane (!%p3433_p11), %v2422_v37, %v2430_v41  ;;  %v2339_v51 = vld [vmem:[#allocation2 + $0x28] sm:$0xff] (!%p3433_p11)  ;;  %v2340_v52 = vld [vmem:[#allocation2 + $0x30] sm:$0xff] (!%p3433_p11) }
 0x25d   : > { %v2227_v1 = vadd.f32 %v1851_v61, %v535_v53  ;;  %v2229_v2 = vadd.f32 %v2137_v62, %v537_v54  ;;  %v1853_v3 = vpop.f32.mrb[38].mxu0  ;;  %v2139_v4 = vpop.f32.mrb[38].mxu1  ;;  %v4857_v49 = vrot.slane (!%p3433_p11), %v2422_v37, %v2434_v42  ;;  %v4859_v50 = vrot.slane (!%p3433_p11), %v2422_v37, %v2438_v43  ;;  %v2341_v53 = vld [vmem:[#allocation2 + $0x38] sm:$0xff] (!%p3433_p11)  ;;  %v2342_v62 = vld [vmem:[#allocation2 + $0x40] sm:$0xff] (!%p3433_p11) }
 0x25e   : > { %2314 = vst [vmem:[#allocation2 + $0x240] sm:$0xff] %v2226_v59  ;;  %2316 = vst [vmem:[#allocation2 + $0x250] sm:$0xff] %v2228_v60  ;;  %v2230_v5 = vadd.f32 %v1853_v3, %v538_v57  ;;  %v2232_v6 = vadd.f32 %v2139_v4, %v540_v58  ;;  %v1855_v7 = vpop.f32.mrb[39].mxu0  ;;  %v2141_v8 = vpop.f32.mrb[39].mxu1  ;;  %v2444_v54 = vadd.f32 (!%p3433_p11), %v4853_v47, %v2334_v38  ;;  %v2344_v4 = vld [vmem:[#allocation2 + $0x50] sm:$0xff] (!%p3433_p11)  ;;  %v2354_v38 = vld [vmem:[#allocation2 + $0xa0] sm:$0xff] (!%p3433_p11) }
 0x25f   : > { %2315 = vst [vmem:[#allocation2 + $0x248] sm:$0xff] %v2227_v1  ;;  %2317 = vst [vmem:[#allocation2 + $0x258] sm:$0xff] %v2229_v2  ;;  %v2231_v9 = vadd.f32 %v1855_v7, %v539_v63  ;;  %v2233_v10 = vadd.f32 %v2141_v8, %v541_v0  ;;  %v2445_v55 = vadd.f32 (!%p3433_p11), %v4855_v48, %v2335_v39  ;;  %v2343_v63 = vld [vmem:[#allocation2 + $0x48] sm:$0xff] (!%p3433_p11) }
 0x260   : > { %2318 = vst [vmem:[#allocation2 + $0x260] sm:$0xff] %v2230_v5  ;;  %2320 = vst [vmem:[#allocation2 + $0x270] sm:$0xff] %v2232_v6  ;;  %v2446_v56 = vadd.f32 (!%p3433_p11), %v4857_v49, %v2336_v44  ;;  %v2447_v57 = vadd.f32 (!%p3433_p11), %v4859_v50, %v2337_v45  ;;  %v2448_v58 = vadd.f32 (!%p3433_p11), %v4853_v47, %v2338_v46  ;;  %v2532_v0 = vmax.f32 (!%p3433_p11), %v2444_v54, 0.0  ;;  %v2345_v5 = vld [vmem:[#allocation2 + $0x58] sm:$0xff] (!%p3433_p11)  ;;  %v2355_v39 = vld [vmem:[#allocation2 + $0xa8] sm:$0xff] (!%p3433_p11) }
 0x261   : > { %2319 = vst [vmem:[#allocation2 + $0x268] sm:$0xff] %v2231_v9  ;;  %2321 = vst [vmem:[#allocation2 + $0x278] sm:$0xff] %v2233_v10  ;;  %v2449_v59 = vadd.f32 (!%p3433_p11), %v4855_v48, %v2339_v51  ;;  %v2450_v60 = vadd.f32 (!%p3433_p11), %v4857_v49, %v2340_v52  ;;  %v2451_v61 = vadd.f32 (!%p3433_p11), %v4859_v50, %v2341_v53  ;;  %v2533_v1 = vmax.f32 (!%p3433_p11), %v2445_v55, 0.0  ;;  %v2346_v10 = vld [vmem:[#allocation2 + $0x60] sm:$0xff] (!%p3433_p11)  ;;  %v2356_v44 = vld [vmem:[#allocation2 + $0xb0] sm:$0xff] (!%p3433_p11) }
 0x262   : > { %v2534_v2 = vmax.f32 (!%p3433_p11), %v2446_v56, 0.0  ;;  %v2535_v3 = vmax.f32 (!%p3433_p11), %v2447_v57, 0.0  ;;  %v2536_v6 = vmax.f32 (!%p3433_p11), %v2448_v58, 0.0  ;;  %v2357_v45 = vld [vmem:[#allocation2 + $0xb8] sm:$0xff] (!%p3433_p11)  ;;  %v2358_v54 = vld [vmem:[#allocation2 + $0xc0] sm:$0xff] (!%p3433_p11)  ;;  %v2464_v57 = vadd.f32 (!%p3433_p11), %v4853_v47, %v2354_v38 }
 0x263   : > { %v1859_v15 = vpop.f32.mrb[40].mxu0  ;;  %v2145_v16 = vpop.f32.mrb[40].mxu1  ;;  %2333 = sbr.rel (%p3433_p11) target bundleno = 669 (0x29d), region = 70  ;;  %v2537_v7 = vmax.f32 (!%p3433_p11), %v2449_v59, 0.0  ;;  %v2538_v8 = vmax.f32 (!%p3433_p11), %v2450_v60, 0.0  ;;  %v2539_v9 = vmax.f32 (!%p3433_p11), %v2451_v61, 0.0  ;;  %v2465_v58 = vadd.f32 (!%p3433_p11), %v4855_v48, %v2355_v39 }
 0x264   : > { %v2234_v19 = vadd.f32 %v1859_v15, %v542_v11  ;;  %v2236_v20 = vadd.f32 %v2145_v16, %v544_v12  ;;  %v1861_v21 = vpop.f32.mrb[41].mxu0  ;;  %v2147_v22 = vpop.f32.mrb[41].mxu1  ;;  %v2347_v11 = vld [vmem:[#allocation2 + $0x68] sm:$0xff] (!%p3433_p11)  ;;  %v3494_v12 = vpack.c.bf16 (!%p3433_p11), %v2533_v1, %v2532_v0  ;;  %v2453_v15 = vadd.f32 (!%p3433_p11), %v4855_v48, %v2343_v63  ;;  %v2348_v16 = vld [vmem:[#allocation2 + $0x70] sm:$0xff] (!%p3433_p11)  ;;  %v2361_v1 = vld [vmem:[#allocation2 + $0xd8] sm:$0xff] (!%p3433_p11) }
 0x265   : > { %v2235_v25 = vadd.f32 %v1861_v21, %v543_v13  ;;  %v2237_v26 = vadd.f32 %v2147_v22, %v545_v14  ;;  %v1863_v27 = vpop.f32.mrb[42].mxu0  ;;  %v2149_v28 = vpop.f32.mrb[42].mxu1  ;;  %v3495_v13 = vpack.c.bf16 (!%p3433_p11), %v2535_v3, %v2534_v2  ;;  %v2452_v14 = vadd.f32 (!%p3433_p11), %v4853_v47, %v2342_v62  ;;  %v2350_v22 = vld [vmem:[#allocation2 + $0x80] sm:$0xff] (!%p3433_p11)  ;;  %v2359_v59 = vld [vmem:[#allocation2 + $0xc8] sm:$0xff] (!%p3433_p11)  ;;  %v2360_v0 = vld [vmem:[#allocation2 + $0xd0] sm:$0xff] (!%p3433_p11) }
 0x266   : > { %2322 = vst [vmem:[#allocation2 + $0x280] sm:$0xff] %v2234_v19  ;;  %2324 = vst [vmem:[#allocation2 + $0x290] sm:$0xff] %v2236_v20  ;;  %v2238_v29 = vadd.f32 %v1863_v27, %v546_v17  ;;  %v2240_v30 = vadd.f32 %v2149_v28, %v548_v18  ;;  %v1865_v31 = vpop.f32.mrb[43].mxu0  ;;  %v2151_v32 = vpop.f32.mrb[43].mxu1  ;;  %v2349_v17 = vld [vmem:[#allocation2 + $0x78] sm:$0xff] (!%p3433_p11)  ;;  %v3496_v18 = vpack.c.bf16 (!%p3433_p11), %v2537_v7, %v2536_v6  ;;  %v2351_v27 = vld [vmem:[#allocation2 + $0x88] sm:$0xff] (!%p3433_p11) }
 0x267   : > { %2323 = vst [vmem:[#allocation2 + $0x288] sm:$0xff] %v2235_v25  ;;  %2325 = vst [vmem:[#allocation2 + $0x298] sm:$0xff] %v2237_v26  ;;  %v2239_v33 = vadd.f32 %v1865_v31, %v547_v23  ;;  %v2241_v34 = vadd.f32 %v2151_v32, %v549_v24  ;;  %v3497_v19 = vpack.c.bf16 (!%p3433_p11), %v2539_v9, %v2538_v8  ;;  %v2540_v23 = vmax.f32 (!%p3433_p11), %v2452_v14, 0.0  ;;  %v2352_v32 = vld [vmem:[#allocation2 + $0x90] sm:$0xff] (!%p3433_p11)  ;;  %v2362_v6 = vld [vmem:[#allocation2 + $0xe0] sm:$0xff] (!%p3433_p11) }
 0x268   : > { %2326 = vst [vmem:[#allocation2 + $0x2a0] sm:$0xff] %v2238_v29  ;;  %2328 = vst [vmem:[#allocation2 + $0x2b0] sm:$0xff] %v2240_v30  ;;  %v2454_v20 = vadd.f32 (!%p3433_p11), %v4857_v49, %v2344_v4  ;;  %v2455_v21 = vadd.f32 (!%p3433_p11), %v4859_v50, %v2345_v5  ;;  %v2541_v24 = vmax.f32 (!%p3433_p11), %v2453_v15, 0.0  ;;  %v2456_v25 = vadd.f32 (!%p3433_p11), %v4853_v47, %v2346_v10  ;;  %v2363_v7 = vld [vmem:[#allocation2 + $0xe8] sm:$0xff] (!%p3433_p11) }
 0x269   : > { %2327 = vst [vmem:[#allocation2 + $0x2a8] sm:$0xff] %v2239_v33  ;;  %2329 = vst [vmem:[#allocation2 + $0x2b8] sm:$0xff] %v2241_v34  ;;  %v2457_v26 = vadd.f32 (!%p3433_p11), %v4855_v48, %v2347_v11  ;;  %v2458_v30 = vadd.f32 (!%p3433_p11), %v4857_v49, %v2348_v16  ;;  %v2459_v31 = vadd.f32 (!%p3433_p11), %v4859_v50, %v2349_v17  ;;  %v2353_v33 = vld [vmem:[#allocation2 + $0x98] sm:$0xff] (!%p3433_p11)  ;;  %v2552_v3 = vmax.f32 (!%p3433_p11), %v2464_v57, 0.0 }
 0x26a   : > { %2884 = vst [vmem:[%s4586_s11] sm:$0xff] %v3494_v12  ;;  %2885 = vst [vmem:[%s4586_s11 + $0x8] sm:$0xff] %v3495_v13  ;;  %v2542_v28 = vmax.f32 %v2454_v20, 0.0  ;;  %v2543_v29 = vmax.f32 %v2455_v21, 0.0  ;;  %v3498_v34 = vpack.c.bf16 %v2541_v24, %v2540_v23  ;;  %v2544_v35 = vmax.f32 %v2456_v25, 0.0  ;;  %v2364_v12 = vld [vmem:[#allocation2 + $0xf0] sm:$0xff]  ;;  %v2365_v13 = vld [vmem:[#allocation2 + $0xf8] sm:$0xff] }
 0x26b   : > { %2886 = vst [vmem:[%s4586_s11 + $0x10] sm:$0xff] %v3496_v18  ;;  %2887 = vst [vmem:[%s4586_s11 + $0x18] sm:$0xff] %v3497_v19  ;;  %v2545_v36 = vmax.f32 %v2457_v26, 0.0  ;;  %v2460_v37 = vadd.f32 %v4853_v47, %v2350_v22  ;;  %v2546_v41 = vmax.f32 %v2458_v30, 0.0  ;;  %v2547_v42 = vmax.f32 %v2459_v31, 0.0  ;;  %v2366_v18 = vld [vmem:[#allocation2 + $0x100] sm:$0xff] }
 0x26c   : > { %v3499_v40 = vpack.c.bf16 %v2543_v29, %v2542_v28  ;;  %v2461_v43 = vadd.f32 %v4855_v48, %v2351_v27  ;;  %2888 = vst [vmem:[%s4586_s11 + $0x20] sm:$0xff] %v3498_v34  ;;  %v2462_v52 = vadd.f32 %v4857_v49, %v2352_v32  ;;  %v2463_v53 = vadd.f32 %v4859_v50, %v2353_v33  ;;  %v2367_v23 = vld [vmem:[#allocation2 + $0x108] sm:$0xff]  ;;  %v2368_v28 = vld [vmem:[#allocation2 + $0x110] sm:$0xff]  ;;  %v2369_v29 = vld [vmem:[#allocation2 + $0x118] sm:$0xff] }
 0x26d   : > { %v3500_v46 = vpack.c.bf16 %v2545_v36, %v2544_v35  ;;  %v2548_v51 = vmax.f32 %v2460_v37, 0.0  ;;  %v3501_v55 = vpack.c.bf16 %v2547_v42, %v2546_v41  ;;  %v2466_v62 = vadd.f32 %v4857_v49, %v2356_v44  ;;  %v2370_v34 = vld [vmem:[#allocation2 + $0x120] sm:$0xff]  ;;  %v2371_v35 = vld [vmem:[#allocation2 + $0x128] sm:$0xff]  ;;  %v2373_v41 = vld [vmem:[#allocation2 + $0x138] sm:$0xff] }
 0x26e   : > { %2889 = vst [vmem:[%s4586_s11 + $0x28] sm:$0xff] %v3499_v40  ;;  %v2549_v56 = vmax.f32 %v2461_v43, 0.0  ;;  %v2550_v60 = vmax.f32 %v2462_v52, 0.0  ;;  %v2551_v61 = vmax.f32 %v2463_v53, 0.0  ;;  %v2467_v63 = vadd.f32 %v4859_v50, %v2357_v45  ;;  %v2372_v40 = vld [vmem:[#allocation2 + $0x130] sm:$0xff] }
 0x26f   : > { %2890 = vst [vmem:[%s4586_s11 + $0x30] sm:$0xff] %v3500_v46  ;;  %2891 = vst [vmem:[%s4586_s11 + $0x38] sm:$0xff] %v3501_v55  ;;  %v2553_v4 = vmax.f32 %v2465_v58, 0.0  ;;  %v2468_v5 = vadd.f32 %v4853_v47, %v2358_v54  ;;  %v2554_v9 = vmax.f32 %v2466_v62, 0.0  ;;  %v2469_v11 = vadd.f32 %v4855_v48, %v2359_v59  ;;  %v2374_v46 = vld [vmem:[#allocation2 + $0x140] sm:$0xff]  ;;  %v2375_v55 = vld [vmem:[#allocation2 + $0x148] sm:$0xff] }
 0x270   : > { %v3502_v2 = vpack.c.bf16 %v2549_v56, %v2548_v51  ;;  %v3503_v8 = vpack.c.bf16 %v2551_v61, %v2550_v60  ;;  %v2555_v10 = vmax.f32 %v2467_v63, 0.0  ;;  %v2470_v16 = vadd.f32 %v4857_v49, %v2360_v0  ;;  %v2376_v60 = vld [vmem:[#allocation2 + $0x150] sm:$0xff]  ;;  %v2377_v61 = vld [vmem:[#allocation2 + $0x158] sm:$0xff] }
 0x271   : > { %v3504_v14 = vpack.c.bf16 %v2553_v4, %v2552_v3  ;;  %v2556_v15 = vmax.f32 %v2468_v5, 0.0  ;;  %v2471_v17 = vadd.f32 %v4859_v50, %v2361_v1  ;;  %v2557_v20 = vmax.f32 %v2469_v11, 0.0  ;;  %v2379_v3 = vld [vmem:[#allocation2 + $0x168] sm:$0xff] }
 0x272   : > { %2892 = vst [vmem:[%s4586_s11 + $0x40] sm:$0xff] %v3502_v2  ;;  %2893 = vst [vmem:[%s4586_s11 + $0x48] sm:$0xff] %v3503_v8  ;;  %v3505_v19 = vpack.c.bf16 %v2555_v10, %v2554_v9  ;;  %v2472_v21 = vadd.f32 %v4853_v47, %v2362_v6  ;;  %v2473_v22 = vadd.f32 %v4855_v48, %v2363_v7  ;;  %v2558_v24 = vmax.f32 %v2470_v16, 0.0  ;;  %v2378_v2 = vld [vmem:[#allocation2 + $0x160] sm:$0xff]  ;;  %v2380_v8 = vld [vmem:[#allocation2 + $0x170] sm:$0xff] }
 0x273   : > { %2894 = vst [vmem:[%s4586_s11 + $0x50] sm:$0xff] %v3504_v14  ;;  %v2559_v25 = vmax.f32 %v2471_v17, 0.0  ;;  %v2474_v26 = vadd.f32 %v4857_v49, %v2364_v12  ;;  %v2475_v27 = vadd.f32 %v4859_v50, %v2365_v13  ;;  %v3506_v30 = vpack.c.bf16 %v2557_v20, %v2556_v15  ;;  %v2381_v9 = vld [vmem:[#allocation2 + $0x178] sm:$0xff]  ;;  %v2382_v14 = vld [vmem:[#allocation2 + $0x180] sm:$0xff] }
 0x274   : > { %2895 = vst [vmem:[%s4586_s11 + $0x58] sm:$0xff] %v3505_v19  ;;  %v2560_v31 = vmax.f32 %v2472_v21, 0.0  ;;  %v2561_v32 = vmax.f32 %v2473_v22, 0.0  ;;  %v2476_v33 = vadd.f32 %v4853_v47, %v2366_v18  ;;  %v2477_v39 = vadd.f32 %v4855_v48, %v2367_v23  ;;  %v2383_v19 = vld [vmem:[#allocation2 + $0x188] sm:$0xff] }
 0x275   : > { %v3507_v36 = vpack.c.bf16 %v2559_v25, %v2558_v24  ;;  %v2562_v37 = vmax.f32 %v2474_v26, 0.0  ;;  %v2563_v38 = vmax.f32 %v2475_v27, 0.0  ;;  %2896 = vst [vmem:[%s4586_s11 + $0x60] sm:$0xff] %v3506_v30  ;;  %v2478_v44 = vadd.f32 %v4857_v49, %v2368_v28  ;;  %v2384_v24 = vld [vmem:[#allocation2 + $0x190] sm:$0xff]  ;;  %v2385_v25 = vld [vmem:[#allocation2 + $0x198] sm:$0xff]  ;;  %v2386_v30 = vld [vmem:[#allocation2 + $0x1a0] sm:$0xff] }
 0x276   : > { %v3508_v42 = vpack.c.bf16 %v2561_v32, %v2560_v31  ;;  %v2564_v43 = vmax.f32 %v2476_v33, 0.0  ;;  %v2479_v45 = vadd.f32 %v4859_v50, %v2369_v29  ;;  %v2565_v52 = vmax.f32 %v2477_v39, 0.0  ;;  %v2387_v31 = vld [vmem:[#allocation2 + $0x1a8] sm:$0xff] }
 0x277   : > { %2897 = vst [vmem:[%s4586_s11 + $0x68] sm:$0xff] %v3507_v36  ;;  %v3509_v51 = vpack.c.bf16 %v2563_v38, %v2562_v37  ;;  %v2480_v53 = vadd.f32 %v4853_v47, %v2370_v34  ;;  %v2481_v54 = vadd.f32 %v4855_v48, %v2371_v35  ;;  %v2566_v56 = vmax.f32 %v2478_v44, 0.0  ;;  %v2388_v36 = vld [vmem:[#allocation2 + $0x1b0] sm:$0xff]  ;;  %v2389_v37 = vld [vmem:[#allocation2 + $0x1b8] sm:$0xff] }
 0x278   : > { %2898 = vst [vmem:[%s4586_s11 + $0x70] sm:$0xff] %v3508_v42  ;;  %v2567_v57 = vmax.f32 %v2479_v45, 0.0  ;;  %v2482_v58 = vadd.f32 %v4857_v49, %v2372_v40  ;;  %v2483_v59 = vadd.f32 %v4859_v50, %v2373_v41  ;;  %v3510_v62 = vpack.c.bf16 %v2565_v52, %v2564_v43  ;;  %v2390_v42 = vld [vmem:[#allocation2 + $0x1c0] sm:$0xff] }
 0x279   : > { %2899 = vst [vmem:[%s4586_s11 + $0x78] sm:$0xff] %v3509_v51  ;;  %v2568_v63 = vmax.f32 %v2480_v53, 0.0  ;;  %v2569_v0 = vmax.f32 %v2481_v54, 0.0  ;;  %v2484_v1 = vadd.f32 %v4853_v47, %v2374_v46  ;;  %v2485_v7 = vadd.f32 %v4855_v48, %v2375_v55  ;;  %v2391_v51 = vld [vmem:[#allocation2 + $0x1c8] sm:$0xff] }
 0x27a   : > { %v3511_v4 = vpack.c.bf16 %v2567_v57, %v2566_v56  ;;  %v2570_v5 = vmax.f32 %v2482_v58, 0.0  ;;  %v2571_v6 = vmax.f32 %v2483_v59, 0.0  ;;  %2900 = vst [vmem:[%s4586_s11 + $0x80] sm:$0xff] %v3510_v62  ;;  %v2486_v12 = vadd.f32 %v4857_v49, %v2376_v60  ;;  %v2392_v56 = vld [vmem:[#allocation2 + $0x1d0] sm:$0xff]  ;;  %v2393_v57 = vld [vmem:[#allocation2 + $0x1d8] sm:$0xff]  ;;  %v2394_v62 = vld [vmem:[#allocation2 + $0x1e0] sm:$0xff] }
 0x27b   : > { %v3512_v10 = vpack.c.bf16 %v2569_v0, %v2568_v63  ;;  %v2572_v11 = vmax.f32 %v2484_v1, 0.0  ;;  %v2487_v13 = vadd.f32 %v4859_v50, %v2377_v61  ;;  %v2573_v16 = vmax.f32 %v2485_v7, 0.0  ;;  %v2395_v63 = vld [vmem:[#allocation2 + $0x1e8] sm:$0xff] }
 0x27c   : > { %2901 = vst [vmem:[%s4586_s11 + $0x88] sm:$0xff] %v3511_v4  ;;  %v3513_v15 = vpack.c.bf16 %v2571_v6, %v2570_v5  ;;  %v2488_v17 = vadd.f32 %v4853_v47, %v2378_v2  ;;  %v2489_v18 = vadd.f32 %v4855_v48, %v2379_v3  ;;  %v2574_v20 = vmax.f32 %v2486_v12, 0.0  ;;  %v2396_v4 = vld [vmem:[#allocation2 + $0x1f0] sm:$0xff]  ;;  %v2397_v5 = vld [vmem:[#allocation2 + $0x1f8] sm:$0xff] }
 0x27d   : > { %2902 = vst [vmem:[%s4586_s11 + $0x90] sm:$0xff] %v3512_v10  ;;  %v2575_v21 = vmax.f32 %v2487_v13, 0.0  ;;  %v2490_v22 = vadd.f32 %v4857_v49, %v2380_v8  ;;  %v2491_v23 = vadd.f32 %v4859_v50, %v2381_v9  ;;  %v3514_v26 = vpack.c.bf16 %v2573_v16, %v2572_v11  ;;  %v2398_v10 = vld [vmem:[#allocation2 + $0x200] sm:$0xff] }
 0x27e   : > { %2903 = vst [vmem:[%s4586_s11 + $0x98] sm:$0xff] %v3513_v15  ;;  %v2576_v27 = vmax.f32 %v2488_v17, 0.0  ;;  %v2577_v28 = vmax.f32 %v2489_v18, 0.0  ;;  %v2492_v29 = vadd.f32 %v4853_v47, %v2382_v14  ;;  %v2493_v35 = vadd.f32 %v4855_v48, %v2383_v19  ;;  %v2399_v15 = vld [vmem:[#allocation2 + $0x208] sm:$0xff] }
 0x27f   : > { %v3515_v32 = vpack.c.bf16 %v2575_v21, %v2574_v20  ;;  %v2578_v33 = vmax.f32 %v2490_v22, 0.0  ;;  %v2579_v34 = vmax.f32 %v2491_v23, 0.0  ;;  %2904 = vst [vmem:[%s4586_s11 + $0xa0] sm:$0xff] %v3514_v26  ;;  %v2494_v40 = vadd.f32 %v4857_v49, %v2384_v24  ;;  %v2400_v20 = vld [vmem:[#allocation2 + $0x210] sm:$0xff]  ;;  %v2401_v21 = vld [vmem:[#allocation2 + $0x218] sm:$0xff]  ;;  %v2402_v26 = vld [vmem:[#allocation2 + $0x220] sm:$0xff] }
 0x280   : > { %v3516_v38 = vpack.c.bf16 %v2577_v28, %v2576_v27  ;;  %v2580_v39 = vmax.f32 %v2492_v29, 0.0  ;;  %v2495_v41 = vadd.f32 %v4859_v50, %v2385_v25  ;;  %v2581_v44 = vmax.f32 %v2493_v35, 0.0  ;;  %v2403_v27 = vld [vmem:[#allocation2 + $0x228] sm:$0xff] }
 0x281   : > { %2905 = vst [vmem:[%s4586_s11 + $0xa8] sm:$0xff] %v3515_v32  ;;  %v3517_v43 = vpack.c.bf16 %v2579_v34, %v2578_v33  ;;  %v2496_v45 = vadd.f32 %v4853_v47, %v2386_v30  ;;  %v2497_v46 = vadd.f32 %v4855_v48, %v2387_v31  ;;  %v2582_v52 = vmax.f32 %v2494_v40, 0.0  ;;  %v2404_v32 = vld [vmem:[#allocation2 + $0x230] sm:$0xff]  ;;  %v2405_v33 = vld [vmem:[#allocation2 + $0x238] sm:$0xff] }
 0x282   : > { %2906 = vst [vmem:[%s4586_s11 + $0xb0] sm:$0xff] %v3516_v38  ;;  %v2583_v53 = vmax.f32 %v2495_v41, 0.0  ;;  %v2498_v54 = vadd.f32 %v4857_v49, %v2388_v36  ;;  %v2499_v55 = vadd.f32 %v4859_v50, %v2389_v37  ;;  %v3518_v58 = vpack.c.bf16 %v2581_v44, %v2580_v39  ;;  %v2406_v38 = vld [vmem:[#allocation2 + $0x240] sm:$0xff] }
 0x283   : > { %2907 = vst [vmem:[%s4586_s11 + $0xb8] sm:$0xff] %v3517_v43  ;;  %v2584_v59 = vmax.f32 %v2496_v45, 0.0  ;;  %v2585_v60 = vmax.f32 %v2497_v46, 0.0  ;;  %v2500_v61 = vadd.f32 %v4853_v47, %v2390_v42  ;;  %v2501_v3 = vadd.f32 %v4855_v48, %v2391_v51  ;;  %v2407_v43 = vld [vmem:[#allocation2 + $0x248] sm:$0xff] }
 0x284   : > { %v3519_v0 = vpack.c.bf16 %v2583_v53, %v2582_v52  ;;  %v2586_v1 = vmax.f32 %v2498_v54, 0.0  ;;  %v2587_v2 = vmax.f32 %v2499_v55, 0.0  ;;  %2908 = vst [vmem:[%s4586_s11 + $0xc0] sm:$0xff] %v3518_v58  ;;  %v2502_v8 = vadd.f32 %v4857_v49, %v2392_v56  ;;  %v2408_v52 = vld [vmem:[#allocation2 + $0x250] sm:$0xff]  ;;  %v2409_v53 = vld [vmem:[#allocation2 + $0x258] sm:$0xff]  ;;  %v2410_v58 = vld [vmem:[#allocation2 + $0x260] sm:$0xff] }
 0x285   : > { %v3520_v6 = vpack.c.bf16 %v2585_v60, %v2584_v59  ;;  %v2588_v7 = vmax.f32 %v2500_v61, 0.0  ;;  %v2503_v9 = vadd.f32 %v4859_v50, %v2393_v57  ;;  %v2589_v12 = vmax.f32 %v2501_v3, 0.0  ;;  %v2411_v59 = vld [vmem:[#allocation2 + $0x268] sm:$0xff] }
 0x286   : > { %2909 = vst [vmem:[%s4586_s11 + $0xc8] sm:$0xff] %v3519_v0  ;;  %v3521_v11 = vpack.c.bf16 %v2587_v2, %v2586_v1  ;;  %v2504_v13 = vadd.f32 %v4853_v47, %v2394_v62  ;;  %v2505_v14 = vadd.f32 %v4855_v48, %v2395_v63  ;;  %v2590_v16 = vmax.f32 %v2502_v8, 0.0  ;;  %v2412_v0 = vld [vmem:[#allocation2 + $0x270] sm:$0xff]  ;;  %v2413_v1 = vld [vmem:[#allocation2 + $0x278] sm:$0xff] }
 0x287   : > { %2910 = vst [vmem:[%s4586_s11 + $0xd0] sm:$0xff] %v3520_v6  ;;  %v2591_v17 = vmax.f32 %v2503_v9, 0.0  ;;  %v2506_v18 = vadd.f32 %v4857_v49, %v2396_v4  ;;  %v2507_v19 = vadd.f32 %v4859_v50, %v2397_v5  ;;  %v3522_v22 = vpack.c.bf16 %v2589_v12, %v2588_v7  ;;  %v2414_v6 = vld [vmem:[#allocation2 + $0x280] sm:$0xff] }
 0x288   : > { %2911 = vst [vmem:[%s4586_s11 + $0xd8] sm:$0xff] %v3521_v11  ;;  %v2592_v23 = vmax.f32 %v2504_v13, 0.0  ;;  %v2593_v24 = vmax.f32 %v2505_v14, 0.0  ;;  %v2508_v25 = vadd.f32 %v4853_v47, %v2398_v10  ;;  %v2509_v31 = vadd.f32 %v4855_v48, %v2399_v15  ;;  %v2415_v11 = vld [vmem:[#allocation2 + $0x288] sm:$0xff] }
 0x289   : > { %v3523_v28 = vpack.c.bf16 %v2591_v17, %v2590_v16  ;;  %v2594_v29 = vmax.f32 %v2506_v18, 0.0  ;;  %v2595_v30 = vmax.f32 %v2507_v19, 0.0  ;;  %2912 = vst [vmem:[%s4586_s11 + $0xe0] sm:$0xff] %v3522_v22  ;;  %v2510_v36 = vadd.f32 %v4857_v49, %v2400_v20  ;;  %v2416_v16 = vld [vmem:[#allocation2 + $0x290] sm:$0xff]  ;;  %v2417_v17 = vld [vmem:[#allocation2 + $0x298] sm:$0xff]  ;;  %v2418_v22 = vld [vmem:[#allocation2 + $0x2a0] sm:$0xff] }
 0x28a   : > { %v3524_v34 = vpack.c.bf16 %v2593_v24, %v2592_v23  ;;  %v2596_v35 = vmax.f32 %v2508_v25, 0.0  ;;  %v2511_v37 = vadd.f32 %v4859_v50, %v2401_v21  ;;  %v2597_v40 = vmax.f32 %v2509_v31, 0.0  ;;  %v2419_v23 = vld [vmem:[#allocation2 + $0x2a8] sm:$0xff] }
 0x28b   : > { %2913 = vst [vmem:[%s4586_s11 + $0xe8] sm:$0xff] %v3523_v28  ;;  %v3525_v39 = vpack.c.bf16 %v2595_v30, %v2594_v29  ;;  %v2512_v41 = vadd.f32 %v4853_v47, %v2402_v26  ;;  %v2513_v42 = vadd.f32 %v4855_v48, %v2403_v27  ;;  %v2598_v44 = vmax.f32 %v2510_v36, 0.0  ;;  %v2420_v28 = vld [vmem:[#allocation2 + $0x2b0] sm:$0xff]  ;;  %v2421_v29 = vld [vmem:[#allocation2 + $0x2b8] sm:$0xff] }
 0x28c   : > { %2914 = vst [vmem:[%s4586_s11 + $0xf0] sm:$0xff] %v3524_v34  ;;  %v2599_v45 = vmax.f32 %v2511_v37, 0.0  ;;  %v2514_v46 = vadd.f32 %v4857_v49, %v2404_v32  ;;  %v2515_v51 = vadd.f32 %v4859_v50, %v2405_v33  ;;  %v3526_v54 = vpack.c.bf16 %v2597_v40, %v2596_v35 }
 0x28d   : > { %2915 = vst [vmem:[%s4586_s11 + $0xf8] sm:$0xff] %v3525_v39  ;;  %v2600_v55 = vmax.f32 %v2512_v41, 0.0  ;;  %v2601_v56 = vmax.f32 %v2513_v42, 0.0  ;;  %v2516_v57 = vadd.f32 %v4853_v47, %v2406_v38  ;;  %v2517_v63 = vadd.f32 %v4855_v48, %v2407_v43 }
 0x28e   : > { %v3527_v60 = vpack.c.bf16 %v2599_v45, %v2598_v44  ;;  %v2602_v61 = vmax.f32 %v2514_v46, 0.0  ;;  %v2603_v62 = vmax.f32 %v2515_v51, 0.0  ;;  %2916 = vst [vmem:[%s4586_s11 + $0x100] sm:$0xff] %v3526_v54  ;;  %v2518_v4 = vadd.f32 %v4857_v49, %v2408_v52 }
 0x28f   : > { %v3528_v2 = vpack.c.bf16 %v2601_v56, %v2600_v55  ;;  %v2604_v3 = vmax.f32 %v2516_v57, 0.0  ;;  %v2519_v5 = vadd.f32 %v4859_v50, %v2409_v53  ;;  %v2605_v8 = vmax.f32 %v2517_v63, 0.0 }
 0x290   : > { %2917 = vst [vmem:[%s4586_s11 + $0x108] sm:$0xff] %v3527_v60  ;;  %v3529_v7 = vpack.c.bf16 %v2603_v62, %v2602_v61  ;;  %v2520_v9 = vadd.f32 %v4853_v47, %v2410_v58  ;;  %v2521_v10 = vadd.f32 %v4855_v48, %v2411_v59  ;;  %v2606_v12 = vmax.f32 %v2518_v4, 0.0 }
 0x291   : > { %2918 = vst [vmem:[%s4586_s11 + $0x110] sm:$0xff] %v3528_v2  ;;  %v2607_v13 = vmax.f32 %v2519_v5, 0.0  ;;  %v2522_v14 = vadd.f32 %v4857_v49, %v2412_v0  ;;  %v2523_v15 = vadd.f32 %v4859_v50, %v2413_v1  ;;  %v3530_v18 = vpack.c.bf16 %v2605_v8, %v2604_v3 }
 0x292   : > { %2919 = vst [vmem:[%s4586_s11 + $0x118] sm:$0xff] %v3529_v7  ;;  %v2608_v19 = vmax.f32 %v2520_v9, 0.0  ;;  %v2609_v20 = vmax.f32 %v2521_v10, 0.0  ;;  %v2524_v21 = vadd.f32 %v4853_v47, %v2414_v6  ;;  %v2525_v27 = vadd.f32 %v4855_v48, %v2415_v11 }
 0x293   : > { %v3531_v24 = vpack.c.bf16 %v2607_v13, %v2606_v12  ;;  %v2610_v25 = vmax.f32 %v2522_v14, 0.0  ;;  %v2611_v26 = vmax.f32 %v2523_v15, 0.0  ;;  %2920 = vst [vmem:[%s4586_s11 + $0x120] sm:$0xff] %v3530_v18  ;;  %v2526_v32 = vadd.f32 %v4857_v49, %v2416_v16 }
 0x294   : > { %v3532_v30 = vpack.c.bf16 %v2609_v20, %v2608_v19  ;;  %v2612_v31 = vmax.f32 %v2524_v21, 0.0  ;;  %v2527_v33 = vadd.f32 %v4859_v50, %v2417_v17  ;;  %v2613_v35 = vmax.f32 %v2525_v27, 0.0 }
 0x295   : > { %2921 = vst [vmem:[%s4586_s11 + $0x128] sm:$0xff] %v3531_v24  ;;  %v3533_v34 = vpack.c.bf16 %v2611_v26, %v2610_v25  ;;  %v2528_v36 = vadd.f32 %v4853_v47, %v2418_v22  ;;  %v2529_v37 = vadd.f32 %v4855_v48, %v2419_v23  ;;  %v2614_v38 = vmax.f32 %v2526_v32, 0.0 }
 0x296   : > { %2922 = vst [vmem:[%s4586_s11 + $0x130] sm:$0xff] %v3532_v30  ;;  %v2615_v39 = vmax.f32 %v2527_v33, 0.0  ;;  %v2530_v40 = vadd.f32 %v4857_v49, %v2420_v28  ;;  %v2531_v41 = vadd.f32 %v4859_v50, %v2421_v29  ;;  %v3534_v42 = vpack.c.bf16 %v2613_v35, %v2612_v31 }
 0x297   : > { %2923 = vst [vmem:[%s4586_s11 + $0x138] sm:$0xff] %v3533_v34  ;;  %v2616_v43 = vmax.f32 %v2528_v36, 0.0  ;;  %v2617_v44 = vmax.f32 %v2529_v37, 0.0 }
 0x298   : > { %v3535_v45 = vpack.c.bf16 %v2615_v39, %v2614_v38  ;;  %v2618_v46 = vmax.f32 %v2530_v40, 0.0  ;;  %v2619_v51 = vmax.f32 %v2531_v41, 0.0  ;;  %2924 = vst [vmem:[%s4586_s11 + $0x140] sm:$0xff] %v3534_v42 }
 0x299   : > { %v3536_v47 = vpack.c.bf16 %v2617_v44, %v2616_v43 }
 0x29a   : > { %2925 = vst [vmem:[%s4586_s11 + $0x148] sm:$0xff] %v3535_v45  ;;  %v3537_v48 = vpack.c.bf16 %v2619_v51, %v2618_v46 }
 0x29b   : > { %2926 = vst [vmem:[%s4586_s11 + $0x150] sm:$0xff] %v3536_v47 }
 0x29c   : > { %2927 = vst [vmem:[%s4586_s11 + $0x158] sm:$0xff] %v3537_v48 }
 0x29d PF: > { %2934 = sbr.rel (!%p4393_p9) target bundleno = 750 (0x2ee), region = 74 }
 0x29e   : > { %s2935_s16 = smul.u32 (%p4393_p9), 22, %s4226_s17 }
 0x29f   : > { %s3541_s23 = smul.u32 (%p4393_p9), 352, %s4226_s17 }
 0x2a0   : > { %s2936_s10 = ssub.s32 (%p4393_p9), 43, %s2935_s16 }
 0x2a1   : > { %p2937_p12 = scmp.lt.s32.totalorder (%p4393_p9), %s2936_s10, 22  ;;  %s5000_s6 = scalar_lea.vmem (%p4393_p9), %s5182_s3, %s3541_s23  }
 0x2a4   : > { %s5223_s10 = smov (!%p2937_p12, %s2936_s10), 22 }
 0x2a5   : > { %s3538_s8 = sshll.u32 %s5223_s10, 8 }
 0x2a6   : > { %p3483_p13 = scmp.eq.s32.totalorder %s3538_s8, 0 }
 0x2a7   : > { %4100 = sdivrem.u32 (!%p3483_p13), %s5223_s10, 22 }
 0x2a8   : > { %2947 = sbr.rel (%p3483_p13) target bundleno = 750 (0x2ee), region = 78 }
 0x2b0   : > { %s5006_s30 = spop.drf %4100 }
 0x2b1   : > { %p3484_p9 = scmp.le.s32.totalorder %s5006_s30, 0 }
 0x2b2   : > { %s5194_s17 = smov (!%p3484_p9), %s5000_s6  ;;  %s5195_s27 = smov (!%p3484_p9), %s4586_s11 }
 0x2b3   : > { %3180 = sbr.rel (%p3484_p9) target bundleno = 721 (0x2d1), region = 158  ;;  %s5015_s24 = smov (!%p3484_p9), 0  }
 0x2b4   : > { %s5017_s26 = smov (!%p3484_p9), 0  }
 0x2ba LB: >> { %v2961_v49 = vld [vmem:[%s4278_s27] sm:$0xff]  ;;  %v2963_v50 = vld [vmem:[%s4278_s27 + $0x10] sm:$0xff]  ;;  %s3049_s0 = sadd.s32 1, %s4282_s24  ;;  %v3005_v8 = vld [vmem:[%s4278_s27 + $0x8] sm:$0xff]  ;;  %s2955_s26 = sadd.s32 1, %s4286_s26   ;;  %s4286_s26 = sphi %s5017_s26, %s2955_s26   ;;  %s4282_s24 = sphi %s5015_s24, %s5198_s24   ;;  %s4278_s27 = sphi %s5195_s27, %s5197_s27   ;;  %s4274_s17 = sphi %s5194_s17, %s5196_s17  }
 0x2bb   : >> { %v2965_v52 = vld [vmem:[%s4278_s27 + $0x20] sm:$0xff]  ;;  %2962 = vst [vmem:[%s4274_s17] sm:$0xff] %v2961_v49  ;;  %2964 = vst [vmem:[%s4274_s17 + $0x10] sm:$0xff] %v2963_v50  ;;  %v2967_v53 = vld [vmem:[%s4278_s27 + $0x30] sm:$0xff]  ;;  %p3050_p0 = scmp.ge.s32.totalorder %s3049_s0, %s5006_s30  ;;  %p2954_p1 = scmp.ge.s32.totalorder %s2955_s26, %s5006_s30 }
 0x2bc   : >> { %2966 = vst [vmem:[%s4274_s17 + $0x20] sm:$0xff] %v2965_v52  ;;  %v2969_v54 = vld [vmem:[%s4278_s27 + $0x40] sm:$0xff]  ;;  %v2971_v55 = vld [vmem:[%s4278_s27 + $0x50] sm:$0xff]  ;;  %2968 = vst [vmem:[%s4274_s17 + $0x30] sm:$0xff] %v2967_v53 }
 0x2bd   : >> { %2970 = vst [vmem:[%s4274_s17 + $0x40] sm:$0xff] %v2969_v54  ;;  %2972 = vst [vmem:[%s4274_s17 + $0x50] sm:$0xff] %v2971_v55  ;;  %v2973_v56 = vld [vmem:[%s4278_s27 + $0x60] sm:$0xff]  ;;  %v2975_v57 = vld [vmem:[%s4278_s27 + $0x70] sm:$0xff]  ;;  %s5225_s0 = smov (%p3050_p0, %s3049_s0), 0 }
 0x2be   : >> { %v2977_v58 = vld [vmem:[%s4278_s27 + $0x80] sm:$0xff]  ;;  %2974 = vst [vmem:[%s4274_s17 + $0x60] sm:$0xff] %v2973_v56  ;;  %2976 = vst [vmem:[%s4274_s17 + $0x70] sm:$0xff] %v2975_v57  ;;  %v2979_v59 = vld [vmem:[%s4278_s27 + $0x90] sm:$0xff]  ;;  %s3052_s22 = smul.u32 352, %s5225_s0  ;;  %s5198_s24 = smov %s5225_s0 }
 0x2bf   : >> { %2978 = vst [vmem:[%s4274_s17 + $0x80] sm:$0xff] %v2977_v58  ;;  %v2981_v60 = vld [vmem:[%s4278_s27 + $0xa0] sm:$0xff]  ;;  %v2983_v61 = vld [vmem:[%s4278_s27 + $0xb0] sm:$0xff]  ;;  %2980 = vst [vmem:[%s4274_s17 + $0x90] sm:$0xff] %v2979_v59 }
 0x2c0   : >> { %2982 = vst [vmem:[%s4274_s17 + $0xa0] sm:$0xff] %v2981_v60  ;;  %2984 = vst [vmem:[%s4274_s17 + $0xb0] sm:$0xff] %v2983_v61  ;;  %v2985_v62 = vld [vmem:[%s4278_s27 + $0xc0] sm:$0xff]  ;;  %v2987_v63 = vld [vmem:[%s4278_s27 + $0xd0] sm:$0xff]  ;;  %s5079_s25 = scalar_lea.vmem %s4586_s11, %s3052_s22 [#allocation4]   ;;  %s5082_s7 = scalar_lea.vmem %s5000_s6, %s3052_s22  }
 0x2c1   : >> { %v2989_v0 = vld [vmem:[%s4278_s27 + $0xe0] sm:$0xff]  ;;  %2986 = vst [vmem:[%s4274_s17 + $0xc0] sm:$0xff] %v2985_v62  ;;  %2988 = vst [vmem:[%s4274_s17 + $0xd0] sm:$0xff] %v2987_v63  ;;  %v2991_v1 = vld [vmem:[%s4278_s27 + $0xf0] sm:$0xff] }
 0x2c2   : >> { %2990 = vst [vmem:[%s4274_s17 + $0xe0] sm:$0xff] %v2989_v0  ;;  %v2993_v2 = vld [vmem:[%s4278_s27 + $0x100] sm:$0xff]  ;;  %v2995_v3 = vld [vmem:[%s4278_s27 + $0x110] sm:$0xff]  ;;  %2992 = vst [vmem:[%s4274_s17 + $0xf0] sm:$0xff] %v2991_v1 }
 0x2c3   : >> { %2994 = vst [vmem:[%s4274_s17 + $0x100] sm:$0xff] %v2993_v2  ;;  %2996 = vst [vmem:[%s4274_s17 + $0x110] sm:$0xff] %v2995_v3  ;;  %v2997_v4 = vld [vmem:[%s4278_s27 + $0x120] sm:$0xff]  ;;  %v2999_v5 = vld [vmem:[%s4278_s27 + $0x130] sm:$0xff] }
 0x2c4   : >> { %v3001_v6 = vld [vmem:[%s4278_s27 + $0x140] sm:$0xff]  ;;  %2998 = vst [vmem:[%s4274_s17 + $0x120] sm:$0xff] %v2997_v4  ;;  %3000 = vst [vmem:[%s4274_s17 + $0x130] sm:$0xff] %v2999_v5  ;;  %v3003_v7 = vld [vmem:[%s4278_s27 + $0x150] sm:$0xff] }
 0x2c5   : >> { %3002 = vst [vmem:[%s4274_s17 + $0x140] sm:$0xff] %v3001_v6  ;;  %v3007_v9 = vld [vmem:[%s4278_s27 + $0x18] sm:$0xff]  ;;  %3004 = vst [vmem:[%s4274_s17 + $0x150] sm:$0xff] %v3003_v7  ;;  %v3009_v10 = vld [vmem:[%s4278_s27 + $0x28] sm:$0xff] }
 0x2c6   : >> { %3006 = vst [vmem:[%s4274_s17 + $0x8] sm:$0xff] %v3005_v8  ;;  %3008 = vst [vmem:[%s4274_s17 + $0x18] sm:$0xff] %v3007_v9  ;;  %v3011_v11 = vld [vmem:[%s4278_s27 + $0x38] sm:$0xff]  ;;  %v3013_v12 = vld [vmem:[%s4278_s27 + $0x48] sm:$0xff] }
 0x2c7   : >> { %3010 = vst [vmem:[%s4274_s17 + $0x28] sm:$0xff] %v3009_v10  ;;  %3012 = vst [vmem:[%s4274_s17 + $0x38] sm:$0xff] %v3011_v11  ;;  %v3015_v13 = vld [vmem:[%s4278_s27 + $0x58] sm:$0xff]  ;;  %v3017_v14 = vld [vmem:[%s4278_s27 + $0x68] sm:$0xff] }
 0x2c8   : >> { %3014 = vst [vmem:[%s4274_s17 + $0x48] sm:$0xff] %v3013_v12  ;;  %v3019_v15 = vld [vmem:[%s4278_s27 + $0x78] sm:$0xff]  ;;  %3016 = vst [vmem:[%s4274_s17 + $0x58] sm:$0xff] %v3015_v13  ;;  %v3021_v16 = vld [vmem:[%s4278_s27 + $0x88] sm:$0xff] }
 0x2c9   : >> { %3018 = vst [vmem:[%s4274_s17 + $0x68] sm:$0xff] %v3017_v14  ;;  %3020 = vst [vmem:[%s4274_s17 + $0x78] sm:$0xff] %v3019_v15  ;;  %v3023_v17 = vld [vmem:[%s4278_s27 + $0x98] sm:$0xff]  ;;  %v3025_v18 = vld [vmem:[%s4278_s27 + $0xa8] sm:$0xff] }
 0x2ca   : >> { %3022 = vst [vmem:[%s4274_s17 + $0x88] sm:$0xff] %v3021_v16  ;;  %3024 = vst [vmem:[%s4274_s17 + $0x98] sm:$0xff] %v3023_v17  ;;  %v3027_v19 = vld [vmem:[%s4278_s27 + $0xb8] sm:$0xff]  ;;  %v3029_v20 = vld [vmem:[%s4278_s27 + $0xc8] sm:$0xff]  ;;  %2957 = sbr.rel (!%p2954_p1) target bundleno = 698 (0x2ba), region = 164 }
 0x2cb   : >> { %3026 = vst [vmem:[%s4274_s17 + $0xa8] sm:$0xff] %v3025_v18  ;;  %v3031_v21 = vld [vmem:[%s4278_s27 + $0xd8] sm:$0xff]  ;;  %3028 = vst [vmem:[%s4274_s17 + $0xb8] sm:$0xff] %v3027_v19  ;;  %v3033_v22 = vld [vmem:[%s4278_s27 + $0xe8] sm:$0xff] }
 0x2cc   : >> { %3030 = vst [vmem:[%s4274_s17 + $0xc8] sm:$0xff] %v3029_v20  ;;  %3032 = vst [vmem:[%s4274_s17 + $0xd8] sm:$0xff] %v3031_v21  ;;  %v3035_v23 = vld [vmem:[%s4278_s27 + $0xf8] sm:$0xff]  ;;  %v3037_v24 = vld [vmem:[%s4278_s27 + $0x108] sm:$0xff] }
 0x2cd   : >> { %3034 = vst [vmem:[%s4274_s17 + $0xe8] sm:$0xff] %v3033_v22  ;;  %3036 = vst [vmem:[%s4274_s17 + $0xf8] sm:$0xff] %v3035_v23  ;;  %v3039_v25 = vld [vmem:[%s4278_s27 + $0x118] sm:$0xff]  ;;  %v3041_v26 = vld [vmem:[%s4278_s27 + $0x128] sm:$0xff] }
 0x2ce   : >> { %3038 = vst [vmem:[%s4274_s17 + $0x108] sm:$0xff] %v3037_v24  ;;  %v3043_v27 = vld [vmem:[%s4278_s27 + $0x138] sm:$0xff]  ;;  %3040 = vst [vmem:[%s4274_s17 + $0x118] sm:$0xff] %v3039_v25  ;;  %v3045_v28 = vld [vmem:[%s4278_s27 + $0x148] sm:$0xff] }
 0x2cf   : >> { %3042 = vst [vmem:[%s4274_s17 + $0x128] sm:$0xff] %v3041_v26  ;;  %3044 = vst [vmem:[%s4274_s17 + $0x138] sm:$0xff] %v3043_v27  ;;  %v3047_v29 = vld [vmem:[%s4278_s27 + $0x158] sm:$0xff]  ;;  %s5197_s27 = smov %s5079_s25 }
 0x2d0   : >> { %3046 = vst [vmem:[%s4274_s17 + $0x148] sm:$0xff] %v3045_v28  ;;  %3048 = vst [vmem:[%s4274_s17 + $0x158] sm:$0xff] %v3047_v29  ;;  %s5196_s17 = smov %s5082_s7 }
 0x2d1 PF: > { %4102 = sdivrem.u32 %s5223_s10, 22 }
 0x2d2   : > { %s3485_s9 = smul.u32 352, %s5006_s30 }
 0x2d4   : > { %s5143_s12 = scalar_lea.vmem %s4586_s11, %s3485_s9 [#allocation4]   ;;  %s5146_s14 = scalar_lea.vmem %s5000_s6, %s3485_s9  }
 0x2da   : > { %s4103_s16 = spop.drf %4102 }
 0x2db   : > { %p3487_p2 = scmp.le.s32.totalorder %s4103_s16, 0 }
 0x2dc   : > { %s4288_s23 = smov (!%p3487_p2), %s5146_s14   ;;  %s4292_s28 = smov (!%p3487_p2), %s5143_s12  }
 0x2dd   : > { %3194 = sbr.rel (%p3487_p2) target bundleno = 750 (0x2ee), region = 169  ;;  %s4296_s29 = smov (!%p3487_p2), 0  }
 0x2de   : > { %s4300_s8 = smov (!%p3487_p2), 0  }
 0x2e4 LB: >> { %v3072_v30 = vld [vmem:[%s4294_s28] sm:$0xff]  ;;  %v3074_v31 = vld [vmem:[%s4294_s28 + $0x8] sm:$0xff]  ;;  %s3076_s11 = sadd.s32 1, %s4298_s29  ;;  %s3066_s8 = sadd.s32 1, %s4302_s8   ;;  %s4302_s8 = sphi %s4300_s8, %s3066_s8   ;;  %s4298_s29 = sphi %s4296_s29, %s4297_s29   ;;  %s4294_s28 = sphi %s4292_s28, %s3081_s28   ;;  %s4290_s23 = sphi %s4288_s23, %s3082_s23  }
 0x2e5   : >> { %3073 = vst [vmem:[%s4290_s23] sm:$0xff] %v3072_v30  ;;  %3075 = vst [vmem:[%s4290_s23 + $0x8] sm:$0xff] %v3074_v31  ;;  %p3077_p3 = scmp.ge.s32.totalorder %s3076_s11, %s4103_s16  ;;  %p3065_p4 = scmp.ge.s32.totalorder %s3066_s8, %s4103_s16 }
 0x2e7   : >> { %s5227_s11 = smov (%p3077_p3, %s3076_s11), 0  ;;  %3068 = sbr.rel (!%p3065_p4) target bundleno = 740 (0x2e4), region = 175 }
 0x2e8   : >> { %s3488_s10 = sshll.u32 %s5227_s11, 4  ;;  %s4297_s29 = smov %s5227_s11  }
 0x2e9   : >> { %s3081_s28 = scalar_lea.vmem %s5143_s12, %s3488_s10 [#allocation4]   ;;  %s3082_s23 = scalar_lea.vmem %s5146_s14, %s3488_s10  }
 0x2ee PF: > { %s13_s20 = sadd.s32 1, %s4238_s20   ;;  %s5199_s6 = sld [smem:[#allocation5_spill]] }
 0x2ef   : > { %p10_p5 = scmp.ge.s32.totalorder %s13_s20, 20   ;;  %s5200_s12 = smov %s4210_s13 }
 0x2f0   : > { %s5201_s13 = smov %s4398_s4  ;;  %s5202_s14 = smov %s4218_s15 }
 0x2f1   : > { %s5203_s15 = smov %s4401_s5  ;;  %s5204_s16 = smov %s4230_s18 }
 0x2f2   : > { %s5205_s17 = smov %s4234_s19  ;;  %s5206_s18 = smov %s5209_s21 }
 0x2f3   :  { %12 = sbr.rel (!%p10_p5) target bundleno = 7 (0x7), region = 186 }
 0x2f4   : > { %s5207_s19 = smov %s5199_s6 }

// kernel: net_forward.10
= control target key start
LH: loop header
LB: loop body
LE: loop exit
PB: predicated region body
PF: predicated region fallthrough
CT: control target
= control target key end

     0   :  { %s574_s0 = inlined_call_operand.vmem [shape: bf16[12,2,6,1024], index: 0, kind: input, shape index: {}]   ;;  %s575_s1 = inlined_call_operand.vmem [shape: bf16[12,6,512], index: 1, kind: output, shape index: {}]  }
   0x1   :  { %v8_v0 = vld [vmem:[%s574_s0] sm:$0x77]  ;;  %v10_v1 = vld [vmem:[%s574_s0 + $0x10] sm:$0x77]  ;;  %v9_v5 = vld [vmem:[%s574_s0 + $0x8] sm:$0x77] }
   0x2   :  { %v12_v2 = vld [vmem:[%s574_s0 + $0x20] sm:$0x77]  ;;  %v14_v3 = vld [vmem:[%s574_s0 + $0x30] sm:$0x77]  ;;  %v11_v6 = vld [vmem:[%s574_s0 + $0x18] sm:$0x77] }
   0x3   :  { %v104_v4 = vmax.bf16 %v12_v2, %v8_v0  ;;  %v106_v7 = vmax.bf16 %v14_v3, %v10_v1  ;;  %v13_v8 = vld [vmem:[%s574_s0 + $0x28] sm:$0x77]  ;;  %v15_v9 = vld [vmem:[%s574_s0 + $0x38] sm:$0x77]  ;;  %v16_v10 = vld [vmem:[%s574_s0 + $0x40] sm:$0x77] }
   0x4   :  { %v105_v11 = vmax.bf16 %v13_v8, %v9_v5  ;;  %v107_v12 = vmax.bf16 %v15_v9, %v11_v6  ;;  %v18_v13 = vld [vmem:[%s574_s0 + $0x50] sm:$0x77]  ;;  %v20_v14 = vld [vmem:[%s574_s0 + $0x60] sm:$0x77]  ;;  %v17_v19 = vld [vmem:[%s574_s0 + $0x48] sm:$0x77] }
   0x5   :  { %v22_v15 = vld [vmem:[%s574_s0 + $0x70] sm:$0x77]  ;;  %v152_v16 = vmax.bf16 %v106_v7, %v104_v4  ;;  %v108_v17 = vmax.bf16 %v20_v14, %v16_v10  ;;  %v19_v20 = vld [vmem:[%s574_s0 + $0x58] sm:$0x77]  ;;  %v21_v21 = vld [vmem:[%s574_s0 + $0x68] sm:$0x77] }
   0x6   :  { %v110_v18 = vmax.bf16 %v22_v15, %v18_v13  ;;  %v153_v22 = vmax.bf16 %v107_v12, %v105_v11  ;;  %v23_v23 = vld [vmem:[%s574_s0 + $0x78] sm:$0x77]  ;;  %v109_v24 = vmax.bf16 %v21_v21, %v17_v19  ;;  %v24_v25 = vld [vmem:[%s574_s0 + $0x80] sm:$0x77]  ;;  %v26_v26 = vld [vmem:[%s574_s0 + $0x90] sm:$0x77] }
   0x7   :  { %176 = vst [vmem:[%s575_s1] sm:$0x77] %v152_v16  ;;  %v111_v28 = vmax.bf16 %v23_v23, %v19_v20  ;;  %v28_v29 = vld [vmem:[%s574_s0 + $0xa0] sm:$0x77]  ;;  %v30_v30 = vld [vmem:[%s574_s0 + $0xb0] sm:$0x77] }
   0x8   :  { %v154_v27 = vmax.bf16 %v110_v18, %v108_v17  ;;  %v25_v31 = vld [vmem:[%s574_s0 + $0x88] sm:$0x77]  ;;  %177 = vst [vmem:[%s575_s1 + $0x8] sm:$0x77] %v153_v22  ;;  %v112_v32 = vmax.bf16 %v28_v29, %v24_v25  ;;  %v114_v33 = vmax.bf16 %v30_v30, %v26_v26  ;;  %v27_v34 = vld [vmem:[%s574_s0 + $0x98] sm:$0x77] }
   0x9   :  { %v29_v35 = vld [vmem:[%s574_s0 + $0xa8] sm:$0x77]  ;;  %v31_v36 = vld [vmem:[%s574_s0 + $0xb8] sm:$0x77]  ;;  %v155_v37 = vmax.bf16 %v111_v28, %v109_v24  ;;  %v32_v40 = vld [vmem:[%s574_s0 + $0xc0] sm:$0x77] }
   0xa   :  { %178 = vst [vmem:[%s575_s1 + $0x10] sm:$0x77] %v154_v27  ;;  %v113_v38 = vmax.bf16 %v29_v35, %v25_v31  ;;  %v115_v39 = vmax.bf16 %v31_v36, %v27_v34  ;;  %v34_v41 = vld [vmem:[%s574_s0 + $0xd0] sm:$0x77]  ;;  %v36_v42 = vld [vmem:[%s574_s0 + $0xe0] sm:$0x77]  ;;  %v156_v43 = vmax.bf16 %v114_v33, %v112_v32 }
   0xb   :  { %v38_v44 = vld [vmem:[%s574_s0 + $0xf0] sm:$0x77]  ;;  %v116_v45 = vmax.bf16 %v36_v42, %v32_v40  ;;  %v33_v46 = vld [vmem:[%s574_s0 + $0xc8] sm:$0x77]  ;;  %v35_v47 = vld [vmem:[%s574_s0 + $0xd8] sm:$0x77] }
   0xc   :  { %179 = vst [vmem:[%s575_s1 + $0x18] sm:$0x77] %v155_v37  ;;  %v157_v48 = vmax.bf16 %v115_v39, %v113_v38  ;;  %v118_v49 = vmax.bf16 %v38_v44, %v34_v41  ;;  %v37_v50 = vld [vmem:[%s574_s0 + $0xe8] sm:$0x77]  ;;  %v39_v51 = vld [vmem:[%s574_s0 + $0xf8] sm:$0x77] }
   0xd   :  { %v40_v52 = vld [vmem:[%s574_s0 + $0x100] sm:$0x77]  ;;  %180 = vst [vmem:[%s575_s1 + $0x20] sm:$0x77] %v156_v43  ;;  %v117_v53 = vmax.bf16 %v37_v50, %v33_v46  ;;  %v119_v54 = vmax.bf16 %v39_v51, %v35_v47  ;;  %v42_v55 = vld [vmem:[%s574_s0 + $0x110] sm:$0x77] }
   0xe   :  { %v44_v56 = vld [vmem:[%s574_s0 + $0x120] sm:$0x77]  ;;  %v46_v57 = vld [vmem:[%s574_s0 + $0x130] sm:$0x77]  ;;  %181 = vst [vmem:[%s575_s1 + $0x28] sm:$0x77] %v157_v48  ;;  %v158_v58 = vmax.bf16 %v118_v49, %v116_v45 }
   0xf   :  { %v120_v59 = vmax.bf16 %v44_v56, %v40_v52  ;;  %v122_v60 = vmax.bf16 %v46_v57, %v42_v55  ;;  %v41_v61 = vld [vmem:[%s574_s0 + $0x108] sm:$0x77]  ;;  %v43_v62 = vld [vmem:[%s574_s0 + $0x118] sm:$0x77]  ;;  %v159_v0 = vmax.bf16 %v119_v54, %v117_v53  ;;  %v48_v3 = vld [vmem:[%s574_s0 + $0x140] sm:$0x77] }
  0x10   :  { %v45_v63 = vld [vmem:[%s574_s0 + $0x128] sm:$0x77]  ;;  %v47_v1 = vld [vmem:[%s574_s0 + $0x138] sm:$0x77]  ;;  %v50_v4 = vld [vmem:[%s574_s0 + $0x150] sm:$0x77] }
  0x11   :  { %v121_v2 = vmax.bf16 %v45_v63, %v41_v61  ;;  %182 = vst [vmem:[%s575_s1 + $0x30] sm:$0x77] %v158_v58  ;;  %v160_v5 = vmax.bf16 %v122_v60, %v120_v59  ;;  %v123_v6 = vmax.bf16 %v47_v1, %v43_v62  ;;  %v52_v7 = vld [vmem:[%s574_s0 + $0x160] sm:$0x77]  ;;  %v54_v8 = vld [vmem:[%s574_s0 + $0x170] sm:$0x77] }
  0x12   :  { %v49_v9 = vld [vmem:[%s574_s0 + $0x148] sm:$0x77]  ;;  %183 = vst [vmem:[%s575_s1 + $0x38] sm:$0x77] %v159_v0  ;;  %v124_v10 = vmax.bf16 %v52_v7, %v48_v3  ;;  %v126_v11 = vmax.bf16 %v54_v8, %v50_v4  ;;  %v51_v12 = vld [vmem:[%s574_s0 + $0x158] sm:$0x77] }
  0x13   :  { %v53_v13 = vld [vmem:[%s574_s0 + $0x168] sm:$0x77]  ;;  %v55_v14 = vld [vmem:[%s574_s0 + $0x178] sm:$0x77]  ;;  %184 = vst [vmem:[%s575_s1 + $0x40] sm:$0x77] %v160_v5  ;;  %v161_v15 = vmax.bf16 %v123_v6, %v121_v2 }
  0x14   :  { %v125_v16 = vmax.bf16 %v53_v13, %v49_v9  ;;  %v127_v17 = vmax.bf16 %v55_v14, %v51_v12  ;;  %v56_v18 = vld [vmem:[%s574_s0 + $0x180] sm:$0x77]  ;;  %v58_v19 = vld [vmem:[%s574_s0 + $0x190] sm:$0x77]  ;;  %v162_v21 = vmax.bf16 %v126_v11, %v124_v10  ;;  %v57_v24 = vld [vmem:[%s574_s0 + $0x188] sm:$0x77] }
  0x15   :  { %v60_v20 = vld [vmem:[%s574_s0 + $0x1a0] sm:$0x77]  ;;  %v62_v22 = vld [vmem:[%s574_s0 + $0x1b0] sm:$0x77]  ;;  %v59_v25 = vld [vmem:[%s574_s0 + $0x198] sm:$0x77] }
  0x16   :  { %v128_v23 = vmax.bf16 %v60_v20, %v56_v18  ;;  %185 = vst [vmem:[%s575_s1 + $0x48] sm:$0x77] %v161_v15  ;;  %v163_v26 = vmax.bf16 %v127_v17, %v125_v16  ;;  %v130_v27 = vmax.bf16 %v62_v22, %v58_v19  ;;  %v61_v28 = vld [vmem:[%s574_s0 + $0x1a8] sm:$0x77]  ;;  %v63_v29 = vld [vmem:[%s574_s0 + $0x1b8] sm:$0x77] }
  0x17   :  { %v64_v30 = vld [vmem:[%s574_s0 + $0x1c0] sm:$0x77]  ;;  %186 = vst [vmem:[%s575_s1 + $0x50] sm:$0x77] %v162_v21  ;;  %v129_v31 = vmax.bf16 %v61_v28, %v57_v24  ;;  %v131_v32 = vmax.bf16 %v63_v29, %v59_v25  ;;  %v66_v33 = vld [vmem:[%s574_s0 + $0x1d0] sm:$0x77] }
  0x18   :  { %v68_v34 = vld [vmem:[%s574_s0 + $0x1e0] sm:$0x77]  ;;  %v70_v35 = vld [vmem:[%s574_s0 + $0x1f0] sm:$0x77]  ;;  %187 = vst [vmem:[%s575_s1 + $0x58] sm:$0x77] %v163_v26  ;;  %v164_v36 = vmax.bf16 %v130_v27, %v128_v23 }
  0x19   :  { %v132_v37 = vmax.bf16 %v68_v34, %v64_v30  ;;  %v134_v38 = vmax.bf16 %v70_v35, %v66_v33  ;;  %v65_v39 = vld [vmem:[%s574_s0 + $0x1c8] sm:$0x77]  ;;  %v67_v40 = vld [vmem:[%s574_s0 + $0x1d8] sm:$0x77]  ;;  %v165_v42 = vmax.bf16 %v131_v32, %v129_v31  ;;  %v72_v45 = vld [vmem:[%s574_s0 + $0x200] sm:$0x77] }
  0x1a   :  { %v69_v41 = vld [vmem:[%s574_s0 + $0x1e8] sm:$0x77]  ;;  %v71_v43 = vld [vmem:[%s574_s0 + $0x1f8] sm:$0x77]  ;;  %v74_v46 = vld [vmem:[%s574_s0 + $0x210] sm:$0x77] }
  0x1b   :  { %v133_v44 = vmax.bf16 %v69_v41, %v65_v39  ;;  %188 = vst [vmem:[%s575_s1 + $0x60] sm:$0x77] %v164_v36  ;;  %v166_v47 = vmax.bf16 %v134_v38, %v132_v37  ;;  %v135_v48 = vmax.bf16 %v71_v43, %v67_v40  ;;  %v76_v49 = vld [vmem:[%s574_s0 + $0x220] sm:$0x77]  ;;  %v78_v50 = vld [vmem:[%s574_s0 + $0x230] sm:$0x77] }
  0x1c   :  { %v73_v51 = vld [vmem:[%s574_s0 + $0x208] sm:$0x77]  ;;  %189 = vst [vmem:[%s575_s1 + $0x68] sm:$0x77] %v165_v42  ;;  %v136_v52 = vmax.bf16 %v76_v49, %v72_v45  ;;  %v138_v53 = vmax.bf16 %v78_v50, %v74_v46  ;;  %v75_v54 = vld [vmem:[%s574_s0 + $0x218] sm:$0x77] }
  0x1d   :  { %v77_v55 = vld [vmem:[%s574_s0 + $0x228] sm:$0x77]  ;;  %v79_v56 = vld [vmem:[%s574_s0 + $0x238] sm:$0x77]  ;;  %190 = vst [vmem:[%s575_s1 + $0x70] sm:$0x77] %v166_v47  ;;  %v167_v57 = vmax.bf16 %v135_v48, %v133_v44 }
  0x1e   :  { %v137_v58 = vmax.bf16 %v77_v55, %v73_v51  ;;  %v139_v59 = vmax.bf16 %v79_v56, %v75_v54  ;;  %v80_v60 = vld [vmem:[%s574_s0 + $0x240] sm:$0x77]  ;;  %v82_v61 = vld [vmem:[%s574_s0 + $0x250] sm:$0x77]  ;;  %v168_v63 = vmax.bf16 %v138_v53, %v136_v52  ;;  %v81_v2 = vld [vmem:[%s574_s0 + $0x248] sm:$0x77] }
  0x1f   :  { %v84_v62 = vld [vmem:[%s574_s0 + $0x260] sm:$0x77]  ;;  %v86_v0 = vld [vmem:[%s574_s0 + $0x270] sm:$0x77]  ;;  %v83_v3 = vld [vmem:[%s574_s0 + $0x258] sm:$0x77] }
  0x20   :  { %v140_v1 = vmax.bf16 %v84_v62, %v80_v60  ;;  %191 = vst [vmem:[%s575_s1 + $0x78] sm:$0x77] %v167_v57  ;;  %v169_v4 = vmax.bf16 %v139_v59, %v137_v58  ;;  %v142_v5 = vmax.bf16 %v86_v0, %v82_v61  ;;  %v85_v6 = vld [vmem:[%s574_s0 + $0x268] sm:$0x77]  ;;  %v87_v7 = vld [vmem:[%s574_s0 + $0x278] sm:$0x77] }
  0x21   :  { %v88_v8 = vld [vmem:[%s574_s0 + $0x280] sm:$0x77]  ;;  %192 = vst [vmem:[%s575_s1 + $0x80] sm:$0x77] %v168_v63  ;;  %v141_v9 = vmax.bf16 %v85_v6, %v81_v2  ;;  %v143_v10 = vmax.bf16 %v87_v7, %v83_v3  ;;  %v90_v11 = vld [vmem:[%s574_s0 + $0x290] sm:$0x77] }
  0x22   :  { %v92_v12 = vld [vmem:[%s574_s0 + $0x2a0] sm:$0x77]  ;;  %v94_v13 = vld [vmem:[%s574_s0 + $0x2b0] sm:$0x77]  ;;  %193 = vst [vmem:[%s575_s1 + $0x88] sm:$0x77] %v169_v4  ;;  %v170_v14 = vmax.bf16 %v142_v5, %v140_v1 }
  0x23   :  { %v144_v15 = vmax.bf16 %v92_v12, %v88_v8  ;;  %v146_v16 = vmax.bf16 %v94_v13, %v90_v11  ;;  %v89_v17 = vld [vmem:[%s574_s0 + $0x288] sm:$0x77]  ;;  %v91_v18 = vld [vmem:[%s574_s0 + $0x298] sm:$0x77]  ;;  %v171_v20 = vmax.bf16 %v143_v10, %v141_v9  ;;  %v96_v23 = vld [vmem:[%s574_s0 + $0x2c0] sm:$0x77] }
  0x24   :  { %v93_v19 = vld [vmem:[%s574_s0 + $0x2a8] sm:$0x77]  ;;  %v95_v21 = vld [vmem:[%s574_s0 + $0x2b8] sm:$0x77]  ;;  %v98_v24 = vld [vmem:[%s574_s0 + $0x2d0] sm:$0x77] }
  0x25   :  { %v145_v22 = vmax.bf16 %v93_v19, %v89_v17  ;;  %194 = vst [vmem:[%s575_s1 + $0x90] sm:$0x77] %v170_v14  ;;  %v172_v25 = vmax.bf16 %v146_v16, %v144_v15  ;;  %v147_v26 = vmax.bf16 %v95_v21, %v91_v18  ;;  %v100_v27 = vld [vmem:[%s574_s0 + $0x2e0] sm:$0x77]  ;;  %v102_v28 = vld [vmem:[%s574_s0 + $0x2f0] sm:$0x77] }
  0x26   :  { %v97_v29 = vld [vmem:[%s574_s0 + $0x2c8] sm:$0x77]  ;;  %195 = vst [vmem:[%s575_s1 + $0x98] sm:$0x77] %v171_v20  ;;  %v148_v30 = vmax.bf16 %v100_v27, %v96_v23  ;;  %v150_v31 = vmax.bf16 %v102_v28, %v98_v24  ;;  %v99_v32 = vld [vmem:[%s574_s0 + $0x2d8] sm:$0x77] }
  0x27   :  { %v101_v33 = vld [vmem:[%s574_s0 + $0x2e8] sm:$0x77]  ;;  %v103_v34 = vld [vmem:[%s574_s0 + $0x2f8] sm:$0x77]  ;;  %196 = vst [vmem:[%s575_s1 + $0xa0] sm:$0x77] %v172_v25  ;;  %v173_v35 = vmax.bf16 %v147_v26, %v145_v22 }
  0x28   :  { %v149_v36 = vmax.bf16 %v101_v33, %v97_v29  ;;  %v151_v37 = vmax.bf16 %v103_v34, %v99_v32  ;;  %v174_v38 = vmax.bf16 %v150_v31, %v148_v30 }
  0x29   :  { %197 = vst [vmem:[%s575_s1 + $0xa8] sm:$0x77] %v173_v35 }
  0x2a   :  { %v175_v39 = vmax.bf16 %v151_v37, %v149_v36  ;;  %198 = vst [vmem:[%s575_s1 + $0xb0] sm:$0x77] %v174_v38 }
  0x2c   :  { %199 = vst [vmem:[%s575_s1 + $0xb8] sm:$0x77] %v175_v39 }

// kernel: net_forward.12
= control target key start
LH: loop header
LB: loop body
LE: loop exit
PB: predicated region body
PF: predicated region fallthrough
CT: control target
= control target key end

     0   :  { %v194_v0 = vmov 0.0   ;;  %vm195_vm0 = vmmov 0   ;;  %s249_s1 = inlined_call_operand.vmem [shape: bf16[128,128], index: 1, kind: input, shape index: {}]   ;;  %s250_s0 = inlined_call_operand.vmem [shape: bf16[2,128], index: 0, kind: input, shape index: {}]   ;;  %s251_s2 = inlined_call_operand.vmem [shape: f32[1,128], index: 2, kind: input, shape index: {}]   ;;  %s252_s3 = inlined_call_operand.vmem [shape: f32[2,128], index: 3, kind: output, shape index: {}]  }
   0x1   :  { %164 = vmatprep.subr.bf16.mxu0 %v194_v0  ;;  %19 = vst [vmem:[#allocation2] sm:$0x3] %v194_v0  ;;  %v186_v1 = vld [vmem:[%s249_s1] sm:$0xff]   ;;  %180 = vmatprep.mubr.msk.bf16.mxu0 %vm195_vm0, %v194_v0  ;;  %v187_v2 = vld [vmem:[%s249_s1 + $0x8] sm:$0xff]   ;;  %v188_v3 = vld [vmem:[%s249_s1 + $0x10] sm:$0xff]  }
   0x2   :  { %165 = vmatpush3.bf16.msra.mxu0 %v186_v1  ;;  %v189_v4 = vld [vmem:[%s249_s1 + $0x18] sm:$0xff]   ;;  %v190_v5 = vld [vmem:[%s249_s1 + $0x20] sm:$0xff]   ;;  %v191_v6 = vld [vmem:[%s249_s1 + $0x28] sm:$0xff]  }
   0x3   :  { %166 = vmatprep.subr.bf16.mxu0 %v194_v0  ;;  %v192_v7 = vld [vmem:[%s249_s1 + $0x30] sm:$0xff]   ;;  %v193_v8 = vld [vmem:[%s249_s1 + $0x38] sm:$0xff]   ;;  %v21_v9 = vld [vmem:[%s250_s0] sm:$0x1] }
   0x4   :  { %v154_v16 = vld [vmem:[%s251_s2] ss:$0 sm:$0xff] }
   0x6   :  { %167 = vmatpush3.bf16.msra.mxu0 %v187_v2 }
   0x7   :  { %168 = vmatprep.subr.bf16.mxu0 %v194_v0 }
   0x8   :  { %v20_v10 = vld [vmem:[#allocation2] sm:$0x3] }
   0xa   :  { %169 = vmatpush3.bf16.msra.mxu0 %v188_v3 }
   0xb   :  { %170 = vmatprep.subr.bf16.mxu0 %v194_v0 }
   0xe   :  { %171 = vmatpush3.bf16.msra.mxu0 %v189_v4 }
   0xf   :  { %172 = vmatprep.subr.bf16.mxu0 %v194_v0 }
  0x12   :  { %173 = vmatpush3.bf16.msra.mxu0 %v190_v5 }
  0x13   :  { %174 = vmatprep.subr.bf16.mxu0 %v194_v0 }
  0x16   :  { %175 = vmatpush3.bf16.msra.mxu0 %v191_v6 }
  0x17   :  { %176 = vmatprep.subr.bf16.mxu0 %v194_v0 }
  0x1a   :  { %177 = vmatpush3.bf16.msra.mxu0 %v192_v7 }
  0x1b   :  { %178 = vmatprep.subr.bf16.mxu0 %v194_v0 }
  0x1e   :  { %179 = vmatpush3.bf16.msra.mxu0 %v193_v8 }
  0x21   :  { %181 = vmatmul.mubr.bf16.vlgmr.msra.gmra.mrb[0].mxu0 %v21_v9 }
  0xf4   :  { %v120_v11 = vpop.f32.mrb[0].mxu0 }
  0xf5   :  { %v126_v12 = vadd.f32 %v120_v11, %v20_v10  ;;  %v182_v13 = vpop.f32.mrb[1].mxu0 }
  0xf6   :  { %v123_v14 = vpop.f32.mrb[2].mxu0 }
  0xf7   :  { %127 = vst [vmem:[#allocation2] sm:$0x3] %v126_v12  ;;  %v183_v15 = vpop.f32.mrb[3].mxu0 }
  0xfe   :  { %v131_v17 = vld [vmem:[#allocation2] sm:$0x3] }
  0xff   :  { %v139_v18 = vadd.f32 %v154_v16, %v131_v17 }
 0x101   :  { %v140_v19 = vmax.f32 %v139_v18, 0.0 }
 0x103   :  { %141 = vst [vmem:[%s252_s3] sm:$0x3] %v140_v19 }

// kernel: net_forward.13
= control target key start
LH: loop header
LB: loop body
LE: loop exit
PB: predicated region body
PF: predicated region fallthrough
CT: control target
= control target key end

     0   :  { %v229_v1 = vmov 0.0   ;;  %vm230_vm0 = vmmov 0   ;;  %s294_s0 = inlined_call_operand.vmem [shape: bf16[2,128], index: 0, kind: input, shape index: {}]   ;;  %s295_s1 = inlined_call_operand.vmem [shape: bf16[128,128], index: 1, kind: input, shape index: {}]   ;;  %s296_s2 = inlined_call_operand.vmem [shape: f32[1,128], index: 2, kind: input, shape index: {}]   ;;  %s297_s3 = inlined_call_operand.hbm [shape: f32[2,128], index: 3, kind: output, shape index: {}]  }
   0x1   :  { %v197_v0 = vld [vmem:[%s295_s1] sm:$0xff]   ;;  %174 = vmatprep.subr.bf16.mxu0 %v229_v1  ;;  %20 = vst [vmem:[#allocation2] sm:$0x3] %v229_v1  ;;  %v198_v2 = vld [vmem:[%s295_s1 + $0x8] sm:$0xff]   ;;  %190 = vmatprep.mubr.msk.bf16.mxu0 %vm230_vm0, %v229_v1  ;;  %v199_v3 = vld [vmem:[%s295_s1 + $0x10] sm:$0xff]  }
   0x2   :  { %175 = vmatpush3.bf16.msra.mxu0 %v197_v0 }
   0x3   :  { %176 = vmatprep.subr.bf16.mxu0 %v229_v1 }
   0x6   :  { %177 = vmatpush3.bf16.msra.mxu0 %v198_v2 }
   0x7   :  { %178 = vmatprep.subr.bf16.mxu0 %v229_v1 }
   0x8   :  { %8 = vsyncpa [#allocation4], 0  ;;  %v200_v4 = vld [vmem:[%s295_s1 + $0x18] sm:$0xff]   ;;  %v201_v5 = vld [vmem:[%s295_s1 + $0x20] sm:$0xff]   ;;  %s231_s5 = smov [#allocation3]  }
   0x9   :  { %v202_v6 = vld [vmem:[%s295_s1 + $0x28] sm:$0xff]   ;;  %v203_v7 = vld [vmem:[%s295_s1 + $0x30] sm:$0xff]   ;;  %v204_v8 = vld [vmem:[%s295_s1 + $0x38] sm:$0xff]   ;;  %s148_s1 = sshll.u32 %s231_s5, 4  ;;  %s149_s1 = int_to_ptr.vmem [resolvable:$true] %s148_s1 }
   0xa   :  { %179 = vmatpush3.bf16.msra.mxu0 %v199_v3  ;;  %v22_v9 = vld [vmem:[%s294_s0] sm:$0x1]  ;;  %s205_s6 = scalar_lea.vmem %s149_s1, 32  ;;  %p210_p1 = scmp.lt.s32.totalorder %s149_s1, %s149_s1 }
   0xb   :  { %180 = vmatprep.subr.bf16.mxu0 %v229_v1  ;;  %v21_v10 = vld [vmem:[#allocation2] sm:$0x3]  ;;  %p206_p0 = scmp.ne.s32.totalorder %s149_s1, %s205_s6  ;;  %p211_p2 = scmp.lt.s32.totalorder %s205_s6, %s205_s6 }
   0xc   :  { %v164_v16 = vld [vmem:[%s296_s2] ss:$0 sm:$0xff] }
   0xd   :  { %p212_p3 = por %p211_p2, %p210_p1 }
   0xe   :  { %181 = vmatpush3.bf16.msra.mxu0 %v200_v4 }
   0xf   :  { %182 = vmatprep.subr.bf16.mxu0 %v229_v1  ;;  %p213_p4 = pnand %p212_p3, %p206_p0 }
  0x12   :  { %183 = vmatpush3.bf16.msra.mxu0 %v201_v5 }
  0x13   :  { %184 = vmatprep.subr.bf16.mxu0 %v229_v1 }
  0x16   :  { %185 = vmatpush3.bf16.msra.mxu0 %v202_v6 }
  0x17   :  { %186 = vmatprep.subr.bf16.mxu0 %v229_v1 }
  0x1a   :  { %187 = vmatpush3.bf16.msra.mxu0 %v203_v7 }
  0x1b   :  { %188 = vmatprep.subr.bf16.mxu0 %v229_v1 }
  0x1e   :  { %189 = vmatpush3.bf16.msra.mxu0 %v204_v8 }
  0x21   :  { %191 = vmatmul.mubr.bf16.vlgmr.msra.gmra.mrb[0].mxu0 %v22_v9 }
  0xf4   :  { %v121_v11 = vpop.f32.mrb[0].mxu0 }
  0xf5   :  { %v127_v12 = vadd.f32 %v121_v11, %v21_v10  ;;  %v192_v13 = vpop.f32.mrb[1].mxu0 }
  0xf6   :  { %v124_v14 = vpop.f32.mrb[2].mxu0 }
  0xf7   :  { %128 = vst [vmem:[#allocation2] sm:$0x3] %v127_v12  ;;  %v193_v15 = vpop.f32.mrb[3].mxu0 }
  0xfe   :  { %v132_v17 = vld [vmem:[#allocation2] sm:$0x3] }
  0xff   :  { %v140_v18 = vadd.f32 %v164_v16, %v132_v17 }
 0x101   :  { %141 = vst [vmem:[#allocation3] sm:$0x3] %v140_v18 }
 0x102   :  { %216 = shalt.err (!%p213_p4)
}
 0x103   :  { %s217_s8 = scalar_lea.hbm %s297_s3, 32 }
 0x104   :  { %p218_p5 = scmp.ne.s32.totalorder %s297_s3, %s217_s8  ;;  %p221_p6 = scmp.lt.u32.totalorder %s217_s8, %s297_s3 }
 0x106   :  { %p223_p7 = pnand %p221_p6, %p218_p5 }
 0x108   :  { %226 = shalt.err (!%p223_p7)
}
 0x109   :  { %151 = dma.vmem_to_hbm [thread:$0]  %s149_s1, 32, %s297_s3, [#allocation4]  }
 0x10a   :  { %227 = dma.done.wait [#allocation4], 32  }
 0x10b   :  { %228 = vsyncadd [#allocation4], 4294967264 }
 0x10c   :  { %155 = vsyncpa [#allocation4], 1 }

// kernel: net_forward.11
= control target key start
LH: loop header
LB: loop body
LE: loop exit
PB: predicated region body
PF: predicated region fallthrough
CT: control target
= control target key end

     0   :  { %s2295_s12 = smov 0   ;;  %s2297_s13 = smov 0   ;;  %s2498_s0 = inlined_call_operand.vmem [shape: bf16[2,18432], index: 0, kind: input, shape index: {}]   ;;  %s2499_s1 = inlined_call_operand.vmem [shape: bf16[18432,128], index: 1, kind: input, shape index: {}]   ;;  %s2500_s2 = inlined_call_operand.vmem [shape: f32[1,128], index: 2, kind: input, shape index: {}]   ;;  %s2501_s3 = inlined_call_operand.vmem [shape: f32[2,128], index: 3, kind: output, shape index: {}]  }
   0x1   :  { %s2299_s14 = smov 0  }
   0x2 LB: > { %s22_s15 = sadd.s32 1, %s2267_s13  ;;  %p1779_p0 = scmp.ge.s32.totalorder %s2271_s14, 1  ;;  %s2271_s14 = sphi %s2299_s14, %s13_s14   ;;  %s2267_s13 = sphi %s2297_s13, %s2503_s13   ;;  %s2263_s12 = sphi %s2295_s12, %s2502_s12  }
   0x3   : > { %p23_p1 = scmp.ge.s32.totalorder %s22_s15, 9  ;;  %p166_p2 = scmp.lt.s32.totalorder %s2271_s14, 10 }
   0x5   : > { %s2505_s15 = smov (%p23_p1, %s22_s15), 0  ;;  %p167_p3 = pnand %p1779_p0, %p166_p2 }
   0x6   : > { %s1780_s16 = sshll.u32 (!%p167_p3), %s2263_s12, 4  ;;  %s1781_s17 = sshll.u32 (!%p167_p3), %s2263_s12, 8 }
   0x7   : > { %170 = sbr.rel (%p167_p3) target bundleno = 387 (0x183), region = 32  ;;  %p200_p4 = scmp.lt.s32.totalorder (!%p167_p3), %s1780_s16, 143 }
   0x8   : > { %p207_p5 = scmp.lt.s32.totalorder (!%p167_p3), %s1781_s17, 2303  ;;  %p1783_p6 = scmp.ne.s32.totalorder (!%p167_p3), %s2263_s12, 0 }
   0xe   : > { %s2507_s16 = smov (!%p200_p4, %s1780_s16), 143  ;;  %s2509_s17 = smov (!%p207_p5, %s1781_s17), 2303 }
   0xf   : > { %s2320_s20 = scalar_lea.vmem %s2498_s0, %s2507_s16  ;;  %s1782_s21 = sshll.u32 %s2509_s17, 2  ;;  %v2273_v0 = vmov (!%p1783_p6), 0.0  }
  0x10   : > { %s2325_s24 = scalar_lea.vmem %s2499_s1, %s1782_s21  ;;  %220 = sbr.rel (%p1783_p6) target bundleno = 23 (0x17), region = 36  ;;  %221 = vst [vmem:[#allocation2] sm:$0x3] (!%p1783_p6), %v2273_v0 }
  0x17 PF: > { %v2119_v1 = vld [vmem:[%s2325_s24 + $0x40] sm:$0xff]   ;;  %v2123_v5 = vld [vmem:[%s2325_s24 + $0x48] sm:$0xff]   ;;  %v2127_v9 = vld [vmem:[%s2325_s24 + $0x50] sm:$0xff]   ;;  %v487_v29 = vlaneseq  ;;  %v2274_v37 = vmov 1966171168   ;;  %p1912_p7 = scmp.ne.s32.totalorder %s2263_s12, 8 }
  0x18   : > { %v2120_v2 = vld [vmem:[%s2325_s24 + $0xc0] sm:$0xff]   ;;  %1917 = vmatprep.subr.bf16.mxu0 %v2119_v1  ;;  %v2124_v6 = vld [vmem:[%s2325_s24 + $0xc8] sm:$0xff]   ;;  %v2128_v10 = vld [vmem:[%s2325_s24 + $0xd0] sm:$0xff]   ;;  %v485_v38 = vunpack.c.l.s4 %v2274_v37 }
  0x19   : > { %v2121_v3 = vld [vmem:[%s2325_s24] sm:$0xff]   ;;  %1939 = vmatprep.subr.bf16.mxu1 %v2120_v2  ;;  %v2125_v7 = vld [vmem:[%s2325_s24 + $0x8] sm:$0xff]   ;;  %v2129_v11 = vld [vmem:[%s2325_s24 + $0x10] sm:$0xff]   ;;  %v488_v34 = vshrl.u32 %v487_v29, 7 }
  0x1a   : > { %v2122_v4 = vld [vmem:[%s2325_s24 + $0x80] sm:$0xff]   ;;  %1918 = vmatpush3.bf16.msra.mxu0 %v2121_v3  ;;  %v2126_v8 = vld [vmem:[%s2325_s24 + $0x88] sm:$0xff]   ;;  %v2130_v12 = vld [vmem:[%s2325_s24 + $0x90] sm:$0xff]   ;;  %v486_v41 = vunpack.c.0.s8 %v485_v38 }
  0x1b   : > { %1940 = vmatpush3.bf16.msra.mxu1 %v2122_v4  ;;  %1919 = vmatprep.subr.bf16.mxu0 %v2123_v5  ;;  %v2131_v13 = vld [vmem:[%s2325_s24 + $0x58] sm:$0xff]   ;;  %v2135_v17 = vld [vmem:[%s2325_s24 + $0x60] sm:$0xff]   ;;  %v2139_v21 = vld [vmem:[%s2325_s24 + $0x68] sm:$0xff]  }
  0x1c   : > { %1941 = vmatprep.subr.bf16.mxu1 %v2124_v6  ;;  %v2132_v14 = vld [vmem:[%s2325_s24 + $0xd8] sm:$0xff]   ;;  %v2136_v18 = vld [vmem:[%s2325_s24 + $0xe0] sm:$0xff]   ;;  %v2140_v22 = vld [vmem:[%s2325_s24 + $0xe8] sm:$0xff]   ;;  %v2363_v42 = vsub.s32 %v486_v41, %v488_v34 }
  0x1d   : > { %v2133_v15 = vld [vmem:[%s2325_s24 + $0x18] sm:$0xff]   ;;  %v2137_v19 = vld [vmem:[%s2325_s24 + $0x20] sm:$0xff]   ;;  %v2141_v23 = vld [vmem:[%s2325_s24 + $0x28] sm:$0xff]  }
  0x1e   : > { %1920 = vmatpush3.bf16.msra.mxu0 %v2125_v7  ;;  %v2134_v16 = vld [vmem:[%s2325_s24 + $0x98] sm:$0xff]   ;;  %v2138_v20 = vld [vmem:[%s2325_s24 + $0xa0] sm:$0xff]   ;;  %v2142_v24 = vld [vmem:[%s2325_s24 + $0xa8] sm:$0xff]  }
  0x1f   : > { %1942 = vmatpush3.bf16.msra.mxu1 %v2126_v8  ;;  %1921 = vmatprep.subr.bf16.mxu0 %v2127_v9  ;;  %v2143_v25 = vld [vmem:[%s2325_s24 + $0x70] sm:$0xff]   ;;  %v2147_v30 = vld [vmem:[%s2325_s24 + $0x78] sm:$0xff]   ;;  %v223_v35 = vld [vmem:[%s2320_s20] sm:$0xff] }
  0x20   : > { %1943 = vmatprep.subr.bf16.mxu1 %v2128_v10  ;;  %v2144_v26 = vld [vmem:[%s2325_s24 + $0xf0] sm:$0xff]   ;;  %v2148_v31 = vld [vmem:[%s2325_s24 + $0xf8] sm:$0xff]   ;;  %v2152_v36 = vld [vmem:[%s2325_s24 + $0x140] sm:$0xff]   ;;  %v483_v40 = vcombine.high %v223_v35, %v223_v35  ;;  %v490_v43 = vrot.slane %v223_v35, %v2363_v42 }
  0x21   : > { %v2145_v27 = vld [vmem:[%s2325_s24 + $0x30] sm:$0xff]   ;;  %v2149_v32 = vld [vmem:[%s2325_s24 + $0x38] sm:$0xff]   ;;  %v2153_v39 = vld [vmem:[%s2325_s24 + $0x1c0] sm:$0xff]  }
  0x22   : > { %1922 = vmatpush3.bf16.msra.mxu0 %v2129_v11  ;;  %v2146_v28 = vld [vmem:[%s2325_s24 + $0xb0] sm:$0xff]   ;;  %v2150_v33 = vld [vmem:[%s2325_s24 + $0xb8] sm:$0xff]   ;;  %v2367_v44 = vrot.slane %v483_v40, %v2363_v42  ;;  %v498_v45 = vcombine.high %v490_v43, %v490_v43  ;;  %v506_v46 = vrot.slane %v490_v43, %v2363_v42  ;;  %v2154_v49 = vld [vmem:[%s2325_s24 + $0x100] sm:$0xff]  }
  0x23   : > { %1944 = vmatpush3.bf16.msra.mxu1 %v2130_v12  ;;  %1923 = vmatprep.subr.bf16.mxu0 %v2131_v13  ;;  %v2156_v52 = vld [vmem:[%s2325_s24 + $0x148] sm:$0xff]   ;;  %v2155_v54 = vld [vmem:[%s2325_s24 + $0x180] sm:$0xff]   ;;  %v2160_v58 = vld [vmem:[%s2325_s24 + $0x150] sm:$0xff]  }
  0x24   : > { %1945 = vmatprep.subr.bf16.mxu1 %v2132_v14  ;;  %v499_v47 = vcombine.high %v2367_v44, %v2367_v44  ;;  %v520_v48 = vrot.slane %v498_v45, %v2363_v42  ;;  %v528_v51 = vcombine.high %v506_v46, %v506_v46  ;;  %v2157_v55 = vld [vmem:[%s2325_s24 + $0x1c8] sm:$0xff]   ;;  %v2161_v60 = vld [vmem:[%s2325_s24 + $0x1d0] sm:$0xff]   ;;  %v2164_v62 = vld [vmem:[%s2325_s24 + $0x158] sm:$0xff]  }
  0x25   : > { %v2158_v57 = vld [vmem:[%s2325_s24 + $0x108] sm:$0xff]   ;;  %v2162_v61 = vld [vmem:[%s2325_s24 + $0x110] sm:$0xff]   ;;  %v2165_v0 = vld [vmem:[%s2325_s24 + $0x1d8] sm:$0xff]  }
  0x26   : > { %1924 = vmatpush3.bf16.msra.mxu0 %v2133_v15  ;;  %v527_v50 = vrot.slane %v499_v47, %v2363_v42  ;;  %1397 = vmatprep.mubr.bf16.mxu0 %v520_v48  ;;  %v530_v53 = vcombine.high %v520_v48, %v520_v48  ;;  %v2159_v59 = vld [vmem:[%s2325_s24 + $0x188] sm:$0xff]   ;;  %v2163_v63 = vld [vmem:[%s2325_s24 + $0x190] sm:$0xff]   ;;  %v2166_v1 = vld [vmem:[%s2325_s24 + $0x118] sm:$0xff]  }
  0x27   : > { %1946 = vmatpush3.bf16.msra.mxu1 %v2134_v16  ;;  %1925 = vmatprep.subr.bf16.mxu0 %v2135_v17  ;;  %v2168_v2 = vld [vmem:[%s2325_s24 + $0x160] sm:$0xff]   ;;  %v2167_v3 = vld [vmem:[%s2325_s24 + $0x198] sm:$0xff]   ;;  %v2172_v6 = vld [vmem:[%s2325_s24 + $0x168] sm:$0xff]  }
  0x28   : > { %1947 = vmatprep.subr.bf16.mxu1 %v2136_v18  ;;  %v531_v56 = vcombine.high %v527_v50, %v527_v50  ;;  %1437 = vmatprep.mubr.bf16.mxu1 %v530_v53  ;;  %v2169_v4 = vld [vmem:[%s2325_s24 + $0x1e0] sm:$0xff]   ;;  %v2173_v8 = vld [vmem:[%s2325_s24 + $0x1e8] sm:$0xff]   ;;  %v2176_v10 = vld [vmem:[%s2325_s24 + $0x170] sm:$0xff]   ;;  %v513_v18 = vrot.slane %v2367_v44, %v2363_v42 }
  0x29   : > { %v2170_v5 = vld [vmem:[%s2325_s24 + $0x120] sm:$0xff]   ;;  %v2174_v9 = vld [vmem:[%s2325_s24 + $0x128] sm:$0xff]   ;;  %v2177_v12 = vld [vmem:[%s2325_s24 + $0x1f0] sm:$0xff]  }
  0x2a   : > { %1926 = vmatpush3.bf16.msra.mxu0 %v2137_v19  ;;  %v2171_v7 = vld [vmem:[%s2325_s24 + $0x1a0] sm:$0xff]   ;;  %v2175_v11 = vld [vmem:[%s2325_s24 + $0x1a8] sm:$0xff]   ;;  %v2178_v13 = vld [vmem:[%s2325_s24 + $0x130] sm:$0xff]  }
  0x2b   : > { %1948 = vmatpush3.bf16.msra.mxu1 %v2138_v20  ;;  %1927 = vmatprep.subr.bf16.mxu0 %v2139_v21  ;;  %v2180_v14 = vld [vmem:[%s2325_s24 + $0x178] sm:$0xff]   ;;  %v2179_v15 = vld [vmem:[%s2325_s24 + $0x1b0] sm:$0xff]   ;;  %v2184_v19 = vld [vmem:[%s2325_s24 + $0x240] sm:$0xff]  }
  0x2c   : > { %1949 = vmatprep.subr.bf16.mxu1 %v2140_v22  ;;  %v2181_v16 = vld [vmem:[%s2325_s24 + $0x1f8] sm:$0xff]   ;;  %v2185_v21 = vld [vmem:[%s2325_s24 + $0x2c0] sm:$0xff]   ;;  %v2191_v29 = vld [vmem:[%s2325_s24 + $0x288] sm:$0xff]  }
  0x2d   : > { %v2182_v17 = vld [vmem:[%s2325_s24 + $0x138] sm:$0xff]   ;;  %v2186_v22 = vld [vmem:[%s2325_s24 + $0x200] sm:$0xff]   ;;  %v2204_v40 = vld [vmem:[%s2325_s24 + $0x268] sm:$0xff]  }
  0x2e   : > { %1928 = vmatpush3.bf16.msra.mxu0 %v2141_v23  ;;  %v2183_v20 = vld [vmem:[%s2325_s24 + $0x1b8] sm:$0xff]   ;;  %v529_v23 = vcombine.high %v513_v18, %v513_v18  ;;  %v2201_v38 = vld [vmem:[%s2325_s24 + $0x2e0] sm:$0xff]   ;;  %v2205_v43 = vld [vmem:[%s2325_s24 + $0x2e8] sm:$0xff]  }
  0x2f   : > { %1950 = vmatpush3.bf16.msra.mxu1 %v2142_v24  ;;  %1929 = vmatprep.subr.bf16.mxu0 %v2143_v25  ;;  %v2188_v24 = vld [vmem:[%s2325_s24 + $0x248] sm:$0xff]   ;;  %v2187_v25 = vld [vmem:[%s2325_s24 + $0x280] sm:$0xff]   ;;  %v2197_v34 = vld [vmem:[%s2325_s24 + $0x2d8] sm:$0xff]  }
  0x30   : > { %1951 = vmatprep.subr.bf16.mxu1 %v2144_v26  ;;  %v2189_v26 = vld [vmem:[%s2325_s24 + $0x2c8] sm:$0xff]   ;;  %v2198_v35 = vld [vmem:[%s2325_s24 + $0x218] sm:$0xff]   ;;  %v2203_v41 = vld [vmem:[%s2325_s24 + $0x2a0] sm:$0xff]  }
  0x31   : > { %v2199_v37 = vld [vmem:[%s2325_s24 + $0x298] sm:$0xff]   ;;  %v2206_v44 = vld [vmem:[%s2325_s24 + $0x228] sm:$0xff]   ;;  %v2208_v45 = vld [vmem:[%s2325_s24 + $0x270] sm:$0xff]  }
  0x32   : > { %1930 = vmatpush3.bf16.msra.mxu0 %v2145_v27  ;;  %v2190_v27 = vld [vmem:[%s2325_s24 + $0x208] sm:$0xff]  }
  0x33   : > { %1952 = vmatpush3.bf16.msra.mxu1 %v2146_v28  ;;  %1931 = vmatprep.subr.bf16.mxu0 %v2147_v30  ;;  %v2192_v28 = vld [vmem:[%s2325_s24 + $0x250] sm:$0xff]   ;;  %v2207_v47 = vld [vmem:[%s2325_s24 + $0x2a8] sm:$0xff]  }
  0x34   : > { %1953 = vmatprep.subr.bf16.mxu1 %v2148_v31  ;;  %v2193_v30 = vld [vmem:[%s2325_s24 + $0x2d0] sm:$0xff]  }
  0x35   : > { %v2194_v31 = vld [vmem:[%s2325_s24 + $0x210] sm:$0xff]  }
  0x36   : > { %1932 = vmatpush3.bf16.msra.mxu0 %v2149_v32  ;;  %v2196_v32 = vld [vmem:[%s2325_s24 + $0x258] sm:$0xff]  }
  0x37   : > { %1954 = vmatpush3.bf16.msra.mxu1 %v2150_v33  ;;  %1961 = vmatprep.subr.bf16.mxu0 %v2152_v36  ;;  %v2195_v33 = vld [vmem:[%s2325_s24 + $0x290] sm:$0xff]   ;;  %v2200_v36 = vld [vmem:[%s2325_s24 + $0x260] sm:$0xff]  }
  0x38   : > { %1983 = vmatprep.subr.bf16.mxu1 %v2153_v39  ;;  %v2202_v39 = vld [vmem:[%s2325_s24 + $0x220] sm:$0xff]  }
  0x39   : > { %1398 = vmatmul.mubr.bf16.vlgmr.msra.gmra.mrb[0].mxu0 %v506_v46  ;;  %v224_v46 = vld [vmem:[%s2320_s20 + $0x8] sm:$0xff] }
  0x3a   : > { %1962 = vmatpush3.bf16.msra.mxu0 %v2154_v49  ;;  %1438 = vmatmul.mubr.bf16.vlgmr.msra.gmra.mrb[0].mxu1 %v528_v51  ;;  %v539_v48 = vrot.slane %v224_v46, %v2363_v42  ;;  %v532_v49 = vcombine.high %v224_v46, %v224_v46  ;;  %v2210_v51 = vld [vmem:[%s2325_s24 + $0x230] sm:$0xff]  }
  0x3b   : > { %1963 = vmatprep.subr.bf16.mxu0 %v2156_v52  ;;  %1984 = vmatpush3.bf16.msra.mxu1 %v2155_v54  ;;  %v2212_v54 = vld [vmem:[%s2325_s24 + $0x278] sm:$0xff]  }
  0x3c   : > { %1477 = vmatprep.mubr.bf16.mxu0 %v527_v50  ;;  %1985 = vmatprep.subr.bf16.mxu1 %v2157_v55  ;;  %v2209_v50 = vld [vmem:[%s2325_s24 + $0x2f0] sm:$0xff]   ;;  %v547_v52 = vcombine.high %v539_v48, %v539_v48  ;;  %v2436_v53 = vrot.slane %v532_v49, %v2363_v42 }
  0x3d   : > { %1517 = vmatprep.mubr.bf16.mxu1 %v531_v56  ;;  %v2211_v55 = vld [vmem:[%s2325_s24 + $0x2b0] sm:$0xff]  }
  0x3e   : > { %1964 = vmatpush3.bf16.msra.mxu0 %v2158_v57  ;;  %v569_v56 = vrot.slane %v547_v52, %v2363_v42  ;;  %v548_v57 = vcombine.high %v2436_v53, %v2436_v53 }
  0x3f   : > { %1965 = vmatprep.subr.bf16.mxu0 %v2160_v58  ;;  %1986 = vmatpush3.bf16.msra.mxu1 %v2159_v59  ;;  %v2213_v58 = vld [vmem:[%s2325_s24 + $0x2f8] sm:$0xff]  }
  0x40   : > { %1987 = vmatprep.subr.bf16.mxu1 %v2161_v60  ;;  %v2214_v59 = vld [vmem:[%s2325_s24 + $0x238] sm:$0xff]   ;;  %v579_v60 = vcombine.high %v569_v56, %v569_v56 }
  0x42   : > { %1966 = vmatpush3.bf16.msra.mxu0 %v2162_v61  ;;  %v555_v61 = vrot.slane %v539_v48, %v2363_v42 }
  0x43   : > { %1967 = vmatprep.subr.bf16.mxu0 %v2164_v62  ;;  %1988 = vmatpush3.bf16.msra.mxu1 %v2163_v63  ;;  %v2216_v62 = vld [vmem:[%s2325_s24 + $0x340] sm:$0xff]   ;;  %v2215_v63 = vld [vmem:[%s2325_s24 + $0x2b8] sm:$0xff]  }
  0x44   : > { %1989 = vmatprep.subr.bf16.mxu1 %v2165_v0  ;;  %v576_v0 = vrot.slane %v548_v57, %v2363_v42 }
  0x46   : > { %1968 = vmatpush3.bf16.msra.mxu0 %v2166_v1  ;;  %v2217_v1 = vld [vmem:[%s2325_s24 + $0x3c0] sm:$0xff]  }
  0x47   : > { %1969 = vmatprep.subr.bf16.mxu0 %v2168_v2  ;;  %1990 = vmatpush3.bf16.msra.mxu1 %v2167_v3  ;;  %v2218_v2 = vld [vmem:[%s2325_s24 + $0x300] sm:$0xff]   ;;  %v577_v3 = vcombine.high %v555_v61, %v555_v61 }
  0x48   : > { %1991 = vmatprep.subr.bf16.mxu1 %v2169_v4  ;;  %v2220_v4 = vld [vmem:[%s2325_s24 + $0x348] sm:$0xff]  }
  0x4a   : > { %1970 = vmatpush3.bf16.msra.mxu0 %v2170_v5  ;;  %v2219_v5 = vld [vmem:[%s2325_s24 + $0x380] sm:$0xff]  }
  0x4b   : > { %1971 = vmatprep.subr.bf16.mxu0 %v2172_v6  ;;  %1992 = vmatpush3.bf16.msra.mxu1 %v2171_v7  ;;  %v580_v6 = vcombine.high %v576_v0, %v576_v0  ;;  %v2221_v7 = vld [vmem:[%s2325_s24 + $0x3c8] sm:$0xff]  }
  0x4c   : > { %1993 = vmatprep.subr.bf16.mxu1 %v2173_v8  ;;  %v2222_v8 = vld [vmem:[%s2325_s24 + $0x308] sm:$0xff]  }
  0x4e   : > { %1972 = vmatpush3.bf16.msra.mxu0 %v2174_v9  ;;  %v2224_v9 = vld [vmem:[%s2325_s24 + $0x350] sm:$0xff]  }
  0x4f   : > { %1973 = vmatprep.subr.bf16.mxu0 %v2176_v10  ;;  %1994 = vmatpush3.bf16.msra.mxu1 %v2175_v11  ;;  %v2223_v10 = vld [vmem:[%s2325_s24 + $0x388] sm:$0xff]   ;;  %v2225_v11 = vld [vmem:[%s2325_s24 + $0x3d0] sm:$0xff]  }
  0x50   : > { %1995 = vmatprep.subr.bf16.mxu1 %v2177_v12  ;;  %v2226_v12 = vld [vmem:[%s2325_s24 + $0x310] sm:$0xff]  }
  0x52   : > { %1974 = vmatpush3.bf16.msra.mxu0 %v2178_v13  ;;  %v2228_v13 = vld [vmem:[%s2325_s24 + $0x358] sm:$0xff]  }
  0x53   : > { %1975 = vmatprep.subr.bf16.mxu0 %v2180_v14  ;;  %1996 = vmatpush3.bf16.msra.mxu1 %v2179_v15  ;;  %v2227_v14 = vld [vmem:[%s2325_s24 + $0x390] sm:$0xff]   ;;  %v2229_v15 = vld [vmem:[%s2325_s24 + $0x3d8] sm:$0xff]  }
  0x54   : > { %1997 = vmatprep.subr.bf16.mxu1 %v2181_v16  ;;  %v2230_v16 = vld [vmem:[%s2325_s24 + $0x318] sm:$0xff]  }
  0x56   : > { %1976 = vmatpush3.bf16.msra.mxu0 %v2182_v17  ;;  %v2232_v17 = vld [vmem:[%s2325_s24 + $0x360] sm:$0xff]  }
  0x57   : > { %2005 = vmatprep.subr.bf16.mxu0 %v2184_v19  ;;  %1998 = vmatpush3.bf16.msra.mxu1 %v2183_v20  ;;  %v2233_v19 = vld [vmem:[%s2325_s24 + $0x3e0] sm:$0xff]  }
  0x58   : > { %2027 = vmatprep.subr.bf16.mxu1 %v2185_v21  ;;  %v2234_v20 = vld [vmem:[%s2325_s24 + $0x320] sm:$0xff]   ;;  %v2236_v21 = vld [vmem:[%s2325_s24 + $0x368] sm:$0xff]  }
  0x59   : > { %1478 = vmatmul.mubr.bf16.vlgmr.msra.gmra.mrb[4].mxu0 %v513_v18  ;;  %v2231_v18 = vld [vmem:[%s2325_s24 + $0x398] sm:$0xff]  }
  0x5a   : > { %2006 = vmatpush3.bf16.msra.mxu0 %v2186_v22  ;;  %1518 = vmatmul.mubr.bf16.vlgmr.msra.gmra.mrb[4].mxu1 %v529_v23  ;;  %v2235_v22 = vld [vmem:[%s2325_s24 + $0x3a0] sm:$0xff]   ;;  %v2237_v23 = vld [vmem:[%s2325_s24 + $0x3e8] sm:$0xff]  }
  0x5b   : > { %2007 = vmatprep.subr.bf16.mxu0 %v2188_v24  ;;  %2028 = vmatpush3.bf16.msra.mxu1 %v2187_v25  ;;  %v2238_v24 = vld [vmem:[%s2325_s24 + $0x328] sm:$0xff]   ;;  %v2240_v25 = vld [vmem:[%s2325_s24 + $0x370] sm:$0xff]  }
  0x5c   : > { %2029 = vmatprep.subr.bf16.mxu1 %v2189_v26  ;;  %1557 = vmatprep.mubr.bf16.mxu0 %v569_v56  ;;  %v2239_v26 = vld [vmem:[%s2325_s24 + $0x3a8] sm:$0xff]  }
  0x5d   : > { %1597 = vmatprep.mubr.bf16.mxu1 %v579_v60 }
  0x5e   : > { %2008 = vmatpush3.bf16.msra.mxu0 %v2190_v27  ;;  %v2241_v27 = vld [vmem:[%s2325_s24 + $0x3f0] sm:$0xff]  }
  0x5f   : > { %2009 = vmatprep.subr.bf16.mxu0 %v2192_v28  ;;  %2030 = vmatpush3.bf16.msra.mxu1 %v2191_v29  ;;  %v2242_v28 = vld [vmem:[%s2325_s24 + $0x330] sm:$0xff]   ;;  %v2244_v29 = vld [vmem:[%s2325_s24 + $0x378] sm:$0xff]  }
  0x60   : > { %2031 = vmatprep.subr.bf16.mxu1 %v2193_v30  ;;  %v2243_v30 = vld [vmem:[%s2325_s24 + $0x3b0] sm:$0xff]  }
  0x62   : > { %2010 = vmatpush3.bf16.msra.mxu0 %v2194_v31  ;;  %v2245_v31 = vld [vmem:[%s2325_s24 + $0x3f8] sm:$0xff]  }
  0x63   : > { %2011 = vmatprep.subr.bf16.mxu0 %v2196_v32  ;;  %2032 = vmatpush3.bf16.msra.mxu1 %v2195_v33  ;;  %v2246_v32 = vld [vmem:[%s2325_s24 + $0x338] sm:$0xff]   ;;  %v562_v33 = vrot.slane %v2436_v53, %v2363_v42 }
  0x64   : > { %2033 = vmatprep.subr.bf16.mxu1 %v2197_v34  ;;  %v2247_v34 = vld [vmem:[%s2325_s24 + $0x3b8] sm:$0xff]  }
  0x66   : > { %2012 = vmatpush3.bf16.msra.mxu0 %v2198_v35  ;;  %v578_v35 = vcombine.high %v562_v33, %v562_v33 }
  0x67   : > { %2013 = vmatprep.subr.bf16.mxu0 %v2200_v36  ;;  %2034 = vmatpush3.bf16.msra.mxu1 %v2199_v37 }
  0x68   : > { %2035 = vmatprep.subr.bf16.mxu1 %v2201_v38 }
  0x6a   : > { %2014 = vmatpush3.bf16.msra.mxu0 %v2202_v39 }
  0x6b   : > { %2015 = vmatprep.subr.bf16.mxu0 %v2204_v40  ;;  %2036 = vmatpush3.bf16.msra.mxu1 %v2203_v41 }
  0x6c   : > { %2037 = vmatprep.subr.bf16.mxu1 %v2205_v43 }
  0x6e   : > { %2016 = vmatpush3.bf16.msra.mxu0 %v2206_v44 }
  0x6f   : > { %2017 = vmatprep.subr.bf16.mxu0 %v2208_v45  ;;  %2038 = vmatpush3.bf16.msra.mxu1 %v2207_v47 }
  0x70   : > { %2039 = vmatprep.subr.bf16.mxu1 %v2209_v50 }
  0x72   : > { %2018 = vmatpush3.bf16.msra.mxu0 %v2210_v51 }
  0x73   : > { %2019 = vmatprep.subr.bf16.mxu0 %v2212_v54  ;;  %2040 = vmatpush3.bf16.msra.mxu1 %v2211_v55 }
  0x74   : > { %2041 = vmatprep.subr.bf16.mxu1 %v2213_v58 }
  0x76   : > { %2020 = vmatpush3.bf16.msra.mxu0 %v2214_v59 }
  0x77   : > { %2049 = vmatprep.subr.bf16.mxu0 %v2216_v62  ;;  %2042 = vmatpush3.bf16.msra.mxu1 %v2215_v63 }
  0x78   : > { %2071 = vmatprep.subr.bf16.mxu1 %v2217_v1 }
  0x79   : > { %1558 = vmatmul.mubr.bf16.vlgmr.msra.gmra.mrb[8].mxu0 %v555_v61 }
  0x7a   : > { %2050 = vmatpush3.bf16.msra.mxu0 %v2218_v2  ;;  %1637 = vmatprep.mubr.bf16.mxu0 %v576_v0 }
  0x7b   : > { %1598 = vmatmul.mubr.bf16.vlgmr.msra.gmra.mrb[8].mxu1 %v577_v3  ;;  %2051 = vmatprep.subr.bf16.mxu0 %v2220_v4 }
  0x7c   : > { %2072 = vmatpush3.bf16.msra.mxu1 %v2219_v5  ;;  %1677 = vmatprep.mubr.bf16.mxu1 %v580_v6 }
  0x7d   : > { %2073 = vmatprep.subr.bf16.mxu1 %v2221_v7 }
  0x7e   : > { %2052 = vmatpush3.bf16.msra.mxu0 %v2222_v8 }
  0x7f   : > { %2053 = vmatprep.subr.bf16.mxu0 %v2224_v9 }
  0x80   : > { %2074 = vmatpush3.bf16.msra.mxu1 %v2223_v10 }
  0x81   : > { %2075 = vmatprep.subr.bf16.mxu1 %v2225_v11 }
  0x82   : > { %2054 = vmatpush3.bf16.msra.mxu0 %v2226_v12 }
  0x83   : > { %2055 = vmatprep.subr.bf16.mxu0 %v2228_v13 }
  0x84   : > { %2076 = vmatpush3.bf16.msra.mxu1 %v2227_v14 }
  0x85   : > { %2077 = vmatprep.subr.bf16.mxu1 %v2229_v15 }
  0x86   : > { %2056 = vmatpush3.bf16.msra.mxu0 %v2230_v16 }
  0x87   : > { %2057 = vmatprep.subr.bf16.mxu0 %v2232_v17  ;;  %v222_v17 = vld [vmem:[#allocation2] sm:$0x3] }
  0x88   : > { %2078 = vmatpush3.bf16.msra.mxu1 %v2231_v18 }
  0x89   : > { %2079 = vmatprep.subr.bf16.mxu1 %v2233_v19 }
  0x8a   : > { %2058 = vmatpush3.bf16.msra.mxu0 %v2234_v20 }
  0x8b   : > { %2059 = vmatprep.subr.bf16.mxu0 %v2236_v21 }
  0x8c   : > { %2080 = vmatpush3.bf16.msra.mxu1 %v2235_v22  ;;  %v1913_v22 = vld [vmem:[%s2500_s2] ss:$0 sm:$0xff] (!%p1912_p7) }
  0x8d   : > { %2081 = vmatprep.subr.bf16.mxu1 %v2237_v23 }
  0x8e   : > { %2060 = vmatpush3.bf16.msra.mxu0 %v2238_v24 }
  0x8f   : > { %2061 = vmatprep.subr.bf16.mxu0 %v2240_v25 }
  0x90   : > { %2082 = vmatpush3.bf16.msra.mxu1 %v2239_v26 }
  0x91   : > { %2083 = vmatprep.subr.bf16.mxu1 %v2241_v27 }
  0x92   : > { %2062 = vmatpush3.bf16.msra.mxu0 %v2242_v28 }
  0x93   : > { %2063 = vmatprep.subr.bf16.mxu0 %v2244_v29 }
  0x94   : > { %2084 = vmatpush3.bf16.msra.mxu1 %v2243_v30 }
  0x95   : > { %2085 = vmatprep.subr.bf16.mxu1 %v2245_v31 }
  0x96   : > { %2064 = vmatpush3.bf16.msra.mxu0 %v2246_v32 }
  0x98   : > { %2086 = vmatpush3.bf16.msra.mxu1 %v2247_v34 }
  0x99   : > { %1638 = vmatmul.mubr.bf16.vlgmr.msra.gmra.mrb[12].mxu0 %v562_v33 }
  0x9b   : > { %1678 = vmatmul.mubr.bf16.vlgmr.msra.gmra.mrb[12].mxu1 %v578_v35 }
 0x10c   : > { %v1933_v36 = vpop.f32.mrb[0].mxu0 }
 0x10d   : > { %v1934_v37 = vpop.f32.mrb[1].mxu0  ;;  %v1955_v38 = vpop.f32.mrb[0].mxu1 }
 0x10e   : > { %v1935_v39 = vadd.f32 %v1934_v37, %v1933_v36  ;;  %v1936_v40 = vpop.f32.mrb[2].mxu0  ;;  %v1956_v41 = vpop.f32.mrb[1].mxu1 }
 0x10f   : > { %v1937_v43 = vpop.f32.mrb[3].mxu0  ;;  %v1957_v44 = vadd.f32 %v1956_v41, %v1955_v38  ;;  %v1958_v45 = vpop.f32.mrb[2].mxu1 }
 0x110   : > { %v1959_v46 = vpop.f32.mrb[3].mxu1 }
 0x111   : > { %v1440_v47 = vadd.f32 %v1957_v44, %v1935_v39 }
 0x12c   : > { %v1977_v42 = vpop.f32.mrb[4].mxu0 }
 0x12d   : > { %v1978_v48 = vpop.f32.mrb[5].mxu0  ;;  %v1999_v49 = vpop.f32.mrb[4].mxu1 }
 0x12e   : > { %v1979_v50 = vadd.f32 %v1978_v48, %v1977_v42  ;;  %v1980_v51 = vpop.f32.mrb[6].mxu0  ;;  %v2000_v52 = vpop.f32.mrb[5].mxu1 }
 0x12f   : > { %v1981_v53 = vpop.f32.mrb[7].mxu0  ;;  %v2001_v55 = vadd.f32 %v2000_v52, %v1999_v49  ;;  %v2002_v56 = vpop.f32.mrb[6].mxu1 }
 0x130   : > { %v1480_v54 = vadd.f32 %v1979_v50, %v1440_v47  ;;  %v2003_v57 = vpop.f32.mrb[7].mxu1 }
 0x132   : > { %v1520_v58 = vadd.f32 %v2001_v55, %v1480_v54 }
 0x14c   : > { %v2021_v59 = vpop.f32.mrb[8].mxu0 }
 0x14d   : > { %v2022_v60 = vpop.f32.mrb[9].mxu0 }
 0x14e   : > { %v2043_v61 = vpop.f32.mrb[8].mxu1  ;;  %v2023_v62 = vadd.f32 %v2022_v60, %v2021_v59  ;;  %v2024_v63 = vpop.f32.mrb[10].mxu0 }
 0x14f   : > { %v2044_v0 = vpop.f32.mrb[9].mxu1  ;;  %v2025_v1 = vpop.f32.mrb[11].mxu0 }
 0x150   : > { %v1560_v2 = vadd.f32 %v2023_v62, %v1520_v58  ;;  %v2045_v3 = vadd.f32 %v2044_v0, %v2043_v61  ;;  %v2046_v4 = vpop.f32.mrb[10].mxu1 }
 0x151   : > { %v2047_v5 = vpop.f32.mrb[11].mxu1 }
 0x152   : > { %v1600_v6 = vadd.f32 %v2045_v3, %v1560_v2 }
 0x16c   : > { %v2065_v7 = vpop.f32.mrb[12].mxu0 }
 0x16d   : > { %v2066_v8 = vpop.f32.mrb[13].mxu0 }
 0x16e   : > { %v2087_v9 = vpop.f32.mrb[12].mxu1  ;;  %v2067_v10 = vadd.f32 %v2066_v8, %v2065_v7  ;;  %v2068_v11 = vpop.f32.mrb[14].mxu0 }
 0x16f   : > { %v2088_v12 = vpop.f32.mrb[13].mxu1  ;;  %v2069_v13 = vpop.f32.mrb[15].mxu0 }
 0x170   : > { %v1640_v14 = vadd.f32 %v2067_v10, %v1600_v6  ;;  %v2089_v15 = vadd.f32 %v2088_v12, %v2087_v9  ;;  %v2090_v16 = vpop.f32.mrb[14].mxu1  ;;  %1690 = sbr.rel (%p1912_p7) target bundleno = 387 (0x183), region = 40 }
 0x171   : > { %v2091_v18 = vpop.f32.mrb[15].mxu1 }
 0x172   : > { %v1680_v19 = vadd.f32 %v2089_v15, %v1640_v14 }
 0x174   : > { %v1685_v20 = vadd.f32 %v1680_v19, %v222_v17 }
 0x176   : > { %1686 = vst [vmem:[#allocation2] sm:$0x3] %v1685_v20 }
 0x17d   : > { %v1691_v21 = vld [vmem:[#allocation2] sm:$0x3] }
 0x17e   : > { %v1699_v23 = vadd.f32 %v1913_v22, %v1691_v21 }
 0x180   : > { %v1700_v24 = vmax.f32 %v1699_v23, 0.0 }
 0x182   : > { %1701 = vst [vmem:[%s2501_s3] sm:$0x3] %v1700_v24 }
 0x183 PF: > { %s13_s14 = sadd.s32 1, %s2271_s14   ;;  %s2502_s12 = smov %s2267_s13 }
 0x184   : > { %p10_p8 = scmp.ge.s32.totalorder %s13_s14, 11   ;;  %s2503_s13 = smov %s2505_s15 }
 0x186   :  { %12 = sbr.rel (!%p10_p8) target bundleno = 2 (0x2), region = 73 }

</bundles_post_ra>
